<compile_context>
chip_gen: v5e
topology: v5e:2x2
jax: 0.10.0
libtpu: 0.0.40
codegen_flags: <defaults>
</compile_context>

<pallas_src>
import functools

import jax
import jax.numpy as jnp
from jax.experimental import pallas as pl
from jax.experimental.pallas import tpu as pltpu


# ----------------------------- Pallas kernels ------------------------------


def _conv_block_kernel(x_ref, w1_ref, s1_ref, t1_ref, w2_ref, s2_ref, t2_ref,
                       m_ref, o_ref, mid_ref, *, offs, base, length):
    """Fused conv3x3->BN->ReLU->conv3x3->BN->ReLU on one padded-flat frame."""
    mask = m_ref[...]                                   # (1, L) f32, 0 at pad cols
    c_mid = w1_ref.shape[1]
    c_out = w2_ref.shape[1]

    # conv1 (+ folded BN + ReLU): 9 per-tap bf16 MXU matmuls, f32 accumulation.
    acc = jnp.zeros((c_mid, length), jnp.float32)
    for t, d in enumerate(offs):
        acc += jnp.dot(w1_ref[t], x_ref[0, :, base + d:base + d + length],
                       preferred_element_type=jnp.float32)
    y1 = jnp.maximum(acc * s1_ref[...] + t1_ref[...], 0.0) * mask

    # Intermediate activation stays in VMEM as a valid padded-flat frame.
    mid_ref[...] = jnp.zeros(mid_ref.shape, mid_ref.dtype)
    mid_ref[:, base:base + length] = y1.astype(mid_ref.dtype)

    # conv2 (+ folded BN + ReLU).
    acc2 = jnp.zeros((c_out, length), jnp.float32)
    for t, d in enumerate(offs):
        acc2 += jnp.dot(w2_ref[t], mid_ref[:, base + d:base + d + length],
                        preferred_element_type=jnp.float32)
    y2 = jnp.maximum(acc2 * s2_ref[...] + t2_ref[...], 0.0) * mask

    o_ref[...] = jnp.zeros(o_ref.shape, o_ref.dtype)
    o_ref[0, :, base:base + length] = y2.astype(o_ref.dtype)


def _conv_block2_kernel(xa_ref, xb_ref, w1a_ref, w1b_ref, s1_ref, t1_ref,
                        w2_ref, s2_ref, t2_ref, m_ref, o_ref, mid_ref, *,
                        offs, base, length):
    """Same fused block, but conv1 reads two frames (decoder: up + skip).

    Equivalent to conv1(cat([xa, xb], channel)) with the conv1 weights split at
    the input-channel axis -- the HBM concat never happens.
    """
    mask = m_ref[...]
    c_mid = w1a_ref.shape[1]
    c_out = w2_ref.shape[1]

    acc = jnp.zeros((c_mid, length), jnp.float32)
    for t, d in enumerate(offs):
        acc += jnp.dot(w1a_ref[t], xa_ref[0, :, base + d:base + d + length],
                       preferred_element_type=jnp.float32)
        acc += jnp.dot(w1b_ref[t], xb_ref[0, :, base + d:base + d + length],
                       preferred_element_type=jnp.float32)
    y1 = jnp.maximum(acc * s1_ref[...] + t1_ref[...], 0.0) * mask

    mid_ref[...] = jnp.zeros(mid_ref.shape, mid_ref.dtype)
    mid_ref[:, base:base + length] = y1.astype(mid_ref.dtype)

    acc2 = jnp.zeros((c_out, length), jnp.float32)
    for t, d in enumerate(offs):
        acc2 += jnp.dot(w2_ref[t], mid_ref[:, base + d:base + d + length],
                        preferred_element_type=jnp.float32)
    y2 = jnp.maximum(acc2 * s2_ref[...] + t2_ref[...], 0.0) * mask

    o_ref[...] = jnp.zeros(o_ref.shape, o_ref.dtype)
    o_ref[0, :, base:base + length] = y2.astype(o_ref.dtype)


def _conv_transpose2x_kernel(x_ref, w_ref, o_ref, *, offs, base, length):
    """ConvTranspose2d(k=4, s=2, p=1) as 4 sub-pixel phases (4 taps each)."""
    c_out = w_ref.shape[2]
    o_ref[...] = jnp.zeros(o_ref.shape, o_ref.dtype)
    for ph in range(4):
        acc = jnp.zeros((c_out, length), jnp.float32)
        for t in range(4):
            d = offs[ph][t]
            acc += jnp.dot(w_ref[ph, t], x_ref[0, :, base + d:base + d + length],
                           preferred_element_type=jnp.float32)
        o_ref[0, ph, :, base:base + length] = acc.astype(o_ref.dtype)


def _conv_last_kernel(x_ref, w_ref, b_ref, r_ref, m_ref, o_ref, *, offs, base, length):
    """conv3x3 + bias + residual (last input channel) + sigmoid, fused."""
    acc = jnp.zeros((1, length), jnp.float32)
    for t, d in enumerate(offs):
        acc += jnp.dot(w_ref[t], x_ref[0, :, base + d:base + d + length],
                       preferred_element_type=jnp.float32)
    y = acc + b_ref[...] + r_ref[0, :, base:base + length].astype(jnp.float32)
    y = jax.nn.sigmoid(y) * m_ref[...]
    o_ref[...] = jnp.zeros(o_ref.shape, o_ref.dtype)
    o_ref[0, :, base:base + length] = y


# --------------------------- frame / glue helpers ---------------------------


def _frame_geometry(H, W):
    Wp = W + 2                         # padded row width
    P = (H + 2) * Wp                   # padded-flat frame length (logical)
    Pp = ((P + 127) // 128) * 128      # lane-dense (128-multiple) frame length
    base = Wp + 1                      # flat index of image pixel (0, 0)
    length = H * Wp - 2                # contiguous run covering every image pixel
    return Wp, P, Pp, base, length


def _tap_offsets3x3(Wp):
    return tuple((kh - 1) * Wp + (kw - 1) for kh in range(3) for kw in range(3))


def _to_frame(x, dtype=jnp.bfloat16):
    """(N,C,H,W) -> zero-padded (pad=1) flat frame (N, C, Pp), lane-dense Pp."""
    N, C, H, W = x.shape
    _, P, Pp, _, _ = _frame_geometry(H, W)
    xp = jnp.pad(x, ((0, 0), (0, 0), (1, 1), (1, 1)))
    f = xp.reshape(N, C, P).astype(dtype)
    if Pp > P:
        f = jnp.pad(f, ((0, 0), (0, 0), (0, Pp - P)))
    return f


def _from_frame(f, H, W):
    N, C, _ = f.shape
    P = (H + 2) * (W + 2)
    return f[:, :, :P].reshape(N, C, H + 2, W + 2)[:, :, 1:-1, 1:-1]


def _run_mask(H, W):
    """1.0 at real image pixels of the run, 0.0 at the in-run pad columns."""
    Wp, _, _, base, length = _frame_geometry(H, W)
    col = (jnp.arange(length) + base) % Wp
    return ((col >= 1) & (col <= W)).astype(jnp.float32).reshape(1, length)


def _fold_bn(bias, bn, eps=1e-5):
    gamma, beta, mean, var = bn
    scale = gamma / jnp.sqrt(var + eps)
    shift = beta - mean * scale + bias * scale
    return scale.astype(jnp.float32), shift.astype(jnp.float32)


def maxpool2(x):
    N, C, H, W = x.shape
    return jnp.max(x.reshape(N, C, H // 2, 2, W // 2, 2), axis=(3, 5))


def _block_params(bp):
    """Per-tap weight stacks + folded BN scale/shift in kernel layout."""
    c_mid = bp["w1"].shape[-1]
    c_out = bp["w2"].shape[-1]
    c_in = bp["w1"].shape[-2]
    w1 = bp["w1"].transpose(0, 1, 3, 2).reshape(9, c_mid, c_in).astype(jnp.bfloat16)
    w2 = bp["w2"].transpose(0, 1, 3, 2).reshape(9, c_out, c_mid).astype(jnp.bfloat16)
    s1, t1 = _fold_bn(bp["b1"], bp["bn1"])
    s2, t2 = _fold_bn(bp["b2"], bp["bn2"])
    return (w1, w2, s1.reshape(c_mid, 1), t1.reshape(c_mid, 1),
            s2.reshape(c_out, 1), t2.reshape(c_out, 1))


_CPARAMS = pltpu.CompilerParams(dimension_semantics=("parallel",),
                                vmem_limit_bytes=32 * 1024 * 1024)


# --------------------------- pallas_call wrappers ---------------------------


def conv_block(bp, x):
    """conv->BN->ReLU->conv->BN->ReLU (BN eval mode) as ONE pallas_call."""
    N, c_in, H, W = x.shape
    c_mid = bp["w1"].shape[-1]
    c_out = bp["w2"].shape[-1]
    Wp, _, Pp, base, length = _frame_geometry(H, W)
    offs = _tap_offsets3x3(Wp)

    xf = _to_frame(x)
    w1, w2, s1, t1, s2, t2 = _block_params(bp)
    mask = _run_mask(H, W)

    kernel = functools.partial(_conv_block_kernel, offs=offs, base=base,
                               length=length)
    out = pl.pallas_call(
        kernel,
        out_shape=jax.ShapeDtypeStruct((N, c_out, Pp), jnp.bfloat16),
        grid=(N,),
        in_specs=[
            pl.BlockSpec((1, c_in, Pp), lambda n: (n, 0, 0)),
            pl.BlockSpec((9, c_mid, c_in), lambda n: (0, 0, 0)),
            pl.BlockSpec((c_mid, 1), lambda n: (0, 0)),
            pl.BlockSpec((c_mid, 1), lambda n: (0, 0)),
            pl.BlockSpec((9, c_out, c_mid), lambda n: (0, 0, 0)),
            pl.BlockSpec((c_out, 1), lambda n: (0, 0)),
            pl.BlockSpec((c_out, 1), lambda n: (0, 0)),
            pl.BlockSpec((1, length), lambda n: (0, 0)),
        ],
        out_specs=pl.BlockSpec((1, c_out, Pp), lambda n: (n, 0, 0)),
        scratch_shapes=[pltpu.VMEM((c_mid, Pp), jnp.bfloat16)],
        compiler_params=_CPARAMS,
    )(xf, w1, s1, t1, w2, s2, t2, mask)
    return _from_frame(out, H, W)


def conv_block_pair(bp, xa, xb):
    """Decoder block: conv_block(cat([xa, xb], channel)) without the HBM concat."""
    N, ca, H, W = xa.shape
    _, cb, _, _ = xb.shape
    c_mid = bp["w1"].shape[-1]
    c_out = bp["w2"].shape[-1]
    Wp, _, Pp, base, length = _frame_geometry(H, W)
    offs = _tap_offsets3x3(Wp)

    fa = _to_frame(xa)
    fb = _to_frame(xb)
    w1, w2, s1, t1, s2, t2 = _block_params(bp)
    w1a, w1b = w1[:, :, :ca], w1[:, :, ca:]            # cat order: (up, skip)
    mask = _run_mask(H, W)

    kernel = functools.partial(_conv_block2_kernel, offs=offs, base=base,
                               length=length)
    out = pl.pallas_call(
        kernel,
        out_shape=jax.ShapeDtypeStruct((N, c_out, Pp), jnp.bfloat16),
        grid=(N,),
        in_specs=[
            pl.BlockSpec((1, ca, Pp), lambda n: (n, 0, 0)),
            pl.BlockSpec((1, cb, Pp), lambda n: (n, 0, 0)),
            pl.BlockSpec((9, c_mid, ca), lambda n: (0, 0, 0)),
            pl.BlockSpec((9, c_mid, cb), lambda n: (0, 0, 0)),
            pl.BlockSpec((c_mid, 1), lambda n: (0, 0)),
            pl.BlockSpec((c_mid, 1), lambda n: (0, 0)),
            pl.BlockSpec((9, c_out, c_mid), lambda n: (0, 0, 0)),
            pl.BlockSpec((c_out, 1), lambda n: (0, 0)),
            pl.BlockSpec((c_out, 1), lambda n: (0, 0)),
            pl.BlockSpec((1, length), lambda n: (0, 0)),
        ],
        out_specs=pl.BlockSpec((1, c_out, Pp), lambda n: (n, 0, 0)),
        scratch_shapes=[pltpu.VMEM((c_mid, Pp), jnp.bfloat16)],
        compiler_params=_CPARAMS,
    )(fa, fb, w1a, w1b, s1, t1, w2, s2, t2, mask)
    return _from_frame(out, H, W)


def conv_transpose2x(w, x):
    """ConvTranspose2d(k=4, s=2, p=1, bias=False) via 4-phase sub-pixel conv.

    `w` uses the native PyTorch ConvTranspose2d layout (Cin, Cout, kH, kW).
    """
    N, c_in, H, W = x.shape
    c_out = w.shape[1]
    Wp, P, Pp, base, length = _frame_geometry(H, W)

    # Phase (a, b) = (output row parity, output col parity).  Each phase is a
    # 4-tap stencil on the input: row offset dr with kernel row kh, col dc / kw.
    row_sel = [[(-1, 3), (0, 1)], [(0, 2), (1, 0)]]   # a = 0 / 1 : (dr, kh)
    col_sel = [[(-1, 3), (0, 1)], [(0, 2), (1, 0)]]   # b = 0 / 1 : (dc, kw)
    offs, wtaps = [], []
    for a in range(2):
        for b in range(2):
            po, pw = [], []
            for dr, kh in row_sel[a]:
                for dc, kw in col_sel[b]:
                    po.append(dr * Wp + dc)
                    pw.append(w[:, :, kh, kw].T)        # (Cout, Cin)
            offs.append(tuple(po))
            wtaps.append(jnp.stack(pw, axis=0))
    offs = tuple(offs)
    wt = jnp.stack(wtaps, axis=0).astype(jnp.bfloat16)  # (4, 4, Cout, Cin)

    xf = _to_frame(x)
    kernel = functools.partial(_conv_transpose2x_kernel, offs=offs, base=base,
                               length=length)
    out = pl.pallas_call(
        kernel,
        out_shape=jax.ShapeDtypeStruct((N, 4, c_out, Pp), jnp.bfloat16),
        grid=(N,),
        in_specs=[
            pl.BlockSpec((1, c_in, Pp), lambda n: (n, 0, 0)),
            pl.BlockSpec((4, 4, c_out, c_in), lambda n: (0, 0, 0, 0)),
        ],
        out_specs=pl.BlockSpec((1, 4, c_out, Pp), lambda n: (n, 0, 0, 0)),
        compiler_params=_CPARAMS,
    )(xf, wt)

    # Interleave the 4 phases into the (2H, 2W) output.
    ph = out[:, :, :, :P].reshape(N, 2, 2, c_out, H + 2, W + 2)[:, :, :, :, 1:-1, 1:-1]
    return jnp.transpose(ph, (0, 3, 4, 1, 5, 2)).reshape(N, c_out, 2 * H, 2 * W)


def conv_last(lp, u, residual):
    """convLast(u) + residual, then sigmoid, fused in one kernel."""
    N, c_in, H, W = u.shape
    Wp, _, Pp, base, length = _frame_geometry(H, W)
    offs = _tap_offsets3x3(Wp)

    uf = _to_frame(u)
    rf = _to_frame(residual, dtype=jnp.float32)
    w = lp["w"].transpose(0, 1, 3, 2).reshape(9, 1, c_in).astype(jnp.bfloat16)
    b = lp["b"].reshape(1, 1).astype(jnp.float32)
    mask = _run_mask(H, W)

    kernel = functools.partial(_conv_last_kernel, offs=offs, base=base,
                               length=length)
    out = pl.pallas_call(
        kernel,
        out_shape=jax.ShapeDtypeStruct((N, 1, Pp), jnp.float32),
        grid=(N,),
        in_specs=[
            pl.BlockSpec((1, c_in, Pp), lambda n: (n, 0, 0)),
            pl.BlockSpec((9, 1, c_in), lambda n: (0, 0, 0)),
            pl.BlockSpec((1, 1), lambda n: (0, 0)),
            pl.BlockSpec((1, 1, Pp), lambda n: (n, 0, 0)),
            pl.BlockSpec((1, length), lambda n: (0, 0)),
        ],
        out_specs=pl.BlockSpec((1, 1, Pp), lambda n: (n, 0, 0)),
        compiler_params=_CPARAMS,
    )(uf, w, b, rf, mask)
    return _from_frame(out, H, W)


# ------------------------------ CUNet forward ------------------------------


def cunet_forward(params, x):
    layer_num = params["layerNum"]
    c, p = [], []
    for i in range(layer_num - 1):
        inp = x if i == 0 else p[-1]
        c.append(conv_block(params["down"][i], inp))
        pooled = maxpool2(c[-1])
        p.append(pooled)   # drop1/drop2(maxpool): dropout is identity in eval
        p.append(pooled)
    c.append(conv_block(params["down"][layer_num - 1], p[-1]))

    u = c[-1]
    for i in range(layer_num - 1):
        up = conv_transpose2x(params["tran"][i], u)
        # cat((up, skip), channel) + conv block, fused without the HBM concat.
        u = conv_block_pair(params["up"][i], up, c[-2 - i])

    return conv_last(params["last"], u, x[:, -1:, :, :])


# --------------------------- deterministic params --------------------------


def init_params(key, input_dim=3, nfilters=8, layer_num=3):
    def conv_w(k, K, cin, cout):
        return jax.random.normal(k, (K, K, cin, cout), jnp.float32) / jnp.sqrt(K * K * cin)

    def tconv_w(k, cin, cout):
        # Native PyTorch ConvTranspose2d layout (Cin, Cout, kH, kW).
        return jax.random.normal(k, (cin, cout, 4, 4), jnp.float32) / jnp.sqrt(16 * cin)

    def bn_p(k, c):
        k1, k2, k3, k4 = jax.random.split(k, 4)
        gamma = 1.0 + 0.1 * jax.random.normal(k1, (c,), jnp.float32)
        beta = 0.1 * jax.random.normal(k2, (c,), jnp.float32)
        mean = 0.1 * jax.random.normal(k3, (c,), jnp.float32)
        var = 1.0 + 0.2 * jax.random.uniform(k4, (c,), jnp.float32)
        return gamma, beta, mean, var

    def block(k, cin, cout):
        ks = jax.random.split(k, 6)
        return {
            "w1": conv_w(ks[0], 3, cin, cout),
            "b1": 0.01 * jax.random.normal(ks[1], (cout,), jnp.float32),
            "bn1": bn_p(ks[2], cout),
            "w2": conv_w(ks[3], 3, cout, cout),
            "b2": 0.01 * jax.random.normal(ks[4], (cout,), jnp.float32),
            "bn2": bn_p(ks[5], cout),
        }

    params = {"layerNum": layer_num, "down": [], "tran": [], "up": []}
    keys = iter(jax.random.split(key, 4 * layer_num + 4))
    for i in range(layer_num):
        cin = input_dim if i == 0 else nfilters * 2 ** (i - 1)
        params["down"].append(block(next(keys), cin, nfilters * 2 ** i))
    for i in range(1, layer_num):
        cin = nfilters * 2 ** (layer_num - i)
        cout = nfilters * 2 ** (layer_num - i - 1)
        params["tran"].append(tconv_w(next(keys), cin, cout))
        params["up"].append(block(next(keys), cin, cout))
    params["last"] = {
        "w": conv_w(next(keys), 3, nfilters, 1),
        "b": 0.01 * jax.random.normal(next(keys), (1,), jnp.float32),
    }
    return params


# ----------------------------------- main -----------------------------------


if __name__ == "__main__":
    key = jax.random.PRNGKey(0)
    pkey, xkey = jax.random.split(key)

    # Small config consistent with CUNet(inputDim=3, nfilters=8, layerNum=3).
    params = init_params(pkey, input_dim=3, nfilters=8, layer_num=3)

    # NCHW input, same layout as the PyTorch reference.
    x = jax.random.normal(xkey, (2, 3, 16, 16), jnp.float32)

    forward = jax.jit(lambda inp: cunet_forward(params, inp))
    out = jax.block_until_ready(forward(x))

    assert out.shape == (2, 1, 16, 16), out.shape
    assert bool(jnp.all(jnp.isfinite(out)))
    assert bool(jnp.all((out >= 0.0) & (out <= 1.0)))
    print("KERNEL_OK")
</pallas_src>

<mosaic_0001>
module attributes {stable_mosaic.version = 11 : i64} {
  func.func @_conv_block_kernel(%arg0: i32, %arg1: memref<1x3x384xbf16, #tpu.memory_space<vmem>>, %arg2: memref<9x8x3xbf16, #tpu.memory_space<vmem>>, %arg3: memref<8x1xf32, #tpu.memory_space<vmem>>, %arg4: memref<8x1xf32, #tpu.memory_space<vmem>>, %arg5: memref<9x8x8xbf16, #tpu.memory_space<vmem>>, %arg6: memref<8x1xf32, #tpu.memory_space<vmem>>, %arg7: memref<8x1xf32, #tpu.memory_space<vmem>>, %arg8: memref<1x286xf32, #tpu.memory_space<vmem>>, %arg9: memref<1x8x384xbf16, #tpu.memory_space<vmem>>, %arg10: memref<8x384xbf16, #tpu.memory_space<vmem>>) attributes {dimension_semantics = [#tpu.dimension_semantics<parallel>], iteration_bounds = array<i64: 2>, scalar_prefetch = 0 : i64, scratch_operands = 1 : i64, tpu.core_type = #tpu.core_type<tc>, window_params = [{transform_indices = @transform_0, window_bounds = array<i64: 1, 3, 384>}, {pipeline_mode = #tpu.pipeline_mode<synchronous>, transform_indices = @transform_1, window_bounds = array<i64: 9, 8, 3>}, {pipeline_mode = #tpu.pipeline_mode<synchronous>, transform_indices = @transform_2, window_bounds = array<i64: 8, 1>}, {pipeline_mode = #tpu.pipeline_mode<synchronous>, transform_indices = @transform_3, window_bounds = array<i64: 8, 1>}, {pipeline_mode = #tpu.pipeline_mode<synchronous>, transform_indices = @transform_4, window_bounds = array<i64: 9, 8, 8>}, {pipeline_mode = #tpu.pipeline_mode<synchronous>, transform_indices = @transform_5, window_bounds = array<i64: 8, 1>}, {pipeline_mode = #tpu.pipeline_mode<synchronous>, transform_indices = @transform_6, window_bounds = array<i64: 8, 1>}, {pipeline_mode = #tpu.pipeline_mode<synchronous>, transform_indices = @transform_7, window_bounds = array<i64: 1, 286>}, {transform_indices = @transform_8, window_bounds = array<i64: 1, 8, 384>}]} {
    %c0 = arith.constant 0 : index
    %c0_0 = arith.constant 0 : index
    %0 = vector.load %arg8[%c0, %c0_0] : memref<1x286xf32, #tpu.memory_space<vmem>>, vector<1x286xf32>
    %cst = arith.constant 0.000000e+00 : f32
    %1 = vector.broadcast %cst : f32 to vector<8x286xf32>
    %c0_1 = arith.constant 0 : index
    %c0_2 = arith.constant 0 : index
    %c0_3 = arith.constant 0 : index
    %2 = vector.load %arg2[%c0_1, %c0_2, %c0_3] : memref<9x8x3xbf16, #tpu.memory_space<vmem>>, vector<1x8x3xbf16>
    %3 = vector.shape_cast %2 : vector<1x8x3xbf16> to vector<8x3xbf16>
    %c0_4 = arith.constant 0 : index
    %c0_5 = arith.constant 0 : index
    %c0_6 = arith.constant 0 : index
    %4 = vector.load %arg1[%c0_4, %c0_5, %c0_6] : memref<1x3x384xbf16, #tpu.memory_space<vmem>>, vector<1x3x286xbf16>
    %5 = vector.shape_cast %4 : vector<1x3x286xbf16> to vector<3x286xbf16>
    %cst_7 = arith.constant dense<0.000000e+00> : vector<8x286xf32>
    %6 = tpu.matmul %3, %5, %cst_7 {dimension_numbers = #tpu.dot_dimension_numbers<[1], [0], [0], [1], [0, 0, 1, 1], [], []>} : vector<8x3xbf16>, vector<3x286xbf16>, vector<8x286xf32> -> vector<8x286xf32>
    %7 = arith.addf %1, %6 : vector<8x286xf32>
    %c1 = arith.constant 1 : index
    %c0_8 = arith.constant 0 : index
    %c0_9 = arith.constant 0 : index
    %8 = vector.load %arg2[%c1, %c0_8, %c0_9] : memref<9x8x3xbf16, #tpu.memory_space<vmem>>, vector<1x8x3xbf16>
    %9 = vector.shape_cast %8 : vector<1x8x3xbf16> to vector<8x3xbf16>
    %c0_10 = arith.constant 0 : index
    %c0_11 = arith.constant 0 : index
    %c1_12 = arith.constant 1 : index
    %10 = vector.load %arg1[%c0_10, %c0_11, %c1_12] : memref<1x3x384xbf16, #tpu.memory_space<vmem>>, vector<1x3x286xbf16>
    %11 = vector.shape_cast %10 : vector<1x3x286xbf16> to vector<3x286xbf16>
    %cst_13 = arith.constant dense<0.000000e+00> : vector<8x286xf32>
    %12 = tpu.matmul %9, %11, %cst_13 {dimension_numbers = #tpu.dot_dimension_numbers<[1], [0], [0], [1], [0, 0, 1, 1], [], []>} : vector<8x3xbf16>, vector<3x286xbf16>, vector<8x286xf32> -> vector<8x286xf32>
    %13 = arith.addf %7, %12 : vector<8x286xf32>
    %c2 = arith.constant 2 : index
    %c0_14 = arith.constant 0 : index
    %c0_15 = arith.constant 0 : index
    %14 = vector.load %arg2[%c2, %c0_14, %c0_15] : memref<9x8x3xbf16, #tpu.memory_space<vmem>>, vector<1x8x3xbf16>
    %15 = vector.shape_cast %14 : vector<1x8x3xbf16> to vector<8x3xbf16>
    %c0_16 = arith.constant 0 : index
    %c0_17 = arith.constant 0 : index
    %c2_18 = arith.constant 2 : index
    %16 = vector.load %arg1[%c0_16, %c0_17, %c2_18] : memref<1x3x384xbf16, #tpu.memory_space<vmem>>, vector<1x3x286xbf16>
    %17 = vector.shape_cast %16 : vector<1x3x286xbf16> to vector<3x286xbf16>
    %cst_19 = arith.constant dense<0.000000e+00> : vector<8x286xf32>
    %18 = tpu.matmul %15, %17, %cst_19 {dimension_numbers = #tpu.dot_dimension_numbers<[1], [0], [0], [1], [0, 0, 1, 1], [], []>} : vector<8x3xbf16>, vector<3x286xbf16>, vector<8x286xf32> -> vector<8x286xf32>
    %19 = arith.addf %13, %18 : vector<8x286xf32>
    %c3 = arith.constant 3 : index
    %c0_20 = arith.constant 0 : index
    %c0_21 = arith.constant 0 : index
    %20 = vector.load %arg2[%c3, %c0_20, %c0_21] : memref<9x8x3xbf16, #tpu.memory_space<vmem>>, vector<1x8x3xbf16>
    %21 = vector.shape_cast %20 : vector<1x8x3xbf16> to vector<8x3xbf16>
    %c0_22 = arith.constant 0 : index
    %c0_23 = arith.constant 0 : index
    %c18 = arith.constant 18 : index
    %22 = vector.load %arg1[%c0_22, %c0_23, %c18] : memref<1x3x384xbf16, #tpu.memory_space<vmem>>, vector<1x3x286xbf16>
    %23 = vector.shape_cast %22 : vector<1x3x286xbf16> to vector<3x286xbf16>
    %cst_24 = arith.constant dense<0.000000e+00> : vector<8x286xf32>
    %24 = tpu.matmul %21, %23, %cst_24 {dimension_numbers = #tpu.dot_dimension_numbers<[1], [0], [0], [1], [0, 0, 1, 1], [], []>} : vector<8x3xbf16>, vector<3x286xbf16>, vector<8x286xf32> -> vector<8x286xf32>
    %25 = arith.addf %19, %24 : vector<8x286xf32>
    %c4 = arith.constant 4 : index
    %c0_25 = arith.constant 0 : index
    %c0_26 = arith.constant 0 : index
    %26 = vector.load %arg2[%c4, %c0_25, %c0_26] : memref<9x8x3xbf16, #tpu.memory_space<vmem>>, vector<1x8x3xbf16>
    %27 = vector.shape_cast %26 : vector<1x8x3xbf16> to vector<8x3xbf16>
    %c0_27 = arith.constant 0 : index
    %c0_28 = arith.constant 0 : index
    %c19 = arith.constant 19 : index
    %28 = vector.load %arg1[%c0_27, %c0_28, %c19] : memref<1x3x384xbf16, #tpu.memory_space<vmem>>, vector<1x3x286xbf16>
    %29 = vector.shape_cast %28 : vector<1x3x286xbf16> to vector<3x286xbf16>
    %cst_29 = arith.constant dense<0.000000e+00> : vector<8x286xf32>
    %30 = tpu.matmul %27, %29, %cst_29 {dimension_numbers = #tpu.dot_dimension_numbers<[1], [0], [0], [1], [0, 0, 1, 1], [], []>} : vector<8x3xbf16>, vector<3x286xbf16>, vector<8x286xf32> -> vector<8x286xf32>
    %31 = arith.addf %25, %30 : vector<8x286xf32>
    %c5 = arith.constant 5 : index
    %c0_30 = arith.constant 0 : index
    %c0_31 = arith.constant 0 : index
    %32 = vector.load %arg2[%c5, %c0_30, %c0_31] : memref<9x8x3xbf16, #tpu.memory_space<vmem>>, vector<1x8x3xbf16>
    %33 = vector.shape_cast %32 : vector<1x8x3xbf16> to vector<8x3xbf16>
    %c0_32 = arith.constant 0 : index
    %c0_33 = arith.constant 0 : index
    %c20 = arith.constant 20 : index
    %34 = vector.load %arg1[%c0_32, %c0_33, %c20] : memref<1x3x384xbf16, #tpu.memory_space<vmem>>, vector<1x3x286xbf16>
    %35 = vector.shape_cast %34 : vector<1x3x286xbf16> to vector<3x286xbf16>
    %cst_34 = arith.constant dense<0.000000e+00> : vector<8x286xf32>
    %36 = tpu.matmul %33, %35, %cst_34 {dimension_numbers = #tpu.dot_dimension_numbers<[1], [0], [0], [1], [0, 0, 1, 1], [], []>} : vector<8x3xbf16>, vector<3x286xbf16>, vector<8x286xf32> -> vector<8x286xf32>
    %37 = arith.addf %31, %36 : vector<8x286xf32>
    %c6 = arith.constant 6 : index
    %c0_35 = arith.constant 0 : index
    %c0_36 = arith.constant 0 : index
    %38 = vector.load %arg2[%c6, %c0_35, %c0_36] : memref<9x8x3xbf16, #tpu.memory_space<vmem>>, vector<1x8x3xbf16>
    %39 = vector.shape_cast %38 : vector<1x8x3xbf16> to vector<8x3xbf16>
    %c0_37 = arith.constant 0 : index
    %c0_38 = arith.constant 0 : index
    %c36 = arith.constant 36 : index
    %40 = vector.load %arg1[%c0_37, %c0_38, %c36] : memref<1x3x384xbf16, #tpu.memory_space<vmem>>, vector<1x3x286xbf16>
    %41 = vector.shape_cast %40 : vector<1x3x286xbf16> to vector<3x286xbf16>
    %cst_39 = arith.constant dense<0.000000e+00> : vector<8x286xf32>
    %42 = tpu.matmul %39, %41, %cst_39 {dimension_numbers = #tpu.dot_dimension_numbers<[1], [0], [0], [1], [0, 0, 1, 1], [], []>} : vector<8x3xbf16>, vector<3x286xbf16>, vector<8x286xf32> -> vector<8x286xf32>
    %43 = arith.addf %37, %42 : vector<8x286xf32>
    %c7 = arith.constant 7 : index
    %c0_40 = arith.constant 0 : index
    %c0_41 = arith.constant 0 : index
    %44 = vector.load %arg2[%c7, %c0_40, %c0_41] : memref<9x8x3xbf16, #tpu.memory_space<vmem>>, vector<1x8x3xbf16>
    %45 = vector.shape_cast %44 : vector<1x8x3xbf16> to vector<8x3xbf16>
    %c0_42 = arith.constant 0 : index
    %c0_43 = arith.constant 0 : index
    %c37 = arith.constant 37 : index
    %46 = vector.load %arg1[%c0_42, %c0_43, %c37] : memref<1x3x384xbf16, #tpu.memory_space<vmem>>, vector<1x3x286xbf16>
    %47 = vector.shape_cast %46 : vector<1x3x286xbf16> to vector<3x286xbf16>
    %cst_44 = arith.constant dense<0.000000e+00> : vector<8x286xf32>
    %48 = tpu.matmul %45, %47, %cst_44 {dimension_numbers = #tpu.dot_dimension_numbers<[1], [0], [0], [1], [0, 0, 1, 1], [], []>} : vector<8x3xbf16>, vector<3x286xbf16>, vector<8x286xf32> -> vector<8x286xf32>
    %49 = arith.addf %43, %48 : vector<8x286xf32>
    %c8 = arith.constant 8 : index
    %c0_45 = arith.constant 0 : index
    %c0_46 = arith.constant 0 : index
    %50 = vector.load %arg2[%c8, %c0_45, %c0_46] : memref<9x8x3xbf16, #tpu.memory_space<vmem>>, vector<1x8x3xbf16>
    %51 = vector.shape_cast %50 : vector<1x8x3xbf16> to vector<8x3xbf16>
    %c0_47 = arith.constant 0 : index
    %c0_48 = arith.constant 0 : index
    %c38 = arith.constant 38 : index
    %52 = vector.load %arg1[%c0_47, %c0_48, %c38] : memref<1x3x384xbf16, #tpu.memory_space<vmem>>, vector<1x3x286xbf16>
    %53 = vector.shape_cast %52 : vector<1x3x286xbf16> to vector<3x286xbf16>
    %cst_49 = arith.constant dense<0.000000e+00> : vector<8x286xf32>
    %54 = tpu.matmul %51, %53, %cst_49 {dimension_numbers = #tpu.dot_dimension_numbers<[1], [0], [0], [1], [0, 0, 1, 1], [], []>} : vector<8x3xbf16>, vector<3x286xbf16>, vector<8x286xf32> -> vector<8x286xf32>
    %55 = arith.addf %49, %54 : vector<8x286xf32>
    %c0_50 = arith.constant 0 : index
    %c0_51 = arith.constant 0 : index
    %56 = vector.load %arg3[%c0_50, %c0_51] : memref<8x1xf32, #tpu.memory_space<vmem>>, vector<8x1xf32>
    %57 = vector.broadcast %56 : vector<8x1xf32> to vector<8x286xf32>
    %58 = arith.mulf %55, %57 : vector<8x286xf32>
    %c0_52 = arith.constant 0 : index
    %c0_53 = arith.constant 0 : index
    %59 = vector.load %arg4[%c0_52, %c0_53] : memref<8x1xf32, #tpu.memory_space<vmem>>, vector<8x1xf32>
    %60 = vector.broadcast %59 : vector<8x1xf32> to vector<8x286xf32>
    %61 = arith.addf %58, %60 : vector<8x286xf32>
    %cst_54 = arith.constant 0.000000e+00 : f32
    %62 = vector.broadcast %cst_54 : f32 to vector<8x286xf32>
    %63 = arith.maximumf %61, %62 : vector<8x286xf32>
    %64 = vector.broadcast %0 : vector<1x286xf32> to vector<8x286xf32>
    %65 = arith.mulf %63, %64 : vector<8x286xf32>
    %cst_55 = arith.constant 0.000000e+00 : bf16
    %66 = vector.broadcast %cst_55 : bf16 to vector<8x384xbf16>
    %c0_56 = arith.constant 0 : index
    %c0_57 = arith.constant 0 : index
    %67 = vector.load %arg10[%c0_56, %c0_57] : memref<8x384xbf16, #tpu.memory_space<vmem>>, vector<8x384xbf16>
    tpu.vector_store %arg10[%c0_56, %c0_57], %66 {strides = array<i32>} : memref<8x384xbf16, #tpu.memory_space<vmem>>, vector<8x384xbf16>,
    %68 = arith.truncf %65 : vector<8x286xf32> to vector<8x286xbf16>
    %c0_58 = arith.constant 0 : index
    %c19_59 = arith.constant 19 : index
    %69 = vector.load %arg10[%c0_58, %c19_59] : memref<8x384xbf16, #tpu.memory_space<vmem>>, vector<8x286xbf16>
    tpu.vector_store %arg10[%c0_58, %c19_59], %68 {strides = array<i32>} : memref<8x384xbf16, #tpu.memory_space<vmem>>, vector<8x286xbf16>,
    %cst_60 = arith.constant 0.000000e+00 : f32
    %70 = vector.broadcast %cst_60 : f32 to vector<8x286xf32>
    %c0_61 = arith.constant 0 : index
    %c0_62 = arith.constant 0 : index
    %c0_63 = arith.constant 0 : index
    %71 = vector.load %arg5[%c0_61, %c0_62, %c0_63] : memref<9x8x8xbf16, #tpu.memory_space<vmem>>, vector<1x8x8xbf16>
    %72 = vector.shape_cast %71 : vector<1x8x8xbf16> to vector<8x8xbf16>
    %c0_64 = arith.constant 0 : index
    %c0_65 = arith.constant 0 : index
    %73 = vector.load %arg10[%c0_64, %c0_65] : memref<8x384xbf16, #tpu.memory_space<vmem>>, vector<8x286xbf16>
    %cst_66 = arith.constant dense<0.000000e+00> : vector<8x286xf32>
    %74 = tpu.matmul %72, %73, %cst_66 {dimension_numbers = #tpu.dot_dimension_numbers<[1], [0], [0], [1], [0, 0, 1, 1], [], []>} : vector<8x8xbf16>, vector<8x286xbf16>, vector<8x286xf32> -> vector<8x286xf32>
    %75 = arith.addf %70, %74 : vector<8x286xf32>
    %c1_67 = arith.constant 1 : index
    %c0_68 = arith.constant 0 : index
    %c0_69 = arith.constant 0 : index
    %76 = vector.load %arg5[%c1_67, %c0_68, %c0_69] : memref<9x8x8xbf16, #tpu.memory_space<vmem>>, vector<1x8x8xbf16>
    %77 = vector.shape_cast %76 : vector<1x8x8xbf16> to vector<8x8xbf16>
    %c0_70 = arith.constant 0 : index
    %c1_71 = arith.constant 1 : index
    %78 = vector.load %arg10[%c0_70, %c1_71] : memref<8x384xbf16, #tpu.memory_space<vmem>>, vector<8x286xbf16>
    %cst_72 = arith.constant dense<0.000000e+00> : vector<8x286xf32>
    %79 = tpu.matmul %77, %78, %cst_72 {dimension_numbers = #tpu.dot_dimension_numbers<[1], [0], [0], [1], [0, 0, 1, 1], [], []>} : vector<8x8xbf16>, vector<8x286xbf16>, vector<8x286xf32> -> vector<8x286xf32>
    %80 = arith.addf %75, %79 : vector<8x286xf32>
    %c2_73 = arith.constant 2 : index
    %c0_74 = arith.constant 0 : index
    %c0_75 = arith.constant 0 : index
    %81 = vector.load %arg5[%c2_73, %c0_74, %c0_75] : memref<9x8x8xbf16, #tpu.memory_space<vmem>>, vector<1x8x8xbf16>
    %82 = vector.shape_cast %81 : vector<1x8x8xbf16> to vector<8x8xbf16>
    %c0_76 = arith.constant 0 : index
    %c2_77 = arith.constant 2 : index
    %83 = vector.load %arg10[%c0_76, %c2_77] : memref<8x384xbf16, #tpu.memory_space<vmem>>, vector<8x286xbf16>
    %cst_78 = arith.constant dense<0.000000e+00> : vector<8x286xf32>
    %84 = tpu.matmul %82, %83, %cst_78 {dimension_numbers = #tpu.dot_dimension_numbers<[1], [0], [0], [1], [0, 0, 1, 1], [], []>} : vector<8x8xbf16>, vector<8x286xbf16>, vector<8x286xf32> -> vector<8x286xf32>
    %85 = arith.addf %80, %84 : vector<8x286xf32>
    %c3_79 = arith.constant 3 : index
    %c0_80 = arith.constant 0 : index
    %c0_81 = arith.constant 0 : index
    %86 = vector.load %arg5[%c3_79, %c0_80, %c0_81] : memref<9x8x8xbf16, #tpu.memory_space<vmem>>, vector<1x8x8xbf16>
    %87 = vector.shape_cast %86 : vector<1x8x8xbf16> to vector<8x8xbf16>
    %c0_82 = arith.constant 0 : index
    %c18_83 = arith.constant 18 : index
    %88 = vector.load %arg10[%c0_82, %c18_83] : memref<8x384xbf16, #tpu.memory_space<vmem>>, vector<8x286xbf16>
    %cst_84 = arith.constant dense<0.000000e+00> : vector<8x286xf32>
    %89 = tpu.matmul %87, %88, %cst_84 {dimension_numbers = #tpu.dot_dimension_numbers<[1], [0], [0], [1], [0, 0, 1, 1], [], []>} : vector<8x8xbf16>, vector<8x286xbf16>, vector<8x286xf32> -> vector<8x286xf32>
    %90 = arith.addf %85, %89 : vector<8x286xf32>
    %c4_85 = arith.constant 4 : index
    %c0_86 = arith.constant 0 : index
    %c0_87 = arith.constant 0 : index
    %91 = vector.load %arg5[%c4_85, %c0_86, %c0_87] : memref<9x8x8xbf16, #tpu.memory_space<vmem>>, vector<1x8x8xbf16>
    %92 = vector.shape_cast %91 : vector<1x8x8xbf16> to vector<8x8xbf16>
    %c0_88 = arith.constant 0 : index
    %c19_89 = arith.constant 19 : index
    %93 = vector.load %arg10[%c0_88, %c19_89] : memref<8x384xbf16, #tpu.memory_space<vmem>>, vector<8x286xbf16>
    %cst_90 = arith.constant dense<0.000000e+00> : vector<8x286xf32>
    %94 = tpu.matmul %92, %93, %cst_90 {dimension_numbers = #tpu.dot_dimension_numbers<[1], [0], [0], [1], [0, 0, 1, 1], [], []>} : vector<8x8xbf16>, vector<8x286xbf16>, vector<8x286xf32> -> vector<8x286xf32>
    %95 = arith.addf %90, %94 : vector<8x286xf32>
    %c5_91 = arith.constant 5 : index
    %c0_92 = arith.constant 0 : index
    %c0_93 = arith.constant 0 : index
    %96 = vector.load %arg5[%c5_91, %c0_92, %c0_93] : memref<9x8x8xbf16, #tpu.memory_space<vmem>>, vector<1x8x8xbf16>
    %97 = vector.shape_cast %96 : vector<1x8x8xbf16> to vector<8x8xbf16>
    %c0_94 = arith.constant 0 : index
    %c20_95 = arith.constant 20 : index
    %98 = vector.load %arg10[%c0_94, %c20_95] : memref<8x384xbf16, #tpu.memory_space<vmem>>, vector<8x286xbf16>
    %cst_96 = arith.constant dense<0.000000e+00> : vector<8x286xf32>
    %99 = tpu.matmul %97, %98, %cst_96 {dimension_numbers = #tpu.dot_dimension_numbers<[1], [0], [0], [1], [0, 0, 1, 1], [], []>} : vector<8x8xbf16>, vector<8x286xbf16>, vector<8x286xf32> -> vector<8x286xf32>
    %100 = arith.addf %95, %99 : vector<8x286xf32>
    %c6_97 = arith.constant 6 : index
    %c0_98 = arith.constant 0 : index
    %c0_99 = arith.constant 0 : index
    %101 = vector.load %arg5[%c6_97, %c0_98, %c0_99] : memref<9x8x8xbf16, #tpu.memory_space<vmem>>, vector<1x8x8xbf16>
    %102 = vector.shape_cast %101 : vector<1x8x8xbf16> to vector<8x8xbf16>
    %c0_100 = arith.constant 0 : index
    %c36_101 = arith.constant 36 : index
    %103 = vector.load %arg10[%c0_100, %c36_101] : memref<8x384xbf16, #tpu.memory_space<vmem>>, vector<8x286xbf16>
    %cst_102 = arith.constant dense<0.000000e+00> : vector<8x286xf32>
    %104 = tpu.matmul %102, %103, %cst_102 {dimension_numbers = #tpu.dot_dimension_numbers<[1], [0], [0], [1], [0, 0, 1, 1], [], []>} : vector<8x8xbf16>, vector<8x286xbf16>, vector<8x286xf32> -> vector<8x286xf32>
    %105 = arith.addf %100, %104 : vector<8x286xf32>
    %c7_103 = arith.constant 7 : index
    %c0_104 = arith.constant 0 : index
    %c0_105 = arith.constant 0 : index
    %106 = vector.load %arg5[%c7_103, %c0_104, %c0_105] : memref<9x8x8xbf16, #tpu.memory_space<vmem>>, vector<1x8x8xbf16>
    %107 = vector.shape_cast %106 : vector<1x8x8xbf16> to vector<8x8xbf16>
    %c0_106 = arith.constant 0 : index
    %c37_107 = arith.constant 37 : index
    %108 = vector.load %arg10[%c0_106, %c37_107] : memref<8x384xbf16, #tpu.memory_space<vmem>>, vector<8x286xbf16>
    %cst_108 = arith.constant dense<0.000000e+00> : vector<8x286xf32>
    %109 = tpu.matmul %107, %108, %cst_108 {dimension_numbers = #tpu.dot_dimension_numbers<[1], [0], [0], [1], [0, 0, 1, 1], [], []>} : vector<8x8xbf16>, vector<8x286xbf16>, vector<8x286xf32> -> vector<8x286xf32>
    %110 = arith.addf %105, %109 : vector<8x286xf32>
    %c8_109 = arith.constant 8 : index
    %c0_110 = arith.constant 0 : index
    %c0_111 = arith.constant 0 : index
    %111 = vector.load %arg5[%c8_109, %c0_110, %c0_111] : memref<9x8x8xbf16, #tpu.memory_space<vmem>>, vector<1x8x8xbf16>
    %112 = vector.shape_cast %111 : vector<1x8x8xbf16> to vector<8x8xbf16>
    %c0_112 = arith.constant 0 : index
    %c38_113 = arith.constant 38 : index
    %113 = vector.load %arg10[%c0_112, %c38_113] : memref<8x384xbf16, #tpu.memory_space<vmem>>, vector<8x286xbf16>
    %cst_114 = arith.constant dense<0.000000e+00> : vector<8x286xf32>
    %114 = tpu.matmul %112, %113, %cst_114 {dimension_numbers = #tpu.dot_dimension_numbers<[1], [0], [0], [1], [0, 0, 1, 1], [], []>} : vector<8x8xbf16>, vector<8x286xbf16>, vector<8x286xf32> -> vector<8x286xf32>
    %115 = arith.addf %110, %114 : vector<8x286xf32>
    %c0_115 = arith.constant 0 : index
    %c0_116 = arith.constant 0 : index
    %116 = vector.load %arg6[%c0_115, %c0_116] : memref<8x1xf32, #tpu.memory_space<vmem>>, vector<8x1xf32>
    %117 = vector.broadcast %116 : vector<8x1xf32> to vector<8x286xf32>
    %118 = arith.mulf %115, %117 : vector<8x286xf32>
    %c0_117 = arith.constant 0 : index
    %c0_118 = arith.constant 0 : index
    %119 = vector.load %arg7[%c0_117, %c0_118] : memref<8x1xf32, #tpu.memory_space<vmem>>, vector<8x1xf32>
    %120 = vector.broadcast %119 : vector<8x1xf32> to vector<8x286xf32>
    %121 = arith.addf %118, %120 : vector<8x286xf32>
    %cst_119 = arith.constant 0.000000e+00 : f32
    %122 = vector.broadcast %cst_119 : f32 to vector<8x286xf32>
    %123 = arith.maximumf %121, %122 : vector<8x286xf32>
    %124 = vector.broadcast %0 : vector<1x286xf32> to vector<8x286xf32>
    %125 = arith.mulf %123, %124 : vector<8x286xf32>
    %cst_120 = arith.constant 0.000000e+00 : bf16
    %126 = vector.broadcast %cst_120 : bf16 to vector<1x8x384xbf16>
    %c0_121 = arith.constant 0 : index
    %c0_122 = arith.constant 0 : index
    %c0_123 = arith.constant 0 : index
    %127 = vector.load %arg9[%c0_121, %c0_122, %c0_123] : memref<1x8x384xbf16, #tpu.memory_space<vmem>>, vector<1x8x384xbf16>
    tpu.vector_store %arg9[%c0_121, %c0_122, %c0_123], %126 {strides = array<i32>} : memref<1x8x384xbf16, #tpu.memory_space<vmem>>, vector<1x8x384xbf16>,
    %128 = arith.truncf %125 : vector<8x286xf32> to vector<8x286xbf16>
    %c0_124 = arith.constant 0 : index
    %c0_125 = arith.constant 0 : index
    %c19_126 = arith.constant 19 : index
    %129 = vector.load %arg9[%c0_124, %c0_125, %c19_126] : memref<1x8x384xbf16, #tpu.memory_space<vmem>>, vector<1x8x286xbf16>
    %130 = vector.shape_cast %129 : vector<1x8x286xbf16> to vector<8x286xbf16>
    %131 = vector.shape_cast %128 : vector<8x286xbf16> to vector<1x8x286xbf16>
    tpu.vector_store %arg9[%c0_124, %c0_125, %c19_126], %131 {strides = array<i32>} : memref<1x8x384xbf16, #tpu.memory_space<vmem>>, vector<1x8x286xbf16>,
    return
  }
  func.func @transform_0(%arg0: i32) -> (i32, i32, i32) {
    %c0_i32 = arith.constant 0 : i32
    %c0_i32_0 = arith.constant 0 : i32
    %c0_i32_1 = arith.constant 0 : i32
    return %arg0, %c0_i32, %c0_i32_0 : i32, i32, i32
  }
  func.func @transform_1(%arg0: i32) -> (i32, i32, i32) {
    %c0_i32 = arith.constant 0 : i32
    %c0_i32_0 = arith.constant 0 : i32
    %c0_i32_1 = arith.constant 0 : i32
    %c0_i32_2 = arith.constant 0 : i32
    return %c0_i32, %c0_i32_0, %c0_i32_1 : i32, i32, i32
  }
  func.func @transform_2(%arg0: i32) -> (i32, i32) {
    %c0_i32 = arith.constant 0 : i32
    %c0_i32_0 = arith.constant 0 : i32
    %c0_i32_1 = arith.constant 0 : i32
    return %c0_i32, %c0_i32_0 : i32, i32
  }
  func.func @transform_3(%arg0: i32) -> (i32, i32) {
    %c0_i32 = arith.constant 0 : i32
    %c0_i32_0 = arith.constant 0 : i32
    %c0_i32_1 = arith.constant 0 : i32
    return %c0_i32, %c0_i32_0 : i32, i32
  }
  func.func @transform_4(%arg0: i32) -> (i32, i32, i32) {
    %c0_i32 = arith.constant 0 : i32
    %c0_i32_0 = arith.constant 0 : i32
    %c0_i32_1 = arith.constant 0 : i32
    %c0_i32_2 = arith.constant 0 : i32
    return %c0_i32, %c0_i32_0, %c0_i32_1 : i32, i32, i32
  }
  func.func @transform_5(%arg0: i32) -> (i32, i32) {
    %c0_i32 = arith.constant 0 : i32
    %c0_i32_0 = arith.constant 0 : i32
    %c0_i32_1 = arith.constant 0 : i32
    return %c0_i32, %c0_i32_0 : i32, i32
  }
  func.func @transform_6(%arg0: i32) -> (i32, i32) {
    %c0_i32 = arith.constant 0 : i32
    %c0_i32_0 = arith.constant 0 : i32
    %c0_i32_1 = arith.constant 0 : i32
    return %c0_i32, %c0_i32_0 : i32, i32
  }
  func.func @transform_7(%arg0: i32) -> (i32, i32) {
    %c0_i32 = arith.constant 0 : i32
    %c0_i32_0 = arith.constant 0 : i32
    %c0_i32_1 = arith.constant 0 : i32
    return %c0_i32, %c0_i32_0 : i32, i32
  }
  func.func @transform_8(%arg0: i32) -> (i32, i32, i32) {
    %c0_i32 = arith.constant 0 : i32
    %c0_i32_0 = arith.constant 0 : i32
    %c0_i32_1 = arith.constant 0 : i32
    return %arg0, %c0_i32, %c0_i32_0 : i32, i32, i32
  }
}

module attributes {stable_mosaic.version = 11 : i64} {
  func.func @_conv_block_kernel(%arg0: i32, %arg1: memref<1x8x128xbf16, #tpu.memory_space<vmem>>, %arg2: memref<9x16x8xbf16, #tpu.memory_space<vmem>>, %arg3: memref<16x1xf32, #tpu.memory_space<vmem>>, %arg4: memref<16x1xf32, #tpu.memory_space<vmem>>, %arg5: memref<9x16x16xbf16, #tpu.memory_space<vmem>>, %arg6: memref<16x1xf32, #tpu.memory_space<vmem>>, %arg7: memref<16x1xf32, #tpu.memory_space<vmem>>, %arg8: memref<1x78xf32, #tpu.memory_space<vmem>>, %arg9: memref<1x16x128xbf16, #tpu.memory_space<vmem>>, %arg10: memref<16x128xbf16, #tpu.memory_space<vmem>>) attributes {dimension_semantics = [#tpu.dimension_semantics<parallel>], iteration_bounds = array<i64: 2>, scalar_prefetch = 0 : i64, scratch_operands = 1 : i64, tpu.core_type = #tpu.core_type<tc>, window_params = [{transform_indices = @transform_0, window_bounds = array<i64: 1, 8, 128>}, {pipeline_mode = #tpu.pipeline_mode<synchronous>, transform_indices = @transform_1, window_bounds = array<i64: 9, 16, 8>}, {pipeline_mode = #tpu.pipeline_mode<synchronous>, transform_indices = @transform_2, window_bounds = array<i64: 16, 1>}, {pipeline_mode = #tpu.pipeline_mode<synchronous>, transform_indices = @transform_3, window_bounds = array<i64: 16, 1>}, {pipeline_mode = #tpu.pipeline_mode<synchronous>, transform_indices = @transform_4, window_bounds = array<i64: 9, 16, 16>}, {pipeline_mode = #tpu.pipeline_mode<synchronous>, transform_indices = @transform_5, window_bounds = array<i64: 16, 1>}, {pipeline_mode = #tpu.pipeline_mode<synchronous>, transform_indices = @transform_6, window_bounds = array<i64: 16, 1>}, {pipeline_mode = #tpu.pipeline_mode<synchronous>, transform_indices = @transform_7, window_bounds = array<i64: 1, 78>}, {transform_indices = @transform_8, window_bounds = array<i64: 1, 16, 128>}]} {
    %c0 = arith.constant 0 : index
    %c0_0 = arith.constant 0 : index
    %0 = vector.load %arg8[%c0, %c0_0] : memref<1x78xf32, #tpu.memory_space<vmem>>, vector<1x78xf32>
    %cst = arith.constant 0.000000e+00 : f32
    %1 = vector.broadcast %cst : f32 to vector<16x78xf32>
    %c0_1 = arith.constant 0 : index
    %c0_2 = arith.constant 0 : index
    %c0_3 = arith.constant 0 : index
    %2 = vector.load %arg2[%c0_1, %c0_2, %c0_3] : memref<9x16x8xbf16, #tpu.memory_space<vmem>>, vector<1x16x8xbf16>
    %3 = vector.shape_cast %2 : vector<1x16x8xbf16> to vector<16x8xbf16>
    %c0_4 = arith.constant 0 : index
    %c0_5 = arith.constant 0 : index
    %c0_6 = arith.constant 0 : index
    %4 = vector.load %arg1[%c0_4, %c0_5, %c0_6] : memref<1x8x128xbf16, #tpu.memory_space<vmem>>, vector<1x8x78xbf16>
    %5 = vector.shape_cast %4 : vector<1x8x78xbf16> to vector<8x78xbf16>
    %cst_7 = arith.constant dense<0.000000e+00> : vector<16x78xf32>
    %6 = tpu.matmul %3, %5, %cst_7 {dimension_numbers = #tpu.dot_dimension_numbers<[1], [0], [0], [1], [0, 0, 1, 1], [], []>} : vector<16x8xbf16>, vector<8x78xbf16>, vector<16x78xf32> -> vector<16x78xf32>
    %7 = arith.addf %1, %6 : vector<16x78xf32>
    %c1 = arith.constant 1 : index
    %c0_8 = arith.constant 0 : index
    %c0_9 = arith.constant 0 : index
    %8 = vector.load %arg2[%c1, %c0_8, %c0_9] : memref<9x16x8xbf16, #tpu.memory_space<vmem>>, vector<1x16x8xbf16>
    %9 = vector.shape_cast %8 : vector<1x16x8xbf16> to vector<16x8xbf16>
    %c0_10 = arith.constant 0 : index
    %c0_11 = arith.constant 0 : index
    %c1_12 = arith.constant 1 : index
    %10 = vector.load %arg1[%c0_10, %c0_11, %c1_12] : memref<1x8x128xbf16, #tpu.memory_space<vmem>>, vector<1x8x78xbf16>
    %11 = vector.shape_cast %10 : vector<1x8x78xbf16> to vector<8x78xbf16>
    %cst_13 = arith.constant dense<0.000000e+00> : vector<16x78xf32>
    %12 = tpu.matmul %9, %11, %cst_13 {dimension_numbers = #tpu.dot_dimension_numbers<[1], [0], [0], [1], [0, 0, 1, 1], [], []>} : vector<16x8xbf16>, vector<8x78xbf16>, vector<16x78xf32> -> vector<16x78xf32>
    %13 = arith.addf %7, %12 : vector<16x78xf32>
    %c2 = arith.constant 2 : index
    %c0_14 = arith.constant 0 : index
    %c0_15 = arith.constant 0 : index
    %14 = vector.load %arg2[%c2, %c0_14, %c0_15] : memref<9x16x8xbf16, #tpu.memory_space<vmem>>, vector<1x16x8xbf16>
    %15 = vector.shape_cast %14 : vector<1x16x8xbf16> to vector<16x8xbf16>
    %c0_16 = arith.constant 0 : index
    %c0_17 = arith.constant 0 : index
    %c2_18 = arith.constant 2 : index
    %16 = vector.load %arg1[%c0_16, %c0_17, %c2_18] : memref<1x8x128xbf16, #tpu.memory_space<vmem>>, vector<1x8x78xbf16>
    %17 = vector.shape_cast %16 : vector<1x8x78xbf16> to vector<8x78xbf16>
    %cst_19 = arith.constant dense<0.000000e+00> : vector<16x78xf32>
    %18 = tpu.matmul %15, %17, %cst_19 {dimension_numbers = #tpu.dot_dimension_numbers<[1], [0], [0], [1], [0, 0, 1, 1], [], []>} : vector<16x8xbf16>, vector<8x78xbf16>, vector<16x78xf32> -> vector<16x78xf32>
    %19 = arith.addf %13, %18 : vector<16x78xf32>
    %c3 = arith.constant 3 : index
    %c0_20 = arith.constant 0 : index
    %c0_21 = arith.constant 0 : index
    %20 = vector.load %arg2[%c3, %c0_20, %c0_21] : memref<9x16x8xbf16, #tpu.memory_space<vmem>>, vector<1x16x8xbf16>
    %21 = vector.shape_cast %20 : vector<1x16x8xbf16> to vector<16x8xbf16>
    %c0_22 = arith.constant 0 : index
    %c0_23 = arith.constant 0 : index
    %c10 = arith.constant 10 : index
    %22 = vector.load %arg1[%c0_22, %c0_23, %c10] : memref<1x8x128xbf16, #tpu.memory_space<vmem>>, vector<1x8x78xbf16>
    %23 = vector.shape_cast %22 : vector<1x8x78xbf16> to vector<8x78xbf16>
    %cst_24 = arith.constant dense<0.000000e+00> : vector<16x78xf32>
    %24 = tpu.matmul %21, %23, %cst_24 {dimension_numbers = #tpu.dot_dimension_numbers<[1], [0], [0], [1], [0, 0, 1, 1], [], []>} : vector<16x8xbf16>, vector<8x78xbf16>, vector<16x78xf32> -> vector<16x78xf32>
    %25 = arith.addf %19, %24 : vector<16x78xf32>
    %c4 = arith.constant 4 : index
    %c0_25 = arith.constant 0 : index
    %c0_26 = arith.constant 0 : index
    %26 = vector.load %arg2[%c4, %c0_25, %c0_26] : memref<9x16x8xbf16, #tpu.memory_space<vmem>>, vector<1x16x8xbf16>
    %27 = vector.shape_cast %26 : vector<1x16x8xbf16> to vector<16x8xbf16>
    %c0_27 = arith.constant 0 : index
    %c0_28 = arith.constant 0 : index
    %c11 = arith.constant 11 : index
    %28 = vector.load %arg1[%c0_27, %c0_28, %c11] : memref<1x8x128xbf16, #tpu.memory_space<vmem>>, vector<1x8x78xbf16>
    %29 = vector.shape_cast %28 : vector<1x8x78xbf16> to vector<8x78xbf16>
    %cst_29 = arith.constant dense<0.000000e+00> : vector<16x78xf32>
    %30 = tpu.matmul %27, %29, %cst_29 {dimension_numbers = #tpu.dot_dimension_numbers<[1], [0], [0], [1], [0, 0, 1, 1], [], []>} : vector<16x8xbf16>, vector<8x78xbf16>, vector<16x78xf32> -> vector<16x78xf32>
    %31 = arith.addf %25, %30 : vector<16x78xf32>
    %c5 = arith.constant 5 : index
    %c0_30 = arith.constant 0 : index
    %c0_31 = arith.constant 0 : index
    %32 = vector.load %arg2[%c5, %c0_30, %c0_31] : memref<9x16x8xbf16, #tpu.memory_space<vmem>>, vector<1x16x8xbf16>
    %33 = vector.shape_cast %32 : vector<1x16x8xbf16> to vector<16x8xbf16>
    %c0_32 = arith.constant 0 : index
    %c0_33 = arith.constant 0 : index
    %c12 = arith.constant 12 : index
    %34 = vector.load %arg1[%c0_32, %c0_33, %c12] : memref<1x8x128xbf16, #tpu.memory_space<vmem>>, vector<1x8x78xbf16>
    %35 = vector.shape_cast %34 : vector<1x8x78xbf16> to vector<8x78xbf16>
    %cst_34 = arith.constant dense<0.000000e+00> : vector<16x78xf32>
    %36 = tpu.matmul %33, %35, %cst_34 {dimension_numbers = #tpu.dot_dimension_numbers<[1], [0], [0], [1], [0, 0, 1, 1], [], []>} : vector<16x8xbf16>, vector<8x78xbf16>, vector<16x78xf32> -> vector<16x78xf32>
    %37 = arith.addf %31, %36 : vector<16x78xf32>
    %c6 = arith.constant 6 : index
    %c0_35 = arith.constant 0 : index
    %c0_36 = arith.constant 0 : index
    %38 = vector.load %arg2[%c6, %c0_35, %c0_36] : memref<9x16x8xbf16, #tpu.memory_space<vmem>>, vector<1x16x8xbf16>
    %39 = vector.shape_cast %38 : vector<1x16x8xbf16> to vector<16x8xbf16>
    %c0_37 = arith.constant 0 : index
    %c0_38 = arith.constant 0 : index
    %c20 = arith.constant 20 : index
    %40 = vector.load %arg1[%c0_37, %c0_38, %c20] : memref<1x8x128xbf16, #tpu.memory_space<vmem>>, vector<1x8x78xbf16>
    %41 = vector.shape_cast %40 : vector<1x8x78xbf16> to vector<8x78xbf16>
    %cst_39 = arith.constant dense<0.000000e+00> : vector<16x78xf32>
    %42 = tpu.matmul %39, %41, %cst_39 {dimension_numbers = #tpu.dot_dimension_numbers<[1], [0], [0], [1], [0, 0, 1, 1], [], []>} : vector<16x8xbf16>, vector<8x78xbf16>, vector<16x78xf32> -> vector<16x78xf32>
    %43 = arith.addf %37, %42 : vector<16x78xf32>
    %c7 = arith.constant 7 : index
    %c0_40 = arith.constant 0 : index
    %c0_41 = arith.constant 0 : index
    %44 = vector.load %arg2[%c7, %c0_40, %c0_41] : memref<9x16x8xbf16, #tpu.memory_space<vmem>>, vector<1x16x8xbf16>
    %45 = vector.shape_cast %44 : vector<1x16x8xbf16> to vector<16x8xbf16>
    %c0_42 = arith.constant 0 : index
    %c0_43 = arith.constant 0 : index
    %c21 = arith.constant 21 : index
    %46 = vector.load %arg1[%c0_42, %c0_43, %c21] : memref<1x8x128xbf16, #tpu.memory_space<vmem>>, vector<1x8x78xbf16>
    %47 = vector.shape_cast %46 : vector<1x8x78xbf16> to vector<8x78xbf16>
    %cst_44 = arith.constant dense<0.000000e+00> : vector<16x78xf32>
    %48 = tpu.matmul %45, %47, %cst_44 {dimension_numbers = #tpu.dot_dimension_numbers<[1], [0], [0], [1], [0, 0, 1, 1], [], []>} : vector<16x8xbf16>, vector<8x78xbf16>, vector<16x78xf32> -> vector<16x78xf32>
    %49 = arith.addf %43, %48 : vector<16x78xf32>
    %c8 = arith.constant 8 : index
    %c0_45 = arith.constant 0 : index
    %c0_46 = arith.constant 0 : index
    %50 = vector.load %arg2[%c8, %c0_45, %c0_46] : memref<9x16x8xbf16, #tpu.memory_space<vmem>>, vector<1x16x8xbf16>
    %51 = vector.shape_cast %50 : vector<1x16x8xbf16> to vector<16x8xbf16>
    %c0_47 = arith.constant 0 : index
    %c0_48 = arith.constant 0 : index
    %c22 = arith.constant 22 : index
    %52 = vector.load %arg1[%c0_47, %c0_48, %c22] : memref<1x8x128xbf16, #tpu.memory_space<vmem>>, vector<1x8x78xbf16>
    %53 = vector.shape_cast %52 : vector<1x8x78xbf16> to vector<8x78xbf16>
    %cst_49 = arith.constant dense<0.000000e+00> : vector<16x78xf32>
    %54 = tpu.matmul %51, %53, %cst_49 {dimension_numbers = #tpu.dot_dimension_numbers<[1], [0], [0], [1], [0, 0, 1, 1], [], []>} : vector<16x8xbf16>, vector<8x78xbf16>, vector<16x78xf32> -> vector<16x78xf32>
    %55 = arith.addf %49, %54 : vector<16x78xf32>
    %c0_50 = arith.constant 0 : index
    %c0_51 = arith.constant 0 : index
    %56 = vector.load %arg3[%c0_50, %c0_51] : memref<16x1xf32, #tpu.memory_space<vmem>>, vector<16x1xf32>
    %57 = vector.broadcast %56 : vector<16x1xf32> to vector<16x78xf32>
    %58 = arith.mulf %55, %57 : vector<16x78xf32>
    %c0_52 = arith.constant 0 : index
    %c0_53 = arith.constant 0 : index
    %59 = vector.load %arg4[%c0_52, %c0_53] : memref<16x1xf32, #tpu.memory_space<vmem>>, vector<16x1xf32>
    %60 = vector.broadcast %59 : vector<16x1xf32> to vector<16x78xf32>
    %61 = arith.addf %58, %60 : vector<16x78xf32>
    %cst_54 = arith.constant 0.000000e+00 : f32
    %62 = vector.broadcast %cst_54 : f32 to vector<16x78xf32>
    %63 = arith.maximumf %61, %62 : vector<16x78xf32>
    %64 = vector.broadcast %0 : vector<1x78xf32> to vector<16x78xf32>
    %65 = arith.mulf %63, %64 : vector<16x78xf32>
    %cst_55 = arith.constant 0.000000e+00 : bf16
    %66 = vector.broadcast %cst_55 : bf16 to vector<16x128xbf16>
    %c0_56 = arith.constant 0 : index
    %c0_57 = arith.constant 0 : index
    %67 = vector.load %arg10[%c0_56, %c0_57] : memref<16x128xbf16, #tpu.memory_space<vmem>>, vector<16x128xbf16>
    tpu.vector_store %arg10[%c0_56, %c0_57], %66 {strides = array<i32>} : memref<16x128xbf16, #tpu.memory_space<vmem>>, vector<16x128xbf16>,
    %68 = arith.truncf %65 : vector<16x78xf32> to vector<16x78xbf16>
    %c0_58 = arith.constant 0 : index
    %c11_59 = arith.constant 11 : index
    %69 = vector.load %arg10[%c0_58, %c11_59] : memref<16x128xbf16, #tpu.memory_space<vmem>>, vector<16x78xbf16>
    tpu.vector_store %arg10[%c0_58, %c11_59], %68 {strides = array<i32>} : memref<16x128xbf16, #tpu.memory_space<vmem>>, vector<16x78xbf16>,
    %cst_60 = arith.constant 0.000000e+00 : f32
    %70 = vector.broadcast %cst_60 : f32 to vector<16x78xf32>
    %c0_61 = arith.constant 0 : index
    %c0_62 = arith.constant 0 : index
    %c0_63 = arith.constant 0 : index
    %71 = vector.load %arg5[%c0_61, %c0_62, %c0_63] : memref<9x16x16xbf16, #tpu.memory_space<vmem>>, vector<1x16x16xbf16>
    %72 = vector.shape_cast %71 : vector<1x16x16xbf16> to vector<16x16xbf16>
    %c0_64 = arith.constant 0 : index
    %c0_65 = arith.constant 0 : index
    %73 = vector.load %arg10[%c0_64, %c0_65] : memref<16x128xbf16, #tpu.memory_space<vmem>>, vector<16x78xbf16>
    %cst_66 = arith.constant dense<0.000000e+00> : vector<16x78xf32>
    %74 = tpu.matmul %72, %73, %cst_66 {dimension_numbers = #tpu.dot_dimension_numbers<[1], [0], [0], [1], [0, 0, 1, 1], [], []>} : vector<16x16xbf16>, vector<16x78xbf16>, vector<16x78xf32> -> vector<16x78xf32>
    %75 = arith.addf %70, %74 : vector<16x78xf32>
    %c1_67 = arith.constant 1 : index
    %c0_68 = arith.constant 0 : index
    %c0_69 = arith.constant 0 : index
    %76 = vector.load %arg5[%c1_67, %c0_68, %c0_69] : memref<9x16x16xbf16, #tpu.memory_space<vmem>>, vector<1x16x16xbf16>
    %77 = vector.shape_cast %76 : vector<1x16x16xbf16> to vector<16x16xbf16>
    %c0_70 = arith.constant 0 : index
    %c1_71 = arith.constant 1 : index
    %78 = vector.load %arg10[%c0_70, %c1_71] : memref<16x128xbf16, #tpu.memory_space<vmem>>, vector<16x78xbf16>
    %cst_72 = arith.constant dense<0.000000e+00> : vector<16x78xf32>
    %79 = tpu.matmul %77, %78, %cst_72 {dimension_numbers = #tpu.dot_dimension_numbers<[1], [0], [0], [1], [0, 0, 1, 1], [], []>} : vector<16x16xbf16>, vector<16x78xbf16>, vector<16x78xf32> -> vector<16x78xf32>
    %80 = arith.addf %75, %79 : vector<16x78xf32>
    %c2_73 = arith.constant 2 : index
    %c0_74 = arith.constant 0 : index
    %c0_75 = arith.constant 0 : index
    %81 = vector.load %arg5[%c2_73, %c0_74, %c0_75] : memref<9x16x16xbf16, #tpu.memory_space<vmem>>, vector<1x16x16xbf16>
    %82 = vector.shape_cast %81 : vector<1x16x16xbf16> to vector<16x16xbf16>
    %c0_76 = arith.constant 0 : index
    %c2_77 = arith.constant 2 : index
    %83 = vector.load %arg10[%c0_76, %c2_77] : memref<16x128xbf16, #tpu.memory_space<vmem>>, vector<16x78xbf16>
    %cst_78 = arith.constant dense<0.000000e+00> : vector<16x78xf32>
    %84 = tpu.matmul %82, %83, %cst_78 {dimension_numbers = #tpu.dot_dimension_numbers<[1], [0], [0], [1], [0, 0, 1, 1], [], []>} : vector<16x16xbf16>, vector<16x78xbf16>, vector<16x78xf32> -> vector<16x78xf32>
    %85 = arith.addf %80, %84 : vector<16x78xf32>
    %c3_79 = arith.constant 3 : index
    %c0_80 = arith.constant 0 : index
    %c0_81 = arith.constant 0 : index
    %86 = vector.load %arg5[%c3_79, %c0_80, %c0_81] : memref<9x16x16xbf16, #tpu.memory_space<vmem>>, vector<1x16x16xbf16>
    %87 = vector.shape_cast %86 : vector<1x16x16xbf16> to vector<16x16xbf16>
    %c0_82 = arith.constant 0 : index
    %c10_83 = arith.constant 10 : index
    %88 = vector.load %arg10[%c0_82, %c10_83] : memref<16x128xbf16, #tpu.memory_space<vmem>>, vector<16x78xbf16>
    %cst_84 = arith.constant dense<0.000000e+00> : vector<16x78xf32>
    %89 = tpu.matmul %87, %88, %cst_84 {dimension_numbers = #tpu.dot_dimension_numbers<[1], [0], [0], [1], [0, 0, 1, 1], [], []>} : vector<16x16xbf16>, vector<16x78xbf16>, vector<16x78xf32> -> vector<16x78xf32>
    %90 = arith.addf %85, %89 : vector<16x78xf32>
    %c4_85 = arith.constant 4 : index
    %c0_86 = arith.constant 0 : index
    %c0_87 = arith.constant 0 : index
    %91 = vector.load %arg5[%c4_85, %c0_86, %c0_87] : memref<9x16x16xbf16, #tpu.memory_space<vmem>>, vector<1x16x16xbf16>
    %92 = vector.shape_cast %91 : vector<1x16x16xbf16> to vector<16x16xbf16>
    %c0_88 = arith.constant 0 : index
    %c11_89 = arith.constant 11 : index
    %93 = vector.load %arg10[%c0_88, %c11_89] : memref<16x128xbf16, #tpu.memory_space<vmem>>, vector<16x78xbf16>
    %cst_90 = arith.constant dense<0.000000e+00> : vector<16x78xf32>
    %94 = tpu.matmul %92, %93, %cst_90 {dimension_numbers = #tpu.dot_dimension_numbers<[1], [0], [0], [1], [0, 0, 1, 1], [], []>} : vector<16x16xbf16>, vector<16x78xbf16>, vector<16x78xf32> -> vector<16x78xf32>
    %95 = arith.addf %90, %94 : vector<16x78xf32>
    %c5_91 = arith.constant 5 : index
    %c0_92 = arith.constant 0 : index
    %c0_93 = arith.constant 0 : index
    %96 = vector.load %arg5[%c5_91, %c0_92, %c0_93] : memref<9x16x16xbf16, #tpu.memory_space<vmem>>, vector<1x16x16xbf16>
    %97 = vector.shape_cast %96 : vector<1x16x16xbf16> to vector<16x16xbf16>
    %c0_94 = arith.constant 0 : index
    %c12_95 = arith.constant 12 : index
    %98 = vector.load %arg10[%c0_94, %c12_95] : memref<16x128xbf16, #tpu.memory_space<vmem>>, vector<16x78xbf16>
    %cst_96 = arith.constant dense<0.000000e+00> : vector<16x78xf32>
    %99 = tpu.matmul %97, %98, %cst_96 {dimension_numbers = #tpu.dot_dimension_numbers<[1], [0], [0], [1], [0, 0, 1, 1], [], []>} : vector<16x16xbf16>, vector<16x78xbf16>, vector<16x78xf32> -> vector<16x78xf32>
    %100 = arith.addf %95, %99 : vector<16x78xf32>
    %c6_97 = arith.constant 6 : index
    %c0_98 = arith.constant 0 : index
    %c0_99 = arith.constant 0 : index
    %101 = vector.load %arg5[%c6_97, %c0_98, %c0_99] : memref<9x16x16xbf16, #tpu.memory_space<vmem>>, vector<1x16x16xbf16>
    %102 = vector.shape_cast %101 : vector<1x16x16xbf16> to vector<16x16xbf16>
    %c0_100 = arith.constant 0 : index
    %c20_101 = arith.constant 20 : index
    %103 = vector.load %arg10[%c0_100, %c20_101] : memref<16x128xbf16, #tpu.memory_space<vmem>>, vector<16x78xbf16>
    %cst_102 = arith.constant dense<0.000000e+00> : vector<16x78xf32>
    %104 = tpu.matmul %102, %103, %cst_102 {dimension_numbers = #tpu.dot_dimension_numbers<[1], [0], [0], [1], [0, 0, 1, 1], [], []>} : vector<16x16xbf16>, vector<16x78xbf16>, vector<16x78xf32> -> vector<16x78xf32>
    %105 = arith.addf %100, %104 : vector<16x78xf32>
    %c7_103 = arith.constant 7 : index
    %c0_104 = arith.constant 0 : index
    %c0_105 = arith.constant 0 : index
    %106 = vector.load %arg5[%c7_103, %c0_104, %c0_105] : memref<9x16x16xbf16, #tpu.memory_space<vmem>>, vector<1x16x16xbf16>
    %107 = vector.shape_cast %106 : vector<1x16x16xbf16> to vector<16x16xbf16>
    %c0_106 = arith.constant 0 : index
    %c21_107 = arith.constant 21 : index
    %108 = vector.load %arg10[%c0_106, %c21_107] : memref<16x128xbf16, #tpu.memory_space<vmem>>, vector<16x78xbf16>
    %cst_108 = arith.constant dense<0.000000e+00> : vector<16x78xf32>
    %109 = tpu.matmul %107, %108, %cst_108 {dimension_numbers = #tpu.dot_dimension_numbers<[1], [0], [0], [1], [0, 0, 1, 1], [], []>} : vector<16x16xbf16>, vector<16x78xbf16>, vector<16x78xf32> -> vector<16x78xf32>
    %110 = arith.addf %105, %109 : vector<16x78xf32>
    %c8_109 = arith.constant 8 : index
    %c0_110 = arith.constant 0 : index
    %c0_111 = arith.constant 0 : index
    %111 = vector.load %arg5[%c8_109, %c0_110, %c0_111] : memref<9x16x16xbf16, #tpu.memory_space<vmem>>, vector<1x16x16xbf16>
    %112 = vector.shape_cast %111 : vector<1x16x16xbf16> to vector<16x16xbf16>
    %c0_112 = arith.constant 0 : index
    %c22_113 = arith.constant 22 : index
    %113 = vector.load %arg10[%c0_112, %c22_113] : memref<16x128xbf16, #tpu.memory_space<vmem>>, vector<16x78xbf16>
    %cst_114 = arith.constant dense<0.000000e+00> : vector<16x78xf32>
    %114 = tpu.matmul %112, %113, %cst_114 {dimension_numbers = #tpu.dot_dimension_numbers<[1], [0], [0], [1], [0, 0, 1, 1], [], []>} : vector<16x16xbf16>, vector<16x78xbf16>, vector<16x78xf32> -> vector<16x78xf32>
    %115 = arith.addf %110, %114 : vector<16x78xf32>
    %c0_115 = arith.constant 0 : index
    %c0_116 = arith.constant 0 : index
    %116 = vector.load %arg6[%c0_115, %c0_116] : memref<16x1xf32, #tpu.memory_space<vmem>>, vector<16x1xf32>
    %117 = vector.broadcast %116 : vector<16x1xf32> to vector<16x78xf32>
    %118 = arith.mulf %115, %117 : vector<16x78xf32>
    %c0_117 = arith.constant 0 : index
    %c0_118 = arith.constant 0 : index
    %119 = vector.load %arg7[%c0_117, %c0_118] : memref<16x1xf32, #tpu.memory_space<vmem>>, vector<16x1xf32>
    %120 = vector.broadcast %119 : vector<16x1xf32> to vector<16x78xf32>
    %121 = arith.addf %118, %120 : vector<16x78xf32>
    %cst_119 = arith.constant 0.000000e+00 : f32
    %122 = vector.broadcast %cst_119 : f32 to vector<16x78xf32>
    %123 = arith.maximumf %121, %122 : vector<16x78xf32>
    %124 = vector.broadcast %0 : vector<1x78xf32> to vector<16x78xf32>
    %125 = arith.mulf %123, %124 : vector<16x78xf32>
    %cst_120 = arith.constant 0.000000e+00 : bf16
    %126 = vector.broadcast %cst_120 : bf16 to vector<1x16x128xbf16>
    %c0_121 = arith.constant 0 : index
    %c0_122 = arith.constant 0 : index
    %c0_123 = arith.constant 0 : index
    %127 = vector.load %arg9[%c0_121, %c0_122, %c0_123] : memref<1x16x128xbf16, #tpu.memory_space<vmem>>, vector<1x16x128xbf16>
    tpu.vector_store %arg9[%c0_121, %c0_122, %c0_123], %126 {strides = array<i32>} : memref<1x16x128xbf16, #tpu.memory_space<vmem>>, vector<1x16x128xbf16>,
    %128 = arith.truncf %125 : vector<16x78xf32> to vector<16x78xbf16>
    %c0_124 = arith.constant 0 : index
    %c0_125 = arith.constant 0 : index
    %c11_126 = arith.constant 11 : index
    %129 = vector.load %arg9[%c0_124, %c0_125, %c11_126] : memref<1x16x128xbf16, #tpu.memory_space<vmem>>, vector<1x16x78xbf16>
    %130 = vector.shape_cast %129 : vector<1x16x78xbf16> to vector<16x78xbf16>
    %131 = vector.shape_cast %128 : vector<16x78xbf16> to vector<1x16x78xbf16>
    tpu.vector_store %arg9[%c0_124, %c0_125, %c11_126], %131 {strides = array<i32>} : memref<1x16x128xbf16, #tpu.memory_space<vmem>>, vector<1x16x78xbf16>,
    return
  }
  func.func @transform_0(%arg0: i32) -> (i32, i32, i32) {
    %c0_i32 = arith.constant 0 : i32
    %c0_i32_0 = arith.constant 0 : i32
    %c0_i32_1 = arith.constant 0 : i32
    return %arg0, %c0_i32, %c0_i32_0 : i32, i32, i32
  }
  func.func @transform_1(%arg0: i32) -> (i32, i32, i32) {
    %c0_i32 = arith.constant 0 : i32
    %c0_i32_0 = arith.constant 0 : i32
    %c0_i32_1 = arith.constant 0 : i32
    %c0_i32_2 = arith.constant 0 : i32
    return %c0_i32, %c0_i32_0, %c0_i32_1 : i32, i32, i32
  }
  func.func @transform_2(%arg0: i32) -> (i32, i32) {
    %c0_i32 = arith.constant 0 : i32
    %c0_i32_0 = arith.constant 0 : i32
    %c0_i32_1 = arith.constant 0 : i32
    return %c0_i32, %c0_i32_0 : i32, i32
  }
  func.func @transform_3(%arg0: i32) -> (i32, i32) {
    %c0_i32 = arith.constant 0 : i32
    %c0_i32_0 = arith.constant 0 : i32
    %c0_i32_1 = arith.constant 0 : i32
    return %c0_i32, %c0_i32_0 : i32, i32
  }
  func.func @transform_4(%arg0: i32) -> (i32, i32, i32) {
    %c0_i32 = arith.constant 0 : i32
    %c0_i32_0 = arith.constant 0 : i32
    %c0_i32_1 = arith.constant 0 : i32
    %c0_i32_2 = arith.constant 0 : i32
    return %c0_i32, %c0_i32_0, %c0_i32_1 : i32, i32, i32
  }
  func.func @transform_5(%arg0: i32) -> (i32, i32) {
    %c0_i32 = arith.constant 0 : i32
    %c0_i32_0 = arith.constant 0 : i32
    %c0_i32_1 = arith.constant 0 : i32
    return %c0_i32, %c0_i32_0 : i32, i32
  }
  func.func @transform_6(%arg0: i32) -> (i32, i32) {
    %c0_i32 = arith.constant 0 : i32
    %c0_i32_0 = arith.constant 0 : i32
    %c0_i32_1 = arith.constant 0 : i32
    return %c0_i32, %c0_i32_0 : i32, i32
  }
  func.func @transform_7(%arg0: i32) -> (i32, i32) {
    %c0_i32 = arith.constant 0 : i32
    %c0_i32_0 = arith.constant 0 : i32
    %c0_i32_1 = arith.constant 0 : i32
    return %c0_i32, %c0_i32_0 : i32, i32
  }
  func.func @transform_8(%arg0: i32) -> (i32, i32, i32) {
    %c0_i32 = arith.constant 0 : i32
    %c0_i32_0 = arith.constant 0 : i32
    %c0_i32_1 = arith.constant 0 : i32
    return %arg0, %c0_i32, %c0_i32_0 : i32, i32, i32
  }
}

module attributes {stable_mosaic.version = 11 : i64} {
  func.func @_conv_block_kernel(%arg0: i32, %arg1: memref<1x16x128xbf16, #tpu.memory_space<vmem>>, %arg2: memref<9x32x16xbf16, #tpu.memory_space<vmem>>, %arg3: memref<32x1xf32, #tpu.memory_space<vmem>>, %arg4: memref<32x1xf32, #tpu.memory_space<vmem>>, %arg5: memref<9x32x32xbf16, #tpu.memory_space<vmem>>, %arg6: memref<32x1xf32, #tpu.memory_space<vmem>>, %arg7: memref<32x1xf32, #tpu.memory_space<vmem>>, %arg8: memref<1x22xf32, #tpu.memory_space<vmem>>, %arg9: memref<1x32x128xbf16, #tpu.memory_space<vmem>>, %arg10: memref<32x128xbf16, #tpu.memory_space<vmem>>) attributes {dimension_semantics = [#tpu.dimension_semantics<parallel>], iteration_bounds = array<i64: 2>, scalar_prefetch = 0 : i64, scratch_operands = 1 : i64, tpu.core_type = #tpu.core_type<tc>, window_params = [{transform_indices = @transform_0, window_bounds = array<i64: 1, 16, 128>}, {pipeline_mode = #tpu.pipeline_mode<synchronous>, transform_indices = @transform_1, window_bounds = array<i64: 9, 32, 16>}, {pipeline_mode = #tpu.pipeline_mode<synchronous>, transform_indices = @transform_2, window_bounds = array<i64: 32, 1>}, {pipeline_mode = #tpu.pipeline_mode<synchronous>, transform_indices = @transform_3, window_bounds = array<i64: 32, 1>}, {pipeline_mode = #tpu.pipeline_mode<synchronous>, transform_indices = @transform_4, window_bounds = array<i64: 9, 32, 32>}, {pipeline_mode = #tpu.pipeline_mode<synchronous>, transform_indices = @transform_5, window_bounds = array<i64: 32, 1>}, {pipeline_mode = #tpu.pipeline_mode<synchronous>, transform_indices = @transform_6, window_bounds = array<i64: 32, 1>}, {pipeline_mode = #tpu.pipeline_mode<synchronous>, transform_indices = @transform_7, window_bounds = array<i64: 1, 22>}, {transform_indices = @transform_8, window_bounds = array<i64: 1, 32, 128>}]} {
    %c0 = arith.constant 0 : index
    %c0_0 = arith.constant 0 : index
    %0 = vector.load %arg8[%c0, %c0_0] : memref<1x22xf32, #tpu.memory_space<vmem>>, vector<1x22xf32>
    %cst = arith.constant 0.000000e+00 : f32
    %1 = vector.broadcast %cst : f32 to vector<32x22xf32>
    %c0_1 = arith.constant 0 : index
    %c0_2 = arith.constant 0 : index
    %c0_3 = arith.constant 0 : index
    %2 = vector.load %arg2[%c0_1, %c0_2, %c0_3] : memref<9x32x16xbf16, #tpu.memory_space<vmem>>, vector<1x32x16xbf16>
    %3 = vector.shape_cast %2 : vector<1x32x16xbf16> to vector<32x16xbf16>
    %c0_4 = arith.constant 0 : index
    %c0_5 = arith.constant 0 : index
    %c0_6 = arith.constant 0 : index
    %4 = vector.load %arg1[%c0_4, %c0_5, %c0_6] : memref<1x16x128xbf16, #tpu.memory_space<vmem>>, vector<1x16x22xbf16>
    %5 = vector.shape_cast %4 : vector<1x16x22xbf16> to vector<16x22xbf16>
    %cst_7 = arith.constant dense<0.000000e+00> : vector<32x22xf32>
    %6 = tpu.matmul %3, %5, %cst_7 {dimension_numbers = #tpu.dot_dimension_numbers<[1], [0], [0], [1], [0, 0, 1, 1], [], []>} : vector<32x16xbf16>, vector<16x22xbf16>, vector<32x22xf32> -> vector<32x22xf32>
    %7 = arith.addf %1, %6 : vector<32x22xf32>
    %c1 = arith.constant 1 : index
    %c0_8 = arith.constant 0 : index
    %c0_9 = arith.constant 0 : index
    %8 = vector.load %arg2[%c1, %c0_8, %c0_9] : memref<9x32x16xbf16, #tpu.memory_space<vmem>>, vector<1x32x16xbf16>
    %9 = vector.shape_cast %8 : vector<1x32x16xbf16> to vector<32x16xbf16>
    %c0_10 = arith.constant 0 : index
    %c0_11 = arith.constant 0 : index
    %c1_12 = arith.constant 1 : index
    %10 = vector.load %arg1[%c0_10, %c0_11, %c1_12] : memref<1x16x128xbf16, #tpu.memory_space<vmem>>, vector<1x16x22xbf16>
    %11 = vector.shape_cast %10 : vector<1x16x22xbf16> to vector<16x22xbf16>
    %cst_13 = arith.constant dense<0.000000e+00> : vector<32x22xf32>
    %12 = tpu.matmul %9, %11, %cst_13 {dimension_numbers = #tpu.dot_dimension_numbers<[1], [0], [0], [1], [0, 0, 1, 1], [], []>} : vector<32x16xbf16>, vector<16x22xbf16>, vector<32x22xf32> -> vector<32x22xf32>
    %13 = arith.addf %7, %12 : vector<32x22xf32>
    %c2 = arith.constant 2 : index
    %c0_14 = arith.constant 0 : index
    %c0_15 = arith.constant 0 : index
    %14 = vector.load %arg2[%c2, %c0_14, %c0_15] : memref<9x32x16xbf16, #tpu.memory_space<vmem>>, vector<1x32x16xbf16>
    %15 = vector.shape_cast %14 : vector<1x32x16xbf16> to vector<32x16xbf16>
    %c0_16 = arith.constant 0 : index
    %c0_17 = arith.constant 0 : index
    %c2_18 = arith.constant 2 : index
    %16 = vector.load %arg1[%c0_16, %c0_17, %c2_18] : memref<1x16x128xbf16, #tpu.memory_space<vmem>>, vector<1x16x22xbf16>
    %17 = vector.shape_cast %16 : vector<1x16x22xbf16> to vector<16x22xbf16>
    %cst_19 = arith.constant dense<0.000000e+00> : vector<32x22xf32>
    %18 = tpu.matmul %15, %17, %cst_19 {dimension_numbers = #tpu.dot_dimension_numbers<[1], [0], [0], [1], [0, 0, 1, 1], [], []>} : vector<32x16xbf16>, vector<16x22xbf16>, vector<32x22xf32> -> vector<32x22xf32>
    %19 = arith.addf %13, %18 : vector<32x22xf32>
    %c3 = arith.constant 3 : index
    %c0_20 = arith.constant 0 : index
    %c0_21 = arith.constant 0 : index
    %20 = vector.load %arg2[%c3, %c0_20, %c0_21] : memref<9x32x16xbf16, #tpu.memory_space<vmem>>, vector<1x32x16xbf16>
    %21 = vector.shape_cast %20 : vector<1x32x16xbf16> to vector<32x16xbf16>
    %c0_22 = arith.constant 0 : index
    %c0_23 = arith.constant 0 : index
    %c6 = arith.constant 6 : index
    %22 = vector.load %arg1[%c0_22, %c0_23, %c6] : memref<1x16x128xbf16, #tpu.memory_space<vmem>>, vector<1x16x22xbf16>
    %23 = vector.shape_cast %22 : vector<1x16x22xbf16> to vector<16x22xbf16>
    %cst_24 = arith.constant dense<0.000000e+00> : vector<32x22xf32>
    %24 = tpu.matmul %21, %23, %cst_24 {dimension_numbers = #tpu.dot_dimension_numbers<[1], [0], [0], [1], [0, 0, 1, 1], [], []>} : vector<32x16xbf16>, vector<16x22xbf16>, vector<32x22xf32> -> vector<32x22xf32>
    %25 = arith.addf %19, %24 : vector<32x22xf32>
    %c4 = arith.constant 4 : index
    %c0_25 = arith.constant 0 : index
    %c0_26 = arith.constant 0 : index
    %26 = vector.load %arg2[%c4, %c0_25, %c0_26] : memref<9x32x16xbf16, #tpu.memory_space<vmem>>, vector<1x32x16xbf16>
    %27 = vector.shape_cast %26 : vector<1x32x16xbf16> to vector<32x16xbf16>
    %c0_27 = arith.constant 0 : index
    %c0_28 = arith.constant 0 : index
    %c7 = arith.constant 7 : index
    %28 = vector.load %arg1[%c0_27, %c0_28, %c7] : memref<1x16x128xbf16, #tpu.memory_space<vmem>>, vector<1x16x22xbf16>
    %29 = vector.shape_cast %28 : vector<1x16x22xbf16> to vector<16x22xbf16>
    %cst_29 = arith.constant dense<0.000000e+00> : vector<32x22xf32>
    %30 = tpu.matmul %27, %29, %cst_29 {dimension_numbers = #tpu.dot_dimension_numbers<[1], [0], [0], [1], [0, 0, 1, 1], [], []>} : vector<32x16xbf16>, vector<16x22xbf16>, vector<32x22xf32> -> vector<32x22xf32>
    %31 = arith.addf %25, %30 : vector<32x22xf32>
    %c5 = arith.constant 5 : index
    %c0_30 = arith.constant 0 : index
    %c0_31 = arith.constant 0 : index
    %32 = vector.load %arg2[%c5, %c0_30, %c0_31] : memref<9x32x16xbf16, #tpu.memory_space<vmem>>, vector<1x32x16xbf16>
    %33 = vector.shape_cast %32 : vector<1x32x16xbf16> to vector<32x16xbf16>
    %c0_32 = arith.constant 0 : index
    %c0_33 = arith.constant 0 : index
    %c8 = arith.constant 8 : index
    %34 = vector.load %arg1[%c0_32, %c0_33, %c8] : memref<1x16x128xbf16, #tpu.memory_space<vmem>>, vector<1x16x22xbf16>
    %35 = vector.shape_cast %34 : vector<1x16x22xbf16> to vector<16x22xbf16>
    %cst_34 = arith.constant dense<0.000000e+00> : vector<32x22xf32>
    %36 = tpu.matmul %33, %35, %cst_34 {dimension_numbers = #tpu.dot_dimension_numbers<[1], [0], [0], [1], [0, 0, 1, 1], [], []>} : vector<32x16xbf16>, vector<16x22xbf16>, vector<32x22xf32> -> vector<32x22xf32>
    %37 = arith.addf %31, %36 : vector<32x22xf32>
    %c6_35 = arith.constant 6 : index
    %c0_36 = arith.constant 0 : index
    %c0_37 = arith.constant 0 : index
    %38 = vector.load %arg2[%c6_35, %c0_36, %c0_37] : memref<9x32x16xbf16, #tpu.memory_space<vmem>>, vector<1x32x16xbf16>
    %39 = vector.shape_cast %38 : vector<1x32x16xbf16> to vector<32x16xbf16>
    %c0_38 = arith.constant 0 : index
    %c0_39 = arith.constant 0 : index
    %c12 = arith.constant 12 : index
    %40 = vector.load %arg1[%c0_38, %c0_39, %c12] : memref<1x16x128xbf16, #tpu.memory_space<vmem>>, vector<1x16x22xbf16>
    %41 = vector.shape_cast %40 : vector<1x16x22xbf16> to vector<16x22xbf16>
    %cst_40 = arith.constant dense<0.000000e+00> : vector<32x22xf32>
    %42 = tpu.matmul %39, %41, %cst_40 {dimension_numbers = #tpu.dot_dimension_numbers<[1], [0], [0], [1], [0, 0, 1, 1], [], []>} : vector<32x16xbf16>, vector<16x22xbf16>, vector<32x22xf32> -> vector<32x22xf32>
    %43 = arith.addf %37, %42 : vector<32x22xf32>
    %c7_41 = arith.constant 7 : index
    %c0_42 = arith.constant 0 : index
    %c0_43 = arith.constant 0 : index
    %44 = vector.load %arg2[%c7_41, %c0_42, %c0_43] : memref<9x32x16xbf16, #tpu.memory_space<vmem>>, vector<1x32x16xbf16>
    %45 = vector.shape_cast %44 : vector<1x32x16xbf16> to vector<32x16xbf16>
    %c0_44 = arith.constant 0 : index
    %c0_45 = arith.constant 0 : index
    %c13 = arith.constant 13 : index
    %46 = vector.load %arg1[%c0_44, %c0_45, %c13] : memref<1x16x128xbf16, #tpu.memory_space<vmem>>, vector<1x16x22xbf16>
    %47 = vector.shape_cast %46 : vector<1x16x22xbf16> to vector<16x22xbf16>
    %cst_46 = arith.constant dense<0.000000e+00> : vector<32x22xf32>
    %48 = tpu.matmul %45, %47, %cst_46 {dimension_numbers = #tpu.dot_dimension_numbers<[1], [0], [0], [1], [0, 0, 1, 1], [], []>} : vector<32x16xbf16>, vector<16x22xbf16>, vector<32x22xf32> -> vector<32x22xf32>
    %49 = arith.addf %43, %48 : vector<32x22xf32>
    %c8_47 = arith.constant 8 : index
    %c0_48 = arith.constant 0 : index
    %c0_49 = arith.constant 0 : index
    %50 = vector.load %arg2[%c8_47, %c0_48, %c0_49] : memref<9x32x16xbf16, #tpu.memory_space<vmem>>, vector<1x32x16xbf16>
    %51 = vector.shape_cast %50 : vector<1x32x16xbf16> to vector<32x16xbf16>
    %c0_50 = arith.constant 0 : index
    %c0_51 = arith.constant 0 : index
    %c14 = arith.constant 14 : index
    %52 = vector.load %arg1[%c0_50, %c0_51, %c14] : memref<1x16x128xbf16, #tpu.memory_space<vmem>>, vector<1x16x22xbf16>
    %53 = vector.shape_cast %52 : vector<1x16x22xbf16> to vector<16x22xbf16>
    %cst_52 = arith.constant dense<0.000000e+00> : vector<32x22xf32>
    %54 = tpu.matmul %51, %53, %cst_52 {dimension_numbers = #tpu.dot_dimension_numbers<[1], [0], [0], [1], [0, 0, 1, 1], [], []>} : vector<32x16xbf16>, vector<16x22xbf16>, vector<32x22xf32> -> vector<32x22xf32>
    %55 = arith.addf %49, %54 : vector<32x22xf32>
    %c0_53 = arith.constant 0 : index
    %c0_54 = arith.constant 0 : index
    %56 = vector.load %arg3[%c0_53, %c0_54] : memref<32x1xf32, #tpu.memory_space<vmem>>, vector<32x1xf32>
    %57 = vector.broadcast %56 : vector<32x1xf32> to vector<32x22xf32>
    %58 = arith.mulf %55, %57 : vector<32x22xf32>
    %c0_55 = arith.constant 0 : index
    %c0_56 = arith.constant 0 : index
    %59 = vector.load %arg4[%c0_55, %c0_56] : memref<32x1xf32, #tpu.memory_space<vmem>>, vector<32x1xf32>
    %60 = vector.broadcast %59 : vector<32x1xf32> to vector<32x22xf32>
    %61 = arith.addf %58, %60 : vector<32x22xf32>
    %cst_57 = arith.constant 0.000000e+00 : f32
    %62 = vector.broadcast %cst_57 : f32 to vector<32x22xf32>
    %63 = arith.maximumf %61, %62 : vector<32x22xf32>
    %64 = vector.broadcast %0 : vector<1x22xf32> to vector<32x22xf32>
    %65 = arith.mulf %63, %64 : vector<32x22xf32>
    %cst_58 = arith.constant 0.000000e+00 : bf16
    %66 = vector.broadcast %cst_58 : bf16 to vector<32x128xbf16>
    %c0_59 = arith.constant 0 : index
    %c0_60 = arith.constant 0 : index
    %67 = vector.load %arg10[%c0_59, %c0_60] : memref<32x128xbf16, #tpu.memory_space<vmem>>, vector<32x128xbf16>
    tpu.vector_store %arg10[%c0_59, %c0_60], %66 {strides = array<i32>} : memref<32x128xbf16, #tpu.memory_space<vmem>>, vector<32x128xbf16>,
    %68 = arith.truncf %65 : vector<32x22xf32> to vector<32x22xbf16>
    %c0_61 = arith.constant 0 : index
    %c7_62 = arith.constant 7 : index
    %69 = vector.load %arg10[%c0_61, %c7_62] : memref<32x128xbf16, #tpu.memory_space<vmem>>, vector<32x22xbf16>
    tpu.vector_store %arg10[%c0_61, %c7_62], %68 {strides = array<i32>} : memref<32x128xbf16, #tpu.memory_space<vmem>>, vector<32x22xbf16>,
    %cst_63 = arith.constant 0.000000e+00 : f32
    %70 = vector.broadcast %cst_63 : f32 to vector<32x22xf32>
    %c0_64 = arith.constant 0 : index
    %c0_65 = arith.constant 0 : index
    %c0_66 = arith.constant 0 : index
    %71 = vector.load %arg5[%c0_64, %c0_65, %c0_66] : memref<9x32x32xbf16, #tpu.memory_space<vmem>>, vector<1x32x32xbf16>
    %72 = vector.shape_cast %71 : vector<1x32x32xbf16> to vector<32x32xbf16>
    %c0_67 = arith.constant 0 : index
    %c0_68 = arith.constant 0 : index
    %73 = vector.load %arg10[%c0_67, %c0_68] : memref<32x128xbf16, #tpu.memory_space<vmem>>, vector<32x22xbf16>
    %cst_69 = arith.constant dense<0.000000e+00> : vector<32x22xf32>
    %74 = tpu.matmul %72, %73, %cst_69 {dimension_numbers = #tpu.dot_dimension_numbers<[1], [0], [0], [1], [0, 0, 1, 1], [], []>} : vector<32x32xbf16>, vector<32x22xbf16>, vector<32x22xf32> -> vector<32x22xf32>
    %75 = arith.addf %70, %74 : vector<32x22xf32>
    %c1_70 = arith.constant 1 : index
    %c0_71 = arith.constant 0 : index
    %c0_72 = arith.constant 0 : index
    %76 = vector.load %arg5[%c1_70, %c0_71, %c0_72] : memref<9x32x32xbf16, #tpu.memory_space<vmem>>, vector<1x32x32xbf16>
    %77 = vector.shape_cast %76 : vector<1x32x32xbf16> to vector<32x32xbf16>
    %c0_73 = arith.constant 0 : index
    %c1_74 = arith.constant 1 : index
    %78 = vector.load %arg10[%c0_73, %c1_74] : memref<32x128xbf16, #tpu.memory_space<vmem>>, vector<32x22xbf16>
    %cst_75 = arith.constant dense<0.000000e+00> : vector<32x22xf32>
    %79 = tpu.matmul %77, %78, %cst_75 {dimension_numbers = #tpu.dot_dimension_numbers<[1], [0], [0], [1], [0, 0, 1, 1], [], []>} : vector<32x32xbf16>, vector<32x22xbf16>, vector<32x22xf32> -> vector<32x22xf32>
    %80 = arith.addf %75, %79 : vector<32x22xf32>
    %c2_76 = arith.constant 2 : index
    %c0_77 = arith.constant 0 : index
    %c0_78 = arith.constant 0 : index
    %81 = vector.load %arg5[%c2_76, %c0_77, %c0_78] : memref<9x32x32xbf16, #tpu.memory_space<vmem>>, vector<1x32x32xbf16>
    %82 = vector.shape_cast %81 : vector<1x32x32xbf16> to vector<32x32xbf16>
    %c0_79 = arith.constant 0 : index
    %c2_80 = arith.constant 2 : index
    %83 = vector.load %arg10[%c0_79, %c2_80] : memref<32x128xbf16, #tpu.memory_space<vmem>>, vector<32x22xbf16>
    %cst_81 = arith.constant dense<0.000000e+00> : vector<32x22xf32>
    %84 = tpu.matmul %82, %83, %cst_81 {dimension_numbers = #tpu.dot_dimension_numbers<[1], [0], [0], [1], [0, 0, 1, 1], [], []>} : vector<32x32xbf16>, vector<32x22xbf16>, vector<32x22xf32> -> vector<32x22xf32>
    %85 = arith.addf %80, %84 : vector<32x22xf32>
    %c3_82 = arith.constant 3 : index
    %c0_83 = arith.constant 0 : index
    %c0_84 = arith.constant 0 : index
    %86 = vector.load %arg5[%c3_82, %c0_83, %c0_84] : memref<9x32x32xbf16, #tpu.memory_space<vmem>>, vector<1x32x32xbf16>
    %87 = vector.shape_cast %86 : vector<1x32x32xbf16> to vector<32x32xbf16>
    %c0_85 = arith.constant 0 : index
    %c6_86 = arith.constant 6 : index
    %88 = vector.load %arg10[%c0_85, %c6_86] : memref<32x128xbf16, #tpu.memory_space<vmem>>, vector<32x22xbf16>
    %cst_87 = arith.constant dense<0.000000e+00> : vector<32x22xf32>
    %89 = tpu.matmul %87, %88, %cst_87 {dimension_numbers = #tpu.dot_dimension_numbers<[1], [0], [0], [1], [0, 0, 1, 1], [], []>} : vector<32x32xbf16>, vector<32x22xbf16>, vector<32x22xf32> -> vector<32x22xf32>
    %90 = arith.addf %85, %89 : vector<32x22xf32>
    %c4_88 = arith.constant 4 : index
    %c0_89 = arith.constant 0 : index
    %c0_90 = arith.constant 0 : index
    %91 = vector.load %arg5[%c4_88, %c0_89, %c0_90] : memref<9x32x32xbf16, #tpu.memory_space<vmem>>, vector<1x32x32xbf16>
    %92 = vector.shape_cast %91 : vector<1x32x32xbf16> to vector<32x32xbf16>
    %c0_91 = arith.constant 0 : index
    %c7_92 = arith.constant 7 : index
    %93 = vector.load %arg10[%c0_91, %c7_92] : memref<32x128xbf16, #tpu.memory_space<vmem>>, vector<32x22xbf16>
    %cst_93 = arith.constant dense<0.000000e+00> : vector<32x22xf32>
    %94 = tpu.matmul %92, %93, %cst_93 {dimension_numbers = #tpu.dot_dimension_numbers<[1], [0], [0], [1], [0, 0, 1, 1], [], []>} : vector<32x32xbf16>, vector<32x22xbf16>, vector<32x22xf32> -> vector<32x22xf32>
    %95 = arith.addf %90, %94 : vector<32x22xf32>
    %c5_94 = arith.constant 5 : index
    %c0_95 = arith.constant 0 : index
    %c0_96 = arith.constant 0 : index
    %96 = vector.load %arg5[%c5_94, %c0_95, %c0_96] : memref<9x32x32xbf16, #tpu.memory_space<vmem>>, vector<1x32x32xbf16>
    %97 = vector.shape_cast %96 : vector<1x32x32xbf16> to vector<32x32xbf16>
    %c0_97 = arith.constant 0 : index
    %c8_98 = arith.constant 8 : index
    %98 = vector.load %arg10[%c0_97, %c8_98] : memref<32x128xbf16, #tpu.memory_space<vmem>>, vector<32x22xbf16>
    %cst_99 = arith.constant dense<0.000000e+00> : vector<32x22xf32>
    %99 = tpu.matmul %97, %98, %cst_99 {dimension_numbers = #tpu.dot_dimension_numbers<[1], [0], [0], [1], [0, 0, 1, 1], [], []>} : vector<32x32xbf16>, vector<32x22xbf16>, vector<32x22xf32> -> vector<32x22xf32>
    %100 = arith.addf %95, %99 : vector<32x22xf32>
    %c6_100 = arith.constant 6 : index
    %c0_101 = arith.constant 0 : index
    %c0_102 = arith.constant 0 : index
    %101 = vector.load %arg5[%c6_100, %c0_101, %c0_102] : memref<9x32x32xbf16, #tpu.memory_space<vmem>>, vector<1x32x32xbf16>
    %102 = vector.shape_cast %101 : vector<1x32x32xbf16> to vector<32x32xbf16>
    %c0_103 = arith.constant 0 : index
    %c12_104 = arith.constant 12 : index
    %103 = vector.load %arg10[%c0_103, %c12_104] : memref<32x128xbf16, #tpu.memory_space<vmem>>, vector<32x22xbf16>
    %cst_105 = arith.constant dense<0.000000e+00> : vector<32x22xf32>
    %104 = tpu.matmul %102, %103, %cst_105 {dimension_numbers = #tpu.dot_dimension_numbers<[1], [0], [0], [1], [0, 0, 1, 1], [], []>} : vector<32x32xbf16>, vector<32x22xbf16>, vector<32x22xf32> -> vector<32x22xf32>
    %105 = arith.addf %100, %104 : vector<32x22xf32>
    %c7_106 = arith.constant 7 : index
    %c0_107 = arith.constant 0 : index
    %c0_108 = arith.constant 0 : index
    %106 = vector.load %arg5[%c7_106, %c0_107, %c0_108] : memref<9x32x32xbf16, #tpu.memory_space<vmem>>, vector<1x32x32xbf16>
    %107 = vector.shape_cast %106 : vector<1x32x32xbf16> to vector<32x32xbf16>
    %c0_109 = arith.constant 0 : index
    %c13_110 = arith.constant 13 : index
    %108 = vector.load %arg10[%c0_109, %c13_110] : memref<32x128xbf16, #tpu.memory_space<vmem>>, vector<32x22xbf16>
    %cst_111 = arith.constant dense<0.000000e+00> : vector<32x22xf32>
    %109 = tpu.matmul %107, %108, %cst_111 {dimension_numbers = #tpu.dot_dimension_numbers<[1], [0], [0], [1], [0, 0, 1, 1], [], []>} : vector<32x32xbf16>, vector<32x22xbf16>, vector<32x22xf32> -> vector<32x22xf32>
    %110 = arith.addf %105, %109 : vector<32x22xf32>
    %c8_112 = arith.constant 8 : index
    %c0_113 = arith.constant 0 : index
    %c0_114 = arith.constant 0 : index
    %111 = vector.load %arg5[%c8_112, %c0_113, %c0_114] : memref<9x32x32xbf16, #tpu.memory_space<vmem>>, vector<1x32x32xbf16>
    %112 = vector.shape_cast %111 : vector<1x32x32xbf16> to vector<32x32xbf16>
    %c0_115 = arith.constant 0 : index
    %c14_116 = arith.constant 14 : index
    %113 = vector.load %arg10[%c0_115, %c14_116] : memref<32x128xbf16, #tpu.memory_space<vmem>>, vector<32x22xbf16>
    %cst_117 = arith.constant dense<0.000000e+00> : vector<32x22xf32>
    %114 = tpu.matmul %112, %113, %cst_117 {dimension_numbers = #tpu.dot_dimension_numbers<[1], [0], [0], [1], [0, 0, 1, 1], [], []>} : vector<32x32xbf16>, vector<32x22xbf16>, vector<32x22xf32> -> vector<32x22xf32>
    %115 = arith.addf %110, %114 : vector<32x22xf32>
    %c0_118 = arith.constant 0 : index
    %c0_119 = arith.constant 0 : index
    %116 = vector.load %arg6[%c0_118, %c0_119] : memref<32x1xf32, #tpu.memory_space<vmem>>, vector<32x1xf32>
    %117 = vector.broadcast %116 : vector<32x1xf32> to vector<32x22xf32>
    %118 = arith.mulf %115, %117 : vector<32x22xf32>
    %c0_120 = arith.constant 0 : index
    %c0_121 = arith.constant 0 : index
    %119 = vector.load %arg7[%c0_120, %c0_121] : memref<32x1xf32, #tpu.memory_space<vmem>>, vector<32x1xf32>
    %120 = vector.broadcast %119 : vector<32x1xf32> to vector<32x22xf32>
    %121 = arith.addf %118, %120 : vector<32x22xf32>
    %cst_122 = arith.constant 0.000000e+00 : f32
    %122 = vector.broadcast %cst_122 : f32 to vector<32x22xf32>
    %123 = arith.maximumf %121, %122 : vector<32x22xf32>
    %124 = vector.broadcast %0 : vector<1x22xf32> to vector<32x22xf32>
    %125 = arith.mulf %123, %124 : vector<32x22xf32>
    %cst_123 = arith.constant 0.000000e+00 : bf16
    %126 = vector.broadcast %cst_123 : bf16 to vector<1x32x128xbf16>
    %c0_124 = arith.constant 0 : index
    %c0_125 = arith.constant 0 : index
    %c0_126 = arith.constant 0 : index
    %127 = vector.load %arg9[%c0_124, %c0_125, %c0_126] : memref<1x32x128xbf16, #tpu.memory_space<vmem>>, vector<1x32x128xbf16>
    tpu.vector_store %arg9[%c0_124, %c0_125, %c0_126], %126 {strides = array<i32>} : memref<1x32x128xbf16, #tpu.memory_space<vmem>>, vector<1x32x128xbf16>,
    %128 = arith.truncf %125 : vector<32x22xf32> to vector<32x22xbf16>
    %c0_127 = arith.constant 0 : index
    %c0_128 = arith.constant 0 : index
    %c7_129 = arith.constant 7 : index
    %129 = vector.load %arg9[%c0_127, %c0_128, %c7_129] : memref<1x32x128xbf16, #tpu.memory_space<vmem>>, vector<1x32x22xbf16>
    %130 = vector.shape_cast %129 : vector<1x32x22xbf16> to vector<32x22xbf16>
    %131 = vector.shape_cast %128 : vector<32x22xbf16> to vector<1x32x22xbf16>
    tpu.vector_store %arg9[%c0_127, %c0_128, %c7_129], %131 {strides = array<i32>} : memref<1x32x128xbf16, #tpu.memory_space<vmem>>, vector<1x32x22xbf16>,
    return
  }
  func.func @transform_0(%arg0: i32) -> (i32, i32, i32) {
    %c0_i32 = arith.constant 0 : i32
    %c0_i32_0 = arith.constant 0 : i32
    %c0_i32_1 = arith.constant 0 : i32
    return %arg0, %c0_i32, %c0_i32_0 : i32, i32, i32
  }
  func.func @transform_1(%arg0: i32) -> (i32, i32, i32) {
    %c0_i32 = arith.constant 0 : i32
    %c0_i32_0 = arith.constant 0 : i32
    %c0_i32_1 = arith.constant 0 : i32
    %c0_i32_2 = arith.constant 0 : i32
    return %c0_i32, %c0_i32_0, %c0_i32_1 : i32, i32, i32
  }
  func.func @transform_2(%arg0: i32) -> (i32, i32) {
    %c0_i32 = arith.constant 0 : i32
    %c0_i32_0 = arith.constant 0 : i32
    %c0_i32_1 = arith.constant 0 : i32
    return %c0_i32, %c0_i32_0 : i32, i32
  }
  func.func @transform_3(%arg0: i32) -> (i32, i32) {
    %c0_i32 = arith.constant 0 : i32
    %c0_i32_0 = arith.constant 0 : i32
    %c0_i32_1 = arith.constant 0 : i32
    return %c0_i32, %c0_i32_0 : i32, i32
  }
  func.func @transform_4(%arg0: i32) -> (i32, i32, i32) {
    %c0_i32 = arith.constant 0 : i32
    %c0_i32_0 = arith.constant 0 : i32
    %c0_i32_1 = arith.constant 0 : i32
    %c0_i32_2 = arith.constant 0 : i32
    return %c0_i32, %c0_i32_0, %c0_i32_1 : i32, i32, i32
  }
  func.func @transform_5(%arg0: i32) -> (i32, i32) {
    %c0_i32 = arith.constant 0 : i32
    %c0_i32_0 = arith.constant 0 : i32
    %c0_i32_1 = arith.constant 0 : i32
    return %c0_i32, %c0_i32_0 : i32, i32
  }
  func.func @transform_6(%arg0: i32) -> (i32, i32) {
    %c0_i32 = arith.constant 0 : i32
    %c0_i32_0 = arith.constant 0 : i32
    %c0_i32_1 = arith.constant 0 : i32
    return %c0_i32, %c0_i32_0 : i32, i32
  }
  func.func @transform_7(%arg0: i32) -> (i32, i32) {
    %c0_i32 = arith.constant 0 : i32
    %c0_i32_0 = arith.constant 0 : i32
    %c0_i32_1 = arith.constant 0 : i32
    return %c0_i32, %c0_i32_0 : i32, i32
  }
  func.func @transform_8(%arg0: i32) -> (i32, i32, i32) {
    %c0_i32 = arith.constant 0 : i32
    %c0_i32_0 = arith.constant 0 : i32
    %c0_i32_1 = arith.constant 0 : i32
    return %arg0, %c0_i32, %c0_i32_0 : i32, i32, i32
  }
}

module attributes {stable_mosaic.version = 11 : i64} {
  func.func @_conv_transpose2x_kernel(%arg0: i32, %arg1: memref<1x32x128xbf16, #tpu.memory_space<vmem>>, %arg2: memref<4x4x16x32xbf16, #tpu.memory_space<vmem>>, %arg3: memref<1x4x16x128xbf16, #tpu.memory_space<vmem>>) attributes {dimension_semantics = [#tpu.dimension_semantics<parallel>], iteration_bounds = array<i64: 2>, scalar_prefetch = 0 : i64, scratch_operands = 0 : i64, tpu.core_type = #tpu.core_type<tc>, window_params = [{transform_indices = @transform_0, window_bounds = array<i64: 1, 32, 128>}, {pipeline_mode = #tpu.pipeline_mode<synchronous>, transform_indices = @transform_1, window_bounds = array<i64: 4, 4, 16, 32>}, {transform_indices = @transform_2, window_bounds = array<i64: 1, 4, 16, 128>}]} {
    %cst = arith.constant 0.000000e+00 : bf16
    %0 = vector.broadcast %cst : bf16 to vector<1x4x16x128xbf16>
    %c0 = arith.constant 0 : index
    %c0_0 = arith.constant 0 : index
    %c0_1 = arith.constant 0 : index
    %c0_2 = arith.constant 0 : index
    %1 = vector.load %arg3[%c0, %c0_0, %c0_1, %c0_2] : memref<1x4x16x128xbf16, #tpu.memory_space<vmem>>, vector<1x4x16x128xbf16>
    tpu.vector_store %arg3[%c0, %c0_0, %c0_1, %c0_2], %0 {strides = array<i32>} : memref<1x4x16x128xbf16, #tpu.memory_space<vmem>>, vector<1x4x16x128xbf16>,
    %cst_3 = arith.constant 0.000000e+00 : f32
    %2 = vector.broadcast %cst_3 : f32 to vector<16x22xf32>
    %c0_4 = arith.constant 0 : index
    %c0_5 = arith.constant 0 : index
    %c0_6 = arith.constant 0 : index
    %c0_7 = arith.constant 0 : index
    %3 = vector.load %arg2[%c0_4, %c0_5, %c0_6, %c0_7] : memref<4x4x16x32xbf16, #tpu.memory_space<vmem>>, vector<1x1x16x32xbf16>
    %4 = vector.shape_cast %3 : vector<1x1x16x32xbf16> to vector<16x32xbf16>
    %c0_8 = arith.constant 0 : index
    %c0_9 = arith.constant 0 : index
    %c0_10 = arith.constant 0 : index
    %5 = vector.load %arg1[%c0_8, %c0_9, %c0_10] : memref<1x32x128xbf16, #tpu.memory_space<vmem>>, vector<1x32x22xbf16>
    %6 = vector.shape_cast %5 : vector<1x32x22xbf16> to vector<32x22xbf16>
    %cst_11 = arith.constant dense<0.000000e+00> : vector<16x22xf32>
    %7 = tpu.matmul %4, %6, %cst_11 {dimension_numbers = #tpu.dot_dimension_numbers<[1], [0], [0], [1], [0, 0, 1, 1], [], []>} : vector<16x32xbf16>, vector<32x22xbf16>, vector<16x22xf32> -> vector<16x22xf32>
    %8 = arith.addf %2, %7 : vector<16x22xf32>
    %c0_12 = arith.constant 0 : index
    %c1 = arith.constant 1 : index
    %c0_13 = arith.constant 0 : index
    %c0_14 = arith.constant 0 : index
    %9 = vector.load %arg2[%c0_12, %c1, %c0_13, %c0_14] : memref<4x4x16x32xbf16, #tpu.memory_space<vmem>>, vector<1x1x16x32xbf16>
    %10 = vector.shape_cast %9 : vector<1x1x16x32xbf16> to vector<16x32xbf16>
    %c0_15 = arith.constant 0 : index
    %c0_16 = arith.constant 0 : index
    %c1_17 = arith.constant 1 : index
    %11 = vector.load %arg1[%c0_15, %c0_16, %c1_17] : memref<1x32x128xbf16, #tpu.memory_space<vmem>>, vector<1x32x22xbf16>
    %12 = vector.shape_cast %11 : vector<1x32x22xbf16> to vector<32x22xbf16>
    %cst_18 = arith.constant dense<0.000000e+00> : vector<16x22xf32>
    %13 = tpu.matmul %10, %12, %cst_18 {dimension_numbers = #tpu.dot_dimension_numbers<[1], [0], [0], [1], [0, 0, 1, 1], [], []>} : vector<16x32xbf16>, vector<32x22xbf16>, vector<16x22xf32> -> vector<16x22xf32>
    %14 = arith.addf %8, %13 : vector<16x22xf32>
    %c0_19 = arith.constant 0 : index
    %c2 = arith.constant 2 : index
    %c0_20 = arith.constant 0 : index
    %c0_21 = arith.constant 0 : index
    %15 = vector.load %arg2[%c0_19, %c2, %c0_20, %c0_21] : memref<4x4x16x32xbf16, #tpu.memory_space<vmem>>, vector<1x1x16x32xbf16>
    %16 = vector.shape_cast %15 : vector<1x1x16x32xbf16> to vector<16x32xbf16>
    %c0_22 = arith.constant 0 : index
    %c0_23 = arith.constant 0 : index
    %c6 = arith.constant 6 : index
    %17 = vector.load %arg1[%c0_22, %c0_23, %c6] : memref<1x32x128xbf16, #tpu.memory_space<vmem>>, vector<1x32x22xbf16>
    %18 = vector.shape_cast %17 : vector<1x32x22xbf16> to vector<32x22xbf16>
    %cst_24 = arith.constant dense<0.000000e+00> : vector<16x22xf32>
    %19 = tpu.matmul %16, %18, %cst_24 {dimension_numbers = #tpu.dot_dimension_numbers<[1], [0], [0], [1], [0, 0, 1, 1], [], []>} : vector<16x32xbf16>, vector<32x22xbf16>, vector<16x22xf32> -> vector<16x22xf32>
    %20 = arith.addf %14, %19 : vector<16x22xf32>
    %c0_25 = arith.constant 0 : index
    %c3 = arith.constant 3 : index
    %c0_26 = arith.constant 0 : index
    %c0_27 = arith.constant 0 : index
    %21 = vector.load %arg2[%c0_25, %c3, %c0_26, %c0_27] : memref<4x4x16x32xbf16, #tpu.memory_space<vmem>>, vector<1x1x16x32xbf16>
    %22 = vector.shape_cast %21 : vector<1x1x16x32xbf16> to vector<16x32xbf16>
    %c0_28 = arith.constant 0 : index
    %c0_29 = arith.constant 0 : index
    %c7 = arith.constant 7 : index
    %23 = vector.load %arg1[%c0_28, %c0_29, %c7] : memref<1x32x128xbf16, #tpu.memory_space<vmem>>, vector<1x32x22xbf16>
    %24 = vector.shape_cast %23 : vector<1x32x22xbf16> to vector<32x22xbf16>
    %cst_30 = arith.constant dense<0.000000e+00> : vector<16x22xf32>
    %25 = tpu.matmul %22, %24, %cst_30 {dimension_numbers = #tpu.dot_dimension_numbers<[1], [0], [0], [1], [0, 0, 1, 1], [], []>} : vector<16x32xbf16>, vector<32x22xbf16>, vector<16x22xf32> -> vector<16x22xf32>
    %26 = arith.addf %20, %25 : vector<16x22xf32>
    %27 = arith.truncf %26 : vector<16x22xf32> to vector<16x22xbf16>
    %c0_31 = arith.constant 0 : index
    %c0_32 = arith.constant 0 : index
    %c0_33 = arith.constant 0 : index
    %c7_34 = arith.constant 7 : index
    %28 = vector.load %arg3[%c0_31, %c0_32, %c0_33, %c7_34] : memref<1x4x16x128xbf16, #tpu.memory_space<vmem>>, vector<1x1x16x22xbf16>
    %29 = vector.shape_cast %28 : vector<1x1x16x22xbf16> to vector<16x22xbf16>
    %30 = vector.shape_cast %27 : vector<16x22xbf16> to vector<1x1x16x22xbf16>
    tpu.vector_store %arg3[%c0_31, %c0_32, %c0_33, %c7_34], %30 {strides = array<i32>} : memref<1x4x16x128xbf16, #tpu.memory_space<vmem>>, vector<1x1x16x22xbf16>,
    %cst_35 = arith.constant 0.000000e+00 : f32
    %31 = vector.broadcast %cst_35 : f32 to vector<16x22xf32>
    %c1_36 = arith.constant 1 : index
    %c0_37 = arith.constant 0 : index
    %c0_38 = arith.constant 0 : index
    %c0_39 = arith.constant 0 : index
    %32 = vector.load %arg2[%c1_36, %c0_37, %c0_38, %c0_39] : memref<4x4x16x32xbf16, #tpu.memory_space<vmem>>, vector<1x1x16x32xbf16>
    %33 = vector.shape_cast %32 : vector<1x1x16x32xbf16> to vector<16x32xbf16>
    %c0_40 = arith.constant 0 : index
    %c0_41 = arith.constant 0 : index
    %c1_42 = arith.constant 1 : index
    %34 = vector.load %arg1[%c0_40, %c0_41, %c1_42] : memref<1x32x128xbf16, #tpu.memory_space<vmem>>, vector<1x32x22xbf16>
    %35 = vector.shape_cast %34 : vector<1x32x22xbf16> to vector<32x22xbf16>
    %cst_43 = arith.constant dense<0.000000e+00> : vector<16x22xf32>
    %36 = tpu.matmul %33, %35, %cst_43 {dimension_numbers = #tpu.dot_dimension_numbers<[1], [0], [0], [1], [0, 0, 1, 1], [], []>} : vector<16x32xbf16>, vector<32x22xbf16>, vector<16x22xf32> -> vector<16x22xf32>
    %37 = arith.addf %31, %36 : vector<16x22xf32>
    %c1_44 = arith.constant 1 : index
    %c1_45 = arith.constant 1 : index
    %c0_46 = arith.constant 0 : index
    %c0_47 = arith.constant 0 : index
    %38 = vector.load %arg2[%c1_44, %c1_45, %c0_46, %c0_47] : memref<4x4x16x32xbf16, #tpu.memory_space<vmem>>, vector<1x1x16x32xbf16>
    %39 = vector.shape_cast %38 : vector<1x1x16x32xbf16> to vector<16x32xbf16>
    %c0_48 = arith.constant 0 : index
    %c0_49 = arith.constant 0 : index
    %c2_50 = arith.constant 2 : index
    %40 = vector.load %arg1[%c0_48, %c0_49, %c2_50] : memref<1x32x128xbf16, #tpu.memory_space<vmem>>, vector<1x32x22xbf16>
    %41 = vector.shape_cast %40 : vector<1x32x22xbf16> to vector<32x22xbf16>
    %cst_51 = arith.constant dense<0.000000e+00> : vector<16x22xf32>
    %42 = tpu.matmul %39, %41, %cst_51 {dimension_numbers = #tpu.dot_dimension_numbers<[1], [0], [0], [1], [0, 0, 1, 1], [], []>} : vector<16x32xbf16>, vector<32x22xbf16>, vector<16x22xf32> -> vector<16x22xf32>
    %43 = arith.addf %37, %42 : vector<16x22xf32>
    %c1_52 = arith.constant 1 : index
    %c2_53 = arith.constant 2 : index
    %c0_54 = arith.constant 0 : index
    %c0_55 = arith.constant 0 : index
    %44 = vector.load %arg2[%c1_52, %c2_53, %c0_54, %c0_55] : memref<4x4x16x32xbf16, #tpu.memory_space<vmem>>, vector<1x1x16x32xbf16>
    %45 = vector.shape_cast %44 : vector<1x1x16x32xbf16> to vector<16x32xbf16>
    %c0_56 = arith.constant 0 : index
    %c0_57 = arith.constant 0 : index
    %c7_58 = arith.constant 7 : index
    %46 = vector.load %arg1[%c0_56, %c0_57, %c7_58] : memref<1x32x128xbf16, #tpu.memory_space<vmem>>, vector<1x32x22xbf16>
    %47 = vector.shape_cast %46 : vector<1x32x22xbf16> to vector<32x22xbf16>
    %cst_59 = arith.constant dense<0.000000e+00> : vector<16x22xf32>
    %48 = tpu.matmul %45, %47, %cst_59 {dimension_numbers = #tpu.dot_dimension_numbers<[1], [0], [0], [1], [0, 0, 1, 1], [], []>} : vector<16x32xbf16>, vector<32x22xbf16>, vector<16x22xf32> -> vector<16x22xf32>
    %49 = arith.addf %43, %48 : vector<16x22xf32>
    %c1_60 = arith.constant 1 : index
    %c3_61 = arith.constant 3 : index
    %c0_62 = arith.constant 0 : index
    %c0_63 = arith.constant 0 : index
    %50 = vector.load %arg2[%c1_60, %c3_61, %c0_62, %c0_63] : memref<4x4x16x32xbf16, #tpu.memory_space<vmem>>, vector<1x1x16x32xbf16>
    %51 = vector.shape_cast %50 : vector<1x1x16x32xbf16> to vector<16x32xbf16>
    %c0_64 = arith.constant 0 : index
    %c0_65 = arith.constant 0 : index
    %c8 = arith.constant 8 : index
    %52 = vector.load %arg1[%c0_64, %c0_65, %c8] : memref<1x32x128xbf16, #tpu.memory_space<vmem>>, vector<1x32x22xbf16>
    %53 = vector.shape_cast %52 : vector<1x32x22xbf16> to vector<32x22xbf16>
    %cst_66 = arith.constant dense<0.000000e+00> : vector<16x22xf32>
    %54 = tpu.matmul %51, %53, %cst_66 {dimension_numbers = #tpu.dot_dimension_numbers<[1], [0], [0], [1], [0, 0, 1, 1], [], []>} : vector<16x32xbf16>, vector<32x22xbf16>, vector<16x22xf32> -> vector<16x22xf32>
    %55 = arith.addf %49, %54 : vector<16x22xf32>
    %56 = arith.truncf %55 : vector<16x22xf32> to vector<16x22xbf16>
    %c0_67 = arith.constant 0 : index
    %c1_68 = arith.constant 1 : index
    %c0_69 = arith.constant 0 : index
    %c7_70 = arith.constant 7 : index
    %57 = vector.load %arg3[%c0_67, %c1_68, %c0_69, %c7_70] : memref<1x4x16x128xbf16, #tpu.memory_space<vmem>>, vector<1x1x16x22xbf16>
    %58 = vector.shape_cast %57 : vector<1x1x16x22xbf16> to vector<16x22xbf16>
    %59 = vector.shape_cast %56 : vector<16x22xbf16> to vector<1x1x16x22xbf16>
    tpu.vector_store %arg3[%c0_67, %c1_68, %c0_69, %c7_70], %59 {strides = array<i32>} : memref<1x4x16x128xbf16, #tpu.memory_space<vmem>>, vector<1x1x16x22xbf16>,
    %cst_71 = arith.constant 0.000000e+00 : f32
    %60 = vector.broadcast %cst_71 : f32 to vector<16x22xf32>
    %c2_72 = arith.constant 2 : index
    %c0_73 = arith.constant 0 : index
    %c0_74 = arith.constant 0 : index
    %c0_75 = arith.constant 0 : index
    %61 = vector.load %arg2[%c2_72, %c0_73, %c0_74, %c0_75] : memref<4x4x16x32xbf16, #tpu.memory_space<vmem>>, vector<1x1x16x32xbf16>
    %62 = vector.shape_cast %61 : vector<1x1x16x32xbf16> to vector<16x32xbf16>
    %c0_76 = arith.constant 0 : index
    %c0_77 = arith.constant 0 : index
    %c6_78 = arith.constant 6 : index
    %63 = vector.load %arg1[%c0_76, %c0_77, %c6_78] : memref<1x32x128xbf16, #tpu.memory_space<vmem>>, vector<1x32x22xbf16>
    %64 = vector.shape_cast %63 : vector<1x32x22xbf16> to vector<32x22xbf16>
    %cst_79 = arith.constant dense<0.000000e+00> : vector<16x22xf32>
    %65 = tpu.matmul %62, %64, %cst_79 {dimension_numbers = #tpu.dot_dimension_numbers<[1], [0], [0], [1], [0, 0, 1, 1], [], []>} : vector<16x32xbf16>, vector<32x22xbf16>, vector<16x22xf32> -> vector<16x22xf32>
    %66 = arith.addf %60, %65 : vector<16x22xf32>
    %c2_80 = arith.constant 2 : index
    %c1_81 = arith.constant 1 : index
    %c0_82 = arith.constant 0 : index
    %c0_83 = arith.constant 0 : index
    %67 = vector.load %arg2[%c2_80, %c1_81, %c0_82, %c0_83] : memref<4x4x16x32xbf16, #tpu.memory_space<vmem>>, vector<1x1x16x32xbf16>
    %68 = vector.shape_cast %67 : vector<1x1x16x32xbf16> to vector<16x32xbf16>
    %c0_84 = arith.constant 0 : index
    %c0_85 = arith.constant 0 : index
    %c7_86 = arith.constant 7 : index
    %69 = vector.load %arg1[%c0_84, %c0_85, %c7_86] : memref<1x32x128xbf16, #tpu.memory_space<vmem>>, vector<1x32x22xbf16>
    %70 = vector.shape_cast %69 : vector<1x32x22xbf16> to vector<32x22xbf16>
    %cst_87 = arith.constant dense<0.000000e+00> : vector<16x22xf32>
    %71 = tpu.matmul %68, %70, %cst_87 {dimension_numbers = #tpu.dot_dimension_numbers<[1], [0], [0], [1], [0, 0, 1, 1], [], []>} : vector<16x32xbf16>, vector<32x22xbf16>, vector<16x22xf32> -> vector<16x22xf32>
    %72 = arith.addf %66, %71 : vector<16x22xf32>
    %c2_88 = arith.constant 2 : index
    %c2_89 = arith.constant 2 : index
    %c0_90 = arith.constant 0 : index
    %c0_91 = arith.constant 0 : index
    %73 = vector.load %arg2[%c2_88, %c2_89, %c0_90, %c0_91] : memref<4x4x16x32xbf16, #tpu.memory_space<vmem>>, vector<1x1x16x32xbf16>
    %74 = vector.shape_cast %73 : vector<1x1x16x32xbf16> to vector<16x32xbf16>
    %c0_92 = arith.constant 0 : index
    %c0_93 = arith.constant 0 : index
    %c12 = arith.constant 12 : index
    %75 = vector.load %arg1[%c0_92, %c0_93, %c12] : memref<1x32x128xbf16, #tpu.memory_space<vmem>>, vector<1x32x22xbf16>
    %76 = vector.shape_cast %75 : vector<1x32x22xbf16> to vector<32x22xbf16>
    %cst_94 = arith.constant dense<0.000000e+00> : vector<16x22xf32>
    %77 = tpu.matmul %74, %76, %cst_94 {dimension_numbers = #tpu.dot_dimension_numbers<[1], [0], [0], [1], [0, 0, 1, 1], [], []>} : vector<16x32xbf16>, vector<32x22xbf16>, vector<16x22xf32> -> vector<16x22xf32>
    %78 = arith.addf %72, %77 : vector<16x22xf32>
    %c2_95 = arith.constant 2 : index
    %c3_96 = arith.constant 3 : index
    %c0_97 = arith.constant 0 : index
    %c0_98 = arith.constant 0 : index
    %79 = vector.load %arg2[%c2_95, %c3_96, %c0_97, %c0_98] : memref<4x4x16x32xbf16, #tpu.memory_space<vmem>>, vector<1x1x16x32xbf16>
    %80 = vector.shape_cast %79 : vector<1x1x16x32xbf16> to vector<16x32xbf16>
    %c0_99 = arith.constant 0 : index
    %c0_100 = arith.constant 0 : index
    %c13 = arith.constant 13 : index
    %81 = vector.load %arg1[%c0_99, %c0_100, %c13] : memref<1x32x128xbf16, #tpu.memory_space<vmem>>, vector<1x32x22xbf16>
    %82 = vector.shape_cast %81 : vector<1x32x22xbf16> to vector<32x22xbf16>
    %cst_101 = arith.constant dense<0.000000e+00> : vector<16x22xf32>
    %83 = tpu.matmul %80, %82, %cst_101 {dimension_numbers = #tpu.dot_dimension_numbers<[1], [0], [0], [1], [0, 0, 1, 1], [], []>} : vector<16x32xbf16>, vector<32x22xbf16>, vector<16x22xf32> -> vector<16x22xf32>
    %84 = arith.addf %78, %83 : vector<16x22xf32>
    %85 = arith.truncf %84 : vector<16x22xf32> to vector<16x22xbf16>
    %c0_102 = arith.constant 0 : index
    %c2_103 = arith.constant 2 : index
    %c0_104 = arith.constant 0 : index
    %c7_105 = arith.constant 7 : index
    %86 = vector.load %arg3[%c0_102, %c2_103, %c0_104, %c7_105] : memref<1x4x16x128xbf16, #tpu.memory_space<vmem>>, vector<1x1x16x22xbf16>
    %87 = vector.shape_cast %86 : vector<1x1x16x22xbf16> to vector<16x22xbf16>
    %88 = vector.shape_cast %85 : vector<16x22xbf16> to vector<1x1x16x22xbf16>
    tpu.vector_store %arg3[%c0_102, %c2_103, %c0_104, %c7_105], %88 {strides = array<i32>} : memref<1x4x16x128xbf16, #tpu.memory_space<vmem>>, vector<1x1x16x22xbf16>,
    %cst_106 = arith.constant 0.000000e+00 : f32
    %89 = vector.broadcast %cst_106 : f32 to vector<16x22xf32>
    %c3_107 = arith.constant 3 : index
    %c0_108 = arith.constant 0 : index
    %c0_109 = arith.constant 0 : index
    %c0_110 = arith.constant 0 : index
    %90 = vector.load %arg2[%c3_107, %c0_108, %c0_109, %c0_110] : memref<4x4x16x32xbf16, #tpu.memory_space<vmem>>, vector<1x1x16x32xbf16>
    %91 = vector.shape_cast %90 : vector<1x1x16x32xbf16> to vector<16x32xbf16>
    %c0_111 = arith.constant 0 : index
    %c0_112 = arith.constant 0 : index
    %c7_113 = arith.constant 7 : index
    %92 = vector.load %arg1[%c0_111, %c0_112, %c7_113] : memref<1x32x128xbf16, #tpu.memory_space<vmem>>, vector<1x32x22xbf16>
    %93 = vector.shape_cast %92 : vector<1x32x22xbf16> to vector<32x22xbf16>
    %cst_114 = arith.constant dense<0.000000e+00> : vector<16x22xf32>
    %94 = tpu.matmul %91, %93, %cst_114 {dimension_numbers = #tpu.dot_dimension_numbers<[1], [0], [0], [1], [0, 0, 1, 1], [], []>} : vector<16x32xbf16>, vector<32x22xbf16>, vector<16x22xf32> -> vector<16x22xf32>
    %95 = arith.addf %89, %94 : vector<16x22xf32>
    %c3_115 = arith.constant 3 : index
    %c1_116 = arith.constant 1 : index
    %c0_117 = arith.constant 0 : index
    %c0_118 = arith.constant 0 : index
    %96 = vector.load %arg2[%c3_115, %c1_116, %c0_117, %c0_118] : memref<4x4x16x32xbf16, #tpu.memory_space<vmem>>, vector<1x1x16x32xbf16>
    %97 = vector.shape_cast %96 : vector<1x1x16x32xbf16> to vector<16x32xbf16>
    %c0_119 = arith.constant 0 : index
    %c0_120 = arith.constant 0 : index
    %c8_121 = arith.constant 8 : index
    %98 = vector.load %arg1[%c0_119, %c0_120, %c8_121] : memref<1x32x128xbf16, #tpu.memory_space<vmem>>, vector<1x32x22xbf16>
    %99 = vector.shape_cast %98 : vector<1x32x22xbf16> to vector<32x22xbf16>
    %cst_122 = arith.constant dense<0.000000e+00> : vector<16x22xf32>
    %100 = tpu.matmul %97, %99, %cst_122 {dimension_numbers = #tpu.dot_dimension_numbers<[1], [0], [0], [1], [0, 0, 1, 1], [], []>} : vector<16x32xbf16>, vector<32x22xbf16>, vector<16x22xf32> -> vector<16x22xf32>
    %101 = arith.addf %95, %100 : vector<16x22xf32>
    %c3_123 = arith.constant 3 : index
    %c2_124 = arith.constant 2 : index
    %c0_125 = arith.constant 0 : index
    %c0_126 = arith.constant 0 : index
    %102 = vector.load %arg2[%c3_123, %c2_124, %c0_125, %c0_126] : memref<4x4x16x32xbf16, #tpu.memory_space<vmem>>, vector<1x1x16x32xbf16>
    %103 = vector.shape_cast %102 : vector<1x1x16x32xbf16> to vector<16x32xbf16>
    %c0_127 = arith.constant 0 : index
    %c0_128 = arith.constant 0 : index
    %c13_129 = arith.constant 13 : index
    %104 = vector.load %arg1[%c0_127, %c0_128, %c13_129] : memref<1x32x128xbf16, #tpu.memory_space<vmem>>, vector<1x32x22xbf16>
    %105 = vector.shape_cast %104 : vector<1x32x22xbf16> to vector<32x22xbf16>
    %cst_130 = arith.constant dense<0.000000e+00> : vector<16x22xf32>
    %106 = tpu.matmul %103, %105, %cst_130 {dimension_numbers = #tpu.dot_dimension_numbers<[1], [0], [0], [1], [0, 0, 1, 1], [], []>} : vector<16x32xbf16>, vector<32x22xbf16>, vector<16x22xf32> -> vector<16x22xf32>
    %107 = arith.addf %101, %106 : vector<16x22xf32>
    %c3_131 = arith.constant 3 : index
    %c3_132 = arith.constant 3 : index
    %c0_133 = arith.constant 0 : index
    %c0_134 = arith.constant 0 : index
    %108 = vector.load %arg2[%c3_131, %c3_132, %c0_133, %c0_134] : memref<4x4x16x32xbf16, #tpu.memory_space<vmem>>, vector<1x1x16x32xbf16>
    %109 = vector.shape_cast %108 : vector<1x1x16x32xbf16> to vector<16x32xbf16>
    %c0_135 = arith.constant 0 : index
    %c0_136 = arith.constant 0 : index
    %c14 = arith.constant 14 : index
    %110 = vector.load %arg1[%c0_135, %c0_136, %c14] : memref<1x32x128xbf16, #tpu.memory_space<vmem>>, vector<1x32x22xbf16>
    %111 = vector.shape_cast %110 : vector<1x32x22xbf16> to vector<32x22xbf16>
    %cst_137 = arith.constant dense<0.000000e+00> : vector<16x22xf32>
    %112 = tpu.matmul %109, %111, %cst_137 {dimension_numbers = #tpu.dot_dimension_numbers<[1], [0], [0], [1], [0, 0, 1, 1], [], []>} : vector<16x32xbf16>, vector<32x22xbf16>, vector<16x22xf32> -> vector<16x22xf32>
    %113 = arith.addf %107, %112 : vector<16x22xf32>
    %114 = arith.truncf %113 : vector<16x22xf32> to vector<16x22xbf16>
    %c0_138 = arith.constant 0 : index
    %c3_139 = arith.constant 3 : index
    %c0_140 = arith.constant 0 : index
    %c7_141 = arith.constant 7 : index
    %115 = vector.load %arg3[%c0_138, %c3_139, %c0_140, %c7_141] : memref<1x4x16x128xbf16, #tpu.memory_space<vmem>>, vector<1x1x16x22xbf16>
    %116 = vector.shape_cast %115 : vector<1x1x16x22xbf16> to vector<16x22xbf16>
    %117 = vector.shape_cast %114 : vector<16x22xbf16> to vector<1x1x16x22xbf16>
    tpu.vector_store %arg3[%c0_138, %c3_139, %c0_140, %c7_141], %117 {strides = array<i32>} : memref<1x4x16x128xbf16, #tpu.memory_space<vmem>>, vector<1x1x16x22xbf16>,
    return
  }
  func.func @transform_0(%arg0: i32) -> (i32, i32, i32) {
    %c0_i32 = arith.constant 0 : i32
    %c0_i32_0 = arith.constant 0 : i32
    %c0_i32_1 = arith.constant 0 : i32
    return %arg0, %c0_i32, %c0_i32_0 : i32, i32, i32
  }
  func.func @transform_1(%arg0: i32) -> (i32, i32, i32, i32) {
    %c0_i32 = arith.constant 0 : i32
    %c0_i32_0 = arith.constant 0 : i32
    %c0_i32_1 = arith.constant 0 : i32
    %c0_i32_2 = arith.constant 0 : i32
    %c0_i32_3 = arith.constant 0 : i32
    return %c0_i32, %c0_i32_0, %c0_i32_1, %c0_i32_2 : i32, i32, i32, i32
  }
  func.func @transform_2(%arg0: i32) -> (i32, i32, i32, i32) {
    %c0_i32 = arith.constant 0 : i32
    %c0_i32_0 = arith.constant 0 : i32
    %c0_i32_1 = arith.constant 0 : i32
    %c0_i32_2 = arith.constant 0 : i32
    return %arg0, %c0_i32, %c0_i32_0, %c0_i32_1 : i32, i32, i32, i32
  }
}

module attributes {stable_mosaic.version = 11 : i64} {
  func.func @_conv_block2_kernel(%arg0: i32, %arg1: memref<1x16x128xbf16, #tpu.memory_space<vmem>>, %arg2: memref<1x16x128xbf16, #tpu.memory_space<vmem>>, %arg3: memref<9x16x16xbf16, #tpu.memory_space<vmem>>, %arg4: memref<9x16x16xbf16, #tpu.memory_space<vmem>>, %arg5: memref<16x1xf32, #tpu.memory_space<vmem>>, %arg6: memref<16x1xf32, #tpu.memory_space<vmem>>, %arg7: memref<9x16x16xbf16, #tpu.memory_space<vmem>>, %arg8: memref<16x1xf32, #tpu.memory_space<vmem>>, %arg9: memref<16x1xf32, #tpu.memory_space<vmem>>, %arg10: memref<1x78xf32, #tpu.memory_space<vmem>>, %arg11: memref<1x16x128xbf16, #tpu.memory_space<vmem>>, %arg12: memref<16x128xbf16, #tpu.memory_space<vmem>>) attributes {dimension_semantics = [#tpu.dimension_semantics<parallel>], iteration_bounds = array<i64: 2>, scalar_prefetch = 0 : i64, scratch_operands = 1 : i64, tpu.core_type = #tpu.core_type<tc>, window_params = [{transform_indices = @transform_0, window_bounds = array<i64: 1, 16, 128>}, {transform_indices = @transform_1, window_bounds = array<i64: 1, 16, 128>}, {pipeline_mode = #tpu.pipeline_mode<synchronous>, transform_indices = @transform_2, window_bounds = array<i64: 9, 16, 16>}, {pipeline_mode = #tpu.pipeline_mode<synchronous>, transform_indices = @transform_3, window_bounds = array<i64: 9, 16, 16>}, {pipeline_mode = #tpu.pipeline_mode<synchronous>, transform_indices = @transform_4, window_bounds = array<i64: 16, 1>}, {pipeline_mode = #tpu.pipeline_mode<synchronous>, transform_indices = @transform_5, window_bounds = array<i64: 16, 1>}, {pipeline_mode = #tpu.pipeline_mode<synchronous>, transform_indices = @transform_6, window_bounds = array<i64: 9, 16, 16>}, {pipeline_mode = #tpu.pipeline_mode<synchronous>, transform_indices = @transform_7, window_bounds = array<i64: 16, 1>}, {pipeline_mode = #tpu.pipeline_mode<synchronous>, transform_indices = @transform_8, window_bounds = array<i64: 16, 1>}, {pipeline_mode = #tpu.pipeline_mode<synchronous>, transform_indices = @transform_9, window_bounds = array<i64: 1, 78>}, {transform_indices = @transform_10, window_bounds = array<i64: 1, 16, 128>}]} {
    %c0 = arith.constant 0 : index
    %c0_0 = arith.constant 0 : index
    %0 = vector.load %arg10[%c0, %c0_0] : memref<1x78xf32, #tpu.memory_space<vmem>>, vector<1x78xf32>
    %cst = arith.constant 0.000000e+00 : f32
    %1 = vector.broadcast %cst : f32 to vector<16x78xf32>
    %c0_1 = arith.constant 0 : index
    %c0_2 = arith.constant 0 : index
    %c0_3 = arith.constant 0 : index
    %2 = vector.load %arg3[%c0_1, %c0_2, %c0_3] : memref<9x16x16xbf16, #tpu.memory_space<vmem>>, vector<1x16x16xbf16>
    %3 = vector.shape_cast %2 : vector<1x16x16xbf16> to vector<16x16xbf16>
    %c0_4 = arith.constant 0 : index
    %c0_5 = arith.constant 0 : index
    %c0_6 = arith.constant 0 : index
    %4 = vector.load %arg1[%c0_4, %c0_5, %c0_6] : memref<1x16x128xbf16, #tpu.memory_space<vmem>>, vector<1x16x78xbf16>
    %5 = vector.shape_cast %4 : vector<1x16x78xbf16> to vector<16x78xbf16>
    %cst_7 = arith.constant dense<0.000000e+00> : vector<16x78xf32>
    %6 = tpu.matmul %3, %5, %cst_7 {dimension_numbers = #tpu.dot_dimension_numbers<[1], [0], [0], [1], [0, 0, 1, 1], [], []>} : vector<16x16xbf16>, vector<16x78xbf16>, vector<16x78xf32> -> vector<16x78xf32>
    %7 = arith.addf %1, %6 : vector<16x78xf32>
    %c0_8 = arith.constant 0 : index
    %c0_9 = arith.constant 0 : index
    %c0_10 = arith.constant 0 : index
    %8 = vector.load %arg4[%c0_8, %c0_9, %c0_10] : memref<9x16x16xbf16, #tpu.memory_space<vmem>>, vector<1x16x16xbf16>
    %9 = vector.shape_cast %8 : vector<1x16x16xbf16> to vector<16x16xbf16>
    %c0_11 = arith.constant 0 : index
    %c0_12 = arith.constant 0 : index
    %c0_13 = arith.constant 0 : index
    %10 = vector.load %arg2[%c0_11, %c0_12, %c0_13] : memref<1x16x128xbf16, #tpu.memory_space<vmem>>, vector<1x16x78xbf16>
    %11 = vector.shape_cast %10 : vector<1x16x78xbf16> to vector<16x78xbf16>
    %cst_14 = arith.constant dense<0.000000e+00> : vector<16x78xf32>
    %12 = tpu.matmul %9, %11, %cst_14 {dimension_numbers = #tpu.dot_dimension_numbers<[1], [0], [0], [1], [0, 0, 1, 1], [], []>} : vector<16x16xbf16>, vector<16x78xbf16>, vector<16x78xf32> -> vector<16x78xf32>
    %13 = arith.addf %7, %12 : vector<16x78xf32>
    %c1 = arith.constant 1 : index
    %c0_15 = arith.constant 0 : index
    %c0_16 = arith.constant 0 : index
    %14 = vector.load %arg3[%c1, %c0_15, %c0_16] : memref<9x16x16xbf16, #tpu.memory_space<vmem>>, vector<1x16x16xbf16>
    %15 = vector.shape_cast %14 : vector<1x16x16xbf16> to vector<16x16xbf16>
    %c0_17 = arith.constant 0 : index
    %c0_18 = arith.constant 0 : index
    %c1_19 = arith.constant 1 : index
    %16 = vector.load %arg1[%c0_17, %c0_18, %c1_19] : memref<1x16x128xbf16, #tpu.memory_space<vmem>>, vector<1x16x78xbf16>
    %17 = vector.shape_cast %16 : vector<1x16x78xbf16> to vector<16x78xbf16>
    %cst_20 = arith.constant dense<0.000000e+00> : vector<16x78xf32>
    %18 = tpu.matmul %15, %17, %cst_20 {dimension_numbers = #tpu.dot_dimension_numbers<[1], [0], [0], [1], [0, 0, 1, 1], [], []>} : vector<16x16xbf16>, vector<16x78xbf16>, vector<16x78xf32> -> vector<16x78xf32>
    %19 = arith.addf %13, %18 : vector<16x78xf32>
    %c1_21 = arith.constant 1 : index
    %c0_22 = arith.constant 0 : index
    %c0_23 = arith.constant 0 : index
    %20 = vector.load %arg4[%c1_21, %c0_22, %c0_23] : memref<9x16x16xbf16, #tpu.memory_space<vmem>>, vector<1x16x16xbf16>
    %21 = vector.shape_cast %20 : vector<1x16x16xbf16> to vector<16x16xbf16>
    %c0_24 = arith.constant 0 : index
    %c0_25 = arith.constant 0 : index
    %c1_26 = arith.constant 1 : index
    %22 = vector.load %arg2[%c0_24, %c0_25, %c1_26] : memref<1x16x128xbf16, #tpu.memory_space<vmem>>, vector<1x16x78xbf16>
    %23 = vector.shape_cast %22 : vector<1x16x78xbf16> to vector<16x78xbf16>
    %cst_27 = arith.constant dense<0.000000e+00> : vector<16x78xf32>
    %24 = tpu.matmul %21, %23, %cst_27 {dimension_numbers = #tpu.dot_dimension_numbers<[1], [0], [0], [1], [0, 0, 1, 1], [], []>} : vector<16x16xbf16>, vector<16x78xbf16>, vector<16x78xf32> -> vector<16x78xf32>
    %25 = arith.addf %19, %24 : vector<16x78xf32>
    %c2 = arith.constant 2 : index
    %c0_28 = arith.constant 0 : index
    %c0_29 = arith.constant 0 : index
    %26 = vector.load %arg3[%c2, %c0_28, %c0_29] : memref<9x16x16xbf16, #tpu.memory_space<vmem>>, vector<1x16x16xbf16>
    %27 = vector.shape_cast %26 : vector<1x16x16xbf16> to vector<16x16xbf16>
    %c0_30 = arith.constant 0 : index
    %c0_31 = arith.constant 0 : index
    %c2_32 = arith.constant 2 : index
    %28 = vector.load %arg1[%c0_30, %c0_31, %c2_32] : memref<1x16x128xbf16, #tpu.memory_space<vmem>>, vector<1x16x78xbf16>
    %29 = vector.shape_cast %28 : vector<1x16x78xbf16> to vector<16x78xbf16>
    %cst_33 = arith.constant dense<0.000000e+00> : vector<16x78xf32>
    %30 = tpu.matmul %27, %29, %cst_33 {dimension_numbers = #tpu.dot_dimension_numbers<[1], [0], [0], [1], [0, 0, 1, 1], [], []>} : vector<16x16xbf16>, vector<16x78xbf16>, vector<16x78xf32> -> vector<16x78xf32>
    %31 = arith.addf %25, %30 : vector<16x78xf32>
    %c2_34 = arith.constant 2 : index
    %c0_35 = arith.constant 0 : index
    %c0_36 = arith.constant 0 : index
    %32 = vector.load %arg4[%c2_34, %c0_35, %c0_36] : memref<9x16x16xbf16, #tpu.memory_space<vmem>>, vector<1x16x16xbf16>
    %33 = vector.shape_cast %32 : vector<1x16x16xbf16> to vector<16x16xbf16>
    %c0_37 = arith.constant 0 : index
    %c0_38 = arith.constant 0 : index
    %c2_39 = arith.constant 2 : index
    %34 = vector.load %arg2[%c0_37, %c0_38, %c2_39] : memref<1x16x128xbf16, #tpu.memory_space<vmem>>, vector<1x16x78xbf16>
    %35 = vector.shape_cast %34 : vector<1x16x78xbf16> to vector<16x78xbf16>
    %cst_40 = arith.constant dense<0.000000e+00> : vector<16x78xf32>
    %36 = tpu.matmul %33, %35, %cst_40 {dimension_numbers = #tpu.dot_dimension_numbers<[1], [0], [0], [1], [0, 0, 1, 1], [], []>} : vector<16x16xbf16>, vector<16x78xbf16>, vector<16x78xf32> -> vector<16x78xf32>
    %37 = arith.addf %31, %36 : vector<16x78xf32>
    %c3 = arith.constant 3 : index
    %c0_41 = arith.constant 0 : index
    %c0_42 = arith.constant 0 : index
    %38 = vector.load %arg3[%c3, %c0_41, %c0_42] : memref<9x16x16xbf16, #tpu.memory_space<vmem>>, vector<1x16x16xbf16>
    %39 = vector.shape_cast %38 : vector<1x16x16xbf16> to vector<16x16xbf16>
    %c0_43 = arith.constant 0 : index
    %c0_44 = arith.constant 0 : index
    %c10 = arith.constant 10 : index
    %40 = vector.load %arg1[%c0_43, %c0_44, %c10] : memref<1x16x128xbf16, #tpu.memory_space<vmem>>, vector<1x16x78xbf16>
    %41 = vector.shape_cast %40 : vector<1x16x78xbf16> to vector<16x78xbf16>
    %cst_45 = arith.constant dense<0.000000e+00> : vector<16x78xf32>
    %42 = tpu.matmul %39, %41, %cst_45 {dimension_numbers = #tpu.dot_dimension_numbers<[1], [0], [0], [1], [0, 0, 1, 1], [], []>} : vector<16x16xbf16>, vector<16x78xbf16>, vector<16x78xf32> -> vector<16x78xf32>
    %43 = arith.addf %37, %42 : vector<16x78xf32>
    %c3_46 = arith.constant 3 : index
    %c0_47 = arith.constant 0 : index
    %c0_48 = arith.constant 0 : index
    %44 = vector.load %arg4[%c3_46, %c0_47, %c0_48] : memref<9x16x16xbf16, #tpu.memory_space<vmem>>, vector<1x16x16xbf16>
    %45 = vector.shape_cast %44 : vector<1x16x16xbf16> to vector<16x16xbf16>
    %c0_49 = arith.constant 0 : index
    %c0_50 = arith.constant 0 : index
    %c10_51 = arith.constant 10 : index
    %46 = vector.load %arg2[%c0_49, %c0_50, %c10_51] : memref<1x16x128xbf16, #tpu.memory_space<vmem>>, vector<1x16x78xbf16>
    %47 = vector.shape_cast %46 : vector<1x16x78xbf16> to vector<16x78xbf16>
    %cst_52 = arith.constant dense<0.000000e+00> : vector<16x78xf32>
    %48 = tpu.matmul %45, %47, %cst_52 {dimension_numbers = #tpu.dot_dimension_numbers<[1], [0], [0], [1], [0, 0, 1, 1], [], []>} : vector<16x16xbf16>, vector<16x78xbf16>, vector<16x78xf32> -> vector<16x78xf32>
    %49 = arith.addf %43, %48 : vector<16x78xf32>
    %c4 = arith.constant 4 : index
    %c0_53 = arith.constant 0 : index
    %c0_54 = arith.constant 0 : index
    %50 = vector.load %arg3[%c4, %c0_53, %c0_54] : memref<9x16x16xbf16, #tpu.memory_space<vmem>>, vector<1x16x16xbf16>
    %51 = vector.shape_cast %50 : vector<1x16x16xbf16> to vector<16x16xbf16>
    %c0_55 = arith.constant 0 : index
    %c0_56 = arith.constant 0 : index
    %c11 = arith.constant 11 : index
    %52 = vector.load %arg1[%c0_55, %c0_56, %c11] : memref<1x16x128xbf16, #tpu.memory_space<vmem>>, vector<1x16x78xbf16>
    %53 = vector.shape_cast %52 : vector<1x16x78xbf16> to vector<16x78xbf16>
    %cst_57 = arith.constant dense<0.000000e+00> : vector<16x78xf32>
    %54 = tpu.matmul %51, %53, %cst_57 {dimension_numbers = #tpu.dot_dimension_numbers<[1], [0], [0], [1], [0, 0, 1, 1], [], []>} : vector<16x16xbf16>, vector<16x78xbf16>, vector<16x78xf32> -> vector<16x78xf32>
    %55 = arith.addf %49, %54 : vector<16x78xf32>
    %c4_58 = arith.constant 4 : index
    %c0_59 = arith.constant 0 : index
    %c0_60 = arith.constant 0 : index
    %56 = vector.load %arg4[%c4_58, %c0_59, %c0_60] : memref<9x16x16xbf16, #tpu.memory_space<vmem>>, vector<1x16x16xbf16>
    %57 = vector.shape_cast %56 : vector<1x16x16xbf16> to vector<16x16xbf16>
    %c0_61 = arith.constant 0 : index
    %c0_62 = arith.constant 0 : index
    %c11_63 = arith.constant 11 : index
    %58 = vector.load %arg2[%c0_61, %c0_62, %c11_63] : memref<1x16x128xbf16, #tpu.memory_space<vmem>>, vector<1x16x78xbf16>
    %59 = vector.shape_cast %58 : vector<1x16x78xbf16> to vector<16x78xbf16>
    %cst_64 = arith.constant dense<0.000000e+00> : vector<16x78xf32>
    %60 = tpu.matmul %57, %59, %cst_64 {dimension_numbers = #tpu.dot_dimension_numbers<[1], [0], [0], [1], [0, 0, 1, 1], [], []>} : vector<16x16xbf16>, vector<16x78xbf16>, vector<16x78xf32> -> vector<16x78xf32>
    %61 = arith.addf %55, %60 : vector<16x78xf32>
    %c5 = arith.constant 5 : index
    %c0_65 = arith.constant 0 : index
    %c0_66 = arith.constant 0 : index
    %62 = vector.load %arg3[%c5, %c0_65, %c0_66] : memref<9x16x16xbf16, #tpu.memory_space<vmem>>, vector<1x16x16xbf16>
    %63 = vector.shape_cast %62 : vector<1x16x16xbf16> to vector<16x16xbf16>
    %c0_67 = arith.constant 0 : index
    %c0_68 = arith.constant 0 : index
    %c12 = arith.constant 12 : index
    %64 = vector.load %arg1[%c0_67, %c0_68, %c12] : memref<1x16x128xbf16, #tpu.memory_space<vmem>>, vector<1x16x78xbf16>
    %65 = vector.shape_cast %64 : vector<1x16x78xbf16> to vector<16x78xbf16>
    %cst_69 = arith.constant dense<0.000000e+00> : vector<16x78xf32>
    %66 = tpu.matmul %63, %65, %cst_69 {dimension_numbers = #tpu.dot_dimension_numbers<[1], [0], [0], [1], [0, 0, 1, 1], [], []>} : vector<16x16xbf16>, vector<16x78xbf16>, vector<16x78xf32> -> vector<16x78xf32>
    %67 = arith.addf %61, %66 : vector<16x78xf32>
    %c5_70 = arith.constant 5 : index
    %c0_71 = arith.constant 0 : index
    %c0_72 = arith.constant 0 : index
    %68 = vector.load %arg4[%c5_70, %c0_71, %c0_72] : memref<9x16x16xbf16, #tpu.memory_space<vmem>>, vector<1x16x16xbf16>
    %69 = vector.shape_cast %68 : vector<1x16x16xbf16> to vector<16x16xbf16>
    %c0_73 = arith.constant 0 : index
    %c0_74 = arith.constant 0 : index
    %c12_75 = arith.constant 12 : index
    %70 = vector.load %arg2[%c0_73, %c0_74, %c12_75] : memref<1x16x128xbf16, #tpu.memory_space<vmem>>, vector<1x16x78xbf16>
    %71 = vector.shape_cast %70 : vector<1x16x78xbf16> to vector<16x78xbf16>
    %cst_76 = arith.constant dense<0.000000e+00> : vector<16x78xf32>
    %72 = tpu.matmul %69, %71, %cst_76 {dimension_numbers = #tpu.dot_dimension_numbers<[1], [0], [0], [1], [0, 0, 1, 1], [], []>} : vector<16x16xbf16>, vector<16x78xbf16>, vector<16x78xf32> -> vector<16x78xf32>
    %73 = arith.addf %67, %72 : vector<16x78xf32>
    %c6 = arith.constant 6 : index
    %c0_77 = arith.constant 0 : index
    %c0_78 = arith.constant 0 : index
    %74 = vector.load %arg3[%c6, %c0_77, %c0_78] : memref<9x16x16xbf16, #tpu.memory_space<vmem>>, vector<1x16x16xbf16>
    %75 = vector.shape_cast %74 : vector<1x16x16xbf16> to vector<16x16xbf16>
    %c0_79 = arith.constant 0 : index
    %c0_80 = arith.constant 0 : index
    %c20 = arith.constant 20 : index
    %76 = vector.load %arg1[%c0_79, %c0_80, %c20] : memref<1x16x128xbf16, #tpu.memory_space<vmem>>, vector<1x16x78xbf16>
    %77 = vector.shape_cast %76 : vector<1x16x78xbf16> to vector<16x78xbf16>
    %cst_81 = arith.constant dense<0.000000e+00> : vector<16x78xf32>
    %78 = tpu.matmul %75, %77, %cst_81 {dimension_numbers = #tpu.dot_dimension_numbers<[1], [0], [0], [1], [0, 0, 1, 1], [], []>} : vector<16x16xbf16>, vector<16x78xbf16>, vector<16x78xf32> -> vector<16x78xf32>
    %79 = arith.addf %73, %78 : vector<16x78xf32>
    %c6_82 = arith.constant 6 : index
    %c0_83 = arith.constant 0 : index
    %c0_84 = arith.constant 0 : index
    %80 = vector.load %arg4[%c6_82, %c0_83, %c0_84] : memref<9x16x16xbf16, #tpu.memory_space<vmem>>, vector<1x16x16xbf16>
    %81 = vector.shape_cast %80 : vector<1x16x16xbf16> to vector<16x16xbf16>
    %c0_85 = arith.constant 0 : index
    %c0_86 = arith.constant 0 : index
    %c20_87 = arith.constant 20 : index
    %82 = vector.load %arg2[%c0_85, %c0_86, %c20_87] : memref<1x16x128xbf16, #tpu.memory_space<vmem>>, vector<1x16x78xbf16>
    %83 = vector.shape_cast %82 : vector<1x16x78xbf16> to vector<16x78xbf16>
    %cst_88 = arith.constant dense<0.000000e+00> : vector<16x78xf32>
    %84 = tpu.matmul %81, %83, %cst_88 {dimension_numbers = #tpu.dot_dimension_numbers<[1], [0], [0], [1], [0, 0, 1, 1], [], []>} : vector<16x16xbf16>, vector<16x78xbf16>, vector<16x78xf32> -> vector<16x78xf32>
    %85 = arith.addf %79, %84 : vector<16x78xf32>
    %c7 = arith.constant 7 : index
    %c0_89 = arith.constant 0 : index
    %c0_90 = arith.constant 0 : index
    %86 = vector.load %arg3[%c7, %c0_89, %c0_90] : memref<9x16x16xbf16, #tpu.memory_space<vmem>>, vector<1x16x16xbf16>
    %87 = vector.shape_cast %86 : vector<1x16x16xbf16> to vector<16x16xbf16>
    %c0_91 = arith.constant 0 : index
    %c0_92 = arith.constant 0 : index
    %c21 = arith.constant 21 : index
    %88 = vector.load %arg1[%c0_91, %c0_92, %c21] : memref<1x16x128xbf16, #tpu.memory_space<vmem>>, vector<1x16x78xbf16>
    %89 = vector.shape_cast %88 : vector<1x16x78xbf16> to vector<16x78xbf16>
    %cst_93 = arith.constant dense<0.000000e+00> : vector<16x78xf32>
    %90 = tpu.matmul %87, %89, %cst_93 {dimension_numbers = #tpu.dot_dimension_numbers<[1], [0], [0], [1], [0, 0, 1, 1], [], []>} : vector<16x16xbf16>, vector<16x78xbf16>, vector<16x78xf32> -> vector<16x78xf32>
    %91 = arith.addf %85, %90 : vector<16x78xf32>
    %c7_94 = arith.constant 7 : index
    %c0_95 = arith.constant 0 : index
    %c0_96 = arith.constant 0 : index
    %92 = vector.load %arg4[%c7_94, %c0_95, %c0_96] : memref<9x16x16xbf16, #tpu.memory_space<vmem>>, vector<1x16x16xbf16>
    %93 = vector.shape_cast %92 : vector<1x16x16xbf16> to vector<16x16xbf16>
    %c0_97 = arith.constant 0 : index
    %c0_98 = arith.constant 0 : index
    %c21_99 = arith.constant 21 : index
    %94 = vector.load %arg2[%c0_97, %c0_98, %c21_99] : memref<1x16x128xbf16, #tpu.memory_space<vmem>>, vector<1x16x78xbf16>
    %95 = vector.shape_cast %94 : vector<1x16x78xbf16> to vector<16x78xbf16>
    %cst_100 = arith.constant dense<0.000000e+00> : vector<16x78xf32>
    %96 = tpu.matmul %93, %95, %cst_100 {dimension_numbers = #tpu.dot_dimension_numbers<[1], [0], [0], [1], [0, 0, 1, 1], [], []>} : vector<16x16xbf16>, vector<16x78xbf16>, vector<16x78xf32> -> vector<16x78xf32>
    %97 = arith.addf %91, %96 : vector<16x78xf32>
    %c8 = arith.constant 8 : index
    %c0_101 = arith.constant 0 : index
    %c0_102 = arith.constant 0 : index
    %98 = vector.load %arg3[%c8, %c0_101, %c0_102] : memref<9x16x16xbf16, #tpu.memory_space<vmem>>, vector<1x16x16xbf16>
    %99 = vector.shape_cast %98 : vector<1x16x16xbf16> to vector<16x16xbf16>
    %c0_103 = arith.constant 0 : index
    %c0_104 = arith.constant 0 : index
    %c22 = arith.constant 22 : index
    %100 = vector.load %arg1[%c0_103, %c0_104, %c22] : memref<1x16x128xbf16, #tpu.memory_space<vmem>>, vector<1x16x78xbf16>
    %101 = vector.shape_cast %100 : vector<1x16x78xbf16> to vector<16x78xbf16>
    %cst_105 = arith.constant dense<0.000000e+00> : vector<16x78xf32>
    %102 = tpu.matmul %99, %101, %cst_105 {dimension_numbers = #tpu.dot_dimension_numbers<[1], [0], [0], [1], [0, 0, 1, 1], [], []>} : vector<16x16xbf16>, vector<16x78xbf16>, vector<16x78xf32> -> vector<16x78xf32>
    %103 = arith.addf %97, %102 : vector<16x78xf32>
    %c8_106 = arith.constant 8 : index
    %c0_107 = arith.constant 0 : index
    %c0_108 = arith.constant 0 : index
    %104 = vector.load %arg4[%c8_106, %c0_107, %c0_108] : memref<9x16x16xbf16, #tpu.memory_space<vmem>>, vector<1x16x16xbf16>
    %105 = vector.shape_cast %104 : vector<1x16x16xbf16> to vector<16x16xbf16>
    %c0_109 = arith.constant 0 : index
    %c0_110 = arith.constant 0 : index
    %c22_111 = arith.constant 22 : index
    %106 = vector.load %arg2[%c0_109, %c0_110, %c22_111] : memref<1x16x128xbf16, #tpu.memory_space<vmem>>, vector<1x16x78xbf16>
    %107 = vector.shape_cast %106 : vector<1x16x78xbf16> to vector<16x78xbf16>
    %cst_112 = arith.constant dense<0.000000e+00> : vector<16x78xf32>
    %108 = tpu.matmul %105, %107, %cst_112 {dimension_numbers = #tpu.dot_dimension_numbers<[1], [0], [0], [1], [0, 0, 1, 1], [], []>} : vector<16x16xbf16>, vector<16x78xbf16>, vector<16x78xf32> -> vector<16x78xf32>
    %109 = arith.addf %103, %108 : vector<16x78xf32>
    %c0_113 = arith.constant 0 : index
    %c0_114 = arith.constant 0 : index
    %110 = vector.load %arg5[%c0_113, %c0_114] : memref<16x1xf32, #tpu.memory_space<vmem>>, vector<16x1xf32>
    %111 = vector.broadcast %110 : vector<16x1xf32> to vector<16x78xf32>
    %112 = arith.mulf %109, %111 : vector<16x78xf32>
    %c0_115 = arith.constant 0 : index
    %c0_116 = arith.constant 0 : index
    %113 = vector.load %arg6[%c0_115, %c0_116] : memref<16x1xf32, #tpu.memory_space<vmem>>, vector<16x1xf32>
    %114 = vector.broadcast %113 : vector<16x1xf32> to vector<16x78xf32>
    %115 = arith.addf %112, %114 : vector<16x78xf32>
    %cst_117 = arith.constant 0.000000e+00 : f32
    %116 = vector.broadcast %cst_117 : f32 to vector<16x78xf32>
    %117 = arith.maximumf %115, %116 : vector<16x78xf32>
    %118 = vector.broadcast %0 : vector<1x78xf32> to vector<16x78xf32>
    %119 = arith.mulf %117, %118 : vector<16x78xf32>
    %cst_118 = arith.constant 0.000000e+00 : bf16
    %120 = vector.broadcast %cst_118 : bf16 to vector<16x128xbf16>
    %c0_119 = arith.constant 0 : index
    %c0_120 = arith.constant 0 : index
    %121 = vector.load %arg12[%c0_119, %c0_120] : memref<16x128xbf16, #tpu.memory_space<vmem>>, vector<16x128xbf16>
    tpu.vector_store %arg12[%c0_119, %c0_120], %120 {strides = array<i32>} : memref<16x128xbf16, #tpu.memory_space<vmem>>, vector<16x128xbf16>,
    %122 = arith.truncf %119 : vector<16x78xf32> to vector<16x78xbf16>
    %c0_121 = arith.constant 0 : index
    %c11_122 = arith.constant 11 : index
    %123 = vector.load %arg12[%c0_121, %c11_122] : memref<16x128xbf16, #tpu.memory_space<vmem>>, vector<16x78xbf16>
    tpu.vector_store %arg12[%c0_121, %c11_122], %122 {strides = array<i32>} : memref<16x128xbf16, #tpu.memory_space<vmem>>, vector<16x78xbf16>,
    %cst_123 = arith.constant 0.000000e+00 : f32
    %124 = vector.broadcast %cst_123 : f32 to vector<16x78xf32>
    %c0_124 = arith.constant 0 : index
    %c0_125 = arith.constant 0 : index
    %c0_126 = arith.constant 0 : index
    %125 = vector.load %arg7[%c0_124, %c0_125, %c0_126] : memref<9x16x16xbf16, #tpu.memory_space<vmem>>, vector<1x16x16xbf16>
    %126 = vector.shape_cast %125 : vector<1x16x16xbf16> to vector<16x16xbf16>
    %c0_127 = arith.constant 0 : index
    %c0_128 = arith.constant 0 : index
    %127 = vector.load %arg12[%c0_127, %c0_128] : memref<16x128xbf16, #tpu.memory_space<vmem>>, vector<16x78xbf16>
    %cst_129 = arith.constant dense<0.000000e+00> : vector<16x78xf32>
    %128 = tpu.matmul %126, %127, %cst_129 {dimension_numbers = #tpu.dot_dimension_numbers<[1], [0], [0], [1], [0, 0, 1, 1], [], []>} : vector<16x16xbf16>, vector<16x78xbf16>, vector<16x78xf32> -> vector<16x78xf32>
    %129 = arith.addf %124, %128 : vector<16x78xf32>
    %c1_130 = arith.constant 1 : index
    %c0_131 = arith.constant 0 : index
    %c0_132 = arith.constant 0 : index
    %130 = vector.load %arg7[%c1_130, %c0_131, %c0_132] : memref<9x16x16xbf16, #tpu.memory_space<vmem>>, vector<1x16x16xbf16>
    %131 = vector.shape_cast %130 : vector<1x16x16xbf16> to vector<16x16xbf16>
    %c0_133 = arith.constant 0 : index
    %c1_134 = arith.constant 1 : index
    %132 = vector.load %arg12[%c0_133, %c1_134] : memref<16x128xbf16, #tpu.memory_space<vmem>>, vector<16x78xbf16>
    %cst_135 = arith.constant dense<0.000000e+00> : vector<16x78xf32>
    %133 = tpu.matmul %131, %132, %cst_135 {dimension_numbers = #tpu.dot_dimension_numbers<[1], [0], [0], [1], [0, 0, 1, 1], [], []>} : vector<16x16xbf16>, vector<16x78xbf16>, vector<16x78xf32> -> vector<16x78xf32>
    %134 = arith.addf %129, %133 : vector<16x78xf32>
    %c2_136 = arith.constant 2 : index
    %c0_137 = arith.constant 0 : index
    %c0_138 = arith.constant 0 : index
    %135 = vector.load %arg7[%c2_136, %c0_137, %c0_138] : memref<9x16x16xbf16, #tpu.memory_space<vmem>>, vector<1x16x16xbf16>
    %136 = vector.shape_cast %135 : vector<1x16x16xbf16> to vector<16x16xbf16>
    %c0_139 = arith.constant 0 : index
    %c2_140 = arith.constant 2 : index
    %137 = vector.load %arg12[%c0_139, %c2_140] : memref<16x128xbf16, #tpu.memory_space<vmem>>, vector<16x78xbf16>
    %cst_141 = arith.constant dense<0.000000e+00> : vector<16x78xf32>
    %138 = tpu.matmul %136, %137, %cst_141 {dimension_numbers = #tpu.dot_dimension_numbers<[1], [0], [0], [1], [0, 0, 1, 1], [], []>} : vector<16x16xbf16>, vector<16x78xbf16>, vector<16x78xf32> -> vector<16x78xf32>
    %139 = arith.addf %134, %138 : vector<16x78xf32>
    %c3_142 = arith.constant 3 : index
    %c0_143 = arith.constant 0 : index
    %c0_144 = arith.constant 0 : index
    %140 = vector.load %arg7[%c3_142, %c0_143, %c0_144] : memref<9x16x16xbf16, #tpu.memory_space<vmem>>, vector<1x16x16xbf16>
    %141 = vector.shape_cast %140 : vector<1x16x16xbf16> to vector<16x16xbf16>
    %c0_145 = arith.constant 0 : index
    %c10_146 = arith.constant 10 : index
    %142 = vector.load %arg12[%c0_145, %c10_146] : memref<16x128xbf16, #tpu.memory_space<vmem>>, vector<16x78xbf16>
    %cst_147 = arith.constant dense<0.000000e+00> : vector<16x78xf32>
    %143 = tpu.matmul %141, %142, %cst_147 {dimension_numbers = #tpu.dot_dimension_numbers<[1], [0], [0], [1], [0, 0, 1, 1], [], []>} : vector<16x16xbf16>, vector<16x78xbf16>, vector<16x78xf32> -> vector<16x78xf32>
    %144 = arith.addf %139, %143 : vector<16x78xf32>
    %c4_148 = arith.constant 4 : index
    %c0_149 = arith.constant 0 : index
    %c0_150 = arith.constant 0 : index
    %145 = vector.load %arg7[%c4_148, %c0_149, %c0_150] : memref<9x16x16xbf16, #tpu.memory_space<vmem>>, vector<1x16x16xbf16>
    %146 = vector.shape_cast %145 : vector<1x16x16xbf16> to vector<16x16xbf16>
    %c0_151 = arith.constant 0 : index
    %c11_152 = arith.constant 11 : index
    %147 = vector.load %arg12[%c0_151, %c11_152] : memref<16x128xbf16, #tpu.memory_space<vmem>>, vector<16x78xbf16>
    %cst_153 = arith.constant dense<0.000000e+00> : vector<16x78xf32>
    %148 = tpu.matmul %146, %147, %cst_153 {dimension_numbers = #tpu.dot_dimension_numbers<[1], [0], [0], [1], [0, 0, 1, 1], [], []>} : vector<16x16xbf16>, vector<16x78xbf16>, vector<16x78xf32> -> vector<16x78xf32>
    %149 = arith.addf %144, %148 : vector<16x78xf32>
    %c5_154 = arith.constant 5 : index
    %c0_155 = arith.constant 0 : index
    %c0_156 = arith.constant 0 : index
    %150 = vector.load %arg7[%c5_154, %c0_155, %c0_156] : memref<9x16x16xbf16, #tpu.memory_space<vmem>>, vector<1x16x16xbf16>
    %151 = vector.shape_cast %150 : vector<1x16x16xbf16> to vector<16x16xbf16>
    %c0_157 = arith.constant 0 : index
    %c12_158 = arith.constant 12 : index
    %152 = vector.load %arg12[%c0_157, %c12_158] : memref<16x128xbf16, #tpu.memory_space<vmem>>, vector<16x78xbf16>
    %cst_159 = arith.constant dense<0.000000e+00> : vector<16x78xf32>
    %153 = tpu.matmul %151, %152, %cst_159 {dimension_numbers = #tpu.dot_dimension_numbers<[1], [0], [0], [1], [0, 0, 1, 1], [], []>} : vector<16x16xbf16>, vector<16x78xbf16>, vector<16x78xf32> -> vector<16x78xf32>
    %154 = arith.addf %149, %153 : vector<16x78xf32>
    %c6_160 = arith.constant 6 : index
    %c0_161 = arith.constant 0 : index
    %c0_162 = arith.constant 0 : index
    %155 = vector.load %arg7[%c6_160, %c0_161, %c0_162] : memref<9x16x16xbf16, #tpu.memory_space<vmem>>, vector<1x16x16xbf16>
    %156 = vector.shape_cast %155 : vector<1x16x16xbf16> to vector<16x16xbf16>
    %c0_163 = arith.constant 0 : index
    %c20_164 = arith.constant 20 : index
    %157 = vector.load %arg12[%c0_163, %c20_164] : memref<16x128xbf16, #tpu.memory_space<vmem>>, vector<16x78xbf16>
    %cst_165 = arith.constant dense<0.000000e+00> : vector<16x78xf32>
    %158 = tpu.matmul %156, %157, %cst_165 {dimension_numbers = #tpu.dot_dimension_numbers<[1], [0], [0], [1], [0, 0, 1, 1], [], []>} : vector<16x16xbf16>, vector<16x78xbf16>, vector<16x78xf32> -> vector<16x78xf32>
    %159 = arith.addf %154, %158 : vector<16x78xf32>
    %c7_166 = arith.constant 7 : index
    %c0_167 = arith.constant 0 : index
    %c0_168 = arith.constant 0 : index
    %160 = vector.load %arg7[%c7_166, %c0_167, %c0_168] : memref<9x16x16xbf16, #tpu.memory_space<vmem>>, vector<1x16x16xbf16>
    %161 = vector.shape_cast %160 : vector<1x16x16xbf16> to vector<16x16xbf16>
    %c0_169 = arith.constant 0 : index
    %c21_170 = arith.constant 21 : index
    %162 = vector.load %arg12[%c0_169, %c21_170] : memref<16x128xbf16, #tpu.memory_space<vmem>>, vector<16x78xbf16>
    %cst_171 = arith.constant dense<0.000000e+00> : vector<16x78xf32>
    %163 = tpu.matmul %161, %162, %cst_171 {dimension_numbers = #tpu.dot_dimension_numbers<[1], [0], [0], [1], [0, 0, 1, 1], [], []>} : vector<16x16xbf16>, vector<16x78xbf16>, vector<16x78xf32> -> vector<16x78xf32>
    %164 = arith.addf %159, %163 : vector<16x78xf32>
    %c8_172 = arith.constant 8 : index
    %c0_173 = arith.constant 0 : index
    %c0_174 = arith.constant 0 : index
    %165 = vector.load %arg7[%c8_172, %c0_173, %c0_174] : memref<9x16x16xbf16, #tpu.memory_space<vmem>>, vector<1x16x16xbf16>
    %166 = vector.shape_cast %165 : vector<1x16x16xbf16> to vector<16x16xbf16>
    %c0_175 = arith.constant 0 : index
    %c22_176 = arith.constant 22 : index
    %167 = vector.load %arg12[%c0_175, %c22_176] : memref<16x128xbf16, #tpu.memory_space<vmem>>, vector<16x78xbf16>
    %cst_177 = arith.constant dense<0.000000e+00> : vector<16x78xf32>
    %168 = tpu.matmul %166, %167, %cst_177 {dimension_numbers = #tpu.dot_dimension_numbers<[1], [0], [0], [1], [0, 0, 1, 1], [], []>} : vector<16x16xbf16>, vector<16x78xbf16>, vector<16x78xf32> -> vector<16x78xf32>
    %169 = arith.addf %164, %168 : vector<16x78xf32>
    %c0_178 = arith.constant 0 : index
    %c0_179 = arith.constant 0 : index
    %170 = vector.load %arg8[%c0_178, %c0_179] : memref<16x1xf32, #tpu.memory_space<vmem>>, vector<16x1xf32>
    %171 = vector.broadcast %170 : vector<16x1xf32> to vector<16x78xf32>
    %172 = arith.mulf %169, %171 : vector<16x78xf32>
    %c0_180 = arith.constant 0 : index
    %c0_181 = arith.constant 0 : index
    %173 = vector.load %arg9[%c0_180, %c0_181] : memref<16x1xf32, #tpu.memory_space<vmem>>, vector<16x1xf32>
    %174 = vector.broadcast %173 : vector<16x1xf32> to vector<16x78xf32>
    %175 = arith.addf %172, %174 : vector<16x78xf32>
    %cst_182 = arith.constant 0.000000e+00 : f32
    %176 = vector.broadcast %cst_182 : f32 to vector<16x78xf32>
    %177 = arith.maximumf %175, %176 : vector<16x78xf32>
    %178 = vector.broadcast %0 : vector<1x78xf32> to vector<16x78xf32>
    %179 = arith.mulf %177, %178 : vector<16x78xf32>
    %cst_183 = arith.constant 0.000000e+00 : bf16
    %180 = vector.broadcast %cst_183 : bf16 to vector<1x16x128xbf16>
    %c0_184 = arith.constant 0 : index
    %c0_185 = arith.constant 0 : index
    %c0_186 = arith.constant 0 : index
    %181 = vector.load %arg11[%c0_184, %c0_185, %c0_186] : memref<1x16x128xbf16, #tpu.memory_space<vmem>>, vector<1x16x128xbf16>
    tpu.vector_store %arg11[%c0_184, %c0_185, %c0_186], %180 {strides = array<i32>} : memref<1x16x128xbf16, #tpu.memory_space<vmem>>, vector<1x16x128xbf16>,
    %182 = arith.truncf %179 : vector<16x78xf32> to vector<16x78xbf16>
    %c0_187 = arith.constant 0 : index
    %c0_188 = arith.constant 0 : index
    %c11_189 = arith.constant 11 : index
    %183 = vector.load %arg11[%c0_187, %c0_188, %c11_189] : memref<1x16x128xbf16, #tpu.memory_space<vmem>>, vector<1x16x78xbf16>
    %184 = vector.shape_cast %183 : vector<1x16x78xbf16> to vector<16x78xbf16>
    %185 = vector.shape_cast %182 : vector<16x78xbf16> to vector<1x16x78xbf16>
    tpu.vector_store %arg11[%c0_187, %c0_188, %c11_189], %185 {strides = array<i32>} : memref<1x16x128xbf16, #tpu.memory_space<vmem>>, vector<1x16x78xbf16>,
    return
  }
  func.func @transform_0(%arg0: i32) -> (i32, i32, i32) {
    %c0_i32 = arith.constant 0 : i32
    %c0_i32_0 = arith.constant 0 : i32
    %c0_i32_1 = arith.constant 0 : i32
    return %arg0, %c0_i32, %c0_i32_0 : i32, i32, i32
  }
  func.func @transform_1(%arg0: i32) -> (i32, i32, i32) {
    %c0_i32 = arith.constant 0 : i32
    %c0_i32_0 = arith.constant 0 : i32
    %c0_i32_1 = arith.constant 0 : i32
    return %arg0, %c0_i32, %c0_i32_0 : i32, i32, i32
  }
  func.func @transform_2(%arg0: i32) -> (i32, i32, i32) {
    %c0_i32 = arith.constant 0 : i32
    %c0_i32_0 = arith.constant 0 : i32
    %c0_i32_1 = arith.constant 0 : i32
    %c0_i32_2 = arith.constant 0 : i32
    return %c0_i32, %c0_i32_0, %c0_i32_1 : i32, i32, i32
  }
  func.func @transform_3(%arg0: i32) -> (i32, i32, i32) {
    %c0_i32 = arith.constant 0 : i32
    %c0_i32_0 = arith.constant 0 : i32
    %c0_i32_1 = arith.constant 0 : i32
    %c0_i32_2 = arith.constant 0 : i32
    return %c0_i32, %c0_i32_0, %c0_i32_1 : i32, i32, i32
  }
  func.func @transform_4(%arg0: i32) -> (i32, i32) {
    %c0_i32 = arith.constant 0 : i32
    %c0_i32_0 = arith.constant 0 : i32
    %c0_i32_1 = arith.constant 0 : i32
    return %c0_i32, %c0_i32_0 : i32, i32
  }
  func.func @transform_5(%arg0: i32) -> (i32, i32) {
    %c0_i32 = arith.constant 0 : i32
    %c0_i32_0 = arith.constant 0 : i32
    %c0_i32_1 = arith.constant 0 : i32
    return %c0_i32, %c0_i32_0 : i32, i32
  }
  func.func @transform_6(%arg0: i32) -> (i32, i32, i32) {
    %c0_i32 = arith.constant 0 : i32
    %c0_i32_0 = arith.constant 0 : i32
    %c0_i32_1 = arith.constant 0 : i32
    %c0_i32_2 = arith.constant 0 : i32
    return %c0_i32, %c0_i32_0, %c0_i32_1 : i32, i32, i32
  }
  func.func @transform_7(%arg0: i32) -> (i32, i32) {
    %c0_i32 = arith.constant 0 : i32
    %c0_i32_0 = arith.constant 0 : i32
    %c0_i32_1 = arith.constant 0 : i32
    return %c0_i32, %c0_i32_0 : i32, i32
  }
  func.func @transform_8(%arg0: i32) -> (i32, i32) {
    %c0_i32 = arith.constant 0 : i32
    %c0_i32_0 = arith.constant 0 : i32
    %c0_i32_1 = arith.constant 0 : i32
    return %c0_i32, %c0_i32_0 : i32, i32
  }
  func.func @transform_9(%arg0: i32) -> (i32, i32) {
    %c0_i32 = arith.constant 0 : i32
    %c0_i32_0 = arith.constant 0 : i32
    %c0_i32_1 = arith.constant 0 : i32
    return %c0_i32, %c0_i32_0 : i32, i32
  }
  func.func @transform_10(%arg0: i32) -> (i32, i32, i32) {
    %c0_i32 = arith.constant 0 : i32
    %c0_i32_0 = arith.constant 0 : i32
    %c0_i32_1 = arith.constant 0 : i32
    return %arg0, %c0_i32, %c0_i32_0 : i32, i32, i32
  }
}

module attributes {stable_mosaic.version = 11 : i64} {
  func.func @_conv_transpose2x_kernel(%arg0: i32, %arg1: memref<1x16x128xbf16, #tpu.memory_space<vmem>>, %arg2: memref<4x4x8x16xbf16, #tpu.memory_space<vmem>>, %arg3: memref<1x4x8x128xbf16, #tpu.memory_space<vmem>>) attributes {dimension_semantics = [#tpu.dimension_semantics<parallel>], iteration_bounds = array<i64: 2>, scalar_prefetch = 0 : i64, scratch_operands = 0 : i64, tpu.core_type = #tpu.core_type<tc>, window_params = [{transform_indices = @transform_0, window_bounds = array<i64: 1, 16, 128>}, {pipeline_mode = #tpu.pipeline_mode<synchronous>, transform_indices = @transform_1, window_bounds = array<i64: 4, 4, 8, 16>}, {transform_indices = @transform_2, window_bounds = array<i64: 1, 4, 8, 128>}]} {
    %cst = arith.constant 0.000000e+00 : bf16
    %0 = vector.broadcast %cst : bf16 to vector<1x4x8x128xbf16>
    %c0 = arith.constant 0 : index
    %c0_0 = arith.constant 0 : index
    %c0_1 = arith.constant 0 : index
    %c0_2 = arith.constant 0 : index
    %1 = vector.load %arg3[%c0, %c0_0, %c0_1, %c0_2] : memref<1x4x8x128xbf16, #tpu.memory_space<vmem>>, vector<1x4x8x128xbf16>
    tpu.vector_store %arg3[%c0, %c0_0, %c0_1, %c0_2], %0 {strides = array<i32>} : memref<1x4x8x128xbf16, #tpu.memory_space<vmem>>, vector<1x4x8x128xbf16>,
    %cst_3 = arith.constant 0.000000e+00 : f32
    %2 = vector.broadcast %cst_3 : f32 to vector<8x78xf32>
    %c0_4 = arith.constant 0 : index
    %c0_5 = arith.constant 0 : index
    %c0_6 = arith.constant 0 : index
    %c0_7 = arith.constant 0 : index
    %3 = vector.load %arg2[%c0_4, %c0_5, %c0_6, %c0_7] : memref<4x4x8x16xbf16, #tpu.memory_space<vmem>>, vector<1x1x8x16xbf16>
    %4 = vector.shape_cast %3 : vector<1x1x8x16xbf16> to vector<8x16xbf16>
    %c0_8 = arith.constant 0 : index
    %c0_9 = arith.constant 0 : index
    %c0_10 = arith.constant 0 : index
    %5 = vector.load %arg1[%c0_8, %c0_9, %c0_10] : memref<1x16x128xbf16, #tpu.memory_space<vmem>>, vector<1x16x78xbf16>
    %6 = vector.shape_cast %5 : vector<1x16x78xbf16> to vector<16x78xbf16>
    %cst_11 = arith.constant dense<0.000000e+00> : vector<8x78xf32>
    %7 = tpu.matmul %4, %6, %cst_11 {dimension_numbers = #tpu.dot_dimension_numbers<[1], [0], [0], [1], [0, 0, 1, 1], [], []>} : vector<8x16xbf16>, vector<16x78xbf16>, vector<8x78xf32> -> vector<8x78xf32>
    %8 = arith.addf %2, %7 : vector<8x78xf32>
    %c0_12 = arith.constant 0 : index
    %c1 = arith.constant 1 : index
    %c0_13 = arith.constant 0 : index
    %c0_14 = arith.constant 0 : index
    %9 = vector.load %arg2[%c0_12, %c1, %c0_13, %c0_14] : memref<4x4x8x16xbf16, #tpu.memory_space<vmem>>, vector<1x1x8x16xbf16>
    %10 = vector.shape_cast %9 : vector<1x1x8x16xbf16> to vector<8x16xbf16>
    %c0_15 = arith.constant 0 : index
    %c0_16 = arith.constant 0 : index
    %c1_17 = arith.constant 1 : index
    %11 = vector.load %arg1[%c0_15, %c0_16, %c1_17] : memref<1x16x128xbf16, #tpu.memory_space<vmem>>, vector<1x16x78xbf16>
    %12 = vector.shape_cast %11 : vector<1x16x78xbf16> to vector<16x78xbf16>
    %cst_18 = arith.constant dense<0.000000e+00> : vector<8x78xf32>
    %13 = tpu.matmul %10, %12, %cst_18 {dimension_numbers = #tpu.dot_dimension_numbers<[1], [0], [0], [1], [0, 0, 1, 1], [], []>} : vector<8x16xbf16>, vector<16x78xbf16>, vector<8x78xf32> -> vector<8x78xf32>
    %14 = arith.addf %8, %13 : vector<8x78xf32>
    %c0_19 = arith.constant 0 : index
    %c2 = arith.constant 2 : index
    %c0_20 = arith.constant 0 : index
    %c0_21 = arith.constant 0 : index
    %15 = vector.load %arg2[%c0_19, %c2, %c0_20, %c0_21] : memref<4x4x8x16xbf16, #tpu.memory_space<vmem>>, vector<1x1x8x16xbf16>
    %16 = vector.shape_cast %15 : vector<1x1x8x16xbf16> to vector<8x16xbf16>
    %c0_22 = arith.constant 0 : index
    %c0_23 = arith.constant 0 : index
    %c10 = arith.constant 10 : index
    %17 = vector.load %arg1[%c0_22, %c0_23, %c10] : memref<1x16x128xbf16, #tpu.memory_space<vmem>>, vector<1x16x78xbf16>
    %18 = vector.shape_cast %17 : vector<1x16x78xbf16> to vector<16x78xbf16>
    %cst_24 = arith.constant dense<0.000000e+00> : vector<8x78xf32>
    %19 = tpu.matmul %16, %18, %cst_24 {dimension_numbers = #tpu.dot_dimension_numbers<[1], [0], [0], [1], [0, 0, 1, 1], [], []>} : vector<8x16xbf16>, vector<16x78xbf16>, vector<8x78xf32> -> vector<8x78xf32>
    %20 = arith.addf %14, %19 : vector<8x78xf32>
    %c0_25 = arith.constant 0 : index
    %c3 = arith.constant 3 : index
    %c0_26 = arith.constant 0 : index
    %c0_27 = arith.constant 0 : index
    %21 = vector.load %arg2[%c0_25, %c3, %c0_26, %c0_27] : memref<4x4x8x16xbf16, #tpu.memory_space<vmem>>, vector<1x1x8x16xbf16>
    %22 = vector.shape_cast %21 : vector<1x1x8x16xbf16> to vector<8x16xbf16>
    %c0_28 = arith.constant 0 : index
    %c0_29 = arith.constant 0 : index
    %c11 = arith.constant 11 : index
    %23 = vector.load %arg1[%c0_28, %c0_29, %c11] : memref<1x16x128xbf16, #tpu.memory_space<vmem>>, vector<1x16x78xbf16>
    %24 = vector.shape_cast %23 : vector<1x16x78xbf16> to vector<16x78xbf16>
    %cst_30 = arith.constant dense<0.000000e+00> : vector<8x78xf32>
    %25 = tpu.matmul %22, %24, %cst_30 {dimension_numbers = #tpu.dot_dimension_numbers<[1], [0], [0], [1], [0, 0, 1, 1], [], []>} : vector<8x16xbf16>, vector<16x78xbf16>, vector<8x78xf32> -> vector<8x78xf32>
    %26 = arith.addf %20, %25 : vector<8x78xf32>
    %27 = arith.truncf %26 : vector<8x78xf32> to vector<8x78xbf16>
    %c0_31 = arith.constant 0 : index
    %c0_32 = arith.constant 0 : index
    %c0_33 = arith.constant 0 : index
    %c11_34 = arith.constant 11 : index
    %28 = vector.load %arg3[%c0_31, %c0_32, %c0_33, %c11_34] : memref<1x4x8x128xbf16, #tpu.memory_space<vmem>>, vector<1x1x8x78xbf16>
    %29 = vector.shape_cast %28 : vector<1x1x8x78xbf16> to vector<8x78xbf16>
    %30 = vector.shape_cast %27 : vector<8x78xbf16> to vector<1x1x8x78xbf16>
    tpu.vector_store %arg3[%c0_31, %c0_32, %c0_33, %c11_34], %30 {strides = array<i32>} : memref<1x4x8x128xbf16, #tpu.memory_space<vmem>>, vector<1x1x8x78xbf16>,
    %cst_35 = arith.constant 0.000000e+00 : f32
    %31 = vector.broadcast %cst_35 : f32 to vector<8x78xf32>
    %c1_36 = arith.constant 1 : index
    %c0_37 = arith.constant 0 : index
    %c0_38 = arith.constant 0 : index
    %c0_39 = arith.constant 0 : index
    %32 = vector.load %arg2[%c1_36, %c0_37, %c0_38, %c0_39] : memref<4x4x8x16xbf16, #tpu.memory_space<vmem>>, vector<1x1x8x16xbf16>
    %33 = vector.shape_cast %32 : vector<1x1x8x16xbf16> to vector<8x16xbf16>
    %c0_40 = arith.constant 0 : index
    %c0_41 = arith.constant 0 : index
    %c1_42 = arith.constant 1 : index
    %34 = vector.load %arg1[%c0_40, %c0_41, %c1_42] : memref<1x16x128xbf16, #tpu.memory_space<vmem>>, vector<1x16x78xbf16>
    %35 = vector.shape_cast %34 : vector<1x16x78xbf16> to vector<16x78xbf16>
    %cst_43 = arith.constant dense<0.000000e+00> : vector<8x78xf32>
    %36 = tpu.matmul %33, %35, %cst_43 {dimension_numbers = #tpu.dot_dimension_numbers<[1], [0], [0], [1], [0, 0, 1, 1], [], []>} : vector<8x16xbf16>, vector<16x78xbf16>, vector<8x78xf32> -> vector<8x78xf32>
    %37 = arith.addf %31, %36 : vector<8x78xf32>
    %c1_44 = arith.constant 1 : index
    %c1_45 = arith.constant 1 : index
    %c0_46 = arith.constant 0 : index
    %c0_47 = arith.constant 0 : index
    %38 = vector.load %arg2[%c1_44, %c1_45, %c0_46, %c0_47] : memref<4x4x8x16xbf16, #tpu.memory_space<vmem>>, vector<1x1x8x16xbf16>
    %39 = vector.shape_cast %38 : vector<1x1x8x16xbf16> to vector<8x16xbf16>
    %c0_48 = arith.constant 0 : index
    %c0_49 = arith.constant 0 : index
    %c2_50 = arith.constant 2 : index
    %40 = vector.load %arg1[%c0_48, %c0_49, %c2_50] : memref<1x16x128xbf16, #tpu.memory_space<vmem>>, vector<1x16x78xbf16>
    %41 = vector.shape_cast %40 : vector<1x16x78xbf16> to vector<16x78xbf16>
    %cst_51 = arith.constant dense<0.000000e+00> : vector<8x78xf32>
    %42 = tpu.matmul %39, %41, %cst_51 {dimension_numbers = #tpu.dot_dimension_numbers<[1], [0], [0], [1], [0, 0, 1, 1], [], []>} : vector<8x16xbf16>, vector<16x78xbf16>, vector<8x78xf32> -> vector<8x78xf32>
    %43 = arith.addf %37, %42 : vector<8x78xf32>
    %c1_52 = arith.constant 1 : index
    %c2_53 = arith.constant 2 : index
    %c0_54 = arith.constant 0 : index
    %c0_55 = arith.constant 0 : index
    %44 = vector.load %arg2[%c1_52, %c2_53, %c0_54, %c0_55] : memref<4x4x8x16xbf16, #tpu.memory_space<vmem>>, vector<1x1x8x16xbf16>
    %45 = vector.shape_cast %44 : vector<1x1x8x16xbf16> to vector<8x16xbf16>
    %c0_56 = arith.constant 0 : index
    %c0_57 = arith.constant 0 : index
    %c11_58 = arith.constant 11 : index
    %46 = vector.load %arg1[%c0_56, %c0_57, %c11_58] : memref<1x16x128xbf16, #tpu.memory_space<vmem>>, vector<1x16x78xbf16>
    %47 = vector.shape_cast %46 : vector<1x16x78xbf16> to vector<16x78xbf16>
    %cst_59 = arith.constant dense<0.000000e+00> : vector<8x78xf32>
    %48 = tpu.matmul %45, %47, %cst_59 {dimension_numbers = #tpu.dot_dimension_numbers<[1], [0], [0], [1], [0, 0, 1, 1], [], []>} : vector<8x16xbf16>, vector<16x78xbf16>, vector<8x78xf32> -> vector<8x78xf32>
    %49 = arith.addf %43, %48 : vector<8x78xf32>
    %c1_60 = arith.constant 1 : index
    %c3_61 = arith.constant 3 : index
    %c0_62 = arith.constant 0 : index
    %c0_63 = arith.constant 0 : index
    %50 = vector.load %arg2[%c1_60, %c3_61, %c0_62, %c0_63] : memref<4x4x8x16xbf16, #tpu.memory_space<vmem>>, vector<1x1x8x16xbf16>
    %51 = vector.shape_cast %50 : vector<1x1x8x16xbf16> to vector<8x16xbf16>
    %c0_64 = arith.constant 0 : index
    %c0_65 = arith.constant 0 : index
    %c12 = arith.constant 12 : index
    %52 = vector.load %arg1[%c0_64, %c0_65, %c12] : memref<1x16x128xbf16, #tpu.memory_space<vmem>>, vector<1x16x78xbf16>
    %53 = vector.shape_cast %52 : vector<1x16x78xbf16> to vector<16x78xbf16>
    %cst_66 = arith.constant dense<0.000000e+00> : vector<8x78xf32>
    %54 = tpu.matmul %51, %53, %cst_66 {dimension_numbers = #tpu.dot_dimension_numbers<[1], [0], [0], [1], [0, 0, 1, 1], [], []>} : vector<8x16xbf16>, vector<16x78xbf16>, vector<8x78xf32> -> vector<8x78xf32>
    %55 = arith.addf %49, %54 : vector<8x78xf32>
    %56 = arith.truncf %55 : vector<8x78xf32> to vector<8x78xbf16>
    %c0_67 = arith.constant 0 : index
    %c1_68 = arith.constant 1 : index
    %c0_69 = arith.constant 0 : index
    %c11_70 = arith.constant 11 : index
    %57 = vector.load %arg3[%c0_67, %c1_68, %c0_69, %c11_70] : memref<1x4x8x128xbf16, #tpu.memory_space<vmem>>, vector<1x1x8x78xbf16>
    %58 = vector.shape_cast %57 : vector<1x1x8x78xbf16> to vector<8x78xbf16>
    %59 = vector.shape_cast %56 : vector<8x78xbf16> to vector<1x1x8x78xbf16>
    tpu.vector_store %arg3[%c0_67, %c1_68, %c0_69, %c11_70], %59 {strides = array<i32>} : memref<1x4x8x128xbf16, #tpu.memory_space<vmem>>, vector<1x1x8x78xbf16>,
    %cst_71 = arith.constant 0.000000e+00 : f32
    %60 = vector.broadcast %cst_71 : f32 to vector<8x78xf32>
    %c2_72 = arith.constant 2 : index
    %c0_73 = arith.constant 0 : index
    %c0_74 = arith.constant 0 : index
    %c0_75 = arith.constant 0 : index
    %61 = vector.load %arg2[%c2_72, %c0_73, %c0_74, %c0_75] : memref<4x4x8x16xbf16, #tpu.memory_space<vmem>>, vector<1x1x8x16xbf16>
    %62 = vector.shape_cast %61 : vector<1x1x8x16xbf16> to vector<8x16xbf16>
    %c0_76 = arith.constant 0 : index
    %c0_77 = arith.constant 0 : index
    %c10_78 = arith.constant 10 : index
    %63 = vector.load %arg1[%c0_76, %c0_77, %c10_78] : memref<1x16x128xbf16, #tpu.memory_space<vmem>>, vector<1x16x78xbf16>
    %64 = vector.shape_cast %63 : vector<1x16x78xbf16> to vector<16x78xbf16>
    %cst_79 = arith.constant dense<0.000000e+00> : vector<8x78xf32>
    %65 = tpu.matmul %62, %64, %cst_79 {dimension_numbers = #tpu.dot_dimension_numbers<[1], [0], [0], [1], [0, 0, 1, 1], [], []>} : vector<8x16xbf16>, vector<16x78xbf16>, vector<8x78xf32> -> vector<8x78xf32>
    %66 = arith.addf %60, %65 : vector<8x78xf32>
    %c2_80 = arith.constant 2 : index
    %c1_81 = arith.constant 1 : index
    %c0_82 = arith.constant 0 : index
    %c0_83 = arith.constant 0 : index
    %67 = vector.load %arg2[%c2_80, %c1_81, %c0_82, %c0_83] : memref<4x4x8x16xbf16, #tpu.memory_space<vmem>>, vector<1x1x8x16xbf16>
    %68 = vector.shape_cast %67 : vector<1x1x8x16xbf16> to vector<8x16xbf16>
    %c0_84 = arith.constant 0 : index
    %c0_85 = arith.constant 0 : index
    %c11_86 = arith.constant 11 : index
    %69 = vector.load %arg1[%c0_84, %c0_85, %c11_86] : memref<1x16x128xbf16, #tpu.memory_space<vmem>>, vector<1x16x78xbf16>
    %70 = vector.shape_cast %69 : vector<1x16x78xbf16> to vector<16x78xbf16>
    %cst_87 = arith.constant dense<0.000000e+00> : vector<8x78xf32>
    %71 = tpu.matmul %68, %70, %cst_87 {dimension_numbers = #tpu.dot_dimension_numbers<[1], [0], [0], [1], [0, 0, 1, 1], [], []>} : vector<8x16xbf16>, vector<16x78xbf16>, vector<8x78xf32> -> vector<8x78xf32>
    %72 = arith.addf %66, %71 : vector<8x78xf32>
    %c2_88 = arith.constant 2 : index
    %c2_89 = arith.constant 2 : index
    %c0_90 = arith.constant 0 : index
    %c0_91 = arith.constant 0 : index
    %73 = vector.load %arg2[%c2_88, %c2_89, %c0_90, %c0_91] : memref<4x4x8x16xbf16, #tpu.memory_space<vmem>>, vector<1x1x8x16xbf16>
    %74 = vector.shape_cast %73 : vector<1x1x8x16xbf16> to vector<8x16xbf16>
    %c0_92 = arith.constant 0 : index
    %c0_93 = arith.constant 0 : index
    %c20 = arith.constant 20 : index
    %75 = vector.load %arg1[%c0_92, %c0_93, %c20] : memref<1x16x128xbf16, #tpu.memory_space<vmem>>, vector<1x16x78xbf16>
    %76 = vector.shape_cast %75 : vector<1x16x78xbf16> to vector<16x78xbf16>
    %cst_94 = arith.constant dense<0.000000e+00> : vector<8x78xf32>
    %77 = tpu.matmul %74, %76, %cst_94 {dimension_numbers = #tpu.dot_dimension_numbers<[1], [0], [0], [1], [0, 0, 1, 1], [], []>} : vector<8x16xbf16>, vector<16x78xbf16>, vector<8x78xf32> -> vector<8x78xf32>
    %78 = arith.addf %72, %77 : vector<8x78xf32>
    %c2_95 = arith.constant 2 : index
    %c3_96 = arith.constant 3 : index
    %c0_97 = arith.constant 0 : index
    %c0_98 = arith.constant 0 : index
    %79 = vector.load %arg2[%c2_95, %c3_96, %c0_97, %c0_98] : memref<4x4x8x16xbf16, #tpu.memory_space<vmem>>, vector<1x1x8x16xbf16>
    %80 = vector.shape_cast %79 : vector<1x1x8x16xbf16> to vector<8x16xbf16>
    %c0_99 = arith.constant 0 : index
    %c0_100 = arith.constant 0 : index
    %c21 = arith.constant 21 : index
    %81 = vector.load %arg1[%c0_99, %c0_100, %c21] : memref<1x16x128xbf16, #tpu.memory_space<vmem>>, vector<1x16x78xbf16>
    %82 = vector.shape_cast %81 : vector<1x16x78xbf16> to vector<16x78xbf16>
    %cst_101 = arith.constant dense<0.000000e+00> : vector<8x78xf32>
    %83 = tpu.matmul %80, %82, %cst_101 {dimension_numbers = #tpu.dot_dimension_numbers<[1], [0], [0], [1], [0, 0, 1, 1], [], []>} : vector<8x16xbf16>, vector<16x78xbf16>, vector<8x78xf32> -> vector<8x78xf32>
    %84 = arith.addf %78, %83 : vector<8x78xf32>
    %85 = arith.truncf %84 : vector<8x78xf32> to vector<8x78xbf16>
    %c0_102 = arith.constant 0 : index
    %c2_103 = arith.constant 2 : index
    %c0_104 = arith.constant 0 : index
    %c11_105 = arith.constant 11 : index
    %86 = vector.load %arg3[%c0_102, %c2_103, %c0_104, %c11_105] : memref<1x4x8x128xbf16, #tpu.memory_space<vmem>>, vector<1x1x8x78xbf16>
    %87 = vector.shape_cast %86 : vector<1x1x8x78xbf16> to vector<8x78xbf16>
    %88 = vector.shape_cast %85 : vector<8x78xbf16> to vector<1x1x8x78xbf16>
    tpu.vector_store %arg3[%c0_102, %c2_103, %c0_104, %c11_105], %88 {strides = array<i32>} : memref<1x4x8x128xbf16, #tpu.memory_space<vmem>>, vector<1x1x8x78xbf16>,
    %cst_106 = arith.constant 0.000000e+00 : f32
    %89 = vector.broadcast %cst_106 : f32 to vector<8x78xf32>
    %c3_107 = arith.constant 3 : index
    %c0_108 = arith.constant 0 : index
    %c0_109 = arith.constant 0 : index
    %c0_110 = arith.constant 0 : index
    %90 = vector.load %arg2[%c3_107, %c0_108, %c0_109, %c0_110] : memref<4x4x8x16xbf16, #tpu.memory_space<vmem>>, vector<1x1x8x16xbf16>
    %91 = vector.shape_cast %90 : vector<1x1x8x16xbf16> to vector<8x16xbf16>
    %c0_111 = arith.constant 0 : index
    %c0_112 = arith.constant 0 : index
    %c11_113 = arith.constant 11 : index
    %92 = vector.load %arg1[%c0_111, %c0_112, %c11_113] : memref<1x16x128xbf16, #tpu.memory_space<vmem>>, vector<1x16x78xbf16>
    %93 = vector.shape_cast %92 : vector<1x16x78xbf16> to vector<16x78xbf16>
    %cst_114 = arith.constant dense<0.000000e+00> : vector<8x78xf32>
    %94 = tpu.matmul %91, %93, %cst_114 {dimension_numbers = #tpu.dot_dimension_numbers<[1], [0], [0], [1], [0, 0, 1, 1], [], []>} : vector<8x16xbf16>, vector<16x78xbf16>, vector<8x78xf32> -> vector<8x78xf32>
    %95 = arith.addf %89, %94 : vector<8x78xf32>
    %c3_115 = arith.constant 3 : index
    %c1_116 = arith.constant 1 : index
    %c0_117 = arith.constant 0 : index
    %c0_118 = arith.constant 0 : index
    %96 = vector.load %arg2[%c3_115, %c1_116, %c0_117, %c0_118] : memref<4x4x8x16xbf16, #tpu.memory_space<vmem>>, vector<1x1x8x16xbf16>
    %97 = vector.shape_cast %96 : vector<1x1x8x16xbf16> to vector<8x16xbf16>
    %c0_119 = arith.constant 0 : index
    %c0_120 = arith.constant 0 : index
    %c12_121 = arith.constant 12 : index
    %98 = vector.load %arg1[%c0_119, %c0_120, %c12_121] : memref<1x16x128xbf16, #tpu.memory_space<vmem>>, vector<1x16x78xbf16>
    %99 = vector.shape_cast %98 : vector<1x16x78xbf16> to vector<16x78xbf16>
    %cst_122 = arith.constant dense<0.000000e+00> : vector<8x78xf32>
    %100 = tpu.matmul %97, %99, %cst_122 {dimension_numbers = #tpu.dot_dimension_numbers<[1], [0], [0], [1], [0, 0, 1, 1], [], []>} : vector<8x16xbf16>, vector<16x78xbf16>, vector<8x78xf32> -> vector<8x78xf32>
    %101 = arith.addf %95, %100 : vector<8x78xf32>
    %c3_123 = arith.constant 3 : index
    %c2_124 = arith.constant 2 : index
    %c0_125 = arith.constant 0 : index
    %c0_126 = arith.constant 0 : index
    %102 = vector.load %arg2[%c3_123, %c2_124, %c0_125, %c0_126] : memref<4x4x8x16xbf16, #tpu.memory_space<vmem>>, vector<1x1x8x16xbf16>
    %103 = vector.shape_cast %102 : vector<1x1x8x16xbf16> to vector<8x16xbf16>
    %c0_127 = arith.constant 0 : index
    %c0_128 = arith.constant 0 : index
    %c21_129 = arith.constant 21 : index
    %104 = vector.load %arg1[%c0_127, %c0_128, %c21_129] : memref<1x16x128xbf16, #tpu.memory_space<vmem>>, vector<1x16x78xbf16>
    %105 = vector.shape_cast %104 : vector<1x16x78xbf16> to vector<16x78xbf16>
    %cst_130 = arith.constant dense<0.000000e+00> : vector<8x78xf32>
    %106 = tpu.matmul %103, %105, %cst_130 {dimension_numbers = #tpu.dot_dimension_numbers<[1], [0], [0], [1], [0, 0, 1, 1], [], []>} : vector<8x16xbf16>, vector<16x78xbf16>, vector<8x78xf32> -> vector<8x78xf32>
    %107 = arith.addf %101, %106 : vector<8x78xf32>
    %c3_131 = arith.constant 3 : index
    %c3_132 = arith.constant 3 : index
    %c0_133 = arith.constant 0 : index
    %c0_134 = arith.constant 0 : index
    %108 = vector.load %arg2[%c3_131, %c3_132, %c0_133, %c0_134] : memref<4x4x8x16xbf16, #tpu.memory_space<vmem>>, vector<1x1x8x16xbf16>
    %109 = vector.shape_cast %108 : vector<1x1x8x16xbf16> to vector<8x16xbf16>
    %c0_135 = arith.constant 0 : index
    %c0_136 = arith.constant 0 : index
    %c22 = arith.constant 22 : index
    %110 = vector.load %arg1[%c0_135, %c0_136, %c22] : memref<1x16x128xbf16, #tpu.memory_space<vmem>>, vector<1x16x78xbf16>
    %111 = vector.shape_cast %110 : vector<1x16x78xbf16> to vector<16x78xbf16>
    %cst_137 = arith.constant dense<0.000000e+00> : vector<8x78xf32>
    %112 = tpu.matmul %109, %111, %cst_137 {dimension_numbers = #tpu.dot_dimension_numbers<[1], [0], [0], [1], [0, 0, 1, 1], [], []>} : vector<8x16xbf16>, vector<16x78xbf16>, vector<8x78xf32> -> vector<8x78xf32>
    %113 = arith.addf %107, %112 : vector<8x78xf32>
    %114 = arith.truncf %113 : vector<8x78xf32> to vector<8x78xbf16>
    %c0_138 = arith.constant 0 : index
    %c3_139 = arith.constant 3 : index
    %c0_140 = arith.constant 0 : index
    %c11_141 = arith.constant 11 : index
    %115 = vector.load %arg3[%c0_138, %c3_139, %c0_140, %c11_141] : memref<1x4x8x128xbf16, #tpu.memory_space<vmem>>, vector<1x1x8x78xbf16>
    %116 = vector.shape_cast %115 : vector<1x1x8x78xbf16> to vector<8x78xbf16>
    %117 = vector.shape_cast %114 : vector<8x78xbf16> to vector<1x1x8x78xbf16>
    tpu.vector_store %arg3[%c0_138, %c3_139, %c0_140, %c11_141], %117 {strides = array<i32>} : memref<1x4x8x128xbf16, #tpu.memory_space<vmem>>, vector<1x1x8x78xbf16>,
    return
  }
  func.func @transform_0(%arg0: i32) -> (i32, i32, i32) {
    %c0_i32 = arith.constant 0 : i32
    %c0_i32_0 = arith.constant 0 : i32
    %c0_i32_1 = arith.constant 0 : i32
    return %arg0, %c0_i32, %c0_i32_0 : i32, i32, i32
  }
  func.func @transform_1(%arg0: i32) -> (i32, i32, i32, i32) {
    %c0_i32 = arith.constant 0 : i32
    %c0_i32_0 = arith.constant 0 : i32
    %c0_i32_1 = arith.constant 0 : i32
    %c0_i32_2 = arith.constant 0 : i32
    %c0_i32_3 = arith.constant 0 : i32
    return %c0_i32, %c0_i32_0, %c0_i32_1, %c0_i32_2 : i32, i32, i32, i32
  }
  func.func @transform_2(%arg0: i32) -> (i32, i32, i32, i32) {
    %c0_i32 = arith.constant 0 : i32
    %c0_i32_0 = arith.constant 0 : i32
    %c0_i32_1 = arith.constant 0 : i32
    %c0_i32_2 = arith.constant 0 : i32
    return %arg0, %c0_i32, %c0_i32_0, %c0_i32_1 : i32, i32, i32, i32
  }
}

module attributes {stable_mosaic.version = 11 : i64} {
  func.func @_conv_block2_kernel(%arg0: i32, %arg1: memref<1x8x384xbf16, #tpu.memory_space<vmem>>, %arg2: memref<1x8x384xbf16, #tpu.memory_space<vmem>>, %arg3: memref<9x8x8xbf16, #tpu.memory_space<vmem>>, %arg4: memref<9x8x8xbf16, #tpu.memory_space<vmem>>, %arg5: memref<8x1xf32, #tpu.memory_space<vmem>>, %arg6: memref<8x1xf32, #tpu.memory_space<vmem>>, %arg7: memref<9x8x8xbf16, #tpu.memory_space<vmem>>, %arg8: memref<8x1xf32, #tpu.memory_space<vmem>>, %arg9: memref<8x1xf32, #tpu.memory_space<vmem>>, %arg10: memref<1x286xf32, #tpu.memory_space<vmem>>, %arg11: memref<1x8x384xbf16, #tpu.memory_space<vmem>>, %arg12: memref<8x384xbf16, #tpu.memory_space<vmem>>) attributes {dimension_semantics = [#tpu.dimension_semantics<parallel>], iteration_bounds = array<i64: 2>, scalar_prefetch = 0 : i64, scratch_operands = 1 : i64, tpu.core_type = #tpu.core_type<tc>, window_params = [{transform_indices = @transform_0, window_bounds = array<i64: 1, 8, 384>}, {transform_indices = @transform_1, window_bounds = array<i64: 1, 8, 384>}, {pipeline_mode = #tpu.pipeline_mode<synchronous>, transform_indices = @transform_2, window_bounds = array<i64: 9, 8, 8>}, {pipeline_mode = #tpu.pipeline_mode<synchronous>, transform_indices = @transform_3, window_bounds = array<i64: 9, 8, 8>}, {pipeline_mode = #tpu.pipeline_mode<synchronous>, transform_indices = @transform_4, window_bounds = array<i64: 8, 1>}, {pipeline_mode = #tpu.pipeline_mode<synchronous>, transform_indices = @transform_5, window_bounds = array<i64: 8, 1>}, {pipeline_mode = #tpu.pipeline_mode<synchronous>, transform_indices = @transform_6, window_bounds = array<i64: 9, 8, 8>}, {pipeline_mode = #tpu.pipeline_mode<synchronous>, transform_indices = @transform_7, window_bounds = array<i64: 8, 1>}, {pipeline_mode = #tpu.pipeline_mode<synchronous>, transform_indices = @transform_8, window_bounds = array<i64: 8, 1>}, {pipeline_mode = #tpu.pipeline_mode<synchronous>, transform_indices = @transform_9, window_bounds = array<i64: 1, 286>}, {transform_indices = @transform_10, window_bounds = array<i64: 1, 8, 384>}]} {
    %c0 = arith.constant 0 : index
    %c0_0 = arith.constant 0 : index
    %0 = vector.load %arg10[%c0, %c0_0] : memref<1x286xf32, #tpu.memory_space<vmem>>, vector<1x286xf32>
    %cst = arith.constant 0.000000e+00 : f32
    %1 = vector.broadcast %cst : f32 to vector<8x286xf32>
    %c0_1 = arith.constant 0 : index
    %c0_2 = arith.constant 0 : index
    %c0_3 = arith.constant 0 : index
    %2 = vector.load %arg3[%c0_1, %c0_2, %c0_3] : memref<9x8x8xbf16, #tpu.memory_space<vmem>>, vector<1x8x8xbf16>
    %3 = vector.shape_cast %2 : vector<1x8x8xbf16> to vector<8x8xbf16>
    %c0_4 = arith.constant 0 : index
    %c0_5 = arith.constant 0 : index
    %c0_6 = arith.constant 0 : index
    %4 = vector.load %arg1[%c0_4, %c0_5, %c0_6] : memref<1x8x384xbf16, #tpu.memory_space<vmem>>, vector<1x8x286xbf16>
    %5 = vector.shape_cast %4 : vector<1x8x286xbf16> to vector<8x286xbf16>
    %cst_7 = arith.constant dense<0.000000e+00> : vector<8x286xf32>
    %6 = tpu.matmul %3, %5, %cst_7 {dimension_numbers = #tpu.dot_dimension_numbers<[1], [0], [0], [1], [0, 0, 1, 1], [], []>} : vector<8x8xbf16>, vector<8x286xbf16>, vector<8x286xf32> -> vector<8x286xf32>
    %7 = arith.addf %1, %6 : vector<8x286xf32>
    %c0_8 = arith.constant 0 : index
    %c0_9 = arith.constant 0 : index
    %c0_10 = arith.constant 0 : index
    %8 = vector.load %arg4[%c0_8, %c0_9, %c0_10] : memref<9x8x8xbf16, #tpu.memory_space<vmem>>, vector<1x8x8xbf16>
    %9 = vector.shape_cast %8 : vector<1x8x8xbf16> to vector<8x8xbf16>
    %c0_11 = arith.constant 0 : index
    %c0_12 = arith.constant 0 : index
    %c0_13 = arith.constant 0 : index
    %10 = vector.load %arg2[%c0_11, %c0_12, %c0_13] : memref<1x8x384xbf16, #tpu.memory_space<vmem>>, vector<1x8x286xbf16>
    %11 = vector.shape_cast %10 : vector<1x8x286xbf16> to vector<8x286xbf16>
    %cst_14 = arith.constant dense<0.000000e+00> : vector<8x286xf32>
    %12 = tpu.matmul %9, %11, %cst_14 {dimension_numbers = #tpu.dot_dimension_numbers<[1], [0], [0], [1], [0, 0, 1, 1], [], []>} : vector<8x8xbf16>, vector<8x286xbf16>, vector<8x286xf32> -> vector<8x286xf32>
    %13 = arith.addf %7, %12 : vector<8x286xf32>
    %c1 = arith.constant 1 : index
    %c0_15 = arith.constant 0 : index
    %c0_16 = arith.constant 0 : index
    %14 = vector.load %arg3[%c1, %c0_15, %c0_16] : memref<9x8x8xbf16, #tpu.memory_space<vmem>>, vector<1x8x8xbf16>
    %15 = vector.shape_cast %14 : vector<1x8x8xbf16> to vector<8x8xbf16>
    %c0_17 = arith.constant 0 : index
    %c0_18 = arith.constant 0 : index
    %c1_19 = arith.constant 1 : index
    %16 = vector.load %arg1[%c0_17, %c0_18, %c1_19] : memref<1x8x384xbf16, #tpu.memory_space<vmem>>, vector<1x8x286xbf16>
    %17 = vector.shape_cast %16 : vector<1x8x286xbf16> to vector<8x286xbf16>
    %cst_20 = arith.constant dense<0.000000e+00> : vector<8x286xf32>
    %18 = tpu.matmul %15, %17, %cst_20 {dimension_numbers = #tpu.dot_dimension_numbers<[1], [0], [0], [1], [0, 0, 1, 1], [], []>} : vector<8x8xbf16>, vector<8x286xbf16>, vector<8x286xf32> -> vector<8x286xf32>
    %19 = arith.addf %13, %18 : vector<8x286xf32>
    %c1_21 = arith.constant 1 : index
    %c0_22 = arith.constant 0 : index
    %c0_23 = arith.constant 0 : index
    %20 = vector.load %arg4[%c1_21, %c0_22, %c0_23] : memref<9x8x8xbf16, #tpu.memory_space<vmem>>, vector<1x8x8xbf16>
    %21 = vector.shape_cast %20 : vector<1x8x8xbf16> to vector<8x8xbf16>
    %c0_24 = arith.constant 0 : index
    %c0_25 = arith.constant 0 : index
    %c1_26 = arith.constant 1 : index
    %22 = vector.load %arg2[%c0_24, %c0_25, %c1_26] : memref<1x8x384xbf16, #tpu.memory_space<vmem>>, vector<1x8x286xbf16>
    %23 = vector.shape_cast %22 : vector<1x8x286xbf16> to vector<8x286xbf16>
    %cst_27 = arith.constant dense<0.000000e+00> : vector<8x286xf32>
    %24 = tpu.matmul %21, %23, %cst_27 {dimension_numbers = #tpu.dot_dimension_numbers<[1], [0], [0], [1], [0, 0, 1, 1], [], []>} : vector<8x8xbf16>, vector<8x286xbf16>, vector<8x286xf32> -> vector<8x286xf32>
    %25 = arith.addf %19, %24 : vector<8x286xf32>
    %c2 = arith.constant 2 : index
    %c0_28 = arith.constant 0 : index
    %c0_29 = arith.constant 0 : index
    %26 = vector.load %arg3[%c2, %c0_28, %c0_29] : memref<9x8x8xbf16, #tpu.memory_space<vmem>>, vector<1x8x8xbf16>
    %27 = vector.shape_cast %26 : vector<1x8x8xbf16> to vector<8x8xbf16>
    %c0_30 = arith.constant 0 : index
    %c0_31 = arith.constant 0 : index
    %c2_32 = arith.constant 2 : index
    %28 = vector.load %arg1[%c0_30, %c0_31, %c2_32] : memref<1x8x384xbf16, #tpu.memory_space<vmem>>, vector<1x8x286xbf16>
    %29 = vector.shape_cast %28 : vector<1x8x286xbf16> to vector<8x286xbf16>
    %cst_33 = arith.constant dense<0.000000e+00> : vector<8x286xf32>
    %30 = tpu.matmul %27, %29, %cst_33 {dimension_numbers = #tpu.dot_dimension_numbers<[1], [0], [0], [1], [0, 0, 1, 1], [], []>} : vector<8x8xbf16>, vector<8x286xbf16>, vector<8x286xf32> -> vector<8x286xf32>
    %31 = arith.addf %25, %30 : vector<8x286xf32>
    %c2_34 = arith.constant 2 : index
    %c0_35 = arith.constant 0 : index
    %c0_36 = arith.constant 0 : index
    %32 = vector.load %arg4[%c2_34, %c0_35, %c0_36] : memref<9x8x8xbf16, #tpu.memory_space<vmem>>, vector<1x8x8xbf16>
    %33 = vector.shape_cast %32 : vector<1x8x8xbf16> to vector<8x8xbf16>
    %c0_37 = arith.constant 0 : index
    %c0_38 = arith.constant 0 : index
    %c2_39 = arith.constant 2 : index
    %34 = vector.load %arg2[%c0_37, %c0_38, %c2_39] : memref<1x8x384xbf16, #tpu.memory_space<vmem>>, vector<1x8x286xbf16>
    %35 = vector.shape_cast %34 : vector<1x8x286xbf16> to vector<8x286xbf16>
    %cst_40 = arith.constant dense<0.000000e+00> : vector<8x286xf32>
    %36 = tpu.matmul %33, %35, %cst_40 {dimension_numbers = #tpu.dot_dimension_numbers<[1], [0], [0], [1], [0, 0, 1, 1], [], []>} : vector<8x8xbf16>, vector<8x286xbf16>, vector<8x286xf32> -> vector<8x286xf32>
    %37 = arith.addf %31, %36 : vector<8x286xf32>
    %c3 = arith.constant 3 : index
    %c0_41 = arith.constant 0 : index
    %c0_42 = arith.constant 0 : index
    %38 = vector.load %arg3[%c3, %c0_41, %c0_42] : memref<9x8x8xbf16, #tpu.memory_space<vmem>>, vector<1x8x8xbf16>
    %39 = vector.shape_cast %38 : vector<1x8x8xbf16> to vector<8x8xbf16>
    %c0_43 = arith.constant 0 : index
    %c0_44 = arith.constant 0 : index
    %c18 = arith.constant 18 : index
    %40 = vector.load %arg1[%c0_43, %c0_44, %c18] : memref<1x8x384xbf16, #tpu.memory_space<vmem>>, vector<1x8x286xbf16>
    %41 = vector.shape_cast %40 : vector<1x8x286xbf16> to vector<8x286xbf16>
    %cst_45 = arith.constant dense<0.000000e+00> : vector<8x286xf32>
    %42 = tpu.matmul %39, %41, %cst_45 {dimension_numbers = #tpu.dot_dimension_numbers<[1], [0], [0], [1], [0, 0, 1, 1], [], []>} : vector<8x8xbf16>, vector<8x286xbf16>, vector<8x286xf32> -> vector<8x286xf32>
    %43 = arith.addf %37, %42 : vector<8x286xf32>
    %c3_46 = arith.constant 3 : index
    %c0_47 = arith.constant 0 : index
    %c0_48 = arith.constant 0 : index
    %44 = vector.load %arg4[%c3_46, %c0_47, %c0_48] : memref<9x8x8xbf16, #tpu.memory_space<vmem>>, vector<1x8x8xbf16>
    %45 = vector.shape_cast %44 : vector<1x8x8xbf16> to vector<8x8xbf16>
    %c0_49 = arith.constant 0 : index
    %c0_50 = arith.constant 0 : index
    %c18_51 = arith.constant 18 : index
    %46 = vector.load %arg2[%c0_49, %c0_50, %c18_51] : memref<1x8x384xbf16, #tpu.memory_space<vmem>>, vector<1x8x286xbf16>
    %47 = vector.shape_cast %46 : vector<1x8x286xbf16> to vector<8x286xbf16>
    %cst_52 = arith.constant dense<0.000000e+00> : vector<8x286xf32>
    %48 = tpu.matmul %45, %47, %cst_52 {dimension_numbers = #tpu.dot_dimension_numbers<[1], [0], [0], [1], [0, 0, 1, 1], [], []>} : vector<8x8xbf16>, vector<8x286xbf16>, vector<8x286xf32> -> vector<8x286xf32>
    %49 = arith.addf %43, %48 : vector<8x286xf32>
    %c4 = arith.constant 4 : index
    %c0_53 = arith.constant 0 : index
    %c0_54 = arith.constant 0 : index
    %50 = vector.load %arg3[%c4, %c0_53, %c0_54] : memref<9x8x8xbf16, #tpu.memory_space<vmem>>, vector<1x8x8xbf16>
    %51 = vector.shape_cast %50 : vector<1x8x8xbf16> to vector<8x8xbf16>
    %c0_55 = arith.constant 0 : index
    %c0_56 = arith.constant 0 : index
    %c19 = arith.constant 19 : index
    %52 = vector.load %arg1[%c0_55, %c0_56, %c19] : memref<1x8x384xbf16, #tpu.memory_space<vmem>>, vector<1x8x286xbf16>
    %53 = vector.shape_cast %52 : vector<1x8x286xbf16> to vector<8x286xbf16>
    %cst_57 = arith.constant dense<0.000000e+00> : vector<8x286xf32>
    %54 = tpu.matmul %51, %53, %cst_57 {dimension_numbers = #tpu.dot_dimension_numbers<[1], [0], [0], [1], [0, 0, 1, 1], [], []>} : vector<8x8xbf16>, vector<8x286xbf16>, vector<8x286xf32> -> vector<8x286xf32>
    %55 = arith.addf %49, %54 : vector<8x286xf32>
    %c4_58 = arith.constant 4 : index
    %c0_59 = arith.constant 0 : index
    %c0_60 = arith.constant 0 : index
    %56 = vector.load %arg4[%c4_58, %c0_59, %c0_60] : memref<9x8x8xbf16, #tpu.memory_space<vmem>>, vector<1x8x8xbf16>
    %57 = vector.shape_cast %56 : vector<1x8x8xbf16> to vector<8x8xbf16>
    %c0_61 = arith.constant 0 : index
    %c0_62 = arith.constant 0 : index
    %c19_63 = arith.constant 19 : index
    %58 = vector.load %arg2[%c0_61, %c0_62, %c19_63] : memref<1x8x384xbf16, #tpu.memory_space<vmem>>, vector<1x8x286xbf16>
    %59 = vector.shape_cast %58 : vector<1x8x286xbf16> to vector<8x286xbf16>
    %cst_64 = arith.constant dense<0.000000e+00> : vector<8x286xf32>
    %60 = tpu.matmul %57, %59, %cst_64 {dimension_numbers = #tpu.dot_dimension_numbers<[1], [0], [0], [1], [0, 0, 1, 1], [], []>} : vector<8x8xbf16>, vector<8x286xbf16>, vector<8x286xf32> -> vector<8x286xf32>
    %61 = arith.addf %55, %60 : vector<8x286xf32>
    %c5 = arith.constant 5 : index
    %c0_65 = arith.constant 0 : index
    %c0_66 = arith.constant 0 : index
    %62 = vector.load %arg3[%c5, %c0_65, %c0_66] : memref<9x8x8xbf16, #tpu.memory_space<vmem>>, vector<1x8x8xbf16>
    %63 = vector.shape_cast %62 : vector<1x8x8xbf16> to vector<8x8xbf16>
    %c0_67 = arith.constant 0 : index
    %c0_68 = arith.constant 0 : index
    %c20 = arith.constant 20 : index
    %64 = vector.load %arg1[%c0_67, %c0_68, %c20] : memref<1x8x384xbf16, #tpu.memory_space<vmem>>, vector<1x8x286xbf16>
    %65 = vector.shape_cast %64 : vector<1x8x286xbf16> to vector<8x286xbf16>
    %cst_69 = arith.constant dense<0.000000e+00> : vector<8x286xf32>
    %66 = tpu.matmul %63, %65, %cst_69 {dimension_numbers = #tpu.dot_dimension_numbers<[1], [0], [0], [1], [0, 0, 1, 1], [], []>} : vector<8x8xbf16>, vector<8x286xbf16>, vector<8x286xf32> -> vector<8x286xf32>
    %67 = arith.addf %61, %66 : vector<8x286xf32>
    %c5_70 = arith.constant 5 : index
    %c0_71 = arith.constant 0 : index
    %c0_72 = arith.constant 0 : index
    %68 = vector.load %arg4[%c5_70, %c0_71, %c0_72] : memref<9x8x8xbf16, #tpu.memory_space<vmem>>, vector<1x8x8xbf16>
    %69 = vector.shape_cast %68 : vector<1x8x8xbf16> to vector<8x8xbf16>
    %c0_73 = arith.constant 0 : index
    %c0_74 = arith.constant 0 : index
    %c20_75 = arith.constant 20 : index
    %70 = vector.load %arg2[%c0_73, %c0_74, %c20_75] : memref<1x8x384xbf16, #tpu.memory_space<vmem>>, vector<1x8x286xbf16>
    %71 = vector.shape_cast %70 : vector<1x8x286xbf16> to vector<8x286xbf16>
    %cst_76 = arith.constant dense<0.000000e+00> : vector<8x286xf32>
    %72 = tpu.matmul %69, %71, %cst_76 {dimension_numbers = #tpu.dot_dimension_numbers<[1], [0], [0], [1], [0, 0, 1, 1], [], []>} : vector<8x8xbf16>, vector<8x286xbf16>, vector<8x286xf32> -> vector<8x286xf32>
    %73 = arith.addf %67, %72 : vector<8x286xf32>
    %c6 = arith.constant 6 : index
    %c0_77 = arith.constant 0 : index
    %c0_78 = arith.constant 0 : index
    %74 = vector.load %arg3[%c6, %c0_77, %c0_78] : memref<9x8x8xbf16, #tpu.memory_space<vmem>>, vector<1x8x8xbf16>
    %75 = vector.shape_cast %74 : vector<1x8x8xbf16> to vector<8x8xbf16>
    %c0_79 = arith.constant 0 : index
    %c0_80 = arith.constant 0 : index
    %c36 = arith.constant 36 : index
    %76 = vector.load %arg1[%c0_79, %c0_80, %c36] : memref<1x8x384xbf16, #tpu.memory_space<vmem>>, vector<1x8x286xbf16>
    %77 = vector.shape_cast %76 : vector<1x8x286xbf16> to vector<8x286xbf16>
    %cst_81 = arith.constant dense<0.000000e+00> : vector<8x286xf32>
    %78 = tpu.matmul %75, %77, %cst_81 {dimension_numbers = #tpu.dot_dimension_numbers<[1], [0], [0], [1], [0, 0, 1, 1], [], []>} : vector<8x8xbf16>, vector<8x286xbf16>, vector<8x286xf32> -> vector<8x286xf32>
    %79 = arith.addf %73, %78 : vector<8x286xf32>
    %c6_82 = arith.constant 6 : index
    %c0_83 = arith.constant 0 : index
    %c0_84 = arith.constant 0 : index
    %80 = vector.load %arg4[%c6_82, %c0_83, %c0_84] : memref<9x8x8xbf16, #tpu.memory_space<vmem>>, vector<1x8x8xbf16>
    %81 = vector.shape_cast %80 : vector<1x8x8xbf16> to vector<8x8xbf16>
    %c0_85 = arith.constant 0 : index
    %c0_86 = arith.constant 0 : index
    %c36_87 = arith.constant 36 : index
    %82 = vector.load %arg2[%c0_85, %c0_86, %c36_87] : memref<1x8x384xbf16, #tpu.memory_space<vmem>>, vector<1x8x286xbf16>
    %83 = vector.shape_cast %82 : vector<1x8x286xbf16> to vector<8x286xbf16>
    %cst_88 = arith.constant dense<0.000000e+00> : vector<8x286xf32>
    %84 = tpu.matmul %81, %83, %cst_88 {dimension_numbers = #tpu.dot_dimension_numbers<[1], [0], [0], [1], [0, 0, 1, 1], [], []>} : vector<8x8xbf16>, vector<8x286xbf16>, vector<8x286xf32> -> vector<8x286xf32>
    %85 = arith.addf %79, %84 : vector<8x286xf32>
    %c7 = arith.constant 7 : index
    %c0_89 = arith.constant 0 : index
    %c0_90 = arith.constant 0 : index
    %86 = vector.load %arg3[%c7, %c0_89, %c0_90] : memref<9x8x8xbf16, #tpu.memory_space<vmem>>, vector<1x8x8xbf16>
    %87 = vector.shape_cast %86 : vector<1x8x8xbf16> to vector<8x8xbf16>
    %c0_91 = arith.constant 0 : index
    %c0_92 = arith.constant 0 : index
    %c37 = arith.constant 37 : index
    %88 = vector.load %arg1[%c0_91, %c0_92, %c37] : memref<1x8x384xbf16, #tpu.memory_space<vmem>>, vector<1x8x286xbf16>
    %89 = vector.shape_cast %88 : vector<1x8x286xbf16> to vector<8x286xbf16>
    %cst_93 = arith.constant dense<0.000000e+00> : vector<8x286xf32>
    %90 = tpu.matmul %87, %89, %cst_93 {dimension_numbers = #tpu.dot_dimension_numbers<[1], [0], [0], [1], [0, 0, 1, 1], [], []>} : vector<8x8xbf16>, vector<8x286xbf16>, vector<8x286xf32> -> vector<8x286xf32>
    %91 = arith.addf %85, %90 : vector<8x286xf32>
    %c7_94 = arith.constant 7 : index
    %c0_95 = arith.constant 0 : index
    %c0_96 = arith.constant 0 : index
    %92 = vector.load %arg4[%c7_94, %c0_95, %c0_96] : memref<9x8x8xbf16, #tpu.memory_space<vmem>>, vector<1x8x8xbf16>
    %93 = vector.shape_cast %92 : vector<1x8x8xbf16> to vector<8x8xbf16>
    %c0_97 = arith.constant 0 : index
    %c0_98 = arith.constant 0 : index
    %c37_99 = arith.constant 37 : index
    %94 = vector.load %arg2[%c0_97, %c0_98, %c37_99] : memref<1x8x384xbf16, #tpu.memory_space<vmem>>, vector<1x8x286xbf16>
    %95 = vector.shape_cast %94 : vector<1x8x286xbf16> to vector<8x286xbf16>
    %cst_100 = arith.constant dense<0.000000e+00> : vector<8x286xf32>
    %96 = tpu.matmul %93, %95, %cst_100 {dimension_numbers = #tpu.dot_dimension_numbers<[1], [0], [0], [1], [0, 0, 1, 1], [], []>} : vector<8x8xbf16>, vector<8x286xbf16>, vector<8x286xf32> -> vector<8x286xf32>
    %97 = arith.addf %91, %96 : vector<8x286xf32>
    %c8 = arith.constant 8 : index
    %c0_101 = arith.constant 0 : index
    %c0_102 = arith.constant 0 : index
    %98 = vector.load %arg3[%c8, %c0_101, %c0_102] : memref<9x8x8xbf16, #tpu.memory_space<vmem>>, vector<1x8x8xbf16>
    %99 = vector.shape_cast %98 : vector<1x8x8xbf16> to vector<8x8xbf16>
    %c0_103 = arith.constant 0 : index
    %c0_104 = arith.constant 0 : index
    %c38 = arith.constant 38 : index
    %100 = vector.load %arg1[%c0_103, %c0_104, %c38] : memref<1x8x384xbf16, #tpu.memory_space<vmem>>, vector<1x8x286xbf16>
    %101 = vector.shape_cast %100 : vector<1x8x286xbf16> to vector<8x286xbf16>
    %cst_105 = arith.constant dense<0.000000e+00> : vector<8x286xf32>
    %102 = tpu.matmul %99, %101, %cst_105 {dimension_numbers = #tpu.dot_dimension_numbers<[1], [0], [0], [1], [0, 0, 1, 1], [], []>} : vector<8x8xbf16>, vector<8x286xbf16>, vector<8x286xf32> -> vector<8x286xf32>
    %103 = arith.addf %97, %102 : vector<8x286xf32>
    %c8_106 = arith.constant 8 : index
    %c0_107 = arith.constant 0 : index
    %c0_108 = arith.constant 0 : index
    %104 = vector.load %arg4[%c8_106, %c0_107, %c0_108] : memref<9x8x8xbf16, #tpu.memory_space<vmem>>, vector<1x8x8xbf16>
    %105 = vector.shape_cast %104 : vector<1x8x8xbf16> to vector<8x8xbf16>
    %c0_109 = arith.constant 0 : index
    %c0_110 = arith.constant 0 : index
    %c38_111 = arith.constant 38 : index
    %106 = vector.load %arg2[%c0_109, %c0_110, %c38_111] : memref<1x8x384xbf16, #tpu.memory_space<vmem>>, vector<1x8x286xbf16>
    %107 = vector.shape_cast %106 : vector<1x8x286xbf16> to vector<8x286xbf16>
    %cst_112 = arith.constant dense<0.000000e+00> : vector<8x286xf32>
    %108 = tpu.matmul %105, %107, %cst_112 {dimension_numbers = #tpu.dot_dimension_numbers<[1], [0], [0], [1], [0, 0, 1, 1], [], []>} : vector<8x8xbf16>, vector<8x286xbf16>, vector<8x286xf32> -> vector<8x286xf32>
    %109 = arith.addf %103, %108 : vector<8x286xf32>
    %c0_113 = arith.constant 0 : index
    %c0_114 = arith.constant 0 : index
    %110 = vector.load %arg5[%c0_113, %c0_114] : memref<8x1xf32, #tpu.memory_space<vmem>>, vector<8x1xf32>
    %111 = vector.broadcast %110 : vector<8x1xf32> to vector<8x286xf32>
    %112 = arith.mulf %109, %111 : vector<8x286xf32>
    %c0_115 = arith.constant 0 : index
    %c0_116 = arith.constant 0 : index
    %113 = vector.load %arg6[%c0_115, %c0_116] : memref<8x1xf32, #tpu.memory_space<vmem>>, vector<8x1xf32>
    %114 = vector.broadcast %113 : vector<8x1xf32> to vector<8x286xf32>
    %115 = arith.addf %112, %114 : vector<8x286xf32>
    %cst_117 = arith.constant 0.000000e+00 : f32
    %116 = vector.broadcast %cst_117 : f32 to vector<8x286xf32>
    %117 = arith.maximumf %115, %116 : vector<8x286xf32>
    %118 = vector.broadcast %0 : vector<1x286xf32> to vector<8x286xf32>
    %119 = arith.mulf %117, %118 : vector<8x286xf32>
    %cst_118 = arith.constant 0.000000e+00 : bf16
    %120 = vector.broadcast %cst_118 : bf16 to vector<8x384xbf16>
    %c0_119 = arith.constant 0 : index
    %c0_120 = arith.constant 0 : index
    %121 = vector.load %arg12[%c0_119, %c0_120] : memref<8x384xbf16, #tpu.memory_space<vmem>>, vector<8x384xbf16>
    tpu.vector_store %arg12[%c0_119, %c0_120], %120 {strides = array<i32>} : memref<8x384xbf16, #tpu.memory_space<vmem>>, vector<8x384xbf16>,
    %122 = arith.truncf %119 : vector<8x286xf32> to vector<8x286xbf16>
    %c0_121 = arith.constant 0 : index
    %c19_122 = arith.constant 19 : index
    %123 = vector.load %arg12[%c0_121, %c19_122] : memref<8x384xbf16, #tpu.memory_space<vmem>>, vector<8x286xbf16>
    tpu.vector_store %arg12[%c0_121, %c19_122], %122 {strides = array<i32>} : memref<8x384xbf16, #tpu.memory_space<vmem>>, vector<8x286xbf16>,
    %cst_123 = arith.constant 0.000000e+00 : f32
    %124 = vector.broadcast %cst_123 : f32 to vector<8x286xf32>
    %c0_124 = arith.constant 0 : index
    %c0_125 = arith.constant 0 : index
    %c0_126 = arith.constant 0 : index
    %125 = vector.load %arg7[%c0_124, %c0_125, %c0_126] : memref<9x8x8xbf16, #tpu.memory_space<vmem>>, vector<1x8x8xbf16>
    %126 = vector.shape_cast %125 : vector<1x8x8xbf16> to vector<8x8xbf16>
    %c0_127 = arith.constant 0 : index
    %c0_128 = arith.constant 0 : index
    %127 = vector.load %arg12[%c0_127, %c0_128] : memref<8x384xbf16, #tpu.memory_space<vmem>>, vector<8x286xbf16>
    %cst_129 = arith.constant dense<0.000000e+00> : vector<8x286xf32>
    %128 = tpu.matmul %126, %127, %cst_129 {dimension_numbers = #tpu.dot_dimension_numbers<[1], [0], [0], [1], [0, 0, 1, 1], [], []>} : vector<8x8xbf16>, vector<8x286xbf16>, vector<8x286xf32> -> vector<8x286xf32>
    %129 = arith.addf %124, %128 : vector<8x286xf32>
    %c1_130 = arith.constant 1 : index
    %c0_131 = arith.constant 0 : index
    %c0_132 = arith.constant 0 : index
    %130 = vector.load %arg7[%c1_130, %c0_131, %c0_132] : memref<9x8x8xbf16, #tpu.memory_space<vmem>>, vector<1x8x8xbf16>
    %131 = vector.shape_cast %130 : vector<1x8x8xbf16> to vector<8x8xbf16>
    %c0_133 = arith.constant 0 : index
    %c1_134 = arith.constant 1 : index
    %132 = vector.load %arg12[%c0_133, %c1_134] : memref<8x384xbf16, #tpu.memory_space<vmem>>, vector<8x286xbf16>
    %cst_135 = arith.constant dense<0.000000e+00> : vector<8x286xf32>
    %133 = tpu.matmul %131, %132, %cst_135 {dimension_numbers = #tpu.dot_dimension_numbers<[1], [0], [0], [1], [0, 0, 1, 1], [], []>} : vector<8x8xbf16>, vector<8x286xbf16>, vector<8x286xf32> -> vector<8x286xf32>
    %134 = arith.addf %129, %133 : vector<8x286xf32>
    %c2_136 = arith.constant 2 : index
    %c0_137 = arith.constant 0 : index
    %c0_138 = arith.constant 0 : index
    %135 = vector.load %arg7[%c2_136, %c0_137, %c0_138] : memref<9x8x8xbf16, #tpu.memory_space<vmem>>, vector<1x8x8xbf16>
    %136 = vector.shape_cast %135 : vector<1x8x8xbf16> to vector<8x8xbf16>
    %c0_139 = arith.constant 0 : index
    %c2_140 = arith.constant 2 : index
    %137 = vector.load %arg12[%c0_139, %c2_140] : memref<8x384xbf16, #tpu.memory_space<vmem>>, vector<8x286xbf16>
    %cst_141 = arith.constant dense<0.000000e+00> : vector<8x286xf32>
    %138 = tpu.matmul %136, %137, %cst_141 {dimension_numbers = #tpu.dot_dimension_numbers<[1], [0], [0], [1], [0, 0, 1, 1], [], []>} : vector<8x8xbf16>, vector<8x286xbf16>, vector<8x286xf32> -> vector<8x286xf32>
    %139 = arith.addf %134, %138 : vector<8x286xf32>
    %c3_142 = arith.constant 3 : index
    %c0_143 = arith.constant 0 : index
    %c0_144 = arith.constant 0 : index
    %140 = vector.load %arg7[%c3_142, %c0_143, %c0_144] : memref<9x8x8xbf16, #tpu.memory_space<vmem>>, vector<1x8x8xbf16>
    %141 = vector.shape_cast %140 : vector<1x8x8xbf16> to vector<8x8xbf16>
    %c0_145 = arith.constant 0 : index
    %c18_146 = arith.constant 18 : index
    %142 = vector.load %arg12[%c0_145, %c18_146] : memref<8x384xbf16, #tpu.memory_space<vmem>>, vector<8x286xbf16>
    %cst_147 = arith.constant dense<0.000000e+00> : vector<8x286xf32>
    %143 = tpu.matmul %141, %142, %cst_147 {dimension_numbers = #tpu.dot_dimension_numbers<[1], [0], [0], [1], [0, 0, 1, 1], [], []>} : vector<8x8xbf16>, vector<8x286xbf16>, vector<8x286xf32> -> vector<8x286xf32>
    %144 = arith.addf %139, %143 : vector<8x286xf32>
    %c4_148 = arith.constant 4 : index
    %c0_149 = arith.constant 0 : index
    %c0_150 = arith.constant 0 : index
    %145 = vector.load %arg7[%c4_148, %c0_149, %c0_150] : memref<9x8x8xbf16, #tpu.memory_space<vmem>>, vector<1x8x8xbf16>
    %146 = vector.shape_cast %145 : vector<1x8x8xbf16> to vector<8x8xbf16>
    %c0_151 = arith.constant 0 : index
    %c19_152 = arith.constant 19 : index
    %147 = vector.load %arg12[%c0_151, %c19_152] : memref<8x384xbf16, #tpu.memory_space<vmem>>, vector<8x286xbf16>
    %cst_153 = arith.constant dense<0.000000e+00> : vector<8x286xf32>
    %148 = tpu.matmul %146, %147, %cst_153 {dimension_numbers = #tpu.dot_dimension_numbers<[1], [0], [0], [1], [0, 0, 1, 1], [], []>} : vector<8x8xbf16>, vector<8x286xbf16>, vector<8x286xf32> -> vector<8x286xf32>
    %149 = arith.addf %144, %148 : vector<8x286xf32>
    %c5_154 = arith.constant 5 : index
    %c0_155 = arith.constant 0 : index
    %c0_156 = arith.constant 0 : index
    %150 = vector.load %arg7[%c5_154, %c0_155, %c0_156] : memref<9x8x8xbf16, #tpu.memory_space<vmem>>, vector<1x8x8xbf16>
    %151 = vector.shape_cast %150 : vector<1x8x8xbf16> to vector<8x8xbf16>
    %c0_157 = arith.constant 0 : index
    %c20_158 = arith.constant 20 : index
    %152 = vector.load %arg12[%c0_157, %c20_158] : memref<8x384xbf16, #tpu.memory_space<vmem>>, vector<8x286xbf16>
    %cst_159 = arith.constant dense<0.000000e+00> : vector<8x286xf32>
    %153 = tpu.matmul %151, %152, %cst_159 {dimension_numbers = #tpu.dot_dimension_numbers<[1], [0], [0], [1], [0, 0, 1, 1], [], []>} : vector<8x8xbf16>, vector<8x286xbf16>, vector<8x286xf32> -> vector<8x286xf32>
    %154 = arith.addf %149, %153 : vector<8x286xf32>
    %c6_160 = arith.constant 6 : index
    %c0_161 = arith.constant 0 : index
    %c0_162 = arith.constant 0 : index
    %155 = vector.load %arg7[%c6_160, %c0_161, %c0_162] : memref<9x8x8xbf16, #tpu.memory_space<vmem>>, vector<1x8x8xbf16>
    %156 = vector.shape_cast %155 : vector<1x8x8xbf16> to vector<8x8xbf16>
    %c0_163 = arith.constant 0 : index
    %c36_164 = arith.constant 36 : index
    %157 = vector.load %arg12[%c0_163, %c36_164] : memref<8x384xbf16, #tpu.memory_space<vmem>>, vector<8x286xbf16>
    %cst_165 = arith.constant dense<0.000000e+00> : vector<8x286xf32>
    %158 = tpu.matmul %156, %157, %cst_165 {dimension_numbers = #tpu.dot_dimension_numbers<[1], [0], [0], [1], [0, 0, 1, 1], [], []>} : vector<8x8xbf16>, vector<8x286xbf16>, vector<8x286xf32> -> vector<8x286xf32>
    %159 = arith.addf %154, %158 : vector<8x286xf32>
    %c7_166 = arith.constant 7 : index
    %c0_167 = arith.constant 0 : index
    %c0_168 = arith.constant 0 : index
    %160 = vector.load %arg7[%c7_166, %c0_167, %c0_168] : memref<9x8x8xbf16, #tpu.memory_space<vmem>>, vector<1x8x8xbf16>
    %161 = vector.shape_cast %160 : vector<1x8x8xbf16> to vector<8x8xbf16>
    %c0_169 = arith.constant 0 : index
    %c37_170 = arith.constant 37 : index
    %162 = vector.load %arg12[%c0_169, %c37_170] : memref<8x384xbf16, #tpu.memory_space<vmem>>, vector<8x286xbf16>
    %cst_171 = arith.constant dense<0.000000e+00> : vector<8x286xf32>
    %163 = tpu.matmul %161, %162, %cst_171 {dimension_numbers = #tpu.dot_dimension_numbers<[1], [0], [0], [1], [0, 0, 1, 1], [], []>} : vector<8x8xbf16>, vector<8x286xbf16>, vector<8x286xf32> -> vector<8x286xf32>
    %164 = arith.addf %159, %163 : vector<8x286xf32>
    %c8_172 = arith.constant 8 : index
    %c0_173 = arith.constant 0 : index
    %c0_174 = arith.constant 0 : index
    %165 = vector.load %arg7[%c8_172, %c0_173, %c0_174] : memref<9x8x8xbf16, #tpu.memory_space<vmem>>, vector<1x8x8xbf16>
    %166 = vector.shape_cast %165 : vector<1x8x8xbf16> to vector<8x8xbf16>
    %c0_175 = arith.constant 0 : index
    %c38_176 = arith.constant 38 : index
    %167 = vector.load %arg12[%c0_175, %c38_176] : memref<8x384xbf16, #tpu.memory_space<vmem>>, vector<8x286xbf16>
    %cst_177 = arith.constant dense<0.000000e+00> : vector<8x286xf32>
    %168 = tpu.matmul %166, %167, %cst_177 {dimension_numbers = #tpu.dot_dimension_numbers<[1], [0], [0], [1], [0, 0, 1, 1], [], []>} : vector<8x8xbf16>, vector<8x286xbf16>, vector<8x286xf32> -> vector<8x286xf32>
    %169 = arith.addf %164, %168 : vector<8x286xf32>
    %c0_178 = arith.constant 0 : index
    %c0_179 = arith.constant 0 : index
    %170 = vector.load %arg8[%c0_178, %c0_179] : memref<8x1xf32, #tpu.memory_space<vmem>>, vector<8x1xf32>
    %171 = vector.broadcast %170 : vector<8x1xf32> to vector<8x286xf32>
    %172 = arith.mulf %169, %171 : vector<8x286xf32>
    %c0_180 = arith.constant 0 : index
    %c0_181 = arith.constant 0 : index
    %173 = vector.load %arg9[%c0_180, %c0_181] : memref<8x1xf32, #tpu.memory_space<vmem>>, vector<8x1xf32>
    %174 = vector.broadcast %173 : vector<8x1xf32> to vector<8x286xf32>
    %175 = arith.addf %172, %174 : vector<8x286xf32>
    %cst_182 = arith.constant 0.000000e+00 : f32
    %176 = vector.broadcast %cst_182 : f32 to vector<8x286xf32>
    %177 = arith.maximumf %175, %176 : vector<8x286xf32>
    %178 = vector.broadcast %0 : vector<1x286xf32> to vector<8x286xf32>
    %179 = arith.mulf %177, %178 : vector<8x286xf32>
    %cst_183 = arith.constant 0.000000e+00 : bf16
    %180 = vector.broadcast %cst_183 : bf16 to vector<1x8x384xbf16>
    %c0_184 = arith.constant 0 : index
    %c0_185 = arith.constant 0 : index
    %c0_186 = arith.constant 0 : index
    %181 = vector.load %arg11[%c0_184, %c0_185, %c0_186] : memref<1x8x384xbf16, #tpu.memory_space<vmem>>, vector<1x8x384xbf16>
    tpu.vector_store %arg11[%c0_184, %c0_185, %c0_186], %180 {strides = array<i32>} : memref<1x8x384xbf16, #tpu.memory_space<vmem>>, vector<1x8x384xbf16>,
    %182 = arith.truncf %179 : vector<8x286xf32> to vector<8x286xbf16>
    %c0_187 = arith.constant 0 : index
    %c0_188 = arith.constant 0 : index
    %c19_189 = arith.constant 19 : index
    %183 = vector.load %arg11[%c0_187, %c0_188, %c19_189] : memref<1x8x384xbf16, #tpu.memory_space<vmem>>, vector<1x8x286xbf16>
    %184 = vector.shape_cast %183 : vector<1x8x286xbf16> to vector<8x286xbf16>
    %185 = vector.shape_cast %182 : vector<8x286xbf16> to vector<1x8x286xbf16>
    tpu.vector_store %arg11[%c0_187, %c0_188, %c19_189], %185 {strides = array<i32>} : memref<1x8x384xbf16, #tpu.memory_space<vmem>>, vector<1x8x286xbf16>,
    return
  }
  func.func @transform_0(%arg0: i32) -> (i32, i32, i32) {
    %c0_i32 = arith.constant 0 : i32
    %c0_i32_0 = arith.constant 0 : i32
    %c0_i32_1 = arith.constant 0 : i32
    return %arg0, %c0_i32, %c0_i32_0 : i32, i32, i32
  }
  func.func @transform_1(%arg0: i32) -> (i32, i32, i32) {
    %c0_i32 = arith.constant 0 : i32
    %c0_i32_0 = arith.constant 0 : i32
    %c0_i32_1 = arith.constant 0 : i32
    return %arg0, %c0_i32, %c0_i32_0 : i32, i32, i32
  }
  func.func @transform_2(%arg0: i32) -> (i32, i32, i32) {
    %c0_i32 = arith.constant 0 : i32
    %c0_i32_0 = arith.constant 0 : i32
    %c0_i32_1 = arith.constant 0 : i32
    %c0_i32_2 = arith.constant 0 : i32
    return %c0_i32, %c0_i32_0, %c0_i32_1 : i32, i32, i32
  }
  func.func @transform_3(%arg0: i32) -> (i32, i32, i32) {
    %c0_i32 = arith.constant 0 : i32
    %c0_i32_0 = arith.constant 0 : i32
    %c0_i32_1 = arith.constant 0 : i32
    %c0_i32_2 = arith.constant 0 : i32
    return %c0_i32, %c0_i32_0, %c0_i32_1 : i32, i32, i32
  }
  func.func @transform_4(%arg0: i32) -> (i32, i32) {
    %c0_i32 = arith.constant 0 : i32
    %c0_i32_0 = arith.constant 0 : i32
    %c0_i32_1 = arith.constant 0 : i32
    return %c0_i32, %c0_i32_0 : i32, i32
  }
  func.func @transform_5(%arg0: i32) -> (i32, i32) {
    %c0_i32 = arith.constant 0 : i32
    %c0_i32_0 = arith.constant 0 : i32
    %c0_i32_1 = arith.constant 0 : i32
    return %c0_i32, %c0_i32_0 : i32, i32
  }
  func.func @transform_6(%arg0: i32) -> (i32, i32, i32) {
    %c0_i32 = arith.constant 0 : i32
    %c0_i32_0 = arith.constant 0 : i32
    %c0_i32_1 = arith.constant 0 : i32
    %c0_i32_2 = arith.constant 0 : i32
    return %c0_i32, %c0_i32_0, %c0_i32_1 : i32, i32, i32
  }
  func.func @transform_7(%arg0: i32) -> (i32, i32) {
    %c0_i32 = arith.constant 0 : i32
    %c0_i32_0 = arith.constant 0 : i32
    %c0_i32_1 = arith.constant 0 : i32
    return %c0_i32, %c0_i32_0 : i32, i32
  }
  func.func @transform_8(%arg0: i32) -> (i32, i32) {
    %c0_i32 = arith.constant 0 : i32
    %c0_i32_0 = arith.constant 0 : i32
    %c0_i32_1 = arith.constant 0 : i32
    return %c0_i32, %c0_i32_0 : i32, i32
  }
  func.func @transform_9(%arg0: i32) -> (i32, i32) {
    %c0_i32 = arith.constant 0 : i32
    %c0_i32_0 = arith.constant 0 : i32
    %c0_i32_1 = arith.constant 0 : i32
    return %c0_i32, %c0_i32_0 : i32, i32
  }
  func.func @transform_10(%arg0: i32) -> (i32, i32, i32) {
    %c0_i32 = arith.constant 0 : i32
    %c0_i32_0 = arith.constant 0 : i32
    %c0_i32_1 = arith.constant 0 : i32
    return %arg0, %c0_i32, %c0_i32_0 : i32, i32, i32
  }
}

module attributes {stable_mosaic.version = 11 : i64} {
  func.func @_conv_last_kernel(%arg0: i32, %arg1: memref<1x8x384xbf16, #tpu.memory_space<vmem>>, %arg2: memref<9x1x8xbf16, #tpu.memory_space<vmem>>, %arg3: memref<1x1xf32, #tpu.memory_space<vmem>>, %arg4: memref<1x1x384xf32, #tpu.memory_space<vmem>>, %arg5: memref<1x286xf32, #tpu.memory_space<vmem>>, %arg6: memref<1x1x384xf32, #tpu.memory_space<vmem>>) attributes {dimension_semantics = [#tpu.dimension_semantics<parallel>], iteration_bounds = array<i64: 2>, scalar_prefetch = 0 : i64, scratch_operands = 0 : i64, tpu.core_type = #tpu.core_type<tc>, window_params = [{transform_indices = @transform_0, window_bounds = array<i64: 1, 8, 384>}, {pipeline_mode = #tpu.pipeline_mode<synchronous>, transform_indices = @transform_1, window_bounds = array<i64: 9, 1, 8>}, {pipeline_mode = #tpu.pipeline_mode<synchronous>, transform_indices = @transform_2, window_bounds = array<i64: 1, 1>}, {transform_indices = @transform_3, window_bounds = array<i64: 1, 1, 384>}, {pipeline_mode = #tpu.pipeline_mode<synchronous>, transform_indices = @transform_4, window_bounds = array<i64: 1, 286>}, {transform_indices = @transform_5, window_bounds = array<i64: 1, 1, 384>}]} {
    %cst = arith.constant 0.000000e+00 : f32
    %0 = vector.broadcast %cst : f32 to vector<1x286xf32>
    %c0 = arith.constant 0 : index
    %c0_0 = arith.constant 0 : index
    %c0_1 = arith.constant 0 : index
    %1 = vector.load %arg2[%c0, %c0_0, %c0_1] : memref<9x1x8xbf16, #tpu.memory_space<vmem>>, vector<1x1x8xbf16>
    %2 = vector.shape_cast %1 : vector<1x1x8xbf16> to vector<1x8xbf16>
    %c0_2 = arith.constant 0 : index
    %c0_3 = arith.constant 0 : index
    %c0_4 = arith.constant 0 : index
    %3 = vector.load %arg1[%c0_2, %c0_3, %c0_4] : memref<1x8x384xbf16, #tpu.memory_space<vmem>>, vector<1x8x286xbf16>
    %4 = vector.shape_cast %3 : vector<1x8x286xbf16> to vector<8x286xbf16>
    %cst_5 = arith.constant dense<0.000000e+00> : vector<1x286xf32>
    %5 = tpu.matmul %2, %4, %cst_5 {dimension_numbers = #tpu.dot_dimension_numbers<[1], [0], [0], [1], [0, 0, 1, 1], [], []>} : vector<1x8xbf16>, vector<8x286xbf16>, vector<1x286xf32> -> vector<1x286xf32>
    %6 = arith.addf %0, %5 : vector<1x286xf32>
    %c1 = arith.constant 1 : index
    %c0_6 = arith.constant 0 : index
    %c0_7 = arith.constant 0 : index
    %7 = vector.load %arg2[%c1, %c0_6, %c0_7] : memref<9x1x8xbf16, #tpu.memory_space<vmem>>, vector<1x1x8xbf16>
    %8 = vector.shape_cast %7 : vector<1x1x8xbf16> to vector<1x8xbf16>
    %c0_8 = arith.constant 0 : index
    %c0_9 = arith.constant 0 : index
    %c1_10 = arith.constant 1 : index
    %9 = vector.load %arg1[%c0_8, %c0_9, %c1_10] : memref<1x8x384xbf16, #tpu.memory_space<vmem>>, vector<1x8x286xbf16>
    %10 = vector.shape_cast %9 : vector<1x8x286xbf16> to vector<8x286xbf16>
    %cst_11 = arith.constant dense<0.000000e+00> : vector<1x286xf32>
    %11 = tpu.matmul %8, %10, %cst_11 {dimension_numbers = #tpu.dot_dimension_numbers<[1], [0], [0], [1], [0, 0, 1, 1], [], []>} : vector<1x8xbf16>, vector<8x286xbf16>, vector<1x286xf32> -> vector<1x286xf32>
    %12 = arith.addf %6, %11 : vector<1x286xf32>
    %c2 = arith.constant 2 : index
    %c0_12 = arith.constant 0 : index
    %c0_13 = arith.constant 0 : index
    %13 = vector.load %arg2[%c2, %c0_12, %c0_13] : memref<9x1x8xbf16, #tpu.memory_space<vmem>>, vector<1x1x8xbf16>
    %14 = vector.shape_cast %13 : vector<1x1x8xbf16> to vector<1x8xbf16>
    %c0_14 = arith.constant 0 : index
    %c0_15 = arith.constant 0 : index
    %c2_16 = arith.constant 2 : index
    %15 = vector.load %arg1[%c0_14, %c0_15, %c2_16] : memref<1x8x384xbf16, #tpu.memory_space<vmem>>, vector<1x8x286xbf16>
    %16 = vector.shape_cast %15 : vector<1x8x286xbf16> to vector<8x286xbf16>
    %cst_17 = arith.constant dense<0.000000e+00> : vector<1x286xf32>
    %17 = tpu.matmul %14, %16, %cst_17 {dimension_numbers = #tpu.dot_dimension_numbers<[1], [0], [0], [1], [0, 0, 1, 1], [], []>} : vector<1x8xbf16>, vector<8x286xbf16>, vector<1x286xf32> -> vector<1x286xf32>
    %18 = arith.addf %12, %17 : vector<1x286xf32>
    %c3 = arith.constant 3 : index
    %c0_18 = arith.constant 0 : index
    %c0_19 = arith.constant 0 : index
    %19 = vector.load %arg2[%c3, %c0_18, %c0_19] : memref<9x1x8xbf16, #tpu.memory_space<vmem>>, vector<1x1x8xbf16>
    %20 = vector.shape_cast %19 : vector<1x1x8xbf16> to vector<1x8xbf16>
    %c0_20 = arith.constant 0 : index
    %c0_21 = arith.constant 0 : index
    %c18 = arith.constant 18 : index
    %21 = vector.load %arg1[%c0_20, %c0_21, %c18] : memref<1x8x384xbf16, #tpu.memory_space<vmem>>, vector<1x8x286xbf16>
    %22 = vector.shape_cast %21 : vector<1x8x286xbf16> to vector<8x286xbf16>
    %cst_22 = arith.constant dense<0.000000e+00> : vector<1x286xf32>
    %23 = tpu.matmul %20, %22, %cst_22 {dimension_numbers = #tpu.dot_dimension_numbers<[1], [0], [0], [1], [0, 0, 1, 1], [], []>} : vector<1x8xbf16>, vector<8x286xbf16>, vector<1x286xf32> -> vector<1x286xf32>
    %24 = arith.addf %18, %23 : vector<1x286xf32>
    %c4 = arith.constant 4 : index
    %c0_23 = arith.constant 0 : index
    %c0_24 = arith.constant 0 : index
    %25 = vector.load %arg2[%c4, %c0_23, %c0_24] : memref<9x1x8xbf16, #tpu.memory_space<vmem>>, vector<1x1x8xbf16>
    %26 = vector.shape_cast %25 : vector<1x1x8xbf16> to vector<1x8xbf16>
    %c0_25 = arith.constant 0 : index
    %c0_26 = arith.constant 0 : index
    %c19 = arith.constant 19 : index
    %27 = vector.load %arg1[%c0_25, %c0_26, %c19] : memref<1x8x384xbf16, #tpu.memory_space<vmem>>, vector<1x8x286xbf16>
    %28 = vector.shape_cast %27 : vector<1x8x286xbf16> to vector<8x286xbf16>
    %cst_27 = arith.constant dense<0.000000e+00> : vector<1x286xf32>
    %29 = tpu.matmul %26, %28, %cst_27 {dimension_numbers = #tpu.dot_dimension_numbers<[1], [0], [0], [1], [0, 0, 1, 1], [], []>} : vector<1x8xbf16>, vector<8x286xbf16>, vector<1x286xf32> -> vector<1x286xf32>
    %30 = arith.addf %24, %29 : vector<1x286xf32>
    %c5 = arith.constant 5 : index
    %c0_28 = arith.constant 0 : index
    %c0_29 = arith.constant 0 : index
    %31 = vector.load %arg2[%c5, %c0_28, %c0_29] : memref<9x1x8xbf16, #tpu.memory_space<vmem>>, vector<1x1x8xbf16>
    %32 = vector.shape_cast %31 : vector<1x1x8xbf16> to vector<1x8xbf16>
    %c0_30 = arith.constant 0 : index
    %c0_31 = arith.constant 0 : index
    %c20 = arith.constant 20 : index
    %33 = vector.load %arg1[%c0_30, %c0_31, %c20] : memref<1x8x384xbf16, #tpu.memory_space<vmem>>, vector<1x8x286xbf16>
    %34 = vector.shape_cast %33 : vector<1x8x286xbf16> to vector<8x286xbf16>
    %cst_32 = arith.constant dense<0.000000e+00> : vector<1x286xf32>
    %35 = tpu.matmul %32, %34, %cst_32 {dimension_numbers = #tpu.dot_dimension_numbers<[1], [0], [0], [1], [0, 0, 1, 1], [], []>} : vector<1x8xbf16>, vector<8x286xbf16>, vector<1x286xf32> -> vector<1x286xf32>
    %36 = arith.addf %30, %35 : vector<1x286xf32>
    %c6 = arith.constant 6 : index
    %c0_33 = arith.constant 0 : index
    %c0_34 = arith.constant 0 : index
    %37 = vector.load %arg2[%c6, %c0_33, %c0_34] : memref<9x1x8xbf16, #tpu.memory_space<vmem>>, vector<1x1x8xbf16>
    %38 = vector.shape_cast %37 : vector<1x1x8xbf16> to vector<1x8xbf16>
    %c0_35 = arith.constant 0 : index
    %c0_36 = arith.constant 0 : index
    %c36 = arith.constant 36 : index
    %39 = vector.load %arg1[%c0_35, %c0_36, %c36] : memref<1x8x384xbf16, #tpu.memory_space<vmem>>, vector<1x8x286xbf16>
    %40 = vector.shape_cast %39 : vector<1x8x286xbf16> to vector<8x286xbf16>
    %cst_37 = arith.constant dense<0.000000e+00> : vector<1x286xf32>
    %41 = tpu.matmul %38, %40, %cst_37 {dimension_numbers = #tpu.dot_dimension_numbers<[1], [0], [0], [1], [0, 0, 1, 1], [], []>} : vector<1x8xbf16>, vector<8x286xbf16>, vector<1x286xf32> -> vector<1x286xf32>
    %42 = arith.addf %36, %41 : vector<1x286xf32>
    %c7 = arith.constant 7 : index
    %c0_38 = arith.constant 0 : index
    %c0_39 = arith.constant 0 : index
    %43 = vector.load %arg2[%c7, %c0_38, %c0_39] : memref<9x1x8xbf16, #tpu.memory_space<vmem>>, vector<1x1x8xbf16>
    %44 = vector.shape_cast %43 : vector<1x1x8xbf16> to vector<1x8xbf16>
    %c0_40 = arith.constant 0 : index
    %c0_41 = arith.constant 0 : index
    %c37 = arith.constant 37 : index
    %45 = vector.load %arg1[%c0_40, %c0_41, %c37] : memref<1x8x384xbf16, #tpu.memory_space<vmem>>, vector<1x8x286xbf16>
    %46 = vector.shape_cast %45 : vector<1x8x286xbf16> to vector<8x286xbf16>
    %cst_42 = arith.constant dense<0.000000e+00> : vector<1x286xf32>
    %47 = tpu.matmul %44, %46, %cst_42 {dimension_numbers = #tpu.dot_dimension_numbers<[1], [0], [0], [1], [0, 0, 1, 1], [], []>} : vector<1x8xbf16>, vector<8x286xbf16>, vector<1x286xf32> -> vector<1x286xf32>
    %48 = arith.addf %42, %47 : vector<1x286xf32>
    %c8 = arith.constant 8 : index
    %c0_43 = arith.constant 0 : index
    %c0_44 = arith.constant 0 : index
    %49 = vector.load %arg2[%c8, %c0_43, %c0_44] : memref<9x1x8xbf16, #tpu.memory_space<vmem>>, vector<1x1x8xbf16>
    %50 = vector.shape_cast %49 : vector<1x1x8xbf16> to vector<1x8xbf16>
    %c0_45 = arith.constant 0 : index
    %c0_46 = arith.constant 0 : index
    %c38 = arith.constant 38 : index
    %51 = vector.load %arg1[%c0_45, %c0_46, %c38] : memref<1x8x384xbf16, #tpu.memory_space<vmem>>, vector<1x8x286xbf16>
    %52 = vector.shape_cast %51 : vector<1x8x286xbf16> to vector<8x286xbf16>
    %cst_47 = arith.constant dense<0.000000e+00> : vector<1x286xf32>
    %53 = tpu.matmul %50, %52, %cst_47 {dimension_numbers = #tpu.dot_dimension_numbers<[1], [0], [0], [1], [0, 0, 1, 1], [], []>} : vector<1x8xbf16>, vector<8x286xbf16>, vector<1x286xf32> -> vector<1x286xf32>
    %54 = arith.addf %48, %53 : vector<1x286xf32>
    %c0_48 = arith.constant 0 : index
    %c0_49 = arith.constant 0 : index
    %55 = vector.load %arg3[%c0_48, %c0_49] : memref<1x1xf32, #tpu.memory_space<vmem>>, vector<1x1xf32>
    %56 = vector.broadcast %55 : vector<1x1xf32> to vector<1x286xf32>
    %57 = arith.addf %54, %56 : vector<1x286xf32>
    %c0_50 = arith.constant 0 : index
    %c0_51 = arith.constant 0 : index
    %c19_52 = arith.constant 19 : index
    %58 = vector.load %arg4[%c0_50, %c0_51, %c19_52] : memref<1x1x384xf32, #tpu.memory_space<vmem>>, vector<1x1x286xf32>
    %59 = vector.shape_cast %58 : vector<1x1x286xf32> to vector<1x286xf32>
    %60 = arith.addf %57, %59 : vector<1x286xf32>
    %61 = arith.negf %60 : vector<1x286xf32>
    %62 = math.exp %61 : vector<1x286xf32>
    %cst_53 = arith.constant 1.000000e+00 : f32
    %63 = vector.broadcast %cst_53 : f32 to vector<1x286xf32>
    %64 = arith.addf %63, %62 : vector<1x286xf32>
    %65 = arith.divf %63, %64 : vector<1x286xf32>
    %c0_54 = arith.constant 0 : index
    %c0_55 = arith.constant 0 : index
    %66 = vector.load %arg5[%c0_54, %c0_55] : memref<1x286xf32, #tpu.memory_space<vmem>>, vector<1x286xf32>
    %67 = arith.mulf %65, %66 : vector<1x286xf32>
    %cst_56 = arith.constant 0.000000e+00 : f32
    %68 = vector.broadcast %cst_56 : f32 to vector<1x1x384xf32>
    %c0_57 = arith.constant 0 : index
    %c0_58 = arith.constant 0 : index
    %c0_59 = arith.constant 0 : index
    %69 = vector.load %arg6[%c0_57, %c0_58, %c0_59] : memref<1x1x384xf32, #tpu.memory_space<vmem>>, vector<1x1x384xf32>
    tpu.vector_store %arg6[%c0_57, %c0_58, %c0_59], %68 {strides = array<i32>} : memref<1x1x384xf32, #tpu.memory_space<vmem>>, vector<1x1x384xf32>,
    %c0_60 = arith.constant 0 : index
    %c0_61 = arith.constant 0 : index
    %c19_62 = arith.constant 19 : index
    %70 = vector.load %arg6[%c0_60, %c0_61, %c19_62] : memref<1x1x384xf32, #tpu.memory_space<vmem>>, vector<1x1x286xf32>
    %71 = vector.shape_cast %70 : vector<1x1x286xf32> to vector<1x286xf32>
    %72 = vector.shape_cast %67 : vector<1x286xf32> to vector<1x1x286xf32>
    tpu.vector_store %arg6[%c0_60, %c0_61, %c19_62], %72 {strides = array<i32>} : memref<1x1x384xf32, #tpu.memory_space<vmem>>, vector<1x1x286xf32>,
    return
  }
  func.func @transform_0(%arg0: i32) -> (i32, i32, i32) {
    %c0_i32 = arith.constant 0 : i32
    %c0_i32_0 = arith.constant 0 : i32
    %c0_i32_1 = arith.constant 0 : i32
    return %arg0, %c0_i32, %c0_i32_0 : i32, i32, i32
  }
  func.func @transform_1(%arg0: i32) -> (i32, i32, i32) {
    %c0_i32 = arith.constant 0 : i32
    %c0_i32_0 = arith.constant 0 : i32
    %c0_i32_1 = arith.constant 0 : i32
    %c0_i32_2 = arith.constant 0 : i32
    return %c0_i32, %c0_i32_0, %c0_i32_1 : i32, i32, i32
  }
  func.func @transform_2(%arg0: i32) -> (i32, i32) {
    %c0_i32 = arith.constant 0 : i32
    %c0_i32_0 = arith.constant 0 : i32
    %c0_i32_1 = arith.constant 0 : i32
    return %c0_i32, %c0_i32_0 : i32, i32
  }
  func.func @transform_3(%arg0: i32) -> (i32, i32, i32) {
    %c0_i32 = arith.constant 0 : i32
    %c0_i32_0 = arith.constant 0 : i32
    %c0_i32_1 = arith.constant 0 : i32
    return %arg0, %c0_i32, %c0_i32_0 : i32, i32, i32
  }
  func.func @transform_4(%arg0: i32) -> (i32, i32) {
    %c0_i32 = arith.constant 0 : i32
    %c0_i32_0 = arith.constant 0 : i32
    %c0_i32_1 = arith.constant 0 : i32
    return %c0_i32, %c0_i32_0 : i32, i32
  }
  func.func @transform_5(%arg0: i32) -> (i32, i32, i32) {
    %c0_i32 = arith.constant 0 : i32
    %c0_i32_0 = arith.constant 0 : i32
    %c0_i32_1 = arith.constant 0 : i32
    return %arg0, %c0_i32, %c0_i32_0 : i32, i32, i32
  }
}

</mosaic_0001>

<bundles_post_ra>
// kernel: _lambda_.8
= control target key start
LH: loop header
LB: loop body
LE: loop exit
PB: predicated region body
PF: predicated region fallthrough
CT: control target
= control target key end

     0   :  { %s1844_s27 = smov 0   ;;  %s2191_s0 = inlined_call_operand.vmem [shape: bf16[2,3,384], index: 0, kind: input, shape index: {}]   ;;  %s2192_s1 = inlined_call_operand.vmem [shape: bf16[9,8,3], index: 1, kind: input, shape index: {}]   ;;  %s2193_s2 = inlined_call_operand.vmem [shape: f32[8,1], index: 2, kind: input, shape index: {}]   ;;  %s2194_s3 = inlined_call_operand.vmem [shape: f32[8,1], index: 3, kind: input, shape index: {}]   ;;  %s2195_s4 = inlined_call_operand.vmem [shape: bf16[9,8,8], index: 4, kind: input, shape index: {}]   ;;  %s2196_s5 = inlined_call_operand.vmem [shape: f32[8,1], index: 5, kind: input, shape index: {}]   ;;  %s2197_s6 = inlined_call_operand.vmem [shape: f32[8,1], index: 6, kind: input, shape index: {}]   ;;  %s2198_s7 = inlined_call_operand.vmem [shape: f32[1,286], index: 7, kind: input, shape index: {}]   ;;  %s2199_s8 = inlined_call_operand.vmem [shape: bf16[2,8,384], index: 8, kind: output, shape index: {}]  }
   0x1 LB: > { %s1677_s28 = sadd.s32 4294967295, %s1786_s27   ;;  %p1681_p0 = scmp.ge.s32.totalorder %s1786_s27, 1  ;;  %s1786_s27 = sphi %s1844_s27, %s18_s27  }
   0x2   : > { %p262_p1 = scmp.lt.s32.totalorder %s1786_s27, 3 }
   0x4   : > { %p263_p2 = pnand %p1681_p0, %p262_p1 }
   0x5   : > { %p296_p3 = scmp.lt.s32.totalorder (!%p263_p2), %s1677_s28, 1  ;;  %s1788_s11 = smov (!%p263_p2), 127  }
   0x6   : > { %266 = sbr.rel (%p263_p2) target bundleno = 989 (0x3dd), region = 52  ;;  %s1789_s12 = smov (!%p263_p2), 126  }
   0x7   : > { %s1790_s13 = smov (!%p263_p2), 110   ;;  %s1791_s14 = smov (!%p263_p2), 109  }
   0x8   : > { %s1792_s15 = smov (!%p263_p2), 108   ;;  %s1793_s16 = smov (!%p263_p2), 92  }
   0x9   : > { %s1794_s17 = smov (!%p263_p2), 91   ;;  %s1795_s18 = smov (!%p263_p2), 90  }
   0xa   : > { %s1798_s19 = smov (!%p263_p2), 19  }
   0xb   : > { %s2203_s28 = smov (!%p296_p3, %s1677_s28), 1  ;;  %vm333_vm0 = vcmask 1040384   ;;  %vm334_vm1 = vcmask 1041408   ;;  %v1796_v34 = vmov 65535   ;;  %v308_v39 = vld [vmem:[%s2192_s1] sm:$0xf] }
   0xc   : > { %s1756_s29 = smul.u32 6, %s2203_s28  ;;  %v335_v35 = vsel %vm333_vm0, 4294967295, %v1796_v34  ;;  %vm329_vm2 = vcmask 23552   ;;  %vm454_vm3 = vcmask 1031168   ;;  %v1684_v45 = vld [vmem:[%s2192_s1 + $0x4] sm:$0xf] }
   0xd   : > { %v1897_v37 = vsel %vm334_vm1, %v335_v35, 0  ;;  %vm326_vm4 = vcmask 1039360   ;;  %v1691_v49 = vld [vmem:[%s2192_s1 + $0x8] sm:$0xf]  ;;  %v1695_v62 = vld [vmem:[%s2192_s1 + $0xc] sm:$0xf] }
   0xe   : > { %s1858_s10 = scalar_lea.vmem %s2191_s0, %s1756_s29  ;;  %vm528_vm5 = vcmask 900096   ;;  %vm602_vm6 = vcmask 891904   ;;  %vm676_vm7 = vcmask 883712   ;;  %vm750_vm8 = vcmask 752640  }
   0xf   : > { %v309_v0 = vld [vmem:[%s1858_s10] sm:$0x3f]  ;;  %vm824_vm9 = vcmask 744448   ;;  %vm898_vm10 = vcmask 736256   ;;  %vm1002_vm11 = vcmask 1043608   ;;  %vm1003_vm12 = vcmask 1047556  }
  0x10   : > { %313 = vst [vmem:[#allocation1] ss:$4 sm:$0xff] %v309_v0  ;;  %v439_v4 = vld [vmem:[%s1858_s10] sm:$0x3f]  ;;  %vm997_vm13 = vcmask 154624   ;;  %vm2027_vm14 = vmor %vm1003_vm12, %vm1002_vm11  ;;  %vm1033_vm15 = vcmask 1043456  }
  0x11   : > { %v513_v8 = vld [vmem:[%s1858_s10] sm:$0x3f]  ;;  %vm1006_vm0 = vcmask 396288   ;;  %vm1029_vm1 = vcmask 64512  }
  0x12   : > { %v587_v12 = vld [vmem:[%s1858_s10] sm:$0x3f] }
  0x13   : > { %v661_v16 = vld [vmem:[%s1858_s10] sm:$0x3f] }
  0x14   : > { %v735_v20 = vld [vmem:[%s1858_s10] sm:$0x3f] }
  0x15   : > { %v809_v24 = vld [vmem:[%s1858_s10] sm:$0x3f] }
  0x16   : > { %v883_v28 = vld [vmem:[%s1858_s10] sm:$0x3f] }
  0x17   : > { %v318_v1 = vld.sshfl [vmem:[#allocation1 + $0x10] sm:$0xff pattern:$0x73625140]  ;;  %v314_v2 = vld.sshfl [vmem:[#allocation1] sm:$0xff pattern:$0x73625140] }
  0x18   : > { %324 = vrot.lane.b32.xlu1 %v318_v1, %s1788_s11  ;;  %320 = vrot.lane.b32.xlu0 %v314_v2, %s1788_s11  ;;  %v316_v3 = vld.sshfl [vmem:[#allocation1 + $0x8] sm:$0xff pattern:$0x73625140] }
  0x19   : > { %385 = vst [vmem:[#allocation1] ss:$4 sm:$0xff] %v309_v0 }
  0x20   : > { %322 = vrot.lane.b32.xlu0 %v316_v3, %s1788_s11  ;;  %v1865_v5 = vld.sshfl [vmem:[#allocation1] sm:$0xff pattern:$0x73625140]  ;;  %v1867_v6 = vld.sshfl [vmem:[#allocation1 + $0x8] sm:$0xff pattern:$0x73625140] }
  0x21   : > { %v1869_v7 = vld.sshfl [vmem:[#allocation1 + $0x10] sm:$0xff pattern:$0x73625140]  ;;  %v392_v38 = vand.u32 %v1865_v5, %v1897_v37  ;;  %v394_v52 = vand.u32 %v1867_v6, %v1897_v37 }
  0x22   : > { %441 = vst [vmem:[#allocation1] ss:$4 sm:$0xff] %v439_v4  ;;  %v396_v53 = vand.u32 %v1869_v7, %v1897_v37 }
  0x23   : > { %405 = vmatpush.bf16.msra.mxu3 %v392_v38 }
  0x26   : > { %1688 = vmatmul.msk.bf16.vlgmr.msra.gmra.mxu3 %vm329_vm2, %v308_v39 }
  0x29   : > { %v442_v9 = vld.sshfl [vmem:[#allocation1] sm:$0xff pattern:$0x73625140]  ;;  %v444_v10 = vld.sshfl [vmem:[#allocation1 + $0x8] sm:$0xff pattern:$0x73625140] }
  0x2a   : > { %448 = vrot.lane.b32.xlu1 %v442_v9, %s1789_s12  ;;  %450 = vrot.lane.b32.xlu2 %v444_v10, %s1789_s12  ;;  %v446_v11 = vld.sshfl [vmem:[#allocation1 + $0x10] sm:$0xff pattern:$0x73625140] }
  0x2b   : > { %515 = vst [vmem:[#allocation1] ss:$4 sm:$0xff] %v513_v8 }
  0x32   : > { %v518_v13 = vld.sshfl [vmem:[#allocation1 + $0x8] sm:$0xff pattern:$0x73625140]  ;;  %v520_v14 = vld.sshfl [vmem:[#allocation1 + $0x10] sm:$0xff pattern:$0x73625140]  ;;  %452 = vrot.lane.b32.xlu2 %v446_v11, %s1789_s12 }
  0x33   : > { %524 = vrot.lane.b32.xlu1 %v518_v13, %s1790_s13  ;;  %v516_v15 = vld.sshfl [vmem:[#allocation1] sm:$0xff pattern:$0x73625140] }
  0x34   : > { %522 = vrot.lane.b32.xlu0 %v516_v15, %s1790_s13  ;;  %589 = vst [vmem:[#allocation1] ss:$4 sm:$0xff] %v587_v12 }
  0x3a   : > { %526 = vrot.lane.b32.xlu2 %v520_v14, %s1790_s13 }
  0x3b   : > { %v592_v17 = vld.sshfl [vmem:[#allocation1 + $0x8] sm:$0xff pattern:$0x73625140]  ;;  %v594_v18 = vld.sshfl [vmem:[#allocation1 + $0x10] sm:$0xff pattern:$0x73625140] }
  0x3c   : > { %598 = vrot.lane.b32.xlu1 %v592_v17, %s1791_s14  ;;  %v590_v19 = vld.sshfl [vmem:[#allocation1] sm:$0xff pattern:$0x73625140] }
  0x3d   : > { %596 = vrot.lane.b32.xlu0 %v590_v19, %s1791_s14  ;;  %663 = vst [vmem:[#allocation1] ss:$4 sm:$0xff] %v661_v16 }
  0x42   : > { %600 = vrot.lane.b32.xlu2 %v594_v18, %s1791_s14 }
  0x44   : > { %v666_v21 = vld.sshfl [vmem:[#allocation1 + $0x8] sm:$0xff pattern:$0x73625140]  ;;  %v668_v22 = vld.sshfl [vmem:[#allocation1 + $0x10] sm:$0xff pattern:$0x73625140] }
  0x45   : > { %672 = vrot.lane.b32.xlu1 %v666_v21, %s1792_s15  ;;  %v664_v23 = vld.sshfl [vmem:[#allocation1] sm:$0xff pattern:$0x73625140] }
  0x46   : > { %670 = vrot.lane.b32.xlu0 %v664_v23, %s1792_s15  ;;  %737 = vst [vmem:[#allocation1] ss:$4 sm:$0xff] %v735_v20 }
  0x4a   : > { %674 = vrot.lane.b32.xlu2 %v668_v22, %s1792_s15  ;;  %v1703_v22 = vld [vmem:[%s2192_s1 + $0x14] sm:$0xf] }
  0x4d   : > { %v740_v25 = vld.sshfl [vmem:[#allocation1 + $0x8] sm:$0xff pattern:$0x73625140]  ;;  %v742_v26 = vld.sshfl [vmem:[#allocation1 + $0x10] sm:$0xff pattern:$0x73625140] }
  0x4e   : > { %746 = vrot.lane.b32.xlu1 %v740_v25, %s1793_s16  ;;  %v738_v27 = vld.sshfl [vmem:[#allocation1] sm:$0xff pattern:$0x73625140] }
  0x4f   : > { %744 = vrot.lane.b32.xlu0 %v738_v27, %s1793_s16  ;;  %811 = vst [vmem:[#allocation1] ss:$4 sm:$0xff] %v809_v24  ;;  %v1699_v24 = vld [vmem:[%s2192_s1 + $0x10] sm:$0xf] }
  0x52   : > { %748 = vrot.lane.b32.xlu2 %v742_v26, %s1793_s16 }
  0x56   : > { %v816_v29 = vld.sshfl [vmem:[#allocation1 + $0x10] sm:$0xff pattern:$0x73625140]  ;;  %v814_v30 = vld.sshfl [vmem:[#allocation1 + $0x8] sm:$0xff pattern:$0x73625140] }
  0x57   : > { %820 = vrot.lane.b32.xlu1 %v814_v30, %s1794_s17  ;;  %v812_v31 = vld.sshfl [vmem:[#allocation1] sm:$0xff pattern:$0x73625140] }
  0x58   : > { %818 = vrot.lane.b32.xlu0 %v812_v31, %s1794_s17  ;;  %885 = vst [vmem:[#allocation1] ss:$4 sm:$0xff] %v883_v28 }
  0x5a   : > { %822 = vrot.lane.b32.xlu2 %v816_v29, %s1794_s17 }
  0x5f   : > { %v888_v32 = vld.sshfl [vmem:[#allocation1 + $0x8] sm:$0xff pattern:$0x73625140]  ;;  %v886_v33 = vld.sshfl [vmem:[#allocation1] sm:$0xff pattern:$0x73625140] }
  0x60   : > { %894 = vrot.lane.b32.xlu1 %v888_v32, %s1795_s18  ;;  %892 = vrot.lane.b32.xlu0 %v886_v33, %s1795_s18  ;;  %v890_v36 = vld.sshfl [vmem:[#allocation1 + $0x10] sm:$0xff pattern:$0x73625140] }
  0x62   : > { %896 = vrot.lane.b32.xlu2 %v890_v36, %s1795_s18 }
  0x84   : > { %v451_v40 = vpop.permute.xlu2 %450 }
  0x8a   : > { %v325_v41 = vpop.permute.xlu1 %324  ;;  %v321_v42 = vpop.permute.xlu0 %320 }
  0x8b   : > { %v344_v43 = vand.u32 %v1897_v37, %v325_v41 }
  0x8c   : > { %v453_v44 = vpop.permute.xlu2 %452 }
  0x8d   : > { %379 = vmatpush.bf16.msra.mxu2 %v344_v43  ;;  %v456_v46 = vsel %vm454_vm3, %v451_v40, %v453_v44  ;;  %v467_v58 = vand.u32 %v453_v44, %v1897_v37 }
  0x8e   : > { %v464_v47 = vand.u32 %v456_v46, %v1897_v37 }
  0x90   : > { %1687 = vmatmul.msk.bf16.vlgmr.msra.gmra.mxu2 %vm329_vm2, %v1684_v45  ;;  %489 = vmatpush.bf16.msrb.mxu3 %v464_v47 }
  0x92   : > { %v323_v48 = vpop.permute.xlu0 %322 }
  0x93   : > { %v327_v50 = vsel %vm326_vm4, %v321_v42, %v323_v48  ;;  %v328_v51 = vsel %vm326_vm4, %v323_v48, %v325_v41  ;;  %1693 = vmatmul.msk.bf16.vlgmr.msrb.gmra.mxu3 %vm329_vm2, %v1691_v49  ;;  %v1707_v41 = vld [vmem:[%s2192_s1 + $0x18] sm:$0xf] }
  0x94   : > { %v338_v54 = vand.u32 %v1897_v37, %v327_v50  ;;  %v341_v55 = vand.u32 %v1897_v37, %v328_v51  ;;  %v527_v56 = vpop.permute.xlu2 %526  ;;  %v964_v50 = vld [vmem:[%s2194_s3] sm:$0xff]  ;;  %v1797_v51 = vmov 0  }
  0x95   : > { %v541_v57 = vand.u32 %v527_v56, %v1897_v37  ;;  %986 = vst [vmem:[#allocation2] sm:$0xff] %v1797_v51  ;;  %1777 = vset.pattern.permute.xlu0 %v1797_v51  ;;  %1778 = vset.pattern.permute.xlu1 %v1797_v51 }
  0x96   : > { %353 = vmatpush.bf16.msra.mxu0 %v338_v54  ;;  %366 = vmatpush.bf16.msra.mxu1 %v341_v55  ;;  %987 = vst [vmem:[#allocation2 + $0x8] sm:$0xf] %v1797_v51 }
  0x97   : > { %576 = vmatpush.bf16.msra.mxu3 %v541_v57  ;;  %967 = vperm.xlu1 %1778, %v964_v50  }
  0x98   : > { %1779 = vset.pattern.permute.xlu2 %v1797_v51 }
  0x99   : > { %1685 = vmatmul.msk.bf16.vlgmr.msra.gmra.mxu0 %vm329_vm2, %v1684_v45  ;;  %1686 = vmatmul.msk.bf16.vlgmr.msra.gmra.mxu1 %vm329_vm2, %v1684_v45 }
  0x9a   : > { %418 = vmatpush.bf16.msrb.mxu0 %v394_v52  ;;  %431 = vmatpush.bf16.msrb.mxu1 %v396_v53  ;;  %v1715_v52 = vld [vmem:[%s2192_s1 + $0x20] sm:$0xf] }
  0x9c   : > { %v449_v59 = vpop.permute.xlu1 %448  ;;  %v601_v63 = vpop.permute.xlu2 %600 }
  0x9d   : > { %v455_v60 = vsel %vm454_vm3, %v449_v59, %v451_v40  ;;  %v615_v5 = vand.u32 %v601_v63, %v1897_v37 }
  0x9e   : > { %502 = vmatpush.bf16.msra.mxu0 %v467_v58  ;;  %v461_v61 = vand.u32 %v455_v60, %v1897_v37 }
  0xa0   : > { %476 = vmatpush.bf16.msrb.mxu2 %v461_v61 }
  0xa3   : > { %1692 = vmatmul.msk.bf16.vlgmr.msrb.gmra.mxu2 %vm329_vm2, %v1691_v49  ;;  %1698 = vmatmul.msk.bf16.vlgmr.msra.gmra.mxu3 %vm329_vm2, %v1695_v62 }
  0xa4   : > { %v675_v7 = vpop.permute.xlu2 %674 }
  0xa5   : > { %v525_v0 = vpop.permute.xlu1 %524  ;;  %v689_v14 = vand.u32 %v675_v7, %v1897_v37 }
  0xa6   : > { %v530_v1 = vsel %vm528_vm5, %v525_v0, %v527_v56  ;;  %v523_v2 = vpop.permute.xlu0 %522 }
  0xa7   : > { %v538_v3 = vand.u32 %v530_v1, %v1897_v37  ;;  %v529_v4 = vsel %vm528_vm5, %v523_v2, %v525_v0 }
  0xa8   : > { %v535_v6 = vand.u32 %v529_v4, %v1897_v37 }
  0xa9   : > { %1689 = vmatmul.msk.bf16.vlgmr.msrb.gmra.mxu0 %vm329_vm2, %v308_v39  ;;  %1690 = vmatmul.msk.bf16.vlgmr.msrb.gmra.mxu1 %vm329_vm2, %v308_v39  ;;  %v407_v53 = vpop.f32.mrf.mxu3 }
  0xaa   : > { %550 = vmatpush.bf16.msra.mxu1 %v535_v6  ;;  %563 = vmatpush.bf16.msra.mxu2 %v538_v3 }
  0xac   : > { %v749_v15 = vpop.permute.xlu2 %748 }
  0xad   : > { %v763_v32 = vand.u32 %v749_v15, %v1897_v37 }
  0xae   : > { %650 = vmatpush.bf16.msrb.mxu2 %v615_v5  ;;  %v599_v8 = vpop.permute.xlu1 %598 }
  0xaf   : > { %v597_v9 = vpop.permute.xlu0 %596  ;;  %v604_v10 = vsel %vm602_vm6, %v599_v8, %v601_v63 }
  0xb0   : > { %v603_v11 = vsel %vm602_vm6, %v597_v9, %v599_v8  ;;  %v612_v12 = vand.u32 %v604_v10, %v1897_v37 }
  0xb1   : > { %v609_v13 = vand.u32 %v603_v11, %v1897_v37  ;;  %v409_v54 = vpop.f32.mrf.mxu3 }
  0xb2   : > { %637 = vmatpush.bf16.msrb.mxu1 %v612_v12 }
  0xb3   : > { %1697 = vmatmul.msk.bf16.vlgmr.msra.gmra.mxu2 %vm329_vm2, %v1695_v62  ;;  %624 = vmatpush.bf16.msrb.mxu0 %v609_v13 }
  0xb4   : > { %v823_v23 = vpop.permute.xlu2 %822 }
  0xb5   : > { %v837_v28 = vand.u32 %v823_v23, %v1897_v37 }
  0xb7   : > { %v673_v16 = vpop.permute.xlu1 %672 }
  0xb8   : > { %v671_v17 = vpop.permute.xlu0 %670  ;;  %v678_v18 = vsel %vm676_vm7, %v673_v16, %v675_v7 }
  0xb9   : > { %1694 = vmatmul.msk.bf16.vlgmr.msra.gmra.mxu0 %vm329_vm2, %v1691_v49  ;;  %1696 = vmatmul.msk.bf16.vlgmr.msra.gmra.mxu1 %vm329_vm2, %v1695_v62  ;;  %v677_v19 = vsel %vm676_vm7, %v671_v17, %v673_v16  ;;  %v686_v20 = vand.u32 %v678_v18, %v1897_v37  ;;  %v955_v49 = vld [vmem:[%s2193_s2] sm:$0xff] }
  0xba   : > { %v683_v21 = vand.u32 %v677_v19, %v1897_v37  ;;  %724 = vmatpush.bf16.msra.mxu1 %v689_v14  ;;  %958 = vperm.xlu0 %1777, %v955_v49  }
  0xbb   : > { %711 = vmatpush.bf16.msra.mxu0 %v686_v20 }
  0xbc   : > { %698 = vmatpush.bf16.msrb.mxu3 %v683_v21  ;;  %v897_v40 = vpop.permute.xlu2 %896 }
  0xbd   : > { %v911_v42 = vand.u32 %v897_v40, %v1897_v37 }
  0xbf   : > { %1704 = vmatmul.msk.bf16.vlgmr.msrb.gmra.mxu3 %vm329_vm2, %v1703_v22 }
  0xc0   : > { %v747_v25 = vpop.permute.xlu1 %746 }
  0xc1   : > { %v752_v26 = vsel %vm750_vm8, %v747_v25, %v749_v15  ;;  %v745_v27 = vpop.permute.xlu0 %744 }
  0xc2   : > { %v760_v29 = vand.u32 %v752_v26, %v1897_v37  ;;  %v751_v30 = vsel %vm750_vm8, %v745_v27, %v747_v25 }
  0xc3   : > { %1702 = vmatmul.msk.bf16.vlgmr.msrb.gmra.mxu2 %vm329_vm2, %v1699_v24  ;;  %v757_v31 = vand.u32 %v751_v30, %v1897_v37 }
  0xc4   : > { %785 = vmatpush.bf16.msra.mxu3 %v760_v29 }
  0xc5   : > { %772 = vmatpush.bf16.msra.mxu2 %v757_v31 }
  0xc8   : > { %872 = vmatpush.bf16.msrb.mxu3 %v837_v28 }
  0xc9   : > { %1700 = vmatmul.msk.bf16.vlgmr.msrb.gmra.mxu0 %vm329_vm2, %v1699_v24  ;;  %1701 = vmatmul.msk.bf16.vlgmr.msrb.gmra.mxu1 %vm329_vm2, %v1699_v24  ;;  %v821_v33 = vpop.permute.xlu1 %820 }
  0xca   : > { %798 = vmatpush.bf16.msrb.mxu0 %v763_v32  ;;  %v826_v34 = vsel %vm824_vm9, %v821_v33, %v823_v23  ;;  %v819_v35 = vpop.permute.xlu0 %818 }
  0xcb   : > { %v834_v36 = vand.u32 %v826_v34, %v1897_v37  ;;  %v825_v38 = vsel %vm824_vm9, %v819_v35, %v821_v33 }
  0xcc   : > { %v831_v39 = vand.u32 %v825_v38, %v1897_v37 }
  0xcd   : > { %859 = vmatpush.bf16.msrb.mxu2 %v834_v36 }
  0xce   : > { %846 = vmatpush.bf16.msrb.mxu1 %v831_v39 }
  0xcf   : > { %1709 = vmatmul.msk.bf16.vlgmr.msra.gmra.mxu3 %vm329_vm2, %v1707_v41 }
  0xd2   : > { %v895_v43 = vpop.permute.xlu1 %894  ;;  %v893_v45 = vpop.permute.xlu0 %892 }
  0xd3   : > { %1708 = vmatmul.msk.bf16.vlgmr.msra.gmra.mxu2 %vm329_vm2, %v1707_v41  ;;  %v900_v44 = vsel %vm898_vm10, %v895_v43, %v897_v40  ;;  %v899_v46 = vsel %vm898_vm10, %v893_v45, %v895_v43 }
  0xd4   : > { %946 = vmatpush.bf16.msra.mxu2 %v911_v42  ;;  %v908_v47 = vand.u32 %v900_v44, %v1897_v37  ;;  %v905_v48 = vand.u32 %v899_v46, %v1897_v37  ;;  %v1711_v37 = vld [vmem:[%s2192_s1 + $0x1c] sm:$0xf] }
  0xd9   : > { %1705 = vmatmul.msk.bf16.vlgmr.msra.gmra.mxu0 %vm329_vm2, %v1703_v22  ;;  %1706 = vmatmul.msk.bf16.vlgmr.msra.gmra.mxu1 %vm329_vm2, %v1703_v22 }
  0xda   : > { %933 = vmatpush.bf16.msra.mxu1 %v908_v47  ;;  %920 = vmatpush.bf16.msra.mxu0 %v905_v48 }
  0xdf   : > { %1714 = vmatmul.msk.bf16.vlgmr.msrb.gmra.mxu3 %vm329_vm2, %v1711_v37 }
  0xe3   : > { %1713 = vmatmul.msk.bf16.vlgmr.msrb.gmra.mxu2 %vm329_vm2, %v1711_v37 }
  0xe9   : > { %1710 = vmatmul.msk.bf16.vlgmr.msrb.gmra.mxu0 %vm329_vm2, %v1707_v41  ;;  %1712 = vmatmul.msk.bf16.vlgmr.msrb.gmra.mxu1 %vm329_vm2, %v1711_v37 }
  0xf3   : > { %1718 = vmatmul.msk.bf16.vlgmr.msra.gmra.mxu2 %vm329_vm2, %v1715_v52 }
  0xf9   : > { %1716 = vmatmul.msk.bf16.vlgmr.msra.gmra.mxu0 %vm329_vm2, %v1715_v52  ;;  %1717 = vmatmul.msk.bf16.vlgmr.msra.gmra.mxu1 %vm329_vm2, %v1715_v52 }
 0x113   : > { %v381_v55 = vpop.f32.mrf.mxu2 }
 0x116   : > { %v355_v56 = vpop.f32.mrf.mxu0  ;;  %v368_v57 = vpop.f32.mrf.mxu1 }
 0x117   : > { %v408_v58 = vadd.f32 %v407_v53, %v355_v56  ;;  %v491_v59 = vpop.f32.mrf.mxu3 }
 0x11b   : > { %v383_v60 = vpop.f32.mrf.mxu2 }
 0x11e   : > { %v357_v61 = vpop.f32.mrf.mxu0  ;;  %v370_v62 = vpop.f32.mrf.mxu1 }
 0x11f   : > { %v493_v63 = vpop.f32.mrf.mxu3 }
 0x126   : > { %v478_v0 = vpop.f32.mrf.mxu2  ;;  %v420_v1 = vpop.f32.mrf.mxu0 }
 0x127   : > { %v508_v2 = vadd.f32 %v478_v0, %v408_v58  ;;  %v421_v3 = vadd.f32 %v420_v1, %v368_v57  ;;  %v433_v4 = vpop.f32.mrf.mxu1  ;;  %v578_v5 = vpop.f32.mrf.mxu3 }
 0x128   : > { %v434_v6 = vadd.f32 %v433_v4, %v381_v55 }
 0x129   : > { %v509_v7 = vadd.f32 %v491_v59, %v421_v3  ;;  %v2014_v3 = vld [vmem:[%s2198_s7] sm:$0x7] }
 0x12c   : > { %v959_v58 = vpop.permute.xlu0 %958 }
 0x12e   : > { %v480_v8 = vpop.f32.mrf.mxu2  ;;  %v422_v9 = vpop.f32.mrf.mxu0 }
 0x12f   : > { %v435_v10 = vpop.f32.mrf.mxu1  ;;  %v580_v11 = vpop.f32.mrf.mxu3  ;;  %v979_v9 = vperm.slane %v2014_v3, 2 }
 0x130   : > { %v977_v10 = vperm.slane %v2014_v3, 0 }
 0x136   : > { %v565_v12 = vpop.f32.mrf.mxu2  ;;  %v504_v13 = vpop.f32.mrf.mxu0 }
 0x137   : > { %v510_v14 = vadd.f32 %v504_v13, %v434_v6  ;;  %v552_v15 = vpop.f32.mrf.mxu1  ;;  %v583_v43 = vadd.f32 %v565_v12, %v509_v7  ;;  %v978_v12 = vperm.slane %v2014_v3, 1 }
 0x138   : > { %v582_v42 = vadd.f32 %v552_v15, %v508_v2  ;;  %v968_v2 = vpop.permute.xlu1 %967 }
 0x139   : > { %v584_v16 = vadd.f32 %v578_v5, %v510_v14 }
 0x13e   : > { %v567_v17 = vpop.f32.mrf.mxu2  ;;  %v506_v18 = vpop.f32.mrf.mxu0 }
 0x13f   : > { %v554_v19 = vpop.f32.mrf.mxu1 }
 0x142   : > { %v700_v20 = vpop.f32.mrf.mxu3 }
 0x146   : > { %v652_v21 = vpop.f32.mrf.mxu2  ;;  %v626_v22 = vpop.f32.mrf.mxu0 }
 0x147   : > { %v639_v23 = vpop.f32.mrf.mxu1  ;;  %v658_v44 = vadd.f32 %v652_v21, %v584_v16  ;;  %v656_v45 = vadd.f32 %v626_v22, %v582_v42 }
 0x148   : > { %v657_v46 = vadd.f32 %v639_v23, %v583_v43 }
 0x149   : > { %v730_v52 = vadd.f32 %v700_v20, %v656_v45 }
 0x14a   : > { %v702_v24 = vpop.f32.mrf.mxu3 }
 0x14e   : > { %v654_v25 = vpop.f32.mrf.mxu2  ;;  %v628_v26 = vpop.f32.mrf.mxu0 }
 0x14f   : > { %v641_v27 = vpop.f32.mrf.mxu1 }
 0x152   : > { %v787_v28 = vpop.f32.mrf.mxu3 }
 0x156   : > { %v774_v29 = vpop.f32.mrf.mxu2  ;;  %v713_v30 = vpop.f32.mrf.mxu0 }
 0x157   : > { %v726_v31 = vpop.f32.mrf.mxu1  ;;  %v731_v37 = vadd.f32 %v713_v30, %v657_v46  ;;  %v804_v54 = vadd.f32 %v774_v29, %v730_v52 }
 0x158   : > { %v732_v49 = vadd.f32 %v726_v31, %v658_v44 }
 0x159   : > { %v805_v55 = vadd.f32 %v787_v28, %v731_v37 }
 0x15a   : > { %v789_v32 = vpop.f32.mrf.mxu3 }
 0x15e   : > { %v776_v33 = vpop.f32.mrf.mxu2  ;;  %v715_v34 = vpop.f32.mrf.mxu0 }
 0x15f   : > { %v728_v35 = vpop.f32.mrf.mxu1 }
 0x162   : > { %v874_v36 = vpop.f32.mrf.mxu3 }
 0x166   : > { %v861_v38 = vpop.f32.mrf.mxu2  ;;  %v800_v39 = vpop.f32.mrf.mxu0 }
 0x167   : > { %v848_v40 = vpop.f32.mrf.mxu1  ;;  %v806_v53 = vadd.f32 %v800_v39, %v732_v49  ;;  %v879_v59 = vadd.f32 %v861_v38, %v805_v55 }
 0x168   : > { %v878_v56 = vadd.f32 %v848_v40, %v804_v54  ;;  %v1590_v40 = vld [vmem:[%s2197_s6] sm:$0xff] }
 0x169   : > { %v880_v57 = vadd.f32 %v874_v36, %v806_v53 }
 0x16a   : > { %v876_v41 = vpop.f32.mrf.mxu3 }
 0x16b   : > { %v1008_v41 = vld [vmem:[%s2195_s4] sm:$0xf] }
 0x16e   : > { %v863_v47 = vpop.f32.mrf.mxu2  ;;  %v802_v48 = vpop.f32.mrf.mxu0 }
 0x16f   : > { %v850_v50 = vpop.f32.mrf.mxu1  ;;  %v1719_v47 = vld [vmem:[%s2195_s4 + $0x4] sm:$0xf] }
 0x176   : > { %v948_v60 = vpop.f32.mrf.mxu2  ;;  %v922_v61 = vpop.f32.mrf.mxu0 }
 0x177   : > { %v954_v62 = vadd.f32 %v948_v60, %v880_v57  ;;  %v952_v63 = vadd.f32 %v922_v61, %v878_v56  ;;  %v935_v0 = vpop.f32.mrf.mxu1 }
 0x178   : > { %v953_v1 = vadd.f32 %v935_v0, %v879_v59 }
 0x179   : > { %v961_v4 = vmul.f32 %v959_v58, %v952_v63  ;;  %v963_v5 = vmul.f32 %v959_v58, %v954_v62 }
 0x17a   : > { %v962_v6 = vmul.f32 %v959_v58, %v953_v1 }
 0x17b   : > { %v970_v7 = vadd.f32 %v968_v2, %v961_v4  ;;  %v972_v8 = vadd.f32 %v968_v2, %v963_v5 }
 0x17c   : > { %v971_v11 = vadd.f32 %v968_v2, %v962_v6  ;;  %v1726_v6 = vld [vmem:[%s2195_s4 + $0x8] sm:$0xf] }
 0x17d   : > { %v973_v13 = vmax.f32 %v970_v7, 0.0  ;;  %v975_v14 = vmax.f32 %v972_v8, 0.0 }
 0x17e   : > { %v974_v15 = vmax.f32 %v971_v11, 0.0  ;;  %v950_v16 = vpop.f32.mrf.mxu2  ;;  %v924_v17 = vpop.f32.mrf.mxu0 }
 0x17f   : > { %v985_v18 = vmul.f32 %v979_v9, %v975_v14  ;;  %v983_v19 = vmul.f32 %v977_v10, %v973_v13  ;;  %v937_v20 = vpop.f32.mrf.mxu1 }
 0x180   : > { %v984_v21 = vmul.f32 %v978_v12, %v974_v15 }
 0x181   : > { %v989_v22 = vpack.c.bf16 %v985_v18, %v985_v18 }
 0x182   : > { %v988_v23 = vpack.c.bf16 %v984_v21, %v983_v19 }
 0x183   : > { %994 = vrot.lane.b32.xlu1 %v989_v22, %s1798_s19 }
 0x184   : > { %992 = vrot.lane.b32.xlu2 %v988_v23, %s1798_s19 }
 0x1de   : > { %v993_v24 = vpop.permute.xlu2 %992 }
 0x1df   : > { %v996_v26 = vrot.slane %v993_v24, 4 }
 0x1e1   : > { %v998_v27 = vsel %vm997_vm13, %v996_v26, %v993_v24  ;;  %v1730_v24 = vld [vmem:[%s2195_s4 + $0xc] sm:$0xf] }
 0x1e2   : > { %1005 = vst.msk [vmem:[#allocation2] sm:$0xff] %vm2027_vm14, %v998_v27 }
 0x1e9   : > { %v1009_v28 = vld [vmem:[#allocation2] sm:$0xff] }
 0x1ea   : > { %v1015_v29 = vunpack.c.l.b16 %v1009_v28  ;;  %v1016_v30 = vunpack.c.h.b16 %v1009_v28 }
 0x1ec   : > { %v1018_v31 = vpack.c.b16 %v1015_v29, %v1015_v29  ;;  %v1019_v32 = vpack.c.b16 %v1016_v30, %v1016_v30 }
 0x1ee   : > { %1023 = vrot.lane.b32.xlu0 %v1019_v32, %s1788_s11  ;;  %1021 = vrot.lane.b32.xlu2 %v1018_v31, %s1788_s11  ;;  %v1086_v33 = vsel %vm1033_vm15, %v1018_v31, 0  ;;  %v1089_v46 = vsel %vm1033_vm15, %v1019_v32, 0 }
 0x1ef   : > { %1101 = vmatpush.bf16.msrb.mxu2 %v1086_v33 }
 0x1f2   : > { %1723 = vmatmul.msk.bf16.vlgmr.msrb.gmra.mxu2 %vm1029_vm1, %v1008_v41 }
 0x1f5   : > { %v995_v34 = vpop.permute.xlu1 %994 }
 0x1f6   : > { %v999_v35 = vsel %vm997_vm13, %v996_v26, %v995_v34  ;;  %1137 = vrot.lane.b32.xlu0 %v1019_v32, %s1789_s12  ;;  %1135 = vrot.lane.b32.xlu2 %v1018_v31, %s1789_s12  ;;  %v1734_v26 = vld [vmem:[%s2195_s4 + $0x10] sm:$0xf] }
 0x1f7   : > { %1007 = vst.msk [vmem:[#allocation2 + $0x8] sm:$0xf] %vm1006_vm0, %v999_v35 }
 0x1fe   : > { %v1010_v36 = vld [vmem:[#allocation2 + $0x8] sm:$0xf]  ;;  %1201 = vrot.lane.b32.xlu0 %v1019_v32, %s1790_s13  ;;  %1199 = vrot.lane.b32.xlu2 %v1018_v31, %s1790_s13 }
 0x1ff   : > { %v1017_v38 = vunpack.c.l.b16 %v1010_v36 }
 0x201   : > { %v1020_v39 = vpack.c.b16 %v1017_v38, %v1017_v38 }
 0x203   : > { %1025 = vrot.lane.b32.xlu1 %v1020_v39, %s1788_s11  ;;  %v1092_v59 = vsel %vm1033_vm15, %v1020_v39, 0 }
 0x206   : > { %1265 = vrot.lane.b32.xlu0 %v1019_v32, %s1791_s14  ;;  %1263 = vrot.lane.b32.xlu2 %v1018_v31, %s1791_s14 }
 0x20b   : > { %1139 = vrot.lane.b32.xlu1 %v1020_v39, %s1789_s12 }
 0x20e   : > { %1329 = vrot.lane.b32.xlu0 %v1019_v32, %s1792_s15  ;;  %1327 = vrot.lane.b32.xlu2 %v1018_v31, %s1792_s15 }
 0x213   : > { %1203 = vrot.lane.b32.xlu1 %v1020_v39, %s1790_s13 }
 0x216   : > { %1393 = vrot.lane.b32.xlu0 %v1019_v32, %s1793_s16  ;;  %1391 = vrot.lane.b32.xlu2 %v1018_v31, %s1793_s16 }
 0x21b   : > { %1267 = vrot.lane.b32.xlu1 %v1020_v39, %s1791_s14  ;;  %s1757_s14 = smul.u32 12, %s2203_s28 }
 0x21e   : > { %1457 = vrot.lane.b32.xlu0 %v1019_v32, %s1794_s17  ;;  %1455 = vrot.lane.b32.xlu2 %v1018_v31, %s1794_s17 }
 0x223   : > { %1331 = vrot.lane.b32.xlu1 %v1020_v39, %s1792_s15 }
 0x226   : > { %1521 = vrot.lane.b32.xlu0 %v1019_v32, %s1795_s18  ;;  %1519 = vrot.lane.b32.xlu2 %v1018_v31, %s1795_s18 }
 0x22b   : > { %1395 = vrot.lane.b32.xlu1 %v1020_v39, %s1793_s16 }
 0x22e   : > { %1593 = vperm.xlu0 %1777, %v1590_v40  }
 0x233   : > { %1459 = vrot.lane.b32.xlu1 %v1020_v39, %s1794_s17  ;;  %s2167_s17 = scalar_lea.vmem %s2199_s8, %s1757_s14 }
 0x234   : > { %1605 = vst [vmem:[%s2167_s17] sm:$0xff] %v1797_v51 }
 0x235   : > { %1606 = vst [vmem:[%s2167_s17 + $0x8] sm:$0xf] %v1797_v51 }
 0x23b   : > { %1523 = vrot.lane.b32.xlu1 %v1020_v39, %s1795_s18 }
 0x248   : > { %v1022_v42 = vpop.permute.xlu2 %1021 }
 0x250   : > { %v1136_v48 = vpop.permute.xlu2 %1135 }
 0x258   : > { %v1200_v50 = vpop.permute.xlu2 %1199 }
 0x260   : > { %v1024_v43 = vpop.permute.xlu0 %1023  ;;  %v1264_v61 = vpop.permute.xlu2 %1263 }
 0x261   : > { %v1027_v44 = vsel %vm326_vm4, %v1022_v42, %v1024_v43 }
 0x262   : > { %v1035_v45 = vsel %vm1033_vm15, %v1027_v44, 0 }
 0x263   : > { %1050 = vmatpush.bf16.msra.mxu3 %v1035_v45 }
 0x266   : > { %1720 = vmatmul.msk.bf16.vlgmr.msra.gmra.mxu3 %vm1029_vm1, %v1719_v47 }
 0x267   : > { %1114 = vmatpush.bf16.msrb.mxu3 %v1089_v46 }
 0x268   : > { %v1138_v49 = vpop.permute.xlu0 %1137  ;;  %v1328_v8 = vpop.permute.xlu2 %1327 }
 0x269   : > { %v1141_v52 = vsel %vm454_vm3, %v1136_v48, %v1138_v49 }
 0x26a   : > { %v1147_v56 = vsel %vm1033_vm15, %v1141_v52, 0 }
 0x270   : > { %v1202_v37 = vpop.permute.xlu0 %1201  ;;  %v1392_v20 = vpop.permute.xlu2 %1391 }
 0x271   : > { %v1205_v58 = vsel %vm528_vm5, %v1200_v50, %v1202_v37 }
 0x272   : > { %v1211_v62 = vsel %vm1033_vm15, %v1205_v58, 0  ;;  %v1581_v58 = vld [vmem:[%s2196_s5] sm:$0xff] }
 0x273   : > { %1584 = vperm.xlu2 %1779, %v1581_v58  }
 0x275   : > { %v1026_v53 = vpop.permute.xlu1 %1025 }
 0x276   : > { %v1028_v54 = vsel %vm326_vm4, %v1024_v43, %v1026_v53  ;;  %v1041_v55 = vsel %vm1033_vm15, %v1026_v53, 0  ;;  %1724 = vmatmul.msk.bf16.vlgmr.msrb.gmra.mxu3 %vm1029_vm1, %v1008_v41 }
 0x277   : > { %v1038_v57 = vsel %vm1033_vm15, %v1028_v54, 0  ;;  %1076 = vmatpush.bf16.msrb.mxu1 %v1041_v55 }
 0x278   : > { %1063 = vmatpush.bf16.msrb.mxu0 %v1038_v57  ;;  %v1266_v60 = vpop.permute.xlu0 %1265  ;;  %v1456_v32 = vpop.permute.xlu2 %1455  ;;  %v1750_v57 = vld [vmem:[%s2195_s4 + $0x20] sm:$0xf] }
 0x279   : > { %v1269_v63 = vsel %vm602_vm6, %v1264_v61, %v1266_v60 }
 0x27a   : > { %1722 = vmatmul.msk.bf16.vlgmr.msrb.gmra.mxu1 %vm1029_vm1, %v1719_v47  ;;  %v1275_v4 = vsel %vm1033_vm15, %v1269_v63, 0 }
 0x27b   : > { %1162 = vmatpush.bf16.msra.mxu1 %v1147_v56  ;;  %1721 = vmatmul.msk.bf16.vlgmr.msrb.gmra.mxu0 %vm1029_vm1, %v1719_v47  ;;  %v1746_v56 = vld [vmem:[%s2195_s4 + $0x1c] sm:$0xf] }
 0x27c   : > { %1127 = vmatpush.bf16.msra.mxu0 %v1092_v59  ;;  %v1103_v59 = vpop.f32.mrf.mxu2 }
 0x27d   : > { %v1140_v0 = vpop.permute.xlu1 %1139 }
 0x27e   : > { %v1142_v1 = vsel %vm454_vm3, %v1138_v49, %v1140_v0  ;;  %v1153_v2 = vsel %vm1033_vm15, %v1140_v0, 0 }
 0x27f   : > { %v1150_v5 = vsel %vm1033_vm15, %v1142_v1, 0  ;;  %1188 = vmatpush.bf16.msra.mxu3 %v1153_v2 }
 0x280   : > { %1226 = vmatpush.bf16.msrb.mxu0 %v1211_v62  ;;  %1175 = vmatpush.bf16.msra.mxu2 %v1150_v5  ;;  %v1330_v7 = vpop.permute.xlu0 %1329  ;;  %v1520_v42 = vpop.permute.xlu2 %1519 }
 0x281   : > { %v1333_v11 = vsel %vm676_vm7, %v1328_v8, %v1330_v7 }
 0x282   : > { %v1339_v16 = vsel %vm1033_vm15, %v1333_v11, 0 }
 0x283   : > { %1290 = vmatpush.bf16.msrb.mxu3 %v1275_v4  ;;  %1728 = vmatmul.msk.bf16.vlgmr.msra.gmra.mxu2 %vm1029_vm1, %v1726_v6 }
 0x285   : > { %v1204_v13 = vpop.permute.xlu1 %1203 }
 0x286   : > { %v1206_v14 = vsel %vm528_vm5, %v1202_v37, %v1204_v13  ;;  %v1217_v15 = vsel %vm1033_vm15, %v1204_v13, 0  ;;  %1729 = vmatmul.msk.bf16.vlgmr.msra.gmra.mxu3 %vm1029_vm1, %v1726_v6  ;;  %v1742_v37 = vld [vmem:[%s2195_s4 + $0x18] sm:$0xf] }
 0x287   : > { %v1214_v17 = vsel %vm1033_vm15, %v1206_v14, 0  ;;  %1252 = vmatpush.bf16.msrb.mxu2 %v1217_v15 }
 0x288   : > { %1239 = vmatpush.bf16.msrb.mxu1 %v1214_v17  ;;  %v1394_v18 = vpop.permute.xlu0 %1393 }
 0x289   : > { %v1397_v30 = vsel %vm750_vm8, %v1392_v20, %v1394_v18 }
 0x28a   : > { %1727 = vmatmul.msk.bf16.vlgmr.msra.gmra.mxu1 %vm1029_vm1, %v1726_v6  ;;  %v1403_v33 = vsel %vm1033_vm15, %v1397_v30, 0 }
 0x28b   : > { %1354 = vmatpush.bf16.msra.mxu2 %v1339_v16  ;;  %1725 = vmatmul.msk.bf16.vlgmr.msra.gmra.mxu0 %vm1029_vm1, %v1008_v41  ;;  %v1738_v41 = vld [vmem:[%s2195_s4 + $0x14] sm:$0xf] }
 0x28d   : > { %v1268_v19 = vpop.permute.xlu1 %1267 }
 0x28e   : > { %v1270_v21 = vsel %vm602_vm6, %v1266_v60, %v1268_v19  ;;  %v1281_v22 = vsel %vm1033_vm15, %v1268_v19, 0  ;;  %v1105_v60 = vpop.f32.mrf.mxu2 }
 0x28f   : > { %v1278_v23 = vsel %vm1033_vm15, %v1270_v21, 0  ;;  %1316 = vmatpush.bf16.msra.mxu1 %v1281_v22 }
 0x290   : > { %1303 = vmatpush.bf16.msra.mxu0 %v1278_v23  ;;  %v1458_v28 = vpop.permute.xlu0 %1457 }
 0x291   : > { %v1461_v48 = vsel %vm824_vm9, %v1456_v32, %v1458_v28 }
 0x292   : > { %v1467_v50 = vsel %vm1033_vm15, %v1461_v48, 0 }
 0x293   : > { %1733 = vmatmul.msk.bf16.vlgmr.msrb.gmra.mxu2 %vm1029_vm1, %v1730_v24 }
 0x295   : > { %v1332_v27 = vpop.permute.xlu1 %1331 }
 0x296   : > { %v1334_v29 = vsel %vm676_vm7, %v1330_v7, %v1332_v27  ;;  %1735 = vmatmul.msk.bf16.vlgmr.msrb.gmra.mxu3 %vm1029_vm1, %v1734_v26  ;;  %v1345_v34 = vsel %vm1033_vm15, %v1332_v27, 0 }
 0x297   : > { %v1342_v31 = vsel %vm1033_vm15, %v1334_v29, 0 }
 0x298   : > { %1367 = vmatpush.bf16.msra.mxu3 %v1342_v31  ;;  %v1522_v40 = vpop.permute.xlu0 %1521 }
 0x299   : > { %v1525_v43 = vsel %vm898_vm10, %v1520_v42, %v1522_v40 }
 0x29a   : > { %1732 = vmatmul.msk.bf16.vlgmr.msrb.gmra.mxu1 %vm1029_vm1, %v1730_v24  ;;  %v1531_v45 = vsel %vm1033_vm15, %v1525_v43, 0 }
 0x29b   : > { %1418 = vmatpush.bf16.msrb.mxu1 %v1403_v33  ;;  %1731 = vmatmul.msk.bf16.vlgmr.msrb.gmra.mxu0 %vm1029_vm1, %v1730_v24 }
 0x29c   : > { %1380 = vmatpush.bf16.msrb.mxu0 %v1345_v34 }
 0x29d   : > { %v1396_v35 = vpop.permute.xlu1 %1395 }
 0x29e   : > { %v1398_v36 = vsel %vm750_vm8, %v1394_v18, %v1396_v35  ;;  %v1409_v38 = vsel %vm1033_vm15, %v1396_v35, 0 }
 0x29f   : > { %v1406_v39 = vsel %vm1033_vm15, %v1398_v36, 0  ;;  %1444 = vmatpush.bf16.msrb.mxu3 %v1409_v38 }
 0x2a0   : > { %1431 = vmatpush.bf16.msrb.mxu2 %v1406_v39 }
 0x2a3   : > { %1739 = vmatmul.msk.bf16.vlgmr.msra.gmra.mxu2 %vm1029_vm1, %v1738_v41 }
 0x2a5   : > { %v1460_v44 = vpop.permute.xlu1 %1459 }
 0x2a6   : > { %v1473_v46 = vsel %vm1033_vm15, %v1460_v44, 0  ;;  %1740 = vmatmul.msk.bf16.vlgmr.msra.gmra.mxu3 %vm1029_vm1, %v1738_v41  ;;  %v1462_v47 = vsel %vm824_vm9, %v1458_v28, %v1460_v44 }
 0x2a7   : > { %1508 = vmatpush.bf16.msra.mxu2 %v1473_v46  ;;  %1546 = vmatpush.bf16.msra.mxu3 %v1531_v45  ;;  %v1470_v49 = vsel %vm1033_vm15, %v1462_v47, 0 }
 0x2aa   : > { %1737 = vmatmul.msk.bf16.vlgmr.msra.gmra.mxu1 %vm1029_vm1, %v1734_v26 }
 0x2ab   : > { %1495 = vmatpush.bf16.msra.mxu1 %v1470_v49  ;;  %1736 = vmatmul.msk.bf16.vlgmr.msra.gmra.mxu0 %vm1029_vm1, %v1734_v26 }
 0x2ac   : > { %1482 = vmatpush.bf16.msra.mxu0 %v1467_v50 }
 0x2ad   : > { %v1524_v52 = vpop.permute.xlu1 %1523 }
 0x2ae   : > { %v1526_v53 = vsel %vm898_vm10, %v1522_v40, %v1524_v52  ;;  %v1537_v54 = vsel %vm1033_vm15, %v1524_v52, 0 }
 0x2af   : > { %v1534_v55 = vsel %vm1033_vm15, %v1526_v53, 0 }
 0x2b3   : > { %1744 = vmatmul.msk.bf16.vlgmr.msrb.gmra.mxu2 %vm1029_vm1, %v1742_v37 }
 0x2b6   : > { %1745 = vmatmul.msk.bf16.vlgmr.msrb.gmra.mxu3 %vm1029_vm1, %v1742_v37 }
 0x2ba   : > { %1743 = vmatmul.msk.bf16.vlgmr.msrb.gmra.mxu1 %vm1029_vm1, %v1742_v37 }
 0x2bb   : > { %1572 = vmatpush.bf16.msrb.mxu1 %v1537_v54  ;;  %1741 = vmatmul.msk.bf16.vlgmr.msrb.gmra.mxu0 %vm1029_vm1, %v1738_v41 }
 0x2bc   : > { %1559 = vmatpush.bf16.msrb.mxu0 %v1534_v55 }
 0x2c3   : > { %1749 = vmatmul.msk.bf16.vlgmr.msra.gmra.mxu2 %vm1029_vm1, %v1746_v56 }
 0x2c6   : > { %1751 = vmatmul.msk.bf16.vlgmr.msra.gmra.mxu3 %vm1029_vm1, %v1750_v57 }
 0x2ca   : > { %1748 = vmatmul.msk.bf16.vlgmr.msra.gmra.mxu1 %vm1029_vm1, %v1746_v56 }
 0x2cb   : > { %1747 = vmatmul.msk.bf16.vlgmr.msra.gmra.mxu0 %vm1029_vm1, %v1746_v56 }
 0x2cd   : > { %v1585_v51 = vpop.permute.xlu2 %1584 }
 0x2da   : > { %1753 = vmatmul.msk.bf16.vlgmr.msrb.gmra.mxu1 %vm1029_vm1, %v1750_v57 }
 0x2db   : > { %1752 = vmatmul.msk.bf16.vlgmr.msrb.gmra.mxu0 %vm1029_vm1, %v1750_v57 }
 0x2e9   : > { %v1052_v61 = vpop.f32.mrf.mxu3 }
 0x2ea   : > { %v1104_v62 = vadd.f32 %v1103_v59, %v1052_v61 }
 0x2f1   : > { %v1054_v63 = vpop.f32.mrf.mxu3 }
 0x2f7   : > { %v1078_v0 = vpop.f32.mrf.mxu1 }
 0x2f8   : > { %v1065_v1 = vpop.f32.mrf.mxu0 }
 0x2f9   : > { %v1116_v2 = vpop.f32.mrf.mxu3 }
 0x2fa   : > { %v1117_v4 = vadd.f32 %v1116_v2, %v1065_v1 }
 0x2ff   : > { %v1080_v5 = vpop.f32.mrf.mxu1 }
 0x300   : > { %v1067_v6 = vpop.f32.mrf.mxu0 }
 0x301   : > { %v1118_v7 = vpop.f32.mrf.mxu3 }
 0x306   : > { %v1177_v8 = vpop.f32.mrf.mxu2 }
 0x307   : > { %v1195_v11 = vadd.f32 %v1177_v8, %v1117_v4  ;;  %v1164_v13 = vpop.f32.mrf.mxu1 }
 0x308   : > { %v1194_v14 = vadd.f32 %v1164_v13, %v1104_v62  ;;  %v1129_v15 = vpop.f32.mrf.mxu0 }
 0x309   : > { %v1130_v16 = vadd.f32 %v1129_v15, %v1078_v0  ;;  %v1190_v17 = vpop.f32.mrf.mxu3 }
 0x30b   : > { %v1196_v18 = vadd.f32 %v1190_v17, %v1130_v16  ;;  %v1594_v16 = vpop.permute.xlu0 %1593 }
 0x30e   : > { %v1179_v19 = vpop.f32.mrf.mxu2 }
 0x30f   : > { %v1166_v20 = vpop.f32.mrf.mxu1 }
 0x310   : > { %v1131_v21 = vpop.f32.mrf.mxu0 }
 0x311   : > { %v1192_v22 = vpop.f32.mrf.mxu3 }
 0x316   : > { %v1254_v23 = vpop.f32.mrf.mxu2 }
 0x317   : > { %v1241_v24 = vpop.f32.mrf.mxu1  ;;  %v1260_v57 = vadd.f32 %v1254_v23, %v1196_v18 }
 0x318   : > { %v1228_v26 = vpop.f32.mrf.mxu0  ;;  %v1259_v58 = vadd.f32 %v1241_v24, %v1195_v11 }
 0x319   : > { %v1292_v27 = vpop.f32.mrf.mxu3  ;;  %v1258_v49 = vadd.f32 %v1228_v26, %v1194_v14 }
 0x31b   : > { %v1322_v37 = vadd.f32 %v1292_v27, %v1258_v49 }
 0x31e   : > { %v1256_v28 = vpop.f32.mrf.mxu2 }
 0x31f   : > { %v1243_v29 = vpop.f32.mrf.mxu1 }
 0x320   : > { %v1230_v30 = vpop.f32.mrf.mxu0 }
 0x321   : > { %v1294_v31 = vpop.f32.mrf.mxu3 }
 0x326   : > { %v1356_v32 = vpop.f32.mrf.mxu2 }
 0x327   : > { %v1318_v33 = vpop.f32.mrf.mxu1  ;;  %v1386_v54 = vadd.f32 %v1356_v32, %v1322_v37 }
 0x328   : > { %v1305_v34 = vpop.f32.mrf.mxu0  ;;  %v1324_v60 = vadd.f32 %v1318_v33, %v1260_v57 }
 0x329   : > { %v1369_v35 = vpop.f32.mrf.mxu3  ;;  %v1323_v62 = vadd.f32 %v1305_v34, %v1259_v58 }
 0x32b   : > { %v1387_v5 = vadd.f32 %v1369_v35, %v1323_v62 }
 0x32e   : > { %v1358_v36 = vpop.f32.mrf.mxu2 }
 0x32f   : > { %v1320_v38 = vpop.f32.mrf.mxu1 }
 0x330   : > { %v1307_v39 = vpop.f32.mrf.mxu0 }
 0x331   : > { %v1371_v40 = vpop.f32.mrf.mxu3 }
 0x336   : > { %v1433_v41 = vpop.f32.mrf.mxu2 }
 0x337   : > { %v1420_v42 = vpop.f32.mrf.mxu1  ;;  %v1451_v7 = vadd.f32 %v1433_v41, %v1387_v5 }
 0x338   : > { %v1382_v43 = vpop.f32.mrf.mxu0  ;;  %v1450_v56 = vadd.f32 %v1420_v42, %v1386_v54 }
 0x339   : > { %v1446_v44 = vpop.f32.mrf.mxu3  ;;  %v1388_v0 = vadd.f32 %v1382_v43, %v1324_v60 }
 0x33b   : > { %v1452_v6 = vadd.f32 %v1446_v44, %v1388_v0 }
 0x33e   : > { %v1435_v45 = vpop.f32.mrf.mxu2 }
 0x33f   : > { %v1422_v46 = vpop.f32.mrf.mxu1 }
 0x340   : > { %v1384_v47 = vpop.f32.mrf.mxu0 }
 0x341   : > { %v1448_v48 = vpop.f32.mrf.mxu3 }
 0x346   : > { %v1510_v50 = vpop.f32.mrf.mxu2 }
 0x347   : > { %v1497_v52 = vpop.f32.mrf.mxu1  ;;  %v1516_v13 = vadd.f32 %v1510_v50, %v1452_v6 }
 0x348   : > { %v1484_v53 = vpop.f32.mrf.mxu0  ;;  %v1515_v14 = vadd.f32 %v1497_v52, %v1451_v7 }
 0x349   : > { %v1548_v55 = vpop.f32.mrf.mxu3  ;;  %v1514_v59 = vadd.f32 %v1484_v53, %v1450_v56 }
 0x34b   : > { %v1578_v2 = vadd.f32 %v1548_v55, %v1514_v59 }
 0x34d   : > { %v1587_v8 = vmul.f32 %v1585_v51, %v1578_v2 }
 0x34e   : > { %v1512_v61 = vpop.f32.mrf.mxu2 }
 0x34f   : > { %v1499_v63 = vpop.f32.mrf.mxu1  ;;  %v1596_v18 = vadd.f32 %v1594_v16, %v1587_v8 }
 0x350   : > { %v1486_v1 = vpop.f32.mrf.mxu0 }
 0x351   : > { %v1550_v4 = vpop.f32.mrf.mxu3  ;;  %v1599_v23 = vmax.f32 %v1596_v18, 0.0 }
 0x353   : > { %v1602_v31 = vmul.f32 %v1599_v23, %v977_v10 }
 0x357   : > { %v1574_v15 = vpop.f32.mrf.mxu1 }
 0x358   : > { %v1580_v17 = vadd.f32 %v1574_v15, %v1516_v13  ;;  %v1561_v11 = vpop.f32.mrf.mxu0 }
 0x359   : > { %v1579_v19 = vadd.f32 %v1561_v11, %v1515_v14 }
 0x35a   : > { %v1589_v20 = vmul.f32 %v1585_v51, %v1580_v17 }
 0x35b   : > { %v1588_v21 = vmul.f32 %v1585_v51, %v1579_v19 }
 0x35c   : > { %v1598_v22 = vadd.f32 %v1594_v16, %v1589_v20 }
 0x35d   : > { %v1597_v24 = vadd.f32 %v1594_v16, %v1588_v21 }
 0x35e   : > { %v1601_v26 = vmax.f32 %v1598_v22, 0.0 }
 0x35f   : > { %v1600_v27 = vmax.f32 %v1597_v24, 0.0  ;;  %v1576_v28 = vpop.f32.mrf.mxu1 }
 0x360   : > { %v1604_v29 = vmul.f32 %v1601_v26, %v979_v9  ;;  %v1563_v30 = vpop.f32.mrf.mxu0 }
 0x361   : > { %v1603_v32 = vmul.f32 %v1600_v27, %v978_v12 }
 0x362   : > { %v1608_v33 = vpack.c.bf16 %v1604_v29, %v1604_v29 }
 0x363   : > { %v1607_v34 = vpack.c.bf16 %v1603_v32, %v1602_v31 }
 0x364   : > { %1613 = vrot.lane.b32.xlu2 %v1608_v33, %s1798_s19 }
 0x365   : > { %1611 = vrot.lane.b32.xlu1 %v1607_v34, %s1798_s19 }
 0x3be   : > { %v1614_v38 = vpop.permute.xlu2 %1613 }
 0x3d7   : > { %v1612_v35 = vpop.permute.xlu1 %1611 }
 0x3d8   : > { %v1615_v36 = vrot.slane %v1612_v35, 4 }
 0x3da   : > { %v1616_v39 = vsel %vm997_vm13, %v1615_v36, %v1612_v35  ;;  %v1617_v9 = vsel %vm997_vm13, %v1615_v36, %v1614_v38 }
 0x3db   : > { %1620 = vst.msk [vmem:[%s2167_s17] sm:$0xff] %vm2027_vm14, %v1616_v39 }
 0x3dc   : > { %1621 = vst.msk [vmem:[%s2167_s17 + $0x8] sm:$0xf] %vm1006_vm0, %v1617_v9 }
 0x3dd PF: > { %s18_s27 = sadd.s32 1, %s1786_s27  }
 0x3de   : > { %p15_p4 = scmp.ge.s32.totalorder %s18_s27, 4  }
 0x3e0   :  { %17 = sbr.rel (!%p15_p4) target bundleno = 1 (0x1), region = 98 }

// kernel: _lambda_.9
= control target key start
LH: loop header
LB: loop body
LE: loop exit
PB: predicated region body
PF: predicated region fallthrough
CT: control target
= control target key end

     0   :  { %s1255_s27 = smov 0   ;;  %s1427_s0 = inlined_call_operand.vmem [shape: bf16[2,8,128], index: 0, kind: input, shape index: {}]   ;;  %s1428_s1 = inlined_call_operand.vmem [shape: bf16[9,16,8], index: 1, kind: input, shape index: {}]   ;;  %s1429_s2 = inlined_call_operand.vmem [shape: f32[16,1], index: 2, kind: input, shape index: {}]   ;;  %s1430_s3 = inlined_call_operand.vmem [shape: f32[16,1], index: 3, kind: input, shape index: {}]   ;;  %s1431_s4 = inlined_call_operand.vmem [shape: bf16[9,16,16], index: 4, kind: input, shape index: {}]   ;;  %s1432_s5 = inlined_call_operand.vmem [shape: f32[16,1], index: 5, kind: input, shape index: {}]   ;;  %s1433_s6 = inlined_call_operand.vmem [shape: f32[16,1], index: 6, kind: input, shape index: {}]   ;;  %s1434_s7 = inlined_call_operand.vmem [shape: f32[1,78], index: 7, kind: input, shape index: {}]   ;;  %s1435_s8 = inlined_call_operand.vmem [shape: bf16[2,16,128], index: 8, kind: output, shape index: {}]  }
   0x1 LB: > { %s1014_s28 = sadd.s32 4294967295, %s1198_s27   ;;  %p1018_p0 = scmp.ge.s32.totalorder %s1198_s27, 1  ;;  %s1198_s27 = sphi %s1255_s27, %s18_s27  }
   0x2   : > { %p261_p1 = scmp.lt.s32.totalorder %s1198_s27, 3 }
   0x4   : > { %p262_p2 = pnand %p1018_p0, %p261_p1 }
   0x5   : > { %p294_p3 = scmp.lt.s32.totalorder (!%p262_p2), %s1014_s28, 1  ;;  %s1200_s11 = smov (!%p262_p2), 127  }
   0x6   : > { %265 = sbr.rel (%p262_p2) target bundleno = 848 (0x350), region = 52  ;;  %s1201_s12 = smov (!%p262_p2), 118  }
   0x7   : > { %s1202_s13 = smov (!%p262_p2), 108   ;;  %s1203_s14 = smov (!%p262_p2), 126  }
   0x8   : > { %s1204_s15 = smov (!%p262_p2), 117   ;;  %s1205_s16 = smov (!%p262_p2), 107  }
   0x9   : > { %s1206_s17 = smov (!%p262_p2), 116   ;;  %s1207_s18 = smov (!%p262_p2), 106  }
   0xa   : > { %s1209_s23 = smov (!%p262_p2), 11  }
   0xb   : > { %s1437_s28 = smov (!%p294_p3, %s1014_s28), 1  ;;  %vm325_vm0 = vcmask 1043456   ;;  %vm321_vm1 = vcmask 64512   ;;  %v1151_v4 = vld [vmem:[%s1428_s1] sm:$0xff]  ;;  %v1152_v12 = vld [vmem:[%s1428_s1 + $0x8] sm:$0xff]  ;;  %v1154_v13 = vld [vmem:[%s1428_s1 + $0x18] sm:$0xff] }
   0xc   : > { %s1019_s29 = sshll.u32 %s1437_s28, 2  ;;  %v606_v14 = vld [vmem:[%s1430_s3] sm:$0xff]  ;;  %v593_v15 = vld [vmem:[%s1429_s2 + $0x8] sm:$0xff]  ;;  %v1208_v16 = vmov 0   ;;  %v1153_v22 = vld [vmem:[%s1428_s1 + $0x10] sm:$0xff]  ;;  %vm639_vm2 = vcmask 724056  }
   0xd   : > { %s297_s10 = scalar_lea.vmem %s1427_s0, %s1019_s29  ;;  %1190 = vset.pattern.permute.xlu1 %v1208_v16  ;;  %627 = vst [vmem:[#allocation2] sm:$0xf] %v1208_v16  ;;  %1189 = vset.pattern.permute.xlu0 %v1208_v16  ;;  %v592_v17 = vld [vmem:[%s1429_s2] sm:$0xff]  ;;  %v607_v24 = vld [vmem:[%s1430_s3 + $0x8] sm:$0xff]  ;;  %v1158_v29 = vld [vmem:[%s1428_s1 + $0x38] sm:$0xff]  ;;  %vm662_vm3 = vcmask 130048  }
   0xe   : > { %v307_v0 = vld [vmem:[%s297_s10] sm:$0xf]  ;;  %628 = vst [vmem:[#allocation2 + $0x4] sm:$0xf] %v1208_v16  ;;  %1188 = vset.pattern.permute.xlu2 %v1208_v16  ;;  %v1156_v31 = vld [vmem:[%s1428_s1 + $0x28] sm:$0xff]  ;;  %v1157_v32 = vld [vmem:[%s1428_s1 + $0x30] sm:$0xff] }
   0xf   : > { %v317_v1 = vunpack.c.l.b16 %v307_v0  ;;  %v352_v3 = vsel %vm325_vm0, %v307_v0, 0  ;;  %v1155_v27 = vld [vmem:[%s1428_s1 + $0x20] sm:$0xff] }
  0x10   : > { %361 = vmatpush.bf16.msra.mxu1 %v352_v3  ;;  %v1159_v33 = vld [vmem:[%s1428_s1 + $0x40] sm:$0xff] }
  0x11   : > { %v318_v2 = vpack.c.b16 %v317_v1, %v317_v1 }
  0x13   : > { %319 = vrot.lane.b32.xlu0 %v318_v2, %s1200_s11  ;;  %408 = vrot.lane.b32.xlu1 %v318_v2, %s1201_s12 }
  0x14   : > { %504 = vrot.lane.b32.xlu2 %v318_v2, %s1202_s13  ;;  %1033 = vmatmul.msk.bf16.vlgmr.msra.gmra.mxu1 %vm321_vm1, %v1151_v4 }
  0x1b   : > { %376 = vrot.lane.b32.xlu0 %v318_v2, %s1203_s14  ;;  %440 = vrot.lane.b32.xlu1 %v318_v2, %s1204_s15 }
  0x1c   : > { %536 = vrot.lane.b32.xlu2 %v318_v2, %s1205_s16 }
  0x23   : > { %472 = vrot.lane.b32.xlu0 %v318_v2, %s1206_s17  ;;  %568 = vrot.lane.b32.xlu1 %v318_v2, %s1207_s18  ;;  %v1342_v2 = vld [vmem:[%s1434_s7] ss:$0 sm:$0xff] }
  0x24   : > { %596 = vperm.xlu2 %1188, %v592_v17  }
  0x2b   : > { %610 = vperm.xlu1 %1190, %v606_v14   ;;  %601 = vperm.xlu0 %1189, %v593_v15  }
  0x2c   : > { %615 = vperm.xlu2 %1188, %v607_v24  }
  0x6e   : > { %v505_v5 = vpop.permute.xlu2 %504 }
  0x6f   : > { %v510_v20 = vsel %vm325_vm0, %v505_v5, 0 }
  0x76   : > { %v537_v6 = vpop.permute.xlu2 %536 }
  0x77   : > { %v542_v9 = vsel %vm325_vm0, %v537_v6, 0 }
  0x7e   : > { %v597_v61 = vpop.permute.xlu2 %596 }
  0x85   : > { %v320_v7 = vpop.permute.xlu0 %319  ;;  %v409_v8 = vpop.permute.xlu1 %408 }
  0x86   : > { %v327_v10 = vsel %vm325_vm0, %v320_v7, 0  ;;  %v414_v11 = vsel %vm325_vm0, %v409_v8, 0  ;;  %v616_v14 = vpop.permute.xlu2 %615 }
  0x87   : > { %336 = vmatpush.bf16.msra.mxu0 %v327_v10  ;;  %423 = vmatpush.bf16.msra.mxu3 %v414_v11 }
  0x8a   : > { %1028 = vmatmul.msk.bf16.vlgmr.msra.gmra.mxu0 %vm321_vm1, %v1152_v12  ;;  %1047 = vmatmul.msk.bf16.vlgmr.msra.gmra.mxu3 %vm321_vm1, %v1154_v13 }
  0x8b   : > { %551 = vmatpush.bf16.msrb.mxu3 %v542_v9 }
  0x8d   : > { %v377_v18 = vpop.permute.xlu0 %376  ;;  %v441_v19 = vpop.permute.xlu1 %440 }
  0x8e   : > { %v382_v21 = vsel %vm325_vm0, %v377_v18, 0  ;;  %v446_v23 = vsel %vm325_vm0, %v441_v19, 0 }
  0x8f   : > { %391 = vmatpush.bf16.msra.mxu2 %v382_v21  ;;  %455 = vmatpush.bf16.msrb.mxu0 %v446_v23 }
  0x91   : > { %v363_v35 = vpop.f32.mrf.mxu1 }
  0x92   : > { %1040 = vmatmul.msk.bf16.vlgmr.msra.gmra.mxu2 %vm321_vm1, %v1153_v22 }
  0x93   : > { %519 = vmatpush.bf16.msrb.mxu2 %v510_v20 }
  0x95   : > { %v473_v25 = vpop.permute.xlu0 %472  ;;  %v569_v26 = vpop.permute.xlu1 %568 }
  0x96   : > { %v478_v28 = vsel %vm325_vm0, %v473_v25, 0  ;;  %v574_v30 = vsel %vm325_vm0, %v569_v26, 0  ;;  %v913_v25 = vld [vmem:[%s1432_s5] sm:$0xff]  ;;  %v928_v26 = vld [vmem:[%s1433_s6 + $0x8] sm:$0xff] }
  0x97   : > { %487 = vmatpush.bf16.msrb.mxu1 %v478_v28  ;;  %583 = vmatpush.bf16.msra.mxu0 %v574_v30  ;;  %v914_v28 = vld [vmem:[%s1432_s5 + $0x8] sm:$0xff] }
  0x99   : > { %v365_v40 = vpop.f32.mrf.mxu1 }
  0x9a   : > { %1054 = vmatmul.msk.bf16.vlgmr.msrb.gmra.mxu0 %vm321_vm1, %v1155_v27  ;;  %1075 = vmatmul.msk.bf16.vlgmr.msrb.gmra.mxu3 %vm321_vm1, %v1158_v29  ;;  %v927_v27 = vld [vmem:[%s1433_s6] sm:$0xff] }
  0x9b   : > { %1061 = vmatmul.msk.bf16.vlgmr.msrb.gmra.mxu1 %vm321_vm1, %v1156_v31  ;;  %v1160_v29 = vld [vmem:[%s1431_s4] sm:$0xff]  ;;  %v1164_v31 = vld [vmem:[%s1431_s4 + $0x18] sm:$0xff] }
  0x9d   : > { %v611_v62 = vpop.permute.xlu1 %610  ;;  %v602_v9 = vpop.permute.xlu0 %601 }
  0xa2   : > { %1068 = vmatmul.msk.bf16.vlgmr.msrb.gmra.mxu2 %vm321_vm1, %v1157_v32 }
  0xaa   : > { %1082 = vmatmul.msk.bf16.vlgmr.msra.gmra.mxu0 %vm321_vm1, %v1159_v33  ;;  %v1163_v33 = vld [vmem:[%s1431_s4 + $0x10] sm:$0xff] }
 0x107   : > { %v338_v34 = vpop.f32.mrf.mxu0 }
 0x108   : > { %v364_v39 = vadd.f32 %v363_v35, %v338_v34 }
 0x10d   : > { %v425_v37 = vpop.f32.mrf.mxu3 }
 0x10f   : > { %v340_v36 = vpop.f32.mrf.mxu0 }
 0x110   : > { %v366_v46 = vadd.f32 %v365_v40, %v340_v36  ;;  %v1162_v36 = vld [vmem:[%s1431_s4 + $0x8] sm:$0xff] }
 0x115   : > { %v393_v38 = vpop.f32.mrf.mxu2  ;;  %v427_v43 = vpop.f32.mrf.mxu3 }
 0x116   : > { %v398_v42 = vadd.f32 %v393_v38, %v364_v39  ;;  %v1166_v38 = vld [vmem:[%s1431_s4 + $0x28] sm:$0xff] }
 0x117   : > { %v457_v41 = vpop.f32.mrf.mxu0 }
 0x118   : > { %v430_v44 = vadd.f32 %v425_v37, %v398_v42  ;;  %v489_v47 = vpop.f32.mrf.mxu1 }
 0x11a   : > { %v462_v49 = vadd.f32 %v457_v41, %v430_v44  ;;  %v1167_v41 = vld [vmem:[%s1431_s4 + $0x30] sm:$0xff]  ;;  %v1168_v44 = vld [vmem:[%s1431_s4 + $0x38] sm:$0xff] }
 0x11c   : > { %v494_v51 = vadd.f32 %v489_v47, %v462_v49 }
 0x11d   : > { %v395_v45 = vpop.f32.mrf.mxu2  ;;  %v553_v53 = vpop.f32.mrf.mxu3 }
 0x11e   : > { %v399_v50 = vadd.f32 %v395_v45, %v366_v46  ;;  %v1169_v45 = vld [vmem:[%s1431_s4 + $0x40] sm:$0xff] }
 0x11f   : > { %v459_v48 = vpop.f32.mrf.mxu0 }
 0x120   : > { %v431_v52 = vadd.f32 %v427_v43, %v399_v50  ;;  %v491_v59 = vpop.f32.mrf.mxu1  ;;  %v1165_v43 = vld [vmem:[%s1431_s4 + $0x20] sm:$0xff] }
 0x122   : > { %v463_v57 = vadd.f32 %v459_v48, %v431_v52 }
 0x124   : > { %v495_v63 = vadd.f32 %v491_v59, %v463_v57 }
 0x125   : > { %v521_v54 = vpop.f32.mrf.mxu2  ;;  %v555_v5 = vpop.f32.mrf.mxu3 }
 0x126   : > { %v526_v55 = vadd.f32 %v521_v54, %v494_v51 }
 0x127   : > { %v585_v56 = vpop.f32.mrf.mxu0 }
 0x128   : > { %v558_v58 = vadd.f32 %v553_v53, %v526_v55 }
 0x12a   : > { %v590_v60 = vadd.f32 %v585_v56, %v558_v58 }
 0x12c   : > { %v604_v0 = vmul.f32 %v597_v61, %v590_v60 }
 0x12d   : > { %v523_v1 = vpop.f32.mrf.mxu2 }
 0x12e   : > { %v618_v3 = vadd.f32 %v611_v62, %v604_v0  ;;  %v527_v4 = vadd.f32 %v523_v1, %v495_v63 }
 0x12f   : > { %v587_v8 = vpop.f32.mrf.mxu0 }
 0x130   : > { %v620_v6 = vmax.f32 %v618_v3, 0.0  ;;  %v559_v7 = vadd.f32 %v555_v5, %v527_v4 }
 0x132   : > { %v625_v10 = vmul.f32 %v1342_v2, %v620_v6  ;;  %v591_v11 = vadd.f32 %v587_v8, %v559_v7 }
 0x134   : > { %v629_v12 = vpack.c.bf16 %v625_v10, %v625_v10  ;;  %v605_v13 = vmul.f32 %v602_v9, %v591_v11 }
 0x136   : > { %v619_v15 = vadd.f32 %v616_v14, %v605_v13  ;;  %633 = vrot.lane.b32.xlu1 %v629_v12, %s1209_s23 }
 0x138   : > { %v621_v17 = vmax.f32 %v619_v15, 0.0 }
 0x13a   : > { %v626_v18 = vmul.f32 %v1342_v2, %v621_v17 }
 0x13c   : > { %v630_v19 = vpack.c.bf16 %v626_v18, %v626_v18 }
 0x13e   : > { %635 = vrot.lane.b32.xlu2 %v630_v19, %s1209_s23 }
 0x198   : > { %v636_v20 = vpop.permute.xlu2 %635 }
 0x199   : > { %641 = vst.msk [vmem:[#allocation2 + $0x4] sm:$0xf] %vm639_vm2, %v636_v20 }
 0x1a0   : > { %v1161_v22 = vld [vmem:[#allocation2] sm:$0xf0] }
 0x1a8   : > { %v634_v21 = vpop.permute.xlu1 %633 }
 0x1a9   : > { %640 = vst.msk [vmem:[#allocation2] sm:$0xf] %vm639_vm2, %v634_v21 }
 0x1b0   : > { %v1091_v23 = vld [vmem:[#allocation2] sm:$0xf] }
 0x1b1   : > { %v1092_v24 = vor.u32 %v1161_v22, %v1091_v23 }
 0x1b3   : > { %741 = vrot.lane.b32.xlu2 %v1092_v24, %s1201_s12  ;;  %711 = vrot.lane.b32.xlu1 %v1092_v24, %s1203_s14 }
 0x1b4   : > { %659 = vrot.lane.b32.xlu0 %v1092_v24, %s1200_s11  ;;  %696 = vmatpush.bf16.msra.mxu2 %v1092_v24 }
 0x1b7   : > { %1098 = vmatmul.msk.bf16.vlgmr.msra.gmra.mxu2 %vm662_vm3, %v1160_v29 }
 0x1bb   : > { %831 = vrot.lane.b32.xlu2 %v1092_v24, %s1202_s13  ;;  %801 = vrot.lane.b32.xlu1 %v1092_v24, %s1206_s17  ;;  %s1150_s17 = sshll.u32 %s1437_s28, 3 }
 0x1bc   : > { %771 = vrot.lane.b32.xlu0 %v1092_v24, %s1204_s15 }
 0x1c3   : > { %917 = vperm.xlu2 %1188, %v913_v25   ;;  %891 = vrot.lane.b32.xlu1 %v1092_v24, %s1207_s18 }
 0x1c4   : > { %861 = vrot.lane.b32.xlu0 %v1092_v24, %s1205_s16  ;;  %s1410_s16 = scalar_lea.vmem %s1435_s8, %s1150_s17 }
 0x1c5   : > { %945 = vst [vmem:[%s1410_s16] sm:$0xf] %v1208_v16 }
 0x1c6   : > { %946 = vst [vmem:[%s1410_s16 + $0x4] sm:$0xf] %v1208_v16 }
 0x1cb   : > { %936 = vperm.xlu2 %1188, %v928_v26   ;;  %931 = vperm.xlu1 %1190, %v927_v27  }
 0x1cc   : > { %922 = vperm.xlu0 %1189, %v914_v28  }
 0x20d   : > { %v742_v30 = vpop.permute.xlu2 %741 }
 0x20e   : > { %754 = vmatpush.bf16.msrb.mxu0 %v742_v30 }
 0x211   : > { %1112 = vmatmul.msk.bf16.vlgmr.msrb.gmra.mxu0 %vm662_vm3, %v1164_v31 }
 0x215   : > { %v832_v34 = vpop.permute.xlu2 %831 }
 0x21d   : > { %v918_v11 = vpop.permute.xlu2 %917 }
 0x225   : > { %v712_v32 = vpop.permute.xlu1 %711  ;;  %v937_v26 = vpop.permute.xlu2 %936 }
 0x226   : > { %v660_v35 = vpop.permute.xlu0 %659  ;;  %724 = vmatpush.bf16.msra.mxu3 %v712_v32 }
 0x227   : > { %673 = vmatpush.bf16.msra.mxu1 %v660_v35 }
 0x229   : > { %1105 = vmatmul.msk.bf16.vlgmr.msra.gmra.mxu3 %vm662_vm3, %v1163_v33 }
 0x22a   : > { %844 = vmatpush.bf16.msrb.mxu3 %v832_v34  ;;  %1093 = vmatmul.msk.bf16.vlgmr.msra.gmra.mxu1 %vm662_vm3, %v1162_v36 }
 0x22d   : > { %v802_v37 = vpop.permute.xlu1 %801 }
 0x22e   : > { %v772_v39 = vpop.permute.xlu0 %771  ;;  %814 = vmatpush.bf16.msrb.mxu2 %v802_v37 }
 0x22f   : > { %784 = vmatpush.bf16.msrb.mxu1 %v772_v39 }
 0x231   : > { %1126 = vmatmul.msk.bf16.vlgmr.msrb.gmra.mxu2 %vm662_vm3, %v1166_v38 }
 0x235   : > { %v892_v40 = vpop.permute.xlu1 %891 }
 0x236   : > { %v862_v42 = vpop.permute.xlu0 %861  ;;  %904 = vmatpush.bf16.msra.mxu1 %v892_v40 }
 0x237   : > { %874 = vmatpush.bf16.msra.mxu0 %v862_v42 }
 0x239   : > { %1133 = vmatmul.msk.bf16.vlgmr.msrb.gmra.mxu3 %vm662_vm3, %v1167_v41 }
 0x23a   : > { %1119 = vmatmul.msk.bf16.vlgmr.msrb.gmra.mxu1 %vm662_vm3, %v1165_v43  ;;  %1140 = vmatmul.msk.bf16.vlgmr.msra.gmra.mxu0 %vm662_vm3, %v1168_v44  ;;  %v698_v47 = vpop.f32.mrf.mxu2 }
 0x23d   : > { %v932_v14 = vpop.permute.xlu1 %931 }
 0x23e   : > { %v923_v23 = vpop.permute.xlu0 %922 }
 0x242   : > { %v700_v51 = vpop.f32.mrf.mxu2 }
 0x24a   : > { %1147 = vmatmul.msk.bf16.vlgmr.msra.gmra.mxu1 %vm662_vm3, %v1169_v45 }
 0x28e   : > { %v756_v50 = vpop.f32.mrf.mxu0 }
 0x296   : > { %v758_v56 = vpop.f32.mrf.mxu0 }
 0x2a7   : > { %v675_v46 = vpop.f32.mrf.mxu1 }
 0x2a8   : > { %v699_v52 = vadd.f32 %v698_v47, %v675_v46 }
 0x2ac   : > { %v726_v48 = vpop.f32.mrf.mxu3 }
 0x2ad   : > { %v731_v54 = vadd.f32 %v726_v48, %v699_v52 }
 0x2af   : > { %v677_v49 = vpop.f32.mrf.mxu1  ;;  %v761_v57 = vadd.f32 %v756_v50, %v731_v54 }
 0x2b0   : > { %v701_v59 = vadd.f32 %v700_v51, %v677_v49 }
 0x2b4   : > { %v728_v53 = vpop.f32.mrf.mxu3  ;;  %v816_v58 = vpop.f32.mrf.mxu2 }
 0x2b5   : > { %v732_v62 = vadd.f32 %v728_v53, %v701_v59 }
 0x2b7   : > { %v786_v55 = vpop.f32.mrf.mxu1  ;;  %v762_v16 = vadd.f32 %v758_v56, %v732_v62  ;;  %v876_v3 = vpop.f32.mrf.mxu0 }
 0x2b8   : > { %v791_v60 = vadd.f32 %v786_v55, %v761_v57 }
 0x2ba   : > { %v821_v0 = vadd.f32 %v816_v58, %v791_v60 }
 0x2bc   : > { %v846_v61 = vpop.f32.mrf.mxu3  ;;  %v818_v5 = vpop.f32.mrf.mxu2 }
 0x2bd   : > { %v851_v1 = vadd.f32 %v846_v61, %v821_v0 }
 0x2bf   : > { %v788_v63 = vpop.f32.mrf.mxu1  ;;  %v881_v6 = vadd.f32 %v876_v3, %v851_v1  ;;  %v878_v17 = vpop.f32.mrf.mxu0 }
 0x2c0   : > { %v792_v4 = vadd.f32 %v788_v63, %v762_v16 }
 0x2c2   : > { %v822_v9 = vadd.f32 %v818_v5, %v792_v4 }
 0x2c4   : > { %v848_v7 = vpop.f32.mrf.mxu3 }
 0x2c5   : > { %v852_v12 = vadd.f32 %v848_v7, %v822_v9 }
 0x2c7   : > { %v906_v8 = vpop.f32.mrf.mxu1  ;;  %v882_v18 = vadd.f32 %v878_v17, %v852_v12 }
 0x2c8   : > { %v911_v10 = vadd.f32 %v906_v8, %v881_v6 }
 0x2ca   : > { %v925_v13 = vmul.f32 %v918_v11, %v911_v10 }
 0x2cc   : > { %v939_v15 = vadd.f32 %v932_v14, %v925_v13 }
 0x2ce   : > { %v941_v19 = vmax.f32 %v939_v15, 0.0 }
 0x2cf   : > { %v908_v20 = vpop.f32.mrf.mxu1 }
 0x2d0   : > { %v912_v21 = vadd.f32 %v908_v20, %v882_v18  ;;  %v943_v22 = vmul.f32 %v1342_v2, %v941_v19 }
 0x2d2   : > { %v926_v24 = vmul.f32 %v923_v23, %v912_v21  ;;  %v947_v25 = vpack.c.bf16 %v943_v22, %v943_v22 }
 0x2d4   : > { %v940_v27 = vadd.f32 %v937_v26, %v926_v24  ;;  %951 = vrot.lane.b32.xlu0 %v947_v25, %s1209_s23 }
 0x2d6   : > { %v942_v28 = vmax.f32 %v940_v27, 0.0 }
 0x2d8   : > { %v944_v29 = vmul.f32 %v1342_v2, %v942_v28 }
 0x2da   : > { %v948_v30 = vpack.c.bf16 %v944_v29, %v944_v29 }
 0x2dc   : > { %953 = vrot.lane.b32.xlu1 %v948_v30, %s1209_s23 }
 0x346   : > { %v952_v31 = vpop.permute.xlu0 %951 }
 0x347   : > { %957 = vst.msk [vmem:[%s1410_s16] sm:$0xf] %vm639_vm2, %v952_v31 }
 0x34e   : > { %v954_v32 = vpop.permute.xlu1 %953 }
 0x34f   : > { %958 = vst.msk [vmem:[%s1410_s16 + $0x4] sm:$0xf] %vm639_vm2, %v954_v32 }
 0x350 PF: > { %s18_s27 = sadd.s32 1, %s1198_s27  }
 0x351   : > { %p15_p4 = scmp.ge.s32.totalorder %s18_s27, 4  }
 0x353   :  { %17 = sbr.rel (!%p15_p4) target bundleno = 1 (0x1), region = 98 }

// kernel: _lambda_.10
= control target key start
LH: loop header
LB: loop body
LE: loop exit
PB: predicated region body
PF: predicated region fallthrough
CT: control target
= control target key end

     0   :  { %s1818_s27 = smov 0   ;;  %s2108_s0 = inlined_call_operand.vmem [shape: bf16[2,16,128], index: 0, kind: input, shape index: {}]   ;;  %s2109_s1 = inlined_call_operand.vmem [shape: bf16[9,32,16], index: 1, kind: input, shape index: {}]   ;;  %s2110_s2 = inlined_call_operand.vmem [shape: f32[32,1], index: 2, kind: input, shape index: {}]   ;;  %s2111_s3 = inlined_call_operand.vmem [shape: f32[32,1], index: 3, kind: input, shape index: {}]   ;;  %s2112_s4 = inlined_call_operand.vmem [shape: bf16[9,32,32], index: 4, kind: input, shape index: {}]   ;;  %s2113_s5 = inlined_call_operand.vmem [shape: f32[32,1], index: 5, kind: input, shape index: {}]   ;;  %s2114_s6 = inlined_call_operand.vmem [shape: f32[32,1], index: 6, kind: input, shape index: {}]   ;;  %s2115_s7 = inlined_call_operand.vmem [shape: f32[1,22], index: 7, kind: input, shape index: {}]   ;;  %s2116_s8 = inlined_call_operand.vmem [shape: bf16[2,32,128], index: 8, kind: output, shape index: {}]  }
   0x1 LB: > { %s1423_s28 = sadd.s32 4294967295, %s1761_s27   ;;  %p1427_p0 = scmp.ge.s32.totalorder %s1761_s27, 1  ;;  %s1761_s27 = sphi %s1818_s27, %s18_s27  }
   0x2   : > { %p262_p1 = scmp.lt.s32.totalorder %s1761_s27, 3 }
   0x4   : > { %p263_p2 = pnand %p1427_p0, %p262_p1 }
   0x5   : > { %p296_p3 = scmp.lt.s32.totalorder (!%p263_p2), %s1423_s28, 1  ;;  %s1763_s11 = smov (!%p263_p2), 127  }
   0x6   : > { %266 = sbr.rel (%p263_p2) target bundleno = 942 (0x3ae), region = 52  ;;  %s1764_s12 = smov (!%p263_p2), 122  }
   0x7   : > { %s1765_s15 = smov (!%p263_p2), 116   ;;  %s1766_s16 = smov (!%p263_p2), 126  }
   0x8   : > { %s1767_s17 = smov (!%p263_p2), 121   ;;  %s1768_s18 = smov (!%p263_p2), 115  }
   0x9   : > { %s1769_s19 = smov (!%p263_p2), 120   ;;  %s1770_s20 = smov (!%p263_p2), 114  }
   0xa   : > { %s1772_s25 = smov (!%p263_p2), 7  }
   0xb   : > { %s2118_s28 = smov (!%p296_p3, %s1423_s28), 1  ;;  %v1693_v1 = vld [vmem:[%s2109_s1 + $0x8] sm:$0xff]  ;;  %vm337_vm0 = vcmask 130048   ;;  %v1692_v2 = vld [vmem:[%s2109_s1] sm:$0xff]  ;;  %v1696_v5 = vld [vmem:[%s2109_s1 + $0x18] sm:$0xff]  ;;  %v1771_v19 = vmov 0  }
   0xc   : > { %s1690_s29 = sshll.u32 %s2118_s28, 3  ;;  %v1695_v6 = vld [vmem:[%s2109_s1 + $0x10] sm:$0xff]  ;;  %v1697_v12 = vld [vmem:[%s2109_s1 + $0x20] sm:$0xff]  ;;  %v1700_v16 = vld [vmem:[%s2109_s1 + $0x38] sm:$0xff]  ;;  %1753 = vset.pattern.permute.xlu1 %v1771_v19  ;;  %795 = vst [vmem:[#allocation2] sm:$0xf] %v1771_v19  ;;  %1752 = vset.pattern.permute.xlu0 %v1771_v19 }
   0xd   : > { %s300_s10 = scalar_lea.vmem %s2108_s0, %s1690_s29  ;;  %v1699_v8 = vld [vmem:[%s2109_s1 + $0x30] sm:$0xff]  ;;  %v1701_v13 = vld [vmem:[%s2109_s1 + $0x40] sm:$0xff]  ;;  %796 = vst [vmem:[#allocation2 + $0x4] sm:$0xf] %v1771_v19  ;;  %1751 = vset.pattern.permute.xlu2 %v1771_v19  ;;  %v1698_v20 = vld [vmem:[%s2109_s1 + $0x28] sm:$0xff]  ;;  %vm819_vm1 = vcmask 232504  }
   0xe   : > { %v1694_v0 = vld [vmem:[%s300_s10] sm:$0xff]  ;;  %v1703_v17 = vld [vmem:[%s2109_s1 + $0x50] sm:$0xff]  ;;  %797 = vst [vmem:[#allocation2 + $0x8] sm:$0xf] %v1771_v19  ;;  %v1702_v21 = vld [vmem:[%s2109_s1 + $0x48] sm:$0xff]  ;;  %vm863_vm2 = vcmask 261120  }
   0xf   : > { %334 = vrot.lane.b32.xlu0 %v1694_v0, %s1763_s11  ;;  %461 = vrot.lane.b32.xlu1 %v1694_v0, %s1764_s12  ;;  %v758_v18 = vld [vmem:[%s2111_s3 + $0x10] sm:$0xff]  ;;  %798 = vst [vmem:[#allocation2 + $0xc] sm:$0xf] %v1771_v19  ;;  %v1704_v23 = vld [vmem:[%s2109_s1 + $0x58] sm:$0xff] }
  0x10   : > { %602 = vrot.lane.b32.xlu2 %v1694_v0, %s1765_s15  ;;  %1732 = vmatpush.bf16.msra.mxu3 %v1694_v0  ;;  %v1707_v22 = vld [vmem:[%s2109_s1 + $0x70] sm:$0xff]  ;;  %v731_v24 = vld [vmem:[%s2110_s2 + $0x18] sm:$0xff]  ;;  %v728_v25 = vld [vmem:[%s2110_s2] sm:$0xff] }
  0x11   : > { %387 = vmatpush.bf16.msra.mxu1 %v1694_v0  ;;  %v730_v26 = vld [vmem:[%s2110_s2 + $0x10] sm:$0xff]  ;;  %v756_v27 = vld [vmem:[%s2111_s3] sm:$0xff]  ;;  %v757_v28 = vld [vmem:[%s2111_s3 + $0x8] sm:$0xff] }
  0x12   : > { %v759_v29 = vld [vmem:[%s2111_s3 + $0x18] sm:$0xff]  ;;  %v1705_v30 = vld [vmem:[%s2109_s1 + $0x60] sm:$0xff]  ;;  %v729_v33 = vld [vmem:[%s2110_s2 + $0x8] sm:$0xff] }
  0x13   : > { %1459 = vmatmul.msk.bf16.vlgmr.msra.gmra.mxu3 %vm337_vm0, %v1693_v1  ;;  %v1709_v31 = vld [vmem:[%s2109_s1 + $0x80] sm:$0xff]  ;;  %v1708_v32 = vld [vmem:[%s2109_s1 + $0x78] sm:$0xff]  ;;  %v1706_v34 = vld [vmem:[%s2109_s1 + $0x68] sm:$0xff] }
  0x14   : > { %1458 = vmatmul.msk.bf16.vlgmr.msra.gmra.mxu1 %vm337_vm0, %v1692_v2  ;;  %v1710_v35 = vld [vmem:[%s2109_s1 + $0x88] sm:$0xff] }
  0x17   : > { %414 = vrot.lane.b32.xlu0 %v1694_v0, %s1766_s16  ;;  %508 = vrot.lane.b32.xlu1 %v1694_v0, %s1767_s17 }
  0x18   : > { %649 = vrot.lane.b32.xlu2 %v1694_v0, %s1768_s18 }
  0x1f   : > { %555 = vrot.lane.b32.xlu0 %v1694_v0, %s1769_s19  ;;  %696 = vrot.lane.b32.xlu1 %v1694_v0, %s1770_s20 }
  0x20   : > { %744 = vperm.xlu2 %1751, %v730_v26  }
  0x27   : > { %772 = vperm.xlu1 %1753, %v758_v18   ;;  %749 = vperm.xlu0 %1752, %v731_v24   ;;  %v1948_v24 = vld [vmem:[%s2115_s7] ss:$0 sm:$0xff] }
  0x28   : > { %777 = vperm.xlu2 %1751, %v759_v29  }
  0x2f   : > { %734 = vperm.xlu1 %1753, %v728_v25   ;;  %762 = vperm.xlu0 %1752, %v756_v27  }
  0x30   : > { %739 = vperm.xlu2 %1751, %v729_v33  }
  0x37   : > { %767 = vperm.xlu1 %1753, %v757_v28  }
  0x6a   : > { %v603_v3 = vpop.permute.xlu2 %602 }
  0x72   : > { %v650_v9 = vpop.permute.xlu2 %649 }
  0x81   : > { %v335_v4 = vpop.permute.xlu0 %334  ;;  %v462_v7 = vpop.permute.xlu1 %461 }
  0x82   : > { %351 = vmatpush.bf16.msra.mxu0 %v335_v4  ;;  %1731 = vmatpush.bf16.msra.mxu2 %v335_v4  ;;  %v745_v4 = vpop.permute.xlu2 %744 }
  0x83   : > { %477 = vmatpush.bf16.msrb.mxu3 %v462_v7 }
  0x85   : > { %1449 = vmatmul.msk.bf16.vlgmr.msra.gmra.mxu2 %vm337_vm0, %v1696_v5  ;;  %1448 = vmatmul.msk.bf16.vlgmr.msra.gmra.mxu0 %vm337_vm0, %v1695_v6 }
  0x86   : > { %1486 = vmatmul.msk.bf16.vlgmr.msrb.gmra.mxu3 %vm337_vm0, %v1699_v8 }
  0x87   : > { %665 = vmatpush.bf16.msra.mxu3 %v650_v9 }
  0x89   : > { %v415_v10 = vpop.permute.xlu0 %414  ;;  %v509_v11 = vpop.permute.xlu1 %508 }
  0x8a   : > { %430 = vmatpush.bf16.msrb.mxu2 %v415_v10  ;;  %524 = vmatpush.bf16.msrb.mxu0 %v509_v11  ;;  %v778_v27 = vpop.permute.xlu2 %777 }
  0x8e   : > { %618 = vmatpush.bf16.msra.mxu2 %v603_v3 }
  0x91   : > { %v556_v14 = vpop.permute.xlu0 %555  ;;  %v697_v15 = vpop.permute.xlu1 %696 }
  0x92   : > { %571 = vmatpush.bf16.msrb.mxu1 %v556_v14  ;;  %712 = vmatpush.bf16.msra.mxu0 %v697_v15  ;;  %v389_v47 = vpop.f32.mrf.mxu1 }
  0x95   : > { %1472 = vmatmul.msk.bf16.vlgmr.msrb.gmra.mxu2 %vm337_vm0, %v1697_v12  ;;  %1500 = vmatmul.msk.bf16.vlgmr.msrb.gmra.mxu0 %vm337_vm0, %v1701_v13 }
  0x96   : > { %1487 = vmatmul.msk.bf16.gmra.mxu3 %vm337_vm0, %v1700_v16  ;;  %1514 = vmatmul.msk.bf16.vlgmr.msrb.gmra.mxu1 %vm337_vm0, %v1703_v17  ;;  %v394_v36 = vpop.f32.mrf.mxu3 }
  0x99   : > { %v773_v60 = vpop.permute.xlu1 %772  ;;  %v1943_v0 = vpop.permute.xlu0 %749 }
  0x9a   : > { %v391_v51 = vpop.f32.mrf.mxu1 }
  0x9e   : > { %v396_v38 = vpop.f32.mrf.mxu3 }
  0xa1   : > { %v735_v12 = vpop.permute.xlu1 %734  ;;  %v763_v16 = vpop.permute.xlu0 %762 }
  0xa5   : > { %1473 = vmatmul.msk.bf16.gmra.mxu2 %vm337_vm0, %v1698_v20  ;;  %1501 = vmatmul.msk.bf16.gmra.mxu0 %vm337_vm0, %v1702_v21 }
  0xa6   : > { %1542 = vmatmul.msk.bf16.vlgmr.msra.gmra.mxu3 %vm337_vm0, %v1707_v22  ;;  %1515 = vmatmul.msk.bf16.gmra.mxu1 %vm337_vm0, %v1704_v23 }
  0xb5   : > { %1528 = vmatmul.msk.bf16.vlgmr.msra.gmra.mxu2 %vm337_vm0, %v1705_v30  ;;  %1556 = vmatmul.msk.bf16.vlgmr.msra.gmra.mxu0 %vm337_vm0, %v1709_v31 }
  0xb6   : > { %1543 = vmatmul.msk.bf16.gmra.mxu3 %vm337_vm0, %v1708_v32 }
  0xc5   : > { %1529 = vmatmul.msk.bf16.gmra.mxu2 %vm337_vm0, %v1706_v34  ;;  %1557 = vmatmul.msk.bf16.gmra.mxu0 %vm337_vm0, %v1710_v35 }
 0x102   : > { %v353_v37 = vpop.f32.mrf.mxu0 }
 0x103   : > { %v390_v53 = vadd.f32 %v389_v47, %v353_v37 }
 0x108   : > { %v358_v39 = vpop.f32.mrf.mxu2 }
 0x109   : > { %v479_v41 = vpop.f32.mrf.mxu3  ;;  %v395_v7 = vadd.f32 %v394_v36, %v358_v39 }
 0x10a   : > { %v355_v40 = vpop.f32.mrf.mxu0 }
 0x10b   : > { %v392_v61 = vadd.f32 %v391_v51, %v355_v40 }
 0x110   : > { %v360_v42 = vpop.f32.mrf.mxu2 }
 0x111   : > { %v481_v44 = vpop.f32.mrf.mxu3  ;;  %v397_v22 = vadd.f32 %v396_v38, %v360_v42 }
 0x112   : > { %v526_v43 = vpop.f32.mrf.mxu0 }
 0x113   : > { %v573_v57 = vpop.f32.mrf.mxu1 }
 0x118   : > { %v432_v45 = vpop.f32.mrf.mxu2 }
 0x119   : > { %v484_v49 = vpop.f32.mrf.mxu3  ;;  %v442_v55 = vadd.f32 %v432_v45, %v390_v53  ;;  %v740_v45 = vpop.permute.xlu2 %739 }
 0x11a   : > { %v528_v46 = vpop.f32.mrf.mxu0 }
 0x11b   : > { %v489_v58 = vadd.f32 %v479_v41, %v442_v55  ;;  %v575_v5 = vpop.f32.mrf.mxu1 }
 0x11d   : > { %v536_v62 = vadd.f32 %v526_v43, %v489_v58 }
 0x11f   : > { %v583_v3 = vadd.f32 %v573_v57, %v536_v62 }
 0x120   : > { %v434_v48 = vpop.f32.mrf.mxu2 }
 0x121   : > { %v486_v54 = vpop.f32.mrf.mxu3  ;;  %v443_v1 = vadd.f32 %v434_v48, %v392_v61 }
 0x122   : > { %v531_v50 = vpop.f32.mrf.mxu0 }
 0x123   : > { %v490_v8 = vadd.f32 %v481_v44, %v443_v1  ;;  %v578_v26 = vpop.f32.mrf.mxu1 }
 0x125   : > { %v537_v13 = vadd.f32 %v528_v46, %v490_v8 }
 0x127   : > { %v584_v23 = vadd.f32 %v575_v5, %v537_v13 }
 0x128   : > { %v437_v52 = vpop.f32.mrf.mxu2 }
 0x129   : > { %v667_v63 = vpop.f32.mrf.mxu3  ;;  %v444_v10 = vadd.f32 %v437_v52, %v395_v7 }
 0x12a   : > { %v533_v56 = vpop.f32.mrf.mxu0 }
 0x12b   : > { %v491_v17 = vadd.f32 %v484_v49, %v444_v10  ;;  %v580_v44 = vpop.f32.mrf.mxu1 }
 0x12d   : > { %v538_v28 = vadd.f32 %v531_v50, %v491_v17  ;;  %v768_v50 = vpop.permute.xlu1 %767  ;;  %v1277_v17 = vld [vmem:[%s2113_s5 + $0x8] sm:$0xff] }
 0x12f   : > { %v585_v33 = vadd.f32 %v578_v26, %v538_v28  ;;  %v1711_v26 = vld [vmem:[%s2112_s4] sm:$0xff] }
 0x130   : > { %v439_v59 = vpop.f32.mrf.mxu2 }
 0x131   : > { %v669_v15 = vpop.f32.mrf.mxu3  ;;  %v445_v29 = vadd.f32 %v439_v59, %v397_v22  ;;  %v1306_v22 = vld [vmem:[%s2114_s6 + $0x10] sm:$0xff] }
 0x132   : > { %v714_v2 = vpop.f32.mrf.mxu0 }
 0x133   : > { %v492_v34 = vadd.f32 %v486_v54, %v445_v29  ;;  %v1712_v29 = vld [vmem:[%s2112_s4 + $0x8] sm:$0xff] }
 0x135   : > { %v539_v41 = vadd.f32 %v533_v56, %v492_v34  ;;  %v1715_v34 = vld [vmem:[%s2112_s4 + $0x10] sm:$0xff] }
 0x137   : > { %v586_v47 = vadd.f32 %v580_v44, %v539_v41  ;;  %v1723_v41 = vld [vmem:[%s2112_s4 + $0x50] sm:$0xff]  ;;  %v1718_v44 = vld [vmem:[%s2112_s4 + $0x28] sm:$0xff] }
 0x138   : > { %v620_v6 = vpop.f32.mrf.mxu2 }
 0x139   : > { %v630_v9 = vadd.f32 %v620_v6, %v583_v3  ;;  %v672_v37 = vpop.f32.mrf.mxu3 }
 0x13a   : > { %v716_v20 = vpop.f32.mrf.mxu0 }
 0x13b   : > { %v677_v11 = vadd.f32 %v667_v63, %v630_v9 }
 0x13d   : > { %v724_v14 = vadd.f32 %v714_v2, %v677_v11 }
 0x13f   : > { %v752_v18 = vmul.f32 %v735_v12, %v724_v14 }
 0x140   : > { %v622_v21 = vpop.f32.mrf.mxu2 }
 0x141   : > { %v780_v25 = vadd.f32 %v763_v16, %v752_v18  ;;  %v631_v30 = vadd.f32 %v622_v21, %v584_v23  ;;  %v674_v54 = vpop.f32.mrf.mxu3  ;;  %v1276_v16 = vld [vmem:[%s2113_s5] sm:$0xff]  ;;  %v1279_v18 = vld [vmem:[%s2113_s5 + $0x18] sm:$0xff]  ;;  %v1305_v23 = vld [vmem:[%s2114_s6 + $0x8] sm:$0xff] }
 0x142   : > { %v719_v40 = vpop.f32.mrf.mxu0  ;;  %v1304_v21 = vld [vmem:[%s2114_s6] sm:$0xff] }
 0x143   : > { %v784_v31 = vmax.f32 %v780_v25, 0.0  ;;  %v678_v35 = vadd.f32 %v669_v15, %v631_v30  ;;  %v1307_v25 = vld [vmem:[%s2114_s6 + $0x18] sm:$0xff] }
 0x145   : > { %v791_v32 = vmul.f32 %v1948_v24, %v784_v31  ;;  %v725_v42 = vadd.f32 %v716_v20, %v678_v35  ;;  %v1278_v20 = vld [vmem:[%s2113_s5 + $0x10] sm:$0xff] }
 0x147   : > { %v799_v36 = vpack.c.bf16 %v791_v32, %v791_v32  ;;  %v753_v48 = vmul.f32 %v740_v45, %v725_v42  ;;  %v1716_v42 = vld [vmem:[%s2112_s4 + $0x18] sm:$0xff] }
 0x148   : > { %v625_v38 = vpop.f32.mrf.mxu2 }
 0x149   : > { %v632_v39 = vadd.f32 %v625_v38, %v585_v33  ;;  %807 = vrot.lane.b32.xlu1 %v799_v36, %s1772_s25  ;;  %v781_v55 = vadd.f32 %v768_v50, %v753_v48  ;;  %v1717_v36 = vld [vmem:[%s2112_s4 + $0x20] sm:$0xff]  ;;  %v1720_v48 = vld [vmem:[%s2112_s4 + $0x38] sm:$0xff] }
 0x14a   : > { %v721_v59 = vpop.f32.mrf.mxu0 }
 0x14b   : > { %v679_v43 = vadd.f32 %v672_v37, %v632_v39  ;;  %v785_v62 = vmax.f32 %v781_v55, 0.0  ;;  %v1719_v39 = vld [vmem:[%s2112_s4 + $0x30] sm:$0xff]  ;;  %v1722_v55 = vld [vmem:[%s2112_s4 + $0x48] sm:$0xff] }
 0x14d   : > { %v726_v46 = vadd.f32 %v719_v40, %v679_v43  ;;  %v792_v3 = vmul.f32 %v1948_v24, %v785_v62 }
 0x14f   : > { %v754_v49 = vmul.f32 %v745_v4, %v726_v46  ;;  %v800_v5 = vpack.c.bf16 %v792_v3, %v792_v3 }
 0x150   : > { %v627_v51 = vpop.f32.mrf.mxu2 }
 0x151   : > { %v633_v52 = vadd.f32 %v627_v51, %v586_v47  ;;  %v782_v53 = vadd.f32 %v773_v60, %v754_v49  ;;  %v1724_v49 = vld [vmem:[%s2112_s4 + $0x58] sm:$0xff]  ;;  %v1721_v51 = vld [vmem:[%s2112_s4 + $0x40] sm:$0xff] }
 0x153   : > { %v680_v57 = vadd.f32 %v674_v54, %v633_v52  ;;  %v786_v58 = vmax.f32 %v782_v53, 0.0  ;;  %v1725_v53 = vld [vmem:[%s2112_s4 + $0x60] sm:$0xff]  ;;  %v1727_v54 = vld [vmem:[%s2112_s4 + $0x70] sm:$0xff] }
 0x155   : > { %v727_v61 = vadd.f32 %v721_v59, %v680_v57  ;;  %v793_v56 = vmul.f32 %v1948_v24, %v786_v58  ;;  %v1726_v57 = vld [vmem:[%s2112_s4 + $0x68] sm:$0xff]  ;;  %v1728_v58 = vld [vmem:[%s2112_s4 + $0x78] sm:$0xff]  ;;  %v1729_v59 = vld [vmem:[%s2112_s4 + $0x80] sm:$0xff] }
 0x157   : > { %v755_v63 = vmul.f32 %v1943_v0, %v727_v61  ;;  %v801_v1 = vpack.c.bf16 %v793_v56, %v793_v56  ;;  %v1730_v61 = vld [vmem:[%s2112_s4 + $0x88] sm:$0xff] }
 0x159   : > { %811 = vrot.lane.b32.xlu2 %v801_v1, %s1772_s25  ;;  %v783_v2 = vadd.f32 %v778_v27, %v755_v63 }
 0x15b   : > { %v787_v4 = vmax.f32 %v783_v2, 0.0 }
 0x15d   : > { %v794_v60 = vmul.f32 %v1948_v24, %v787_v4 }
 0x15f   : > { %v802_v6 = vpack.c.bf16 %v794_v60, %v794_v60 }
 0x161   : > { %813 = vrot.lane.b32.xlu0 %v802_v6, %s1772_s25  ;;  %809 = vrot.lane.b32.xlu2 %v800_v5, %s1772_s25 }
 0x1b3   : > { %v812_v7 = vpop.permute.xlu2 %811 }
 0x1b4   : > { %822 = vst.msk [vmem:[#allocation2 + $0x8] sm:$0xf] %vm819_vm1, %v812_v7 }
 0x1bb   : > { %v810_v0 = vpop.permute.xlu2 %809  ;;  %v808_v8 = vpop.permute.xlu1 %807  ;;  %v1576_v13 = vld [vmem:[#allocation2 + $0x8] sm:$0xf] }
 0x1bc   : > { %821 = vst.msk [vmem:[#allocation2 + $0x4] sm:$0xf] %vm819_vm1, %v810_v0 }
 0x1bd   : > { %820 = vst.msk [vmem:[#allocation2] sm:$0xf] %vm819_vm1, %v808_v8 }
 0x1c3   : > { %v1713_v9 = vld [vmem:[#allocation2] sm:$0xf0] }
 0x1c4   : > { %v1572_v10 = vld [vmem:[#allocation2] sm:$0xf] }
 0x1c5   : > { %v1573_v11 = vor.u32 %v1713_v9, %v1572_v10 }
 0x1c7   : > { %857 = vrot.lane.b32.xlu1 %v1573_v11, %s1763_s11 }
 0x1d3   : > { %v814_v12 = vpop.permute.xlu0 %813 }
 0x1d4   : > { %823 = vst.msk [vmem:[#allocation2 + $0xc] sm:$0xf] %vm819_vm1, %v814_v12 }
 0x1db   : > { %v1714_v14 = vld [vmem:[#allocation2 + $0x8] sm:$0xf0] }
 0x1dc   : > { %v1577_v15 = vor.u32 %v1714_v14, %v1576_v13 }
 0x1de   : > { %859 = vrot.lane.b32.xlu0 %v1577_v15, %s1763_s11  ;;  %913 = vmatpush.bf16.msrb.mxu2 %v1577_v15 }
 0x1df   : > { %943 = vrot.lane.b32.xlu2 %v1577_v15, %s1766_s16  ;;  %993 = vrot.lane.b32.xlu1 %v1577_v15, %s1764_s12 }
 0x1e2   : > { %914 = vmatpush.bf16.msrb.mxu2 %v1573_v11 }
 0x1e5   : > { %1588 = vmatmul.msk.bf16.vlgmr.msrb.gmra.mxu2 %vm863_vm2, %v1711_v26 }
 0x1e6   : > { %941 = vrot.lane.b32.xlu0 %v1573_v11, %s1766_s16 }
 0x1e7   : > { %1043 = vrot.lane.b32.xlu2 %v1577_v15, %s1767_s17  ;;  %1041 = vrot.lane.b32.xlu1 %v1573_v11, %s1767_s17 }
 0x1ee   : > { %991 = vrot.lane.b32.xlu0 %v1573_v11, %s1764_s12 }
 0x1ef   : > { %1093 = vrot.lane.b32.xlu2 %v1577_v15, %s1769_s19  ;;  %1091 = vrot.lane.b32.xlu1 %v1573_v11, %s1769_s19 }
 0x1f5   : > { %1589 = vmatmul.msk.bf16.gmra.mxu2 %vm863_vm2, %v1712_v29 }
 0x1f6   : > { %1143 = vrot.lane.b32.xlu0 %v1577_v15, %s1765_s15 }
 0x1f7   : > { %1141 = vrot.lane.b32.xlu2 %v1573_v11, %s1765_s15  ;;  %1243 = vrot.lane.b32.xlu1 %v1577_v15, %s1770_s20 }
 0x1fe   : > { %1193 = vrot.lane.b32.xlu0 %v1577_v15, %s1768_s18 }
 0x1ff   : > { %1191 = vrot.lane.b32.xlu2 %v1573_v11, %s1768_s18  ;;  %1282 = vperm.xlu1 %1753, %v1276_v16  }
 0x206   : > { %1241 = vrot.lane.b32.xlu0 %v1573_v11, %s1770_s20  ;;  %s1691_s20 = sshll.u32 %s2118_s28, 4 }
 0x207   : > { %1287 = vperm.xlu2 %1751, %v1277_v17   ;;  %1297 = vperm.xlu1 %1753, %v1279_v18   ;;  %s2079_s23 = scalar_lea.vmem %s2116_s8, %s1691_s20 }
 0x208   : > { %1342 = vst [vmem:[%s2079_s23 + $0x8] sm:$0xf] %v1771_v19 }
 0x209   : > { %1340 = vst [vmem:[%s2079_s23] sm:$0xf] %v1771_v19 }
 0x20a   : > { %1341 = vst [vmem:[%s2079_s23 + $0x4] sm:$0xf] %v1771_v19 }
 0x20b   : > { %1343 = vst [vmem:[%s2079_s23 + $0xc] sm:$0xf] %v1771_v19 }
 0x20e   : > { %1292 = vperm.xlu0 %1752, %v1278_v20  }
 0x20f   : > { %1310 = vperm.xlu2 %1751, %v1304_v21   ;;  %1320 = vperm.xlu1 %1753, %v1306_v22  }
 0x216   : > { %1315 = vperm.xlu0 %1752, %v1305_v23  }
 0x217   : > { %1325 = vperm.xlu2 %1751, %v1307_v25  }
 0x239   : > { %v944_v27 = vpop.permute.xlu2 %943  ;;  %v858_v30 = vpop.permute.xlu1 %857 }
 0x23a   : > { %959 = vmatpush.bf16.msrb.mxu3 %v944_v27 }
 0x241   : > { %v1044_v28 = vpop.permute.xlu2 %1043 }
 0x249   : > { %v1094_v31 = vpop.permute.xlu2 %1093 }
 0x24a   : > { %1109 = vmatpush.bf16.msra.mxu2 %v1094_v31 }
 0x250   : > { %v860_v32 = vpop.permute.xlu0 %859 }
 0x251   : > { %v994_v33 = vpop.permute.xlu1 %993  ;;  %876 = vmatpush.bf16.msra.mxu1 %v860_v32  ;;  %v1142_v46 = vpop.permute.xlu2 %1141 }
 0x252   : > { %1009 = vmatpush.bf16.msrb.mxu0 %v994_v33 }
 0x255   : > { %877 = vmatpush.bf16.msra.mxu1 %v858_v30 }
 0x258   : > { %v942_v35 = vpop.permute.xlu0 %941  ;;  %1578 = vmatmul.msk.bf16.vlgmr.msra.gmra.mxu1 %vm863_vm2, %v1715_v34 }
 0x259   : > { %1059 = vmatpush.bf16.msrb.mxu1 %v1044_v28  ;;  %v1042_v37 = vpop.permute.xlu1 %1041  ;;  %960 = vmatpush.bf16.msrb.mxu3 %v942_v35  ;;  %v1192_v50 = vpop.permute.xlu2 %1191 }
 0x25c   : > { %1602 = vmatmul.msk.bf16.vlgmr.msrb.gmra.mxu3 %vm863_vm2, %v1717_v36 }
 0x25d   : > { %1060 = vmatpush.bf16.msrb.mxu1 %v1042_v37 }
 0x260   : > { %v992_v38 = vpop.permute.xlu0 %991 }
 0x261   : > { %v1092_v40 = vpop.permute.xlu1 %1091  ;;  %1010 = vmatpush.bf16.msrb.mxu0 %v992_v38  ;;  %v1288_v27 = vpop.permute.xlu2 %1287 }
 0x262   : > { %1110 = vmatpush.bf16.msra.mxu2 %v1092_v40 }
 0x264   : > { %1616 = vmatmul.msk.bf16.vlgmr.msrb.gmra.mxu0 %vm863_vm2, %v1719_v39 }
 0x265   : > { %1644 = vmatmul.msk.bf16.vlgmr.msra.gmra.mxu2 %vm863_vm2, %v1723_v41 }
 0x268   : > { %v1144_v43 = vpop.permute.xlu0 %1143  ;;  %1579 = vmatmul.msk.bf16.gmra.mxu1 %vm863_vm2, %v1716_v42  ;;  %v916_v63 = vpop.f32.mrf.mxu2 }
 0x269   : > { %v1244_v45 = vpop.permute.xlu1 %1243  ;;  %1159 = vmatpush.bf16.msra.mxu3 %v1144_v43 }
 0x26a   : > { %1259 = vmatpush.bf16.msra.mxu1 %v1244_v45  ;;  %v1311_v45 = vpop.permute.xlu2 %1310 }
 0x26c   : > { %1603 = vmatmul.msk.bf16.gmra.mxu3 %vm863_vm2, %v1718_v44 }
 0x26d   : > { %1160 = vmatpush.bf16.msra.mxu3 %v1142_v46 }
 0x270   : > { %v1194_v47 = vpop.permute.xlu0 %1193  ;;  %v918_v4 = vpop.f32.mrf.mxu2 }
 0x271   : > { %1209 = vmatpush.bf16.msra.mxu0 %v1194_v47  ;;  %v1283_v34 = vpop.permute.xlu1 %1282 }
 0x274   : > { %1617 = vmatmul.msk.bf16.gmra.mxu0 %vm863_vm2, %v1720_v48 }
 0x275   : > { %1210 = vmatpush.bf16.msra.mxu0 %v1192_v50  ;;  %1645 = vmatmul.msk.bf16.gmra.mxu2 %vm863_vm2, %v1724_v49 }
 0x278   : > { %v1242_v52 = vpop.permute.xlu0 %1241  ;;  %1630 = vmatmul.msk.bf16.vlgmr.msrb.gmra.mxu1 %vm863_vm2, %v1721_v51  ;;  %v921_v7 = vpop.f32.mrf.mxu2 }
 0x279   : > { %1260 = vmatpush.bf16.msra.mxu1 %v1242_v52 }
 0x27c   : > { %1658 = vmatmul.msk.bf16.vlgmr.msra.gmra.mxu3 %vm863_vm2, %v1725_v53 }
 0x280   : > { %v923_v10 = vpop.f32.mrf.mxu2  ;;  %v1293_v41 = vpop.permute.xlu0 %1292 }
 0x284   : > { %1672 = vmatmul.msk.bf16.vlgmr.msra.gmra.mxu0 %vm863_vm2, %v1727_v54 }
 0x288   : > { %1631 = vmatmul.msk.bf16.gmra.mxu1 %vm863_vm2, %v1722_v55 }
 0x28c   : > { %1659 = vmatmul.msk.bf16.gmra.mxu3 %vm863_vm2, %v1726_v57 }
 0x294   : > { %1673 = vmatmul.msk.bf16.gmra.mxu0 %vm863_vm2, %v1728_v58 }
 0x298   : > { %1686 = vmatmul.msk.bf16.vlgmr.msra.gmra.mxu1 %vm863_vm2, %v1729_v59  ;;  %v1298_v59 = vpop.permute.xlu1 %1297 }
 0x2a8   : > { %1687 = vmatmul.msk.bf16.gmra.mxu1 %vm863_vm2, %v1730_v61 }
 0x2d5   : > { %v879_v56 = vpop.f32.mrf.mxu1 }
 0x2d6   : > { %v917_v14 = vadd.f32 %v916_v63, %v879_v56 }
 0x2dd   : > { %v881_v62 = vpop.f32.mrf.mxu1 }
 0x2de   : > { %v919_v20 = vadd.f32 %v918_v4, %v881_v62 }
 0x2df   : > { %v962_v1 = vpop.f32.mrf.mxu3 }
 0x2e0   : > { %v972_v19 = vadd.f32 %v962_v1, %v917_v14  ;;  %v1321_v14 = vpop.permute.xlu1 %1320 }
 0x2e1   : > { %v1012_v2 = vpop.f32.mrf.mxu0 }
 0x2e2   : > { %v1022_v18 = vadd.f32 %v1012_v2, %v972_v19  ;;  %v1316_v2 = vpop.permute.xlu0 %1315 }
 0x2e5   : > { %v884_v3 = vpop.f32.mrf.mxu1 }
 0x2e6   : > { %v922_v32 = vadd.f32 %v921_v7, %v884_v3 }
 0x2e7   : > { %v964_v60 = vpop.f32.mrf.mxu3 }
 0x2e8   : > { %v1112_v15 = vpop.f32.mrf.mxu2  ;;  %v973_v23 = vadd.f32 %v964_v60, %v919_v20 }
 0x2e9   : > { %v1014_v5 = vpop.f32.mrf.mxu0 }
 0x2ea   : > { %v1023_v29 = vadd.f32 %v1014_v5, %v973_v23 }
 0x2ed   : > { %v886_v6 = vpop.f32.mrf.mxu1 }
 0x2ee   : > { %v924_v47 = vadd.f32 %v923_v10, %v886_v6 }
 0x2ef   : > { %v967_v0 = vpop.f32.mrf.mxu3 }
 0x2f0   : > { %v1114_v28 = vpop.f32.mrf.mxu2  ;;  %v974_v35 = vadd.f32 %v967_v0, %v922_v32 }
 0x2f1   : > { %v1017_v9 = vpop.f32.mrf.mxu0 }
 0x2f2   : > { %v1024_v42 = vadd.f32 %v1017_v9, %v974_v35 }
 0x2f5   : > { %v1062_v8 = vpop.f32.mrf.mxu1 }
 0x2f6   : > { %v1072_v21 = vadd.f32 %v1062_v8, %v1022_v18 }
 0x2f7   : > { %v969_v11 = vpop.f32.mrf.mxu3 }
 0x2f8   : > { %v1122_v26 = vadd.f32 %v1112_v15, %v1072_v21  ;;  %v1117_v46 = vpop.f32.mrf.mxu2  ;;  %v975_v51 = vadd.f32 %v969_v11, %v924_v47 }
 0x2f9   : > { %v1019_v13 = vpop.f32.mrf.mxu0 }
 0x2fa   : > { %v1025_v56 = vadd.f32 %v1019_v13, %v975_v51 }
 0x2fd   : > { %v1064_v12 = vpop.f32.mrf.mxu1 }
 0x2fe   : > { %v1073_v33 = vadd.f32 %v1064_v12, %v1023_v29 }
 0x2ff   : > { %v1162_v17 = vpop.f32.mrf.mxu3 }
 0x300   : > { %v1172_v30 = vadd.f32 %v1162_v17, %v1122_v26  ;;  %v1123_v39 = vadd.f32 %v1114_v28, %v1073_v33  ;;  %v1119_v60 = vpop.f32.mrf.mxu2 }
 0x301   : > { %v1212_v22 = vpop.f32.mrf.mxu0 }
 0x302   : > { %v1222_v36 = vadd.f32 %v1212_v22, %v1172_v30 }
 0x305   : > { %v1067_v16 = vpop.f32.mrf.mxu1 }
 0x306   : > { %v1074_v48 = vadd.f32 %v1067_v16, %v1024_v42 }
 0x307   : > { %v1164_v31 = vpop.f32.mrf.mxu3 }
 0x308   : > { %v1173_v43 = vadd.f32 %v1164_v31, %v1123_v39  ;;  %v1124_v55 = vadd.f32 %v1117_v46, %v1074_v48 }
 0x309   : > { %v1214_v37 = vpop.f32.mrf.mxu0 }
 0x30a   : > { %v1223_v52 = vadd.f32 %v1214_v37, %v1173_v43 }
 0x30d   : > { %v1069_v25 = vpop.f32.mrf.mxu1 }
 0x30e   : > { %v1075_v3 = vadd.f32 %v1069_v25, %v1025_v56  ;;  %v1326_v25 = vpop.permute.xlu2 %1325 }
 0x30f   : > { %v1167_v50 = vpop.f32.mrf.mxu3 }
 0x310   : > { %v1174_v62 = vadd.f32 %v1167_v50, %v1124_v55  ;;  %v1125_v8 = vadd.f32 %v1119_v60, %v1075_v3 }
 0x311   : > { %v1217_v61 = vpop.f32.mrf.mxu0 }
 0x312   : > { %v1224_v5 = vadd.f32 %v1217_v61, %v1174_v62 }
 0x315   : > { %v1262_v38 = vpop.f32.mrf.mxu1 }
 0x316   : > { %v1272_v40 = vadd.f32 %v1262_v38, %v1222_v36 }
 0x317   : > { %v1169_v7 = vpop.f32.mrf.mxu3 }
 0x318   : > { %v1300_v44 = vmul.f32 %v1283_v34, %v1272_v40  ;;  %v1175_v11 = vadd.f32 %v1169_v7, %v1125_v8 }
 0x319   : > { %v1219_v19 = vpop.f32.mrf.mxu0 }
 0x31a   : > { %v1328_v49 = vadd.f32 %v1311_v45, %v1300_v44  ;;  %v1225_v16 = vadd.f32 %v1219_v19, %v1175_v11 }
 0x31c   : > { %v1332_v53 = vmax.f32 %v1328_v49, 0.0 }
 0x31d   : > { %v1264_v54 = vpop.f32.mrf.mxu1 }
 0x31e   : > { %v1273_v57 = vadd.f32 %v1264_v54, %v1223_v52  ;;  %v1336_v58 = vmul.f32 %v1948_v24, %v1332_v53 }
 0x320   : > { %v1301_v63 = vmul.f32 %v1288_v27, %v1273_v57  ;;  %v1344_v1 = vpack.c.bf16 %v1336_v58, %v1336_v58 }
 0x322   : > { %v1329_v4 = vadd.f32 %v1316_v2, %v1301_v63  ;;  %1352 = vrot.lane.b32.xlu0 %v1344_v1, %s1772_s25 }
 0x324   : > { %v1333_v6 = vmax.f32 %v1329_v4, 0.0 }
 0x325   : > { %v1267_v0 = vpop.f32.mrf.mxu1 }
 0x326   : > { %v1274_v9 = vadd.f32 %v1267_v0, %v1224_v5  ;;  %v1337_v10 = vmul.f32 %v1948_v24, %v1333_v6 }
 0x328   : > { %v1302_v12 = vmul.f32 %v1293_v41, %v1274_v9  ;;  %v1345_v13 = vpack.c.bf16 %v1337_v10, %v1337_v10 }
 0x32a   : > { %v1330_v15 = vadd.f32 %v1321_v14, %v1302_v12  ;;  %1354 = vrot.lane.b32.xlu1 %v1345_v13, %s1772_s25 }
 0x32c   : > { %v1334_v17 = vmax.f32 %v1330_v15, 0.0 }
 0x32d   : > { %v1269_v18 = vpop.f32.mrf.mxu1 }
 0x32e   : > { %v1275_v20 = vadd.f32 %v1269_v18, %v1225_v16  ;;  %v1338_v21 = vmul.f32 %v1948_v24, %v1334_v17 }
 0x330   : > { %v1303_v22 = vmul.f32 %v1298_v59, %v1275_v20  ;;  %v1346_v23 = vpack.c.bf16 %v1338_v21, %v1338_v21 }
 0x332   : > { %v1331_v26 = vadd.f32 %v1326_v25, %v1303_v22  ;;  %1356 = vrot.lane.b32.xlu2 %v1346_v23, %s1772_s25 }
 0x334   : > { %v1335_v27 = vmax.f32 %v1331_v26, 0.0 }
 0x336   : > { %v1339_v28 = vmul.f32 %v1948_v24, %v1335_v27 }
 0x338   : > { %v1347_v29 = vpack.c.bf16 %v1339_v28, %v1339_v28 }
 0x33a   : > { %1358 = vrot.lane.b32.xlu0 %v1347_v29, %s1772_s25 }
 0x38c   : > { %v1357_v30 = vpop.permute.xlu2 %1356 }
 0x38d   : > { %1366 = vst.msk [vmem:[%s2079_s23 + $0x8] sm:$0xf] %vm819_vm1, %v1357_v30 }
 0x394   : > { %v1353_v31 = vpop.permute.xlu0 %1352 }
 0x395   : > { %1364 = vst.msk [vmem:[%s2079_s23] sm:$0xf] %vm819_vm1, %v1353_v31 }
 0x39c   : > { %v1355_v32 = vpop.permute.xlu1 %1354 }
 0x39d   : > { %1365 = vst.msk [vmem:[%s2079_s23 + $0x4] sm:$0xf] %vm819_vm1, %v1355_v32 }
 0x3ac   : > { %v1359_v33 = vpop.permute.xlu0 %1358 }
 0x3ad   : > { %1367 = vst.msk [vmem:[%s2079_s23 + $0xc] sm:$0xf] %vm819_vm1, %v1359_v33 }
 0x3ae PF: > { %s18_s27 = sadd.s32 1, %s1761_s27  }
 0x3af   : > { %p15_p4 = scmp.ge.s32.totalorder %s18_s27, 4  }
 0x3b1   :  { %17 = sbr.rel (!%p15_p4) target bundleno = 1 (0x1), region = 98 }

// kernel: _lambda_.11
= control target key start
LH: loop header
LB: loop body
LE: loop exit
PB: predicated region body
PF: predicated region fallthrough
CT: control target
= control target key end

     0   :  { %s1060_s9 = smov 0   ;;  %s1205_s0 = inlined_call_operand.vmem [shape: bf16[2,32,128], index: 0, kind: input, shape index: {}]   ;;  %s1206_s1 = inlined_call_operand.vmem [shape: bf16[4,4,16,32], index: 1, kind: input, shape index: {}]   ;;  %s1207_s2 = inlined_call_operand.vmem [shape: bf16[2,4,16,128], index: 2, kind: output, shape index: {}]  }
   0x1 LB: > { %s824_s10 = sadd.s32 4294967295, %s1033_s9   ;;  %p828_p0 = scmp.ge.s32.totalorder %s1033_s9, 1  ;;  %s1033_s9 = sphi %s1060_s9, %s12_s9  }
   0x2   : > { %p112_p1 = scmp.lt.s32.totalorder %s1033_s9, 3 }
   0x4   : > { %p113_p2 = pnand %p828_p0, %p112_p1 }
   0x5   : > { %p134_p3 = scmp.lt.s32.totalorder (!%p113_p2), %s824_s10, 1  ;;  %s1035_s15 = smov (!%p113_p2), 127  }
   0x6   : > { %116 = sbr.rel (%p113_p2) target bundleno = 466 (0x1d2), region = 28  ;;  %s1036_s16 = smov (!%p113_p2), 122  }
   0x7   : > { %s1037_s17 = smov (!%p113_p2), 121   ;;  %s1038_s18 = smov (!%p113_p2), 120  }
   0x8   : > { %s1039_s19 = smov (!%p113_p2), 126   ;;  %s1040_s20 = smov (!%p113_p2), 116  }
   0x9   : > { %s1041_s21 = smov (!%p113_p2), 115   ;;  %s1042_s22 = smov (!%p113_p2), 114  }
   0xa   : > { %s1043_s29 = smov (!%p113_p2), 7  }
   0xb   : > { %s1209_s10 = smov (!%p134_p3, %s824_s10), 1  ;;  %v985_v10 = vld [vmem:[%s1206_s1] sm:$0xff]  ;;  %vm183_vm0 = vcmask 261120   ;;  %v988_v14 = vld [vmem:[%s1206_s1 + $0x8] sm:$0xff]  ;;  %v989_v18 = vld [vmem:[%s1206_s1 + $0x10] sm:$0xff]  ;;  %vm301_vm1 = vcmask 232504  }
   0xc   : > { %s983_s11 = sshll.u32 %s1209_s10, 4  ;;  %v990_v19 = vld [vmem:[%s1206_s1 + $0x18] sm:$0xff]  ;;  %v995_v25 = vld [vmem:[%s1206_s1 + $0x30] sm:$0xff]  ;;  %v994_v30 = vld [vmem:[%s1206_s1 + $0x28] sm:$0xff]  ;;  %s984_s30 = sshll.u32 %s1209_s10, 5 }
   0xd   : > { %s1074_s14 = scalar_lea.vmem %s1205_s0, %s983_s11  ;;  %v996_v27 = vld [vmem:[%s1206_s1 + $0x38] sm:$0xff]  ;;  %v991_v31 = vld [vmem:[%s1206_s1 + $0x20] sm:$0xff]  ;;  %v1001_v38 = vld [vmem:[%s1206_s1 + $0x50] sm:$0xff]  ;;  %s1172_s5 = scalar_lea.vmem %s1207_s2, %s984_s30 }
   0xe   : > { %v987_v0 = vld [vmem:[%s1074_s14 + $0x8] sm:$0xff]  ;;  %v986_v1 = vld [vmem:[%s1074_s14] sm:$0xff]  ;;  %v1002_v39 = vld [vmem:[%s1206_s1 + $0x58] sm:$0xff] }
   0xf   : > { %179 = vrot.lane.b32.xlu1 %v987_v0, %s1035_s15  ;;  %235 = vrot.lane.b32.xlu0 %v987_v0, %s1036_s16  ;;  %v993_v2 = vld [vmem:[%s1074_s14 + $0x8] sm:$0xff]  ;;  %v992_v3 = vld [vmem:[%s1074_s14] sm:$0xff] }
  0x10   : > { %266 = vrot.lane.b32.xlu2 %v986_v1, %s1037_s17  ;;  %217 = vmatpush.bf16.msra.mxu1 %v987_v0  ;;  %v999_v4 = vld [vmem:[%s1074_s14 + $0x8] sm:$0xff]  ;;  %v998_v5 = vld [vmem:[%s1074_s14] sm:$0xff]  ;;  %v1007_v47 = vld [vmem:[%s1206_s1 + $0x70] sm:$0xff] }
  0x11   : > { %v1005_v6 = vld [vmem:[%s1074_s14 + $0x8] sm:$0xff]  ;;  %v1004_v7 = vld [vmem:[%s1074_s14] sm:$0xff]  ;;  %v1008_v53 = vld [vmem:[%s1206_s1 + $0x78] sm:$0xff] }
  0x12   : > { %v1000_v40 = vld [vmem:[%s1206_s1 + $0x48] sm:$0xff]  ;;  %v997_v44 = vld [vmem:[%s1206_s1 + $0x40] sm:$0xff] }
  0x13   : > { %v1006_v51 = vld [vmem:[%s1206_s1 + $0x68] sm:$0xff]  ;;  %v1003_v52 = vld [vmem:[%s1206_s1 + $0x60] sm:$0xff] }
  0x14   : > { %218 = vmatpush.bf16.msra.mxu1 %v986_v1 }
  0x17   : > { %268 = vrot.lane.b32.xlu0 %v987_v0, %s1037_s17  ;;  %233 = vrot.lane.b32.xlu1 %v986_v1, %s1036_s16 }
  0x18   : > { %177 = vrot.lane.b32.xlu2 %v986_v1, %s1035_s15  ;;  %852 = vmatmul.msk.bf16.vlgmr.msra.gmra.mxu1 %vm183_vm0, %v985_v10 }
  0x1f   : > { %390 = vrot.lane.b32.xlu0 %v993_v2, %s1037_s17  ;;  %423 = vrot.lane.b32.xlu1 %v993_v2, %s1038_s18 }
  0x20   : > { %331 = vrot.lane.b32.xlu2 %v993_v2, %s1039_s19 }
  0x27   : > { %359 = vrot.lane.b32.xlu0 %v993_v2, %s1035_s15  ;;  %388 = vrot.lane.b32.xlu1 %v992_v3, %s1037_s17 }
  0x28   : > { %421 = vrot.lane.b32.xlu2 %v992_v3, %s1038_s18 }
  0x2f   : > { %329 = vrot.lane.b32.xlu0 %v992_v3, %s1039_s19  ;;  %357 = vrot.lane.b32.xlu1 %v992_v3, %s1035_s15 }
  0x30   : > { %545 = vrot.lane.b32.xlu2 %v999_v4, %s1040_s20 }
  0x37   : > { %578 = vrot.lane.b32.xlu0 %v999_v4, %s1041_s21  ;;  %486 = vrot.lane.b32.xlu1 %v999_v4, %s1037_s17 }
  0x38   : > { %514 = vrot.lane.b32.xlu2 %v999_v4, %s1036_s16 }
  0x3f   : > { %543 = vrot.lane.b32.xlu0 %v998_v5, %s1040_s20  ;;  %576 = vrot.lane.b32.xlu1 %v998_v5, %s1041_s21 }
  0x40   : > { %484 = vrot.lane.b32.xlu2 %v998_v5, %s1037_s17 }
  0x47   : > { %512 = vrot.lane.b32.xlu0 %v998_v5, %s1036_s16  ;;  %700 = vrot.lane.b32.xlu1 %v1005_v6, %s1041_s21 }
  0x48   : > { %733 = vrot.lane.b32.xlu2 %v1005_v6, %s1042_s22 }
  0x4f   : > { %641 = vrot.lane.b32.xlu0 %v1005_v6, %s1038_s18  ;;  %669 = vrot.lane.b32.xlu1 %v1005_v6, %s1037_s17 }
  0x50   : > { %698 = vrot.lane.b32.xlu2 %v1004_v7, %s1041_s21 }
  0x57   : > { %731 = vrot.lane.b32.xlu0 %v1004_v7, %s1042_s22  ;;  %639 = vrot.lane.b32.xlu1 %v1004_v7, %s1038_s18 }
  0x58   : > { %667 = vrot.lane.b32.xlu2 %v1004_v7, %s1037_s17 }
  0x6a   : > { %v267_v8 = vpop.permute.xlu2 %266 }
  0x72   : > { %v178_v9 = vpop.permute.xlu2 %177 }
  0x7a   : > { %v332_v11 = vpop.permute.xlu2 %331 }
  0x81   : > { %v180_v12 = vpop.permute.xlu1 %179  ;;  %v236_v13 = vpop.permute.xlu0 %235 }
  0x82   : > { %248 = vmatpush.bf16.msra.mxu2 %v236_v13  ;;  %193 = vmatpush.bf16.msra.mxu0 %v180_v12  ;;  %v422_v15 = vpop.permute.xlu2 %421 }
  0x86   : > { %194 = vmatpush.bf16.msra.mxu0 %v178_v9 }
  0x89   : > { %v269_v16 = vpop.permute.xlu0 %268  ;;  %v234_v17 = vpop.permute.xlu1 %233  ;;  %847 = vmatmul.msk.bf16.vlgmr.msra.gmra.mxu0 %vm183_vm0, %v988_v14 }
  0x8a   : > { %344 = vmatpush.bf16.msrb.mxu0 %v332_v11  ;;  %281 = vmatpush.bf16.msra.mxu3 %v269_v16  ;;  %v546_v20 = vpop.permute.xlu2 %545 }
  0x8b   : > { %249 = vmatpush.bf16.msra.mxu2 %v234_v17 }
  0x8e   : > { %859 = vmatmul.msk.bf16.vlgmr.msra.gmra.mxu2 %vm183_vm0, %v989_v18  ;;  %282 = vmatpush.bf16.msra.mxu3 %v267_v8 }
  0x91   : > { %v391_v21 = vpop.permute.xlu0 %390  ;;  %v424_v22 = vpop.permute.xlu1 %423  ;;  %866 = vmatmul.msk.bf16.vlgmr.msra.gmra.mxu3 %vm183_vm0, %v990_v19 }
  0x92   : > { %403 = vmatpush.bf16.msrb.mxu2 %v391_v21  ;;  %436 = vmatpush.bf16.msrb.mxu3 %v424_v22  ;;  %v515_v26 = vpop.permute.xlu2 %514 }
  0x95   : > { %v220_v55 = vpop.f32.mrf.mxu1 }
  0x96   : > { %437 = vmatpush.bf16.msrb.mxu3 %v422_v15 }
  0x99   : > { %v360_v23 = vpop.permute.xlu0 %359  ;;  %v389_v24 = vpop.permute.xlu1 %388 }
  0x9a   : > { %372 = vmatpush.bf16.msrb.mxu1 %v360_v23  ;;  %404 = vmatpush.bf16.msrb.mxu2 %v389_v24  ;;  %v485_v32 = vpop.permute.xlu2 %484 }
  0x9d   : > { %v222_v60 = vpop.f32.mrf.mxu1 }
  0x9e   : > { %558 = vmatpush.bf16.msra.mxu2 %v546_v20 }
  0x9f   : > { %895 = vmatmul.msk.bf16.vlgmr.msrb.gmra.mxu2 %vm183_vm0, %v995_v25 }
  0xa1   : > { %v330_v28 = vpop.permute.xlu0 %329  ;;  %v358_v29 = vpop.permute.xlu1 %357  ;;  %902 = vmatmul.msk.bf16.vlgmr.msrb.gmra.mxu3 %vm183_vm0, %v996_v27 }
  0xa2   : > { %345 = vmatpush.bf16.msrb.mxu0 %v330_v28  ;;  %373 = vmatpush.bf16.msrb.mxu1 %v358_v29  ;;  %v734_v35 = vpop.permute.xlu2 %733  ;;  %v1044_v29 = vmov 0  }
  0xa3   : > { %147 = vst [vmem:[%s1172_s5 + $0x8] sm:$0xf] %v1044_v29 }
  0xa4   : > { %145 = vst [vmem:[%s1172_s5] sm:$0xf] %v1044_v29 }
  0xa5   : > { %883 = vmatmul.msk.bf16.vlgmr.msrb.gmra.mxu0 %vm183_vm0, %v994_v30  ;;  %888 = vmatmul.msk.bf16.vlgmr.msrb.gmra.mxu1 %vm183_vm0, %v991_v31  ;;  %146 = vst [vmem:[%s1172_s5 + $0x4] sm:$0xf] %v1044_v29 }
  0xa6   : > { %527 = vmatpush.bf16.msra.mxu1 %v515_v26  ;;  %148 = vst [vmem:[%s1172_s5 + $0xc] sm:$0xf] %v1044_v29 }
  0xa7   : > { %149 = vst [vmem:[%s1172_s5 + $0x10] sm:$0xf] %v1044_v29 }
  0xa8   : > { %150 = vst [vmem:[%s1172_s5 + $0x14] sm:$0xf] %v1044_v29 }
  0xa9   : > { %v579_v33 = vpop.permute.xlu0 %578  ;;  %v487_v34 = vpop.permute.xlu1 %486  ;;  %151 = vst [vmem:[%s1172_s5 + $0x18] sm:$0xf] %v1044_v29 }
  0xaa   : > { %591 = vmatpush.bf16.msra.mxu3 %v579_v33  ;;  %499 = vmatpush.bf16.msra.mxu0 %v487_v34  ;;  %v699_v41 = vpop.permute.xlu2 %698  ;;  %152 = vst [vmem:[%s1172_s5 + $0x1c] sm:$0xf] %v1044_v29 }
  0xae   : > { %500 = vmatpush.bf16.msra.mxu0 %v485_v32 }
  0xb1   : > { %v544_v36 = vpop.permute.xlu0 %543  ;;  %v577_v37 = vpop.permute.xlu1 %576 }
  0xb2   : > { %559 = vmatpush.bf16.msra.mxu2 %v544_v36  ;;  %592 = vmatpush.bf16.msra.mxu3 %v577_v37  ;;  %v668_v48 = vpop.permute.xlu2 %667 }
  0xb5   : > { %933 = vmatmul.msk.bf16.vlgmr.msra.gmra.mxu2 %vm183_vm0, %v1001_v38  ;;  %940 = vmatmul.msk.bf16.vlgmr.msra.gmra.mxu3 %vm183_vm0, %v1002_v39 }
  0xb6   : > { %746 = vmatpush.bf16.msrb.mxu3 %v734_v35  ;;  %921 = vmatmul.msk.bf16.vlgmr.msra.gmra.mxu0 %vm183_vm0, %v1000_v40 }
  0xb9   : > { %v513_v42 = vpop.permute.xlu0 %512  ;;  %v701_v43 = vpop.permute.xlu1 %700 }
  0xba   : > { %528 = vmatpush.bf16.msra.mxu1 %v513_v42  ;;  %713 = vmatpush.bf16.msrb.mxu2 %v701_v43 }
  0xbd   : > { %926 = vmatmul.msk.bf16.vlgmr.msra.gmra.mxu1 %vm183_vm0, %v997_v44 }
  0xbe   : > { %714 = vmatpush.bf16.msrb.mxu2 %v699_v41 }
  0xc1   : > { %v642_v45 = vpop.permute.xlu0 %641  ;;  %v670_v46 = vpop.permute.xlu1 %669 }
  0xc2   : > { %654 = vmatpush.bf16.msrb.mxu0 %v642_v45  ;;  %682 = vmatpush.bf16.msrb.mxu1 %v670_v46 }
  0xc5   : > { %971 = vmatmul.msk.bf16.vlgmr.msrb.gmra.mxu2 %vm183_vm0, %v1007_v47 }
  0xc6   : > { %683 = vmatpush.bf16.msrb.mxu1 %v668_v48 }
  0xc9   : > { %v732_v49 = vpop.permute.xlu0 %731  ;;  %v640_v50 = vpop.permute.xlu1 %639 }
  0xca   : > { %655 = vmatpush.bf16.msrb.mxu0 %v640_v50  ;;  %747 = vmatpush.bf16.msrb.mxu3 %v732_v49 }
  0xcd   : > { %959 = vmatmul.msk.bf16.vlgmr.msrb.gmra.mxu0 %vm183_vm0, %v1006_v51  ;;  %964 = vmatmul.msk.bf16.vlgmr.msrb.gmra.mxu1 %vm183_vm0, %v1003_v52 }
  0xce   : > { %978 = vmatmul.msk.bf16.vlgmr.msrb.gmra.mxu3 %vm183_vm0, %v1008_v53 }
 0x106   : > { %v196_v54 = vpop.f32.mrf.mxu0 }
 0x107   : > { %v221_v56 = vadd.f32 %v220_v55, %v196_v54 }
 0x10e   : > { %v198_v59 = vpop.f32.mrf.mxu0 }
 0x10f   : > { %v223_v63 = vadd.f32 %v222_v60, %v198_v59 }
 0x111   : > { %v251_v57 = vpop.f32.mrf.mxu2 }
 0x112   : > { %v256_v58 = vadd.f32 %v251_v57, %v221_v56 }
 0x114   : > { %v284_v61 = vpop.f32.mrf.mxu3 }
 0x115   : > { %v289_v62 = vadd.f32 %v284_v61, %v256_v58 }
 0x117   : > { %v291_v0 = vpack.c.bf16 %v289_v62, %v289_v62 }
 0x119   : > { %v253_v1 = vpop.f32.mrf.mxu2  ;;  %295 = vrot.lane.b32.xlu0 %v291_v0, %s1043_s29 }
 0x11a   : > { %v257_v2 = vadd.f32 %v253_v1, %v223_v63 }
 0x11c   : > { %v286_v3 = vpop.f32.mrf.mxu3 }
 0x11d   : > { %v290_v4 = vadd.f32 %v286_v3, %v257_v2 }
 0x11f   : > { %v292_v5 = vpack.c.bf16 %v290_v4, %v290_v4 }
 0x121   : > { %297 = vrot.lane.b32.xlu1 %v292_v5, %s1043_s29 }
 0x122   : > { %v406_v6 = vpop.f32.mrf.mxu2  ;;  %v347_v7 = vpop.f32.mrf.mxu0 }
 0x123   : > { %v375_v8 = vpop.f32.mrf.mxu1 }
 0x124   : > { %v376_v9 = vadd.f32 %v375_v8, %v347_v7  ;;  %v439_v10 = vpop.f32.mrf.mxu3 }
 0x126   : > { %v411_v11 = vadd.f32 %v406_v6, %v376_v9 }
 0x128   : > { %v444_v12 = vadd.f32 %v439_v10, %v411_v11 }
 0x12a   : > { %v446_v13 = vpack.c.bf16 %v444_v12, %v444_v12  ;;  %v408_v14 = vpop.f32.mrf.mxu2  ;;  %v349_v15 = vpop.f32.mrf.mxu0 }
 0x12b   : > { %v377_v16 = vpop.f32.mrf.mxu1 }
 0x12c   : > { %v378_v17 = vadd.f32 %v377_v16, %v349_v15  ;;  %450 = vrot.lane.b32.xlu2 %v446_v13, %s1043_s29  ;;  %v441_v18 = vpop.f32.mrf.mxu3 }
 0x12e   : > { %v412_v19 = vadd.f32 %v408_v14, %v378_v17 }
 0x130   : > { %v445_v20 = vadd.f32 %v441_v18, %v412_v19 }
 0x132   : > { %v447_v21 = vpack.c.bf16 %v445_v20, %v445_v20 }
 0x133   : > { %v502_v22 = vpop.f32.mrf.mxu0 }
 0x134   : > { %452 = vrot.lane.b32.xlu0 %v447_v21, %s1043_s29 }
 0x138   : > { %v561_v23 = vpop.f32.mrf.mxu2  ;;  %v594_v26 = vpop.f32.mrf.mxu3 }
 0x13a   : > { %v530_v24 = vpop.f32.mrf.mxu1 }
 0x13b   : > { %v531_v25 = vadd.f32 %v530_v24, %v502_v22  ;;  %v504_v31 = vpop.f32.mrf.mxu0 }
 0x13d   : > { %v566_v27 = vadd.f32 %v561_v23, %v531_v25 }
 0x13f   : > { %v599_v28 = vadd.f32 %v594_v26, %v566_v27 }
 0x140   : > { %v563_v34 = vpop.f32.mrf.mxu2  ;;  %v596_v36 = vpop.f32.mrf.mxu3 }
 0x141   : > { %v601_v30 = vpack.c.bf16 %v599_v28, %v599_v28 }
 0x142   : > { %v532_v32 = vpop.f32.mrf.mxu1 }
 0x143   : > { %v533_v33 = vadd.f32 %v532_v32, %v504_v31  ;;  %605 = vrot.lane.b32.xlu1 %v601_v30, %s1043_s29 }
 0x145   : > { %v567_v35 = vadd.f32 %v563_v34, %v533_v33 }
 0x147   : > { %v600_v37 = vadd.f32 %v596_v36, %v567_v35 }
 0x148   : > { %v716_v42 = vpop.f32.mrf.mxu2 }
 0x149   : > { %v602_v38 = vpack.c.bf16 %v600_v37, %v600_v37 }
 0x14a   : > { %v657_v39 = vpop.f32.mrf.mxu0  ;;  %v685_v40 = vpop.f32.mrf.mxu1 }
 0x14b   : > { %v686_v41 = vadd.f32 %v685_v40, %v657_v39  ;;  %607 = vrot.lane.b32.xlu2 %v602_v38, %s1043_s29 }
 0x14d   : > { %v721_v43 = vadd.f32 %v716_v42, %v686_v41 }
 0x150   : > { %v718_v50 = vpop.f32.mrf.mxu2 }
 0x151   : > { %v749_v44 = vpop.f32.mrf.mxu3 }
 0x152   : > { %v754_v45 = vadd.f32 %v749_v44, %v721_v43  ;;  %v659_v46 = vpop.f32.mrf.mxu0  ;;  %v687_v47 = vpop.f32.mrf.mxu1 }
 0x153   : > { %v688_v49 = vadd.f32 %v687_v47, %v659_v46 }
 0x154   : > { %v756_v48 = vpack.c.bf16 %v754_v45, %v754_v45 }
 0x155   : > { %v722_v51 = vadd.f32 %v718_v50, %v688_v49 }
 0x156   : > { %760 = vrot.lane.b32.xlu0 %v756_v48, %s1043_s29 }
 0x159   : > { %v751_v52 = vpop.f32.mrf.mxu3 }
 0x15a   : > { %v755_v53 = vadd.f32 %v751_v52, %v722_v51 }
 0x15c   : > { %v757_v54 = vpack.c.bf16 %v755_v53, %v755_v53 }
 0x15e   : > { %762 = vrot.lane.b32.xlu1 %v757_v54, %s1043_s29 }
 0x186   : > { %v451_v55 = vpop.permute.xlu2 %450 }
 0x187   : > { %903 = vst.msk [vmem:[%s1172_s5 + $0x8] sm:$0xf] %vm301_vm1, %v451_v55 }
 0x18b   : > { %v296_v56 = vpop.permute.xlu0 %295 }
 0x18c   : > { %302 = vst.msk [vmem:[%s1172_s5] sm:$0xf] %vm301_vm1, %v296_v56 }
 0x193   : > { %v298_v57 = vpop.permute.xlu1 %297 }
 0x194   : > { %303 = vst.msk [vmem:[%s1172_s5 + $0x4] sm:$0xf] %vm301_vm1, %v298_v57 }
 0x1a5   : > { %v608_v58 = vpop.permute.xlu2 %607 }
 0x1a6   : > { %v453_v59 = vpop.permute.xlu0 %452  ;;  %942 = vst.msk [vmem:[%s1172_s5 + $0x14] sm:$0xf] %vm301_vm1, %v608_v58 }
 0x1a7   : > { %904 = vst.msk [vmem:[%s1172_s5 + $0xc] sm:$0xf] %vm301_vm1, %v453_v59 }
 0x1b5   : > { %v606_v60 = vpop.permute.xlu1 %605 }
 0x1b6   : > { %941 = vst.msk [vmem:[%s1172_s5 + $0x10] sm:$0xf] %vm301_vm1, %v606_v60 }
 0x1c8   : > { %v761_v61 = vpop.permute.xlu0 %760 }
 0x1c9   : > { %979 = vst.msk [vmem:[%s1172_s5 + $0x18] sm:$0xf] %vm301_vm1, %v761_v61 }
 0x1d0   : > { %v763_v62 = vpop.permute.xlu1 %762 }
 0x1d1   : > { %980 = vst.msk [vmem:[%s1172_s5 + $0x1c] sm:$0xf] %vm301_vm1, %v763_v62 }
 0x1d2 PF: > { %s12_s9 = sadd.s32 1, %s1033_s9  }
 0x1d3   : > { %p9_p4 = scmp.ge.s32.totalorder %s12_s9, 4  }
 0x1d5   :  { %11 = sbr.rel (!%p9_p4) target bundleno = 1 (0x1), region = 76 }

// kernel: _lambda_.13
= control target key start
LH: loop header
LB: loop body
LE: loop exit
PB: predicated region body
PF: predicated region fallthrough
CT: control target
= control target key end

     0   :  { %s720_s9 = smov 0   ;;  %s819_s0 = inlined_call_operand.vmem [shape: bf16[2,16,128], index: 0, kind: input, shape index: {}]   ;;  %s820_s1 = inlined_call_operand.vmem [shape: bf16[4,4,8,16], index: 1, kind: input, shape index: {}]   ;;  %s821_s2 = inlined_call_operand.vmem [shape: bf16[2,4,8,128], index: 2, kind: output, shape index: {}]  }
   0x1 LB: > { %s602_s10 = sadd.s32 4294967295, %s693_s9   ;;  %p606_p0 = scmp.ge.s32.totalorder %s693_s9, 1  ;;  %s693_s9 = sphi %s720_s9, %s12_s9  }
   0x2   : > { %p112_p1 = scmp.lt.s32.totalorder %s693_s9, 3 }
   0x4   : > { %p113_p2 = pnand %p606_p0, %p112_p1 }
   0x5   : > { %p134_p3 = scmp.lt.s32.totalorder (!%p113_p2), %s602_s10, 1  ;;  %s695_s15 = smov (!%p113_p2), 118  }
   0x6   : > { %116 = sbr.rel (%p113_p2) target bundleno = 441 (0x1b9), region = 28  ;;  %s696_s16 = smov (!%p113_p2), 127  }
   0x7   : > { %s697_s17 = smov (!%p113_p2), 116   ;;  %s698_s18 = smov (!%p113_p2), 117  }
   0x8   : > { %s699_s19 = smov (!%p113_p2), 126   ;;  %s700_s20 = smov (!%p113_p2), 108  }
   0x9   : > { %s701_s21 = smov (!%p113_p2), 107   ;;  %s702_s22 = smov (!%p113_p2), 106  }
   0xa   : > { %s703_s29 = smov (!%p113_p2), 11  }
   0xb   : > { %s823_s10 = smov (!%p134_p3, %s602_s10), 1  ;;  %vm162_vm0 = vcmask 130048   ;;  %v149_v4 = vld [vmem:[%s820_s1] sm:$0xf]  ;;  %v618_v9 = vld [vmem:[%s820_s1 + $0x8] sm:$0xf] }
   0xc   : > { %s663_s11 = sshll.u32 %s823_s10, 3  ;;  %v611_v10 = vld [vmem:[%s820_s1 + $0x4] sm:$0xf]  ;;  %v620_v14 = vld [vmem:[%s820_s1 + $0xc] sm:$0xf]  ;;  %s664_s30 = sshll.u32 %s823_s10, 4 }
   0xd   : > { %s138_s14 = scalar_lea.vmem %s819_s0, %s663_s11  ;;  %v630_v18 = vld [vmem:[%s820_s1 + $0x18] sm:$0xf]  ;;  %v623_v19 = vld [vmem:[%s820_s1 + $0x14] sm:$0xf]  ;;  %v622_v20 = vld [vmem:[%s820_s1 + $0x10] sm:$0xf]  ;;  %s804_s5 = scalar_lea.vmem %s821_s2, %s664_s30 }
   0xe   : > { %v665_v0 = vld [vmem:[%s138_s14] sm:$0xff]  ;;  %v632_v24 = vld [vmem:[%s820_s1 + $0x1c] sm:$0xf]  ;;  %v643_v27 = vld [vmem:[%s820_s1 + $0x28] sm:$0xf]  ;;  %v704_v63 = vmov 0  }
   0xf   : > { %v666_v1 = vld [vmem:[%s138_s14] sm:$0xff]  ;;  %198 = vrot.lane.b32.xlu0 %v665_v0, %s695_s15  ;;  %159 = vrot.lane.b32.xlu1 %v665_v0, %s696_s16  ;;  %v645_v30 = vld [vmem:[%s820_s1 + $0x2c] sm:$0xf]  ;;  %vm245_vm1 = vcmask 724056  }
  0x10   : > { %320 = vrot.lane.b32.xlu2 %v666_v1, %s697_s17  ;;  %190 = vmatpush.bf16.msra.mxu1 %v665_v0  ;;  %v667_v2 = vld [vmem:[%s138_s14] sm:$0xff]  ;;  %v656_v31 = vld [vmem:[%s820_s1 + $0x38] sm:$0xf]  ;;  %v649_v32 = vld [vmem:[%s820_s1 + $0x34] sm:$0xf] }
  0x11   : > { %v668_v3 = vld [vmem:[%s138_s14] sm:$0xff]  ;;  %v648_v33 = vld [vmem:[%s820_s1 + $0x30] sm:$0xf]  ;;  %v658_v34 = vld [vmem:[%s820_s1 + $0x3c] sm:$0xf]  ;;  %145 = vst [vmem:[%s804_s5] sm:$0xf] %v704_v63 }
  0x12   : > { %v636_v28 = vld [vmem:[%s820_s1 + $0x24] sm:$0xf]  ;;  %v635_v29 = vld [vmem:[%s820_s1 + $0x20] sm:$0xf]  ;;  %146 = vst [vmem:[%s804_s5 + $0x4] sm:$0xf] %v704_v63 }
  0x13   : > { %617 = vmatmul.msk.bf16.vlgmr.msra.gmra.mxu1 %vm162_vm0, %v149_v4  ;;  %147 = vst [vmem:[%s804_s5 + $0x8] sm:$0xf] %v704_v63 }
  0x14   : > { %148 = vst [vmem:[%s804_s5 + $0xc] sm:$0xf] %v704_v63 }
  0x17   : > { %220 = vrot.lane.b32.xlu0 %v665_v0, %s698_s18  ;;  %298 = vrot.lane.b32.xlu1 %v666_v1, %s698_s18 }
  0x18   : > { %258 = vrot.lane.b32.xlu2 %v666_v1, %s699_s19 }
  0x1f   : > { %277 = vrot.lane.b32.xlu0 %v666_v1, %s696_s16  ;;  %398 = vrot.lane.b32.xlu1 %v667_v2, %s700_s20 }
  0x20   : > { %420 = vrot.lane.b32.xlu2 %v667_v2, %s701_s21 }
  0x27   : > { %377 = vrot.lane.b32.xlu1 %v667_v2, %s695_s15  ;;  %358 = vrot.lane.b32.xlu0 %v667_v2, %s698_s18 }
  0x28   : > { %498 = vrot.lane.b32.xlu2 %v668_v3, %s701_s21 }
  0x2f   : > { %520 = vrot.lane.b32.xlu0 %v668_v3, %s702_s22  ;;  %458 = vrot.lane.b32.xlu1 %v668_v3, %s697_s17 }
  0x30   : > { %477 = vrot.lane.b32.xlu2 %v668_v3, %s698_s18 }
  0x6a   : > { %v321_v5 = vpop.permute.xlu2 %320 }
  0x72   : > { %v259_v6 = vpop.permute.xlu2 %258 }
  0x7a   : > { %v421_v11 = vpop.permute.xlu2 %420 }
  0x81   : > { %v199_v7 = vpop.permute.xlu0 %198  ;;  %v160_v8 = vpop.permute.xlu1 %159 }
  0x82   : > { %211 = vmatpush.bf16.msra.mxu2 %v199_v7  ;;  %173 = vmatpush.bf16.msra.mxu0 %v160_v8  ;;  %v499_v15 = vpop.permute.xlu2 %498 }
  0x85   : > { %619 = vmatmul.msk.bf16.vlgmr.msra.gmra.mxu2 %vm162_vm0, %v618_v9  ;;  %616 = vmatmul.msk.bf16.vlgmr.msra.gmra.mxu0 %vm162_vm0, %v611_v10 }
  0x86   : > { %271 = vmatpush.bf16.msrb.mxu0 %v259_v6 }
  0x89   : > { %v221_v12 = vpop.permute.xlu0 %220  ;;  %v299_v13 = vpop.permute.xlu1 %298 }
  0x8a   : > { %233 = vmatpush.bf16.msra.mxu3 %v221_v12  ;;  %311 = vmatpush.bf16.msrb.mxu2 %v299_v13  ;;  %v478_v21 = vpop.permute.xlu2 %477 }
  0x8d   : > { %621 = vmatmul.msk.bf16.vlgmr.msra.gmra.mxu3 %vm162_vm0, %v620_v14 }
  0x8e   : > { %333 = vmatpush.bf16.msrb.mxu3 %v321_v5 }
  0x90   : > { %v192_v35 = vpop.f32.mrf.mxu1 }
  0x91   : > { %v278_v16 = vpop.permute.xlu0 %277  ;;  %v399_v17 = vpop.permute.xlu1 %398 }
  0x92   : > { %433 = vmatpush.bf16.msra.mxu3 %v421_v11  ;;  %290 = vmatpush.bf16.msrb.mxu1 %v278_v16 }
  0x93   : > { %411 = vmatpush.bf16.msra.mxu2 %v399_v17 }
  0x95   : > { %631 = vmatmul.msk.bf16.vlgmr.msrb.gmra.mxu2 %vm162_vm0, %v630_v18  ;;  %628 = vmatmul.msk.bf16.vlgmr.msrb.gmra.mxu0 %vm162_vm0, %v623_v19 }
  0x96   : > { %629 = vmatmul.msk.bf16.vlgmr.msrb.gmra.mxu1 %vm162_vm0, %v622_v20 }
  0x97   : > { %511 = vmatpush.bf16.msrb.mxu2 %v499_v15 }
  0x98   : > { %v194_v36 = vpop.f32.mrf.mxu1 }
  0x99   : > { %v378_v22 = vpop.permute.xlu1 %377  ;;  %v359_v23 = vpop.permute.xlu0 %358 }
  0x9a   : > { %371 = vmatpush.bf16.msra.mxu0 %v359_v23  ;;  %390 = vmatpush.bf16.msra.mxu1 %v378_v22 }
  0x9d   : > { %633 = vmatmul.msk.bf16.vlgmr.msrb.gmra.mxu3 %vm162_vm0, %v632_v24 }
  0x9e   : > { %490 = vmatpush.bf16.msrb.mxu1 %v478_v21 }
  0xa1   : > { %v521_v25 = vpop.permute.xlu0 %520  ;;  %v459_v26 = vpop.permute.xlu1 %458 }
  0xa2   : > { %533 = vmatpush.bf16.msrb.mxu3 %v521_v25  ;;  %471 = vmatpush.bf16.msrb.mxu0 %v459_v26 }
  0xa5   : > { %644 = vmatmul.msk.bf16.vlgmr.msra.gmra.mxu2 %vm162_vm0, %v643_v27  ;;  %641 = vmatmul.msk.bf16.vlgmr.msra.gmra.mxu0 %vm162_vm0, %v636_v28 }
  0xa6   : > { %642 = vmatmul.msk.bf16.vlgmr.msra.gmra.mxu1 %vm162_vm0, %v635_v29 }
  0xad   : > { %646 = vmatmul.msk.bf16.vlgmr.msra.gmra.mxu3 %vm162_vm0, %v645_v30 }
  0xb5   : > { %657 = vmatmul.msk.bf16.vlgmr.msrb.gmra.mxu2 %vm162_vm0, %v656_v31  ;;  %654 = vmatmul.msk.bf16.vlgmr.msrb.gmra.mxu0 %vm162_vm0, %v649_v32 }
  0xb6   : > { %655 = vmatmul.msk.bf16.vlgmr.msrb.gmra.mxu1 %vm162_vm0, %v648_v33 }
  0xbd   : > { %659 = vmatmul.msk.bf16.vlgmr.msrb.gmra.mxu3 %vm162_vm0, %v658_v34 }
 0x102   : > { %v175_v37 = vpop.f32.mrf.mxu0 }
 0x103   : > { %v193_v39 = vadd.f32 %v192_v35, %v175_v37 }
 0x108   : > { %v213_v38 = vpop.f32.mrf.mxu2 }
 0x109   : > { %v217_v41 = vadd.f32 %v213_v38, %v193_v39 }
 0x10a   : > { %v177_v40 = vpop.f32.mrf.mxu0 }
 0x110   : > { %v235_v42 = vpop.f32.mrf.mxu3  ;;  %v215_v43 = vpop.f32.mrf.mxu2 }
 0x111   : > { %v239_v44 = vadd.f32 %v235_v42, %v217_v41 }
 0x112   : > { %v273_v45 = vpop.f32.mrf.mxu0 }
 0x113   : > { %v240_v46 = vpack.c.bf16 %v239_v44, %v239_v44  ;;  %v292_v47 = vpop.f32.mrf.mxu1 }
 0x114   : > { %v293_v50 = vadd.f32 %v292_v47, %v273_v45 }
 0x115   : > { %242 = vrot.lane.b32.xlu0 %v240_v46, %s703_s29 }
 0x118   : > { %v237_v48 = vpop.f32.mrf.mxu3  ;;  %v313_v49 = vpop.f32.mrf.mxu2 }
 0x119   : > { %v317_v53 = vadd.f32 %v313_v49, %v293_v50 }
 0x11a   : > { %v275_v51 = vpop.f32.mrf.mxu0 }
 0x11b   : > { %v294_v52 = vpop.f32.mrf.mxu1 }
 0x120   : > { %v335_v54 = vpop.f32.mrf.mxu3  ;;  %v315_v55 = vpop.f32.mrf.mxu2 }
 0x121   : > { %v339_v56 = vadd.f32 %v335_v54, %v317_v53 }
 0x122   : > { %v373_v57 = vpop.f32.mrf.mxu0 }
 0x123   : > { %v340_v58 = vpack.c.bf16 %v339_v56, %v339_v56  ;;  %v392_v59 = vpop.f32.mrf.mxu1 }
 0x124   : > { %v393_v62 = vadd.f32 %v392_v59, %v373_v57 }
 0x125   : > { %342 = vrot.lane.b32.xlu1 %v340_v58, %s703_s29 }
 0x128   : > { %v337_v60 = vpop.f32.mrf.mxu3  ;;  %v413_v61 = vpop.f32.mrf.mxu2 }
 0x129   : > { %v417_v2 = vadd.f32 %v413_v61, %v393_v62 }
 0x12a   : > { %v375_v0 = vpop.f32.mrf.mxu0 }
 0x12b   : > { %v394_v1 = vpop.f32.mrf.mxu1 }
 0x130   : > { %v435_v3 = vpop.f32.mrf.mxu3  ;;  %v415_v4 = vpop.f32.mrf.mxu2 }
 0x131   : > { %v439_v5 = vadd.f32 %v435_v3, %v417_v2 }
 0x132   : > { %v473_v6 = vpop.f32.mrf.mxu0 }
 0x133   : > { %v440_v7 = vpack.c.bf16 %v439_v5, %v439_v5  ;;  %v492_v8 = vpop.f32.mrf.mxu1 }
 0x134   : > { %v493_v11 = vadd.f32 %v492_v8, %v473_v6 }
 0x135   : > { %442 = vrot.lane.b32.xlu2 %v440_v7, %s703_s29 }
 0x138   : > { %v437_v9 = vpop.f32.mrf.mxu3  ;;  %v513_v10 = vpop.f32.mrf.mxu2 }
 0x139   : > { %v517_v14 = vadd.f32 %v513_v10, %v493_v11 }
 0x13a   : > { %v475_v12 = vpop.f32.mrf.mxu0 }
 0x13b   : > { %v494_v13 = vpop.f32.mrf.mxu1 }
 0x140   : > { %v535_v15 = vpop.f32.mrf.mxu3  ;;  %v515_v16 = vpop.f32.mrf.mxu2 }
 0x141   : > { %v539_v17 = vadd.f32 %v535_v15, %v517_v14 }
 0x143   : > { %v540_v18 = vpack.c.bf16 %v539_v17, %v539_v17 }
 0x145   : > { %542 = vrot.lane.b32.xlu0 %v540_v18, %s703_s29 }
 0x148   : > { %v537_v19 = vpop.f32.mrf.mxu3 }
 0x187   : > { %v243_v20 = vpop.permute.xlu0 %242 }
 0x188   : > { %246 = vst.msk [vmem:[%s804_s5] sm:$0xf] %vm245_vm1, %v243_v20 }
 0x18f   : > { %v443_v21 = vpop.permute.xlu2 %442 }
 0x190   : > { %647 = vst.msk [vmem:[%s804_s5 + $0x8] sm:$0xf] %vm245_vm1, %v443_v21 }
 0x197   : > { %v343_v22 = vpop.permute.xlu1 %342 }
 0x198   : > { %634 = vst.msk [vmem:[%s804_s5 + $0x4] sm:$0xf] %vm245_vm1, %v343_v22 }
 0x1b7   : > { %v543_v23 = vpop.permute.xlu0 %542 }
 0x1b8   : > { %660 = vst.msk [vmem:[%s804_s5 + $0xc] sm:$0xf] %vm245_vm1, %v543_v23 }
 0x1b9 PF: > { %s12_s9 = sadd.s32 1, %s693_s9  }
 0x1ba   : > { %p9_p4 = scmp.ge.s32.totalorder %s12_s9, 4  }
 0x1bc   :  { %11 = sbr.rel (!%p9_p4) target bundleno = 1 (0x1), region = 76 }

// kernel: _lambda_.12
= control target key start
LH: loop header
LB: loop body
LE: loop exit
PB: predicated region body
PF: predicated region fallthrough
CT: control target
= control target key end

     0   :  { %s1696_s13 = smov 0   ;;  %s1907_s0 = inlined_call_operand.vmem [shape: bf16[2,16,128], index: 0, kind: input, shape index: {}]   ;;  %s1908_s1 = inlined_call_operand.vmem [shape: bf16[2,16,128], index: 1, kind: input, shape index: {}]   ;;  %s1909_s2 = inlined_call_operand.vmem [shape: bf16[9,16,16], index: 2, kind: input, shape index: {}]   ;;  %s1910_s3 = inlined_call_operand.vmem [shape: bf16[9,16,16], index: 3, kind: input, shape index: {}]   ;;  %s1911_s4 = inlined_call_operand.vmem [shape: f32[16,1], index: 4, kind: input, shape index: {}]   ;;  %s1912_s5 = inlined_call_operand.vmem [shape: f32[16,1], index: 5, kind: input, shape index: {}]   ;;  %s1913_s6 = inlined_call_operand.vmem [shape: bf16[9,16,16], index: 6, kind: input, shape index: {}]   ;;  %s1914_s7 = inlined_call_operand.vmem [shape: f32[16,1], index: 7, kind: input, shape index: {}]   ;;  %s1915_s8 = inlined_call_operand.vmem [shape: f32[16,1], index: 8, kind: input, shape index: {}]   ;;  %s1916_s9 = inlined_call_operand.vmem [shape: f32[1,78], index: 9, kind: input, shape index: {}]   ;;  %s1917_s10 = inlined_call_operand.vmem [shape: bf16[2,16,128], index: 10, kind: output, shape index: {}]  }
   0x1 LB: > { %s1360_s14 = sadd.s32 4294967295, %s1629_s13   ;;  %p1364_p0 = scmp.ge.s32.totalorder %s1629_s13, 1  ;;  %s1629_s13 = sphi %s1696_s13, %s20_s13  }
   0x2   : > { %p322_p1 = scmp.lt.s32.totalorder %s1629_s13, 3 }
   0x4   : > { %p323_p2 = pnand %p1364_p0, %p322_p1 }
   0x5   : > { %p365_p3 = scmp.lt.s32.totalorder (!%p323_p2), %s1360_s14, 1  ;;  %s1631_s22 = smov (!%p323_p2), 127  }
   0x6   : > { %326 = sbr.rel (%p323_p2) target bundleno = 872 (0x368), region = 60  ;;  %s1632_s23 = smov (!%p323_p2), 126  }
   0x7   : > { %s1633_s24 = smov (!%p323_p2), 118   ;;  %s1634_s29 = smov (!%p323_p2), 117  }
   0x8   : > { %s1635_s30 = smov (!%p323_p2), 116   ;;  %s1636_s11 = smov (!%p323_p2), 108  }
   0x9   : > { %s1637_s12 = smov (!%p323_p2), 107  }
   0xb   : > { %s1919_s14 = smov (!%p365_p3, %s1360_s14), 1  ;;  %v1573_v2 = vld [vmem:[%s1910_s3] sm:$0xff]  ;;  %vm401_vm0 = vcmask 130048   ;;  %v1575_v8 = vld [vmem:[%s1909_s2 + $0x8] sm:$0xff]  ;;  %v1577_v9 = vld [vmem:[%s1909_s2 + $0x10] sm:$0xff]  ;;  %v1639_v26 = vmov 0  }
   0xc   : > { %s1704_s15 = sshll.u32 %s1919_s14, 3  ;;  %v1571_v3 = vld [vmem:[%s1909_s2] sm:$0xff]  ;;  %s1638_s14 = smov 106   ;;  %v1576_v13 = vld [vmem:[%s1910_s3 + $0x8] sm:$0xff]  ;;  %v1578_v14 = vld [vmem:[%s1910_s3 + $0x10] sm:$0xff]  ;;  %1619 = vset.pattern.permute.xlu1 %v1639_v26  ;;  %1621 = vset.pattern.permute.xlu0 %v1639_v26  ;;  %vm974_vm1 = vcmask 724056  }
   0xd   : > { %s369_s18 = scalar_lea.vmem %s1907_s0, %s1704_s15  ;;  %s374_s21 = scalar_lea.vmem %s1908_s1, %s1704_s15  ;;  %v1579_v16 = vld [vmem:[%s1909_s2 + $0x18] sm:$0xff]  ;;  %v1581_v19 = vld [vmem:[%s1909_s2 + $0x20] sm:$0xff]  ;;  %962 = vst [vmem:[#allocation2] sm:$0xf] %v1639_v26  ;;  %v928_v28 = vld [vmem:[%s1911_s4 + $0x8] sm:$0xff]  ;;  %1620 = vset.pattern.permute.xlu2 %v1639_v26 }
   0xe   : > { %v1572_v0 = vld [vmem:[%s369_s18] sm:$0xff]  ;;  %v1580_v21 = vld [vmem:[%s1910_s3 + $0x18] sm:$0xff]  ;;  %963 = vst [vmem:[#allocation2 + $0x4] sm:$0xf] %v1639_v26  ;;  %v1583_v29 = vld [vmem:[%s1909_s2 + $0x28] sm:$0xff]  ;;  %s1640_s18 = smov 11  }
   0xf   : > { %v1574_v1 = vld [vmem:[%s374_s21] sm:$0xff]  ;;  %455 = vrot.lane.b32.xlu0 %v1572_v0, %s1631_s22  ;;  %515 = vrot.lane.b32.xlu1 %v1572_v0, %s1632_s23  ;;  %v1585_v30 = vld [vmem:[%s1909_s2 + $0x30] sm:$0xff] }
  0x10   : > { %575 = vrot.lane.b32.xlu2 %v1572_v0, %s1633_s24  ;;  %412 = vmatpush.bf16.msra.mxu0 %v1574_v1  ;;  %v1582_v22 = vld [vmem:[%s1910_s3 + $0x20] sm:$0xff]  ;;  %v942_v33 = vld [vmem:[%s1912_s5 + $0x8] sm:$0xff]  ;;  %v1586_v35 = vld [vmem:[%s1910_s3 + $0x30] sm:$0xff] }
  0x11   : > { %440 = vmatpush.bf16.msra.mxu1 %v1572_v0  ;;  %v927_v25 = vld [vmem:[%s1911_s4] sm:$0xff]  ;;  %v1584_v34 = vld [vmem:[%s1910_s3 + $0x28] sm:$0xff]  ;;  %v1587_v37 = vld [vmem:[%s1909_s2 + $0x38] sm:$0xff] }
  0x12   : > { %v941_v27 = vld [vmem:[%s1912_s5] sm:$0xff]  ;;  %v1588_v39 = vld [vmem:[%s1910_s3 + $0x38] sm:$0xff] }
  0x13   : > { %1379 = vmatmul.msk.bf16.vlgmr.msra.gmra.mxu0 %vm401_vm0, %v1573_v2  ;;  %v1589_v38 = vld [vmem:[%s1909_s2 + $0x40] sm:$0xff] }
  0x14   : > { %1388 = vmatmul.msk.bf16.vlgmr.msra.gmra.mxu1 %vm401_vm0, %v1571_v3  ;;  %v1590_v40 = vld [vmem:[%s1910_s3 + $0x40] sm:$0xff] }
  0x17   : > { %485 = vrot.lane.b32.xlu0 %v1574_v1, %s1631_s22  ;;  %545 = vrot.lane.b32.xlu1 %v1574_v1, %s1632_s23 }
  0x18   : > { %605 = vrot.lane.b32.xlu2 %v1574_v1, %s1633_s24 }
  0x1f   : > { %635 = vrot.lane.b32.xlu0 %v1572_v0, %s1634_s29  ;;  %665 = vrot.lane.b32.xlu1 %v1574_v1, %s1634_s29 }
  0x20   : > { %695 = vrot.lane.b32.xlu2 %v1572_v0, %s1635_s30 }
  0x27   : > { %755 = vrot.lane.b32.xlu1 %v1572_v0, %s1636_s11  ;;  %725 = vrot.lane.b32.xlu0 %v1574_v1, %s1635_s30 }
  0x28   : > { %785 = vrot.lane.b32.xlu2 %v1574_v1, %s1636_s11 }
  0x2f   : > { %815 = vrot.lane.b32.xlu0 %v1572_v0, %s1637_s12  ;;  %845 = vrot.lane.b32.xlu1 %v1574_v1, %s1637_s12 }
  0x30   : > { %875 = vrot.lane.b32.xlu2 %v1572_v0, %s1638_s14 }
  0x37   : > { %905 = vrot.lane.b32.xlu0 %v1574_v1, %s1638_s14  ;;  %931 = vperm.xlu1 %1619, %v927_v25  }
  0x38   : > { %936 = vperm.xlu2 %1620, %v928_v28  }
  0x3f   : > { %945 = vperm.xlu0 %1621, %v941_v27   ;;  %950 = vperm.xlu1 %1619, %v942_v33  }
  0x6a   : > { %v576_v4 = vpop.permute.xlu2 %575 }
  0x72   : > { %v606_v5 = vpop.permute.xlu2 %605 }
  0x7a   : > { %v696_v10 = vpop.permute.xlu2 %695 }
  0x81   : > { %v456_v6 = vpop.permute.xlu0 %455  ;;  %v516_v7 = vpop.permute.xlu1 %515 }
  0x82   : > { %468 = vmatpush.bf16.msra.mxu2 %v456_v6  ;;  %528 = vmatpush.bf16.msrb.mxu0 %v516_v7  ;;  %v786_v15 = vpop.permute.xlu2 %785 }
  0x85   : > { %1395 = vmatmul.msk.bf16.vlgmr.msra.gmra.mxu2 %vm401_vm0, %v1575_v8  ;;  %1409 = vmatmul.msk.bf16.vlgmr.msrb.gmra.mxu0 %vm401_vm0, %v1577_v9 }
  0x86   : > { %588 = vmatpush.bf16.msrb.mxu2 %v576_v4 }
  0x89   : > { %v486_v11 = vpop.permute.xlu0 %485  ;;  %v546_v12 = vpop.permute.xlu1 %545 }
  0x8a   : > { %708 = vmatpush.bf16.msra.mxu2 %v696_v10  ;;  %498 = vmatpush.bf16.msra.mxu3 %v486_v11  ;;  %v876_v20 = vpop.permute.xlu2 %875 }
  0x8b   : > { %558 = vmatpush.bf16.msrb.mxu1 %v546_v12 }
  0x8d   : > { %1402 = vmatmul.msk.bf16.vlgmr.msra.gmra.mxu3 %vm401_vm0, %v1576_v13 }
  0x8e   : > { %618 = vmatpush.bf16.msrb.mxu3 %v606_v5  ;;  %1416 = vmatmul.msk.bf16.vlgmr.msrb.gmra.mxu1 %vm401_vm0, %v1578_v14 }
  0x90   : > { %v414_v41 = vpop.f32.mrf.mxu0 }
  0x91   : > { %v636_v17 = vpop.permute.xlu0 %635  ;;  %v666_v18 = vpop.permute.xlu1 %665 }
  0x92   : > { %648 = vmatpush.bf16.msra.mxu0 %v636_v17  ;;  %678 = vmatpush.bf16.msra.mxu1 %v666_v18  ;;  %v442_v42 = vpop.f32.mrf.mxu1 }
  0x93   : > { %v443_v55 = vadd.f32 %v442_v42, %v414_v41 }
  0x95   : > { %1423 = vmatmul.msk.bf16.vlgmr.msrb.gmra.mxu2 %vm401_vm0, %v1579_v16  ;;  %1437 = vmatmul.msk.bf16.vlgmr.msra.gmra.mxu0 %vm401_vm0, %v1581_v19 }
  0x96   : > { %798 = vmatpush.bf16.msrb.mxu1 %v786_v15 }
  0x98   : > { %v416_v43 = vpop.f32.mrf.mxu0 }
  0x99   : > { %v756_v23 = vpop.permute.xlu1 %755  ;;  %v726_v24 = vpop.permute.xlu0 %725 }
  0x9a   : > { %738 = vmatpush.bf16.msra.mxu3 %v726_v24  ;;  %768 = vmatpush.bf16.msrb.mxu0 %v756_v23  ;;  %v444_v44 = vpop.f32.mrf.mxu1 }
  0x9b   : > { %v445_v61 = vadd.f32 %v444_v44, %v416_v43 }
  0x9d   : > { %1430 = vmatmul.msk.bf16.vlgmr.msrb.gmra.mxu3 %vm401_vm0, %v1580_v21 }
  0x9e   : > { %888 = vmatpush.bf16.msra.mxu0 %v876_v20  ;;  %1444 = vmatmul.msk.bf16.vlgmr.msra.gmra.mxu1 %vm401_vm0, %v1582_v22 }
  0xa1   : > { %v816_v31 = vpop.permute.xlu0 %815  ;;  %v846_v32 = vpop.permute.xlu1 %845 }
  0xa2   : > { %828 = vmatpush.bf16.msrb.mxu2 %v816_v31  ;;  %858 = vmatpush.bf16.msrb.mxu3 %v846_v32 }
  0xa5   : > { %1451 = vmatmul.msk.bf16.vlgmr.msra.gmra.mxu2 %vm401_vm0, %v1583_v29  ;;  %1465 = vmatmul.msk.bf16.vlgmr.msrb.gmra.mxu0 %vm401_vm0, %v1585_v30 }
  0xa9   : > { %v906_v36 = vpop.permute.xlu0 %905  ;;  %v932_v41 = vpop.permute.xlu1 %931 }
  0xaa   : > { %918 = vmatpush.bf16.msra.mxu1 %v906_v36 }
  0xad   : > { %1458 = vmatmul.msk.bf16.vlgmr.msra.gmra.mxu3 %vm401_vm0, %v1584_v34 }
  0xae   : > { %1472 = vmatmul.msk.bf16.vlgmr.msrb.gmra.mxu1 %vm401_vm0, %v1586_v35 }
  0xb1   : > { %v946_v42 = vpop.permute.xlu0 %945 }
  0xb5   : > { %1479 = vmatmul.msk.bf16.vlgmr.msrb.gmra.mxu2 %vm401_vm0, %v1587_v37  ;;  %1493 = vmatmul.msk.bf16.vlgmr.msra.gmra.mxu0 %vm401_vm0, %v1589_v38 }
  0xbd   : > { %1486 = vmatmul.msk.bf16.vlgmr.msrb.gmra.mxu3 %vm401_vm0, %v1588_v39 }
  0xbe   : > { %1500 = vmatmul.msk.bf16.vlgmr.msra.gmra.mxu1 %vm401_vm0, %v1590_v40 }
 0x102   : > { %v530_v45 = vpop.f32.mrf.mxu0 }
 0x108   : > { %v470_v46 = vpop.f32.mrf.mxu2 }
 0x109   : > { %v475_v57 = vadd.f32 %v470_v46, %v443_v55 }
 0x10a   : > { %v532_v48 = vpop.f32.mrf.mxu0 }
 0x10b   : > { %v560_v47 = vpop.f32.mrf.mxu1 }
 0x110   : > { %v472_v49 = vpop.f32.mrf.mxu2  ;;  %v500_v50 = vpop.f32.mrf.mxu3 }
 0x111   : > { %v505_v58 = vadd.f32 %v500_v50, %v475_v57  ;;  %v476_v0 = vadd.f32 %v472_v49, %v445_v61 }
 0x112   : > { %v650_v52 = vpop.f32.mrf.mxu0 }
 0x113   : > { %v562_v51 = vpop.f32.mrf.mxu1  ;;  %v535_v62 = vadd.f32 %v530_v45, %v505_v58  ;;  %v951_v58 = vpop.permute.xlu1 %950 }
 0x115   : > { %v565_v3 = vadd.f32 %v560_v47, %v535_v62  ;;  %v1822_v47 = vld [vmem:[%s1916_s9] ss:$0 sm:$0xff] }
 0x118   : > { %v502_v53 = vpop.f32.mrf.mxu3  ;;  %v590_v54 = vpop.f32.mrf.mxu2 }
 0x119   : > { %v506_v2 = vadd.f32 %v502_v53, %v476_v0  ;;  %v595_v4 = vadd.f32 %v590_v54, %v565_v3  ;;  %v937_v53 = vpop.permute.xlu2 %936 }
 0x11a   : > { %v652_v63 = vpop.f32.mrf.mxu0 }
 0x11b   : > { %v680_v56 = vpop.f32.mrf.mxu1  ;;  %v536_v7 = vadd.f32 %v532_v48, %v506_v2 }
 0x11d   : > { %v566_v10 = vadd.f32 %v562_v51, %v536_v7  ;;  %v1248_v7 = vld [vmem:[%s1914_s7 + $0x8] sm:$0xff] }
 0x120   : > { %v592_v59 = vpop.f32.mrf.mxu2  ;;  %v620_v60 = vpop.f32.mrf.mxu3 }
 0x121   : > { %v625_v8 = vadd.f32 %v620_v60, %v595_v4  ;;  %v596_v13 = vadd.f32 %v592_v59, %v566_v10  ;;  %v1247_v4 = vld [vmem:[%s1914_s7] sm:$0xff]  ;;  %v1593_v10 = vld [vmem:[%s1913_s6 + $0x8] sm:$0xff] }
 0x122   : > { %v770_v9 = vpop.f32.mrf.mxu0 }
 0x123   : > { %v682_v1 = vpop.f32.mrf.mxu1  ;;  %v655_v11 = vadd.f32 %v650_v52, %v625_v8  ;;  %v1591_v8 = vld [vmem:[%s1913_s6] sm:$0xff] }
 0x125   : > { %v685_v17 = vadd.f32 %v680_v56, %v655_v11 }
 0x128   : > { %v622_v5 = vpop.f32.mrf.mxu3  ;;  %v710_v6 = vpop.f32.mrf.mxu2 }
 0x129   : > { %v626_v16 = vadd.f32 %v622_v5, %v596_v13  ;;  %v715_v18 = vadd.f32 %v710_v6, %v685_v17  ;;  %v1262_v5 = vld [vmem:[%s1915_s8 + $0x8] sm:$0xff]  ;;  %v1261_v6 = vld [vmem:[%s1915_s8] sm:$0xff] }
 0x12a   : > { %v772_v21 = vpop.f32.mrf.mxu0 }
 0x12b   : > { %v800_v12 = vpop.f32.mrf.mxu1  ;;  %v656_v19 = vadd.f32 %v652_v63, %v626_v16  ;;  %v1596_v16 = vld [vmem:[%s1913_s6 + $0x20] sm:$0xff] }
 0x12d   : > { %v686_v24 = vadd.f32 %v682_v1, %v656_v19 }
 0x130   : > { %v712_v14 = vpop.f32.mrf.mxu2  ;;  %v740_v15 = vpop.f32.mrf.mxu3 }
 0x131   : > { %v745_v20 = vadd.f32 %v740_v15, %v715_v18  ;;  %v716_v28 = vadd.f32 %v712_v14, %v686_v24  ;;  %v1594_v15 = vld [vmem:[%s1913_s6 + $0x10] sm:$0xff]  ;;  %v1599_v24 = vld [vmem:[%s1913_s6 + $0x38] sm:$0xff] }
 0x132   : > { %v890_v32 = vpop.f32.mrf.mxu0 }
 0x133   : > { %v802_v22 = vpop.f32.mrf.mxu1  ;;  %v775_v25 = vadd.f32 %v770_v9, %v745_v20  ;;  %v1597_v20 = vld [vmem:[%s1913_s6 + $0x28] sm:$0xff] }
 0x135   : > { %v805_v30 = vadd.f32 %v800_v12, %v775_v25  ;;  %v1595_v12 = vld [vmem:[%s1913_s6 + $0x18] sm:$0xff] }
 0x138   : > { %v742_v23 = vpop.f32.mrf.mxu3  ;;  %v830_v27 = vpop.f32.mrf.mxu2 }
 0x139   : > { %v746_v29 = vadd.f32 %v742_v23, %v716_v28  ;;  %v835_v31 = vadd.f32 %v830_v27, %v805_v30  ;;  %v1600_v23 = vld [vmem:[%s1913_s6 + $0x40] sm:$0xff] }
 0x13a   : > { %v892_v49 = vpop.f32.mrf.mxu0 }
 0x13b   : > { %v776_v34 = vadd.f32 %v772_v21, %v746_v29  ;;  %v920_v36 = vpop.f32.mrf.mxu1 }
 0x13d   : > { %v806_v39 = vadd.f32 %v802_v22, %v776_v34  ;;  %v1598_v22 = vld [vmem:[%s1913_s6 + $0x30] sm:$0xff] }
 0x140   : > { %v860_v33 = vpop.f32.mrf.mxu3  ;;  %v832_v38 = vpop.f32.mrf.mxu2 }
 0x141   : > { %v865_v35 = vadd.f32 %v860_v33, %v835_v31  ;;  %v836_v43 = vadd.f32 %v832_v38, %v806_v39 }
 0x143   : > { %v895_v37 = vadd.f32 %v890_v32, %v865_v35  ;;  %v922_v52 = vpop.f32.mrf.mxu1 }
 0x145   : > { %v925_v40 = vadd.f32 %v920_v36, %v895_v37 }
 0x147   : > { %v939_v44 = vmul.f32 %v932_v41, %v925_v40 }
 0x148   : > { %v862_v45 = vpop.f32.mrf.mxu3 }
 0x149   : > { %v866_v46 = vadd.f32 %v862_v45, %v836_v43  ;;  %v953_v48 = vadd.f32 %v946_v42, %v939_v44 }
 0x14b   : > { %v896_v50 = vadd.f32 %v892_v49, %v866_v46  ;;  %v955_v51 = vmax.f32 %v953_v48, 0.0 }
 0x14d   : > { %v960_v54 = vmul.f32 %v1822_v47, %v955_v51  ;;  %v926_v55 = vadd.f32 %v922_v52, %v896_v50 }
 0x14f   : > { %v964_v56 = vpack.c.bf16 %v960_v54, %v960_v54  ;;  %v940_v57 = vmul.f32 %v937_v53, %v926_v55 }
 0x151   : > { %v954_v59 = vadd.f32 %v951_v58, %v940_v57  ;;  %968 = vrot.lane.b32.xlu2 %v964_v56, %s1640_s18 }
 0x153   : > { %v956_v60 = vmax.f32 %v954_v59, 0.0 }
 0x155   : > { %v961_v61 = vmul.f32 %v1822_v47, %v956_v60 }
 0x157   : > { %v965_v62 = vpack.c.bf16 %v961_v61, %v961_v61 }
 0x159   : > { %970 = vrot.lane.b32.xlu1 %v965_v62, %s1640_s18 }
 0x1ab   : > { %v969_v63 = vpop.permute.xlu2 %968 }
 0x1ac   : > { %975 = vst.msk [vmem:[#allocation2] sm:$0xf] %vm974_vm1, %v969_v63 }
 0x1b3   : > { %v1509_v1 = vld [vmem:[#allocation2] sm:$0xf] }
 0x1cb   : > { %v971_v0 = vpop.permute.xlu1 %970 }
 0x1cc   : > { %976 = vst.msk [vmem:[#allocation2 + $0x4] sm:$0xf] %vm974_vm1, %v971_v0 }
 0x1d3   : > { %v1592_v2 = vld [vmem:[#allocation2] sm:$0xf0] }
 0x1d4   : > { %v1510_v3 = vor.u32 %v1592_v2, %v1509_v1 }
 0x1d6   : > { %1045 = vrot.lane.b32.xlu1 %v1510_v3, %s1632_s23  ;;  %1105 = vrot.lane.b32.xlu0 %v1510_v3, %s1634_s29 }
 0x1d7   : > { %994 = vrot.lane.b32.xlu2 %v1510_v3, %s1631_s22  ;;  %1030 = vmatpush.bf16.msra.mxu3 %v1510_v3 }
 0x1da   : > { %1516 = vmatmul.msk.bf16.vlgmr.msra.gmra.mxu3 %vm401_vm0, %v1591_v8 }
 0x1de   : > { %1225 = vrot.lane.b32.xlu1 %v1510_v3, %s1638_s14  ;;  %1135 = vrot.lane.b32.xlu0 %v1510_v3, %s1635_s30 }
 0x1df   : > { %1075 = vrot.lane.b32.xlu2 %v1510_v3, %s1633_s24 }
 0x1e6   : > { %1251 = vperm.xlu1 %1619, %v1247_v4   ;;  %1195 = vrot.lane.b32.xlu0 %v1510_v3, %s1637_s12  ;;  %s1890_s12 = scalar_lea.vmem %s1917_s10, %s1704_s15 }
 0x1e7   : > { %1165 = vrot.lane.b32.xlu2 %v1510_v3, %s1636_s11  ;;  %1279 = vst [vmem:[%s1890_s12] sm:$0xf] %v1639_v26 }
 0x1e8   : > { %1280 = vst [vmem:[%s1890_s12 + $0x4] sm:$0xf] %v1639_v26 }
 0x1ee   : > { %1270 = vperm.xlu1 %1619, %v1262_v5   ;;  %1265 = vperm.xlu0 %1621, %v1261_v6  }
 0x1ef   : > { %1256 = vperm.xlu2 %1620, %v1248_v7  }
 0x231   : > { %v995_v9 = vpop.permute.xlu2 %994 }
 0x232   : > { %1007 = vmatpush.bf16.msra.mxu2 %v995_v9 }
 0x235   : > { %1511 = vmatmul.msk.bf16.vlgmr.msra.gmra.mxu2 %vm401_vm0, %v1593_v10 }
 0x239   : > { %v1076_v11 = vpop.permute.xlu2 %1075 }
 0x23a   : > { %1088 = vmatpush.bf16.msrb.mxu1 %v1076_v11 }
 0x23d   : > { %1530 = vmatmul.msk.bf16.vlgmr.msrb.gmra.mxu1 %vm401_vm0, %v1595_v12 }
 0x241   : > { %v1166_v17 = vpop.permute.xlu2 %1165 }
 0x248   : > { %v1046_v13 = vpop.permute.xlu1 %1045  ;;  %v1106_v14 = vpop.permute.xlu0 %1105 }
 0x249   : > { %1058 = vmatpush.bf16.msrb.mxu0 %v1046_v13  ;;  %1118 = vmatpush.bf16.msrb.mxu2 %v1106_v14  ;;  %v1257_v2 = vpop.permute.xlu2 %1256 }
 0x24c   : > { %1523 = vmatmul.msk.bf16.vlgmr.msrb.gmra.mxu0 %vm401_vm0, %v1594_v15  ;;  %1537 = vmatmul.msk.bf16.vlgmr.msrb.gmra.mxu2 %vm401_vm0, %v1596_v16 }
 0x24d   : > { %1178 = vmatpush.bf16.msra.mxu0 %v1166_v17 }
 0x250   : > { %v1226_v18 = vpop.permute.xlu1 %1225  ;;  %v1136_v19 = vpop.permute.xlu0 %1135 }
 0x251   : > { %1148 = vmatpush.bf16.msrb.mxu3 %v1136_v19  ;;  %1238 = vmatpush.bf16.msra.mxu2 %v1226_v18 }
 0x254   : > { %1544 = vmatmul.msk.bf16.vlgmr.msrb.gmra.mxu3 %vm401_vm0, %v1597_v20 }
 0x258   : > { %v1196_v21 = vpop.permute.xlu0 %1195  ;;  %v1252_v54 = vpop.permute.xlu1 %1251 }
 0x259   : > { %1208 = vmatpush.bf16.msra.mxu1 %v1196_v21 }
 0x25c   : > { %1551 = vmatmul.msk.bf16.vlgmr.msra.gmra.mxu0 %vm401_vm0, %v1598_v22  ;;  %1565 = vmatmul.msk.bf16.vlgmr.msra.gmra.mxu2 %vm401_vm0, %v1600_v23 }
 0x25d   : > { %1558 = vmatmul.msk.bf16.vlgmr.msra.gmra.mxu1 %vm401_vm0, %v1599_v24  ;;  %v1032_v27 = vpop.f32.mrf.mxu3 }
 0x260   : > { %v1266_v58 = vpop.permute.xlu0 %1265  ;;  %v1271_v5 = vpop.permute.xlu1 %1270 }
 0x265   : > { %v1034_v32 = vpop.f32.mrf.mxu3 }
 0x2b8   : > { %v1009_v25 = vpop.f32.mrf.mxu2 }
 0x2b9   : > { %v1033_v31 = vadd.f32 %v1032_v27, %v1009_v25 }
 0x2ba   : > { %v1090_v30 = vpop.f32.mrf.mxu1 }
 0x2c0   : > { %v1011_v28 = vpop.f32.mrf.mxu2 }
 0x2c1   : > { %v1035_v38 = vadd.f32 %v1034_v32, %v1011_v28 }
 0x2c2   : > { %v1092_v36 = vpop.f32.mrf.mxu1 }
 0x2c9   : > { %v1060_v29 = vpop.f32.mrf.mxu0 }
 0x2ca   : > { %v1065_v34 = vadd.f32 %v1060_v29, %v1033_v31 }
 0x2cc   : > { %v1095_v37 = vadd.f32 %v1090_v30, %v1065_v34 }
 0x2cf   : > { %v1120_v33 = vpop.f32.mrf.mxu2 }
 0x2d0   : > { %v1125_v39 = vadd.f32 %v1120_v33, %v1095_v37 }
 0x2d1   : > { %v1062_v35 = vpop.f32.mrf.mxu0 }
 0x2d2   : > { %v1066_v42 = vadd.f32 %v1062_v35, %v1035_v38 }
 0x2d4   : > { %v1096_v46 = vadd.f32 %v1092_v36, %v1066_v42 }
 0x2d7   : > { %v1122_v40 = vpop.f32.mrf.mxu2  ;;  %v1150_v41 = vpop.f32.mrf.mxu3 }
 0x2d8   : > { %v1155_v43 = vadd.f32 %v1150_v41, %v1125_v39  ;;  %v1126_v48 = vadd.f32 %v1122_v40, %v1096_v46 }
 0x2d9   : > { %v1180_v44 = vpop.f32.mrf.mxu0 }
 0x2da   : > { %v1185_v26 = vadd.f32 %v1180_v44, %v1155_v43  ;;  %v1210_v45 = vpop.f32.mrf.mxu1 }
 0x2dc   : > { %v1215_v49 = vadd.f32 %v1210_v45, %v1185_v26 }
 0x2df   : > { %v1152_v50 = vpop.f32.mrf.mxu3  ;;  %v1240_v51 = vpop.f32.mrf.mxu2 }
 0x2e0   : > { %v1156_v52 = vadd.f32 %v1152_v50, %v1126_v48  ;;  %v1245_v53 = vadd.f32 %v1240_v51, %v1215_v49 }
 0x2e1   : > { %v1182_v55 = vpop.f32.mrf.mxu0 }
 0x2e2   : > { %v1259_v56 = vmul.f32 %v1252_v54, %v1245_v53  ;;  %v1186_v57 = vadd.f32 %v1182_v55, %v1156_v52  ;;  %v1212_v60 = vpop.f32.mrf.mxu1 }
 0x2e4   : > { %v1273_v59 = vadd.f32 %v1266_v58, %v1259_v56  ;;  %v1216_v62 = vadd.f32 %v1212_v60, %v1186_v57 }
 0x2e6   : > { %v1275_v61 = vmax.f32 %v1273_v59, 0.0 }
 0x2e7   : > { %v1242_v63 = vpop.f32.mrf.mxu2 }
 0x2e8   : > { %v1246_v0 = vadd.f32 %v1242_v63, %v1216_v62  ;;  %v1277_v1 = vmul.f32 %v1822_v47, %v1275_v61 }
 0x2ea   : > { %v1260_v3 = vmul.f32 %v1257_v2, %v1246_v0  ;;  %v1281_v4 = vpack.c.bf16 %v1277_v1, %v1277_v1 }
 0x2ec   : > { %v1274_v6 = vadd.f32 %v1271_v5, %v1260_v3  ;;  %1285 = vrot.lane.b32.xlu2 %v1281_v4, %s1640_s18 }
 0x2ee   : > { %v1276_v7 = vmax.f32 %v1274_v6, 0.0 }
 0x2f0   : > { %v1278_v8 = vmul.f32 %v1822_v47, %v1276_v7 }
 0x2f2   : > { %v1282_v9 = vpack.c.bf16 %v1278_v8, %v1278_v8 }
 0x2f4   : > { %1287 = vrot.lane.b32.xlu0 %v1282_v9, %s1640_s18 }
 0x346   : > { %v1286_v10 = vpop.permute.xlu2 %1285 }
 0x347   : > { %1291 = vst.msk [vmem:[%s1890_s12] sm:$0xf] %vm974_vm1, %v1286_v10 }
 0x366   : > { %v1288_v11 = vpop.permute.xlu0 %1287 }
 0x367   : > { %1292 = vst.msk [vmem:[%s1890_s12 + $0x4] sm:$0xf] %vm974_vm1, %v1288_v11 }
 0x368 PF: > { %s20_s13 = sadd.s32 1, %s1629_s13  }
 0x369   : > { %p17_p4 = scmp.ge.s32.totalorder %s20_s13, 4  }
 0x36b   :  { %19 = sbr.rel (!%p17_p4) target bundleno = 1 (0x1), region = 117 }

// kernel: _lambda_.15
= control target key start
LH: loop header
LB: loop body
LE: loop exit
PB: predicated region body
PF: predicated region fallthrough
CT: control target
= control target key end

     0   :  { %s1143_s20 = smov 0   ;;  %s1295_s0 = inlined_call_operand.vmem [shape: bf16[2,8,384], index: 0, kind: input, shape index: {}]   ;;  %s1296_s1 = inlined_call_operand.vmem [shape: bf16[9,1,8], index: 1, kind: input, shape index: {}]   ;;  %s1297_s2 = inlined_call_operand.<no memory space> [shape: f32[1,1], index: 2, kind: input, shape index: {}]   ;;  %s1298_s3 = inlined_call_operand.vmem [shape: f32[2,1,384], index: 3, kind: input, shape index: {}]   ;;  %s1299_s4 = inlined_call_operand.vmem [shape: f32[1,286], index: 4, kind: input, shape index: {}]   ;;  %s1300_s5 = inlined_call_operand.vmem [shape: f32[2,1,384], index: 5, kind: output, shape index: {}]  }
   0x1   :  { %v10_v0 = vstv %s1297_s2 }
   0x2   :  { %11 = vst [vmem:[#allocation2] sm:$0x1] %v10_v0 }
   0x3 LB: > { %s1011_s21 = sadd.s32 4294967295, %s1097_s20   ;;  %p1015_p0 = scmp.ge.s32.totalorder %s1097_s20, 1  ;;  %s1097_s20 = sphi %s1143_s20, %s17_s20  }
   0x4   : > { %p198_p1 = scmp.lt.s32.totalorder %s1097_s20, 3 }
   0x6   : > { %p199_p2 = pnand %p1015_p0, %p198_p1 }
   0x7   : > { %p229_p3 = scmp.lt.s32.totalorder (!%p199_p2), %s1011_s21, 1  ;;  %s1099_s25 = smov (!%p199_p2), 127  }
   0x8   : > { %202 = sbr.rel (%p199_p2) target bundleno = 508 (0x1fc), region = 40  ;;  %s1100_s26 = smov (!%p199_p2), 126  }
   0x9   : > { %s1101_s27 = smov (!%p199_p2), 110   ;;  %s1102_s28 = smov (!%p199_p2), 109  }
   0xa   : > { %s1103_s29 = smov (!%p199_p2), 108   ;;  %s1104_s30 = smov (!%p199_p2), 92  }
   0xb   : > { %s1105_s6 = smov (!%p199_p2), 91   ;;  %s1106_s7 = smov (!%p199_p2), 90  }
   0xc   : > { %s1109_s10 = smov (!%p199_p2), 19  }
   0xd   : > { %s1302_s21 = smov (!%p229_p3, %s1011_s21), 1  ;;  %vm269_vm0 = vcmask 1043456   ;;  %vm265_vm1 = vcmask 64512   ;;  %v1174_v10 = vld [vmem:[%s1296_s1] sm:$0x1]  ;;  %vm377_vm2 = vcmask 1031168  }
   0xe   : > { %s1057_s2 = smul.u32 12, %s1302_s21  ;;  %v1183_v15 = vld [vmem:[%s1296_s1 + $0x2] sm:$0x1]  ;;  %v1017_v19 = vld [vmem:[%s1296_s1 + $0x1] sm:$0x1]  ;;  %vm262_vm3 = vcmask 1039360  }
   0xf   : > { %vm442_vm4 = vcmask 900096   ;;  %v1028_v40 = vld [vmem:[%s1296_s1 + $0x3] sm:$0x1]  ;;  %vm507_vm5 = vcmask 891904   ;;  %vm572_vm6 = vcmask 883712   ;;  %vm637_vm7 = vcmask 752640  }
  0x10   : > { %s233_s24 = scalar_lea.vmem %s1295_s0, %s1057_s2  ;;  %v1036_v53 = vld [vmem:[%s1296_s1 + $0x5] sm:$0x1]  ;;  %vm702_vm8 = vcmask 744448   ;;  %s1058_s23 = smul.u32 3, %s1302_s21  ;;  %vm767_vm9 = vcmask 736256  }
  0x11   : > { %v245_v1 = vld [vmem:[%s233_s24 + $0x8] sm:$0xf]  ;;  %v244_v2 = vld [vmem:[%s233_s24] sm:$0xff] }
  0x12   : > { %v252_v3 = vunpack.c.l.b16 %v245_v1  ;;  %v250_v4 = vunpack.c.l.b16 %v244_v2  ;;  %v251_v5 = vunpack.c.h.b16 %v244_v2  ;;  %s1282_s8 = scalar_lea.vmem %s1300_s5, %s1058_s23 }
  0x14   : > { %v255_v6 = vpack.c.b16 %v252_v3, %v252_v3  ;;  %v253_v7 = vpack.c.b16 %v250_v4, %v250_v4  ;;  %v1157_v8 = vpack.c.b16 %v251_v5, %v251_v5  ;;  %v1032_v4 = vld [vmem:[%s1296_s1 + $0x4] sm:$0x1] }
  0x16   : > { %260 = vrot.lane.b32.xlu0 %v255_v6, %s1099_s25  ;;  %256 = vrot.lane.b32.xlu1 %v253_v7, %s1099_s25  ;;  %v322_v9 = vsel %vm269_vm0, %v253_v7, 0  ;;  %v328_v25 = vsel %vm269_vm0, %v255_v6, 0  ;;  %v325_v29 = vsel %vm269_vm0, %v1157_v8, 0 }
  0x17   : > { %373 = vrot.lane.b32.xlu2 %v1157_v8, %s1100_s26  ;;  %337 = vmatpush.bf16.msra.mxu3 %v322_v9 }
  0x1a   : > { %1021 = vmatmul.msk.bf16.vlgmr.msra.gmra.mxu3 %vm265_vm1, %v1174_v10 }
  0x1e   : > { %258 = vrot.lane.b32.xlu0 %v1157_v8, %s1099_s25  ;;  %371 = vrot.lane.b32.xlu1 %v253_v7, %s1100_s26 }
  0x1f   : > { %375 = vrot.lane.b32.xlu2 %v255_v6, %s1100_s26 }
  0x26   : > { %438 = vrot.lane.b32.xlu0 %v1157_v8, %s1101_s27  ;;  %440 = vrot.lane.b32.xlu1 %v255_v6, %s1101_s27 }
  0x27   : > { %436 = vrot.lane.b32.xlu2 %v253_v7, %s1101_s27 }
  0x2e   : > { %503 = vrot.lane.b32.xlu1 %v1157_v8, %s1102_s28  ;;  %505 = vrot.lane.b32.xlu0 %v255_v6, %s1102_s28 }
  0x2f   : > { %501 = vrot.lane.b32.xlu2 %v253_v7, %s1102_s28 }
  0x36   : > { %568 = vrot.lane.b32.xlu1 %v1157_v8, %s1103_s29  ;;  %566 = vrot.lane.b32.xlu0 %v253_v7, %s1103_s29 }
  0x37   : > { %631 = vrot.lane.b32.xlu2 %v253_v7, %s1104_s30 }
  0x3e   : > { %570 = vrot.lane.b32.xlu1 %v255_v6, %s1103_s29  ;;  %633 = vrot.lane.b32.xlu0 %v1157_v8, %s1104_s30  ;;  %s237_s29 = scalar_lea.vmem %s1298_s3, %s1058_s23 }
  0x3f   : > { %635 = vrot.lane.b32.xlu2 %v255_v6, %s1104_s30 }
  0x46   : > { %698 = vrot.lane.b32.xlu0 %v1157_v8, %s1105_s6  ;;  %700 = vrot.lane.b32.xlu1 %v255_v6, %s1105_s6 }
  0x47   : > { %696 = vrot.lane.b32.xlu2 %v253_v7, %s1105_s6 }
  0x4e   : > { %765 = vrot.lane.b32.xlu0 %v255_v6, %s1106_s7  ;;  %763 = vrot.lane.b32.xlu1 %v1157_v8, %s1106_s7  ;;  %v1040_v6 = vld [vmem:[%s1296_s1 + $0x6] sm:$0x1] }
  0x4f   : > { %761 = vrot.lane.b32.xlu2 %v253_v7, %s1106_s7 }
  0x71   : > { %v374_v11 = vpop.permute.xlu2 %373 }
  0x79   : > { %v376_v12 = vpop.permute.xlu2 %375 }
  0x7a   : > { %v379_v13 = vsel %vm377_vm2, %v374_v11, %v376_v12  ;;  %v390_v31 = vsel %vm269_vm0, %v376_v12, 0 }
  0x7b   : > { %v387_v14 = vsel %vm269_vm0, %v379_v13, 0  ;;  %v1044_v13 = vld [vmem:[%s1296_s1 + $0x7] sm:$0x1] }
  0x7c   : > { %412 = vmatpush.bf16.msrb.mxu3 %v387_v14 }
  0x7f   : > { %1026 = vmatmul.msk.bf16.vlgmr.msrb.gmra.mxu3 %vm265_vm1, %v1183_v15 }
  0x81   : > { %v437_v30 = vpop.permute.xlu2 %436 }
  0x88   : > { %v261_v16 = vpop.permute.xlu0 %260  ;;  %v257_v17 = vpop.permute.xlu1 %256 }
  0x89   : > { %v277_v18 = vsel %vm269_vm0, %v261_v16, 0  ;;  %v502_v39 = vpop.permute.xlu2 %501 }
  0x8a   : > { %312 = vmatpush.bf16.msra.mxu2 %v277_v18  ;;  %v834_v18 = vld [vmem:[%s237_s29] sm:$0x7] }
  0x8d   : > { %1020 = vmatmul.msk.bf16.vlgmr.msra.gmra.mxu2 %vm265_vm1, %v1017_v19 }
  0x90   : > { %v259_v20 = vpop.permute.xlu0 %258  ;;  %v372_v21 = vpop.permute.xlu1 %371 }
  0x91   : > { %v263_v22 = vsel %vm262_vm3, %v257_v17, %v259_v20  ;;  %v264_v23 = vsel %vm262_vm3, %v259_v20, %v261_v16  ;;  %v378_v24 = vsel %vm377_vm2, %v372_v21, %v374_v11  ;;  %v632_v48 = vpop.permute.xlu2 %631  ;;  %v837_v21 = vperm.slane %v834_v18, 1 }
  0x92   : > { %v271_v26 = vsel %vm269_vm0, %v263_v22, 0  ;;  %v274_v27 = vsel %vm269_vm0, %v264_v23, 0  ;;  %v384_v28 = vsel %vm269_vm0, %v378_v24, 0  ;;  %v824_v22 = vld [vmem:[#allocation2] sm:$0x1]  ;;  %v1107_v23 = vmov 0  }
  0x93   : > { %286 = vmatpush.bf16.msra.mxu0 %v271_v26  ;;  %299 = vmatpush.bf16.msra.mxu1 %v274_v27  ;;  %v836_v24 = vperm.slane %v834_v18, 0  ;;  %v838_v27 = vperm.slane %v834_v18, 2 }
  0x94   : > { %399 = vmatpush.bf16.msrb.mxu2 %v384_v28  ;;  %841 = vrot.lane.b32.xlu1 %v837_v21, %s1102_s28 }
  0x95   : > { %1078 = vset.pattern.permute.xlu0 %v1107_v23  ;;  %843 = vrot.lane.b32.xlu2 %v838_v27, %s1102_s28 }
  0x96   : > { %1018 = vmatmul.msk.bf16.vlgmr.msra.gmra.mxu0 %vm265_vm1, %v1017_v19  ;;  %1019 = vmatmul.msk.bf16.vlgmr.msra.gmra.mxu1 %vm265_vm1, %v1017_v19 }
  0x97   : > { %363 = vmatpush.bf16.msrb.mxu1 %v328_v25  ;;  %350 = vmatpush.bf16.msrb.mxu0 %v325_v29  ;;  %v1048_v25 = vld [vmem:[%s1296_s1 + $0x8] sm:$0x1] }
  0x98   : > { %v439_v32 = vpop.permute.xlu0 %438  ;;  %v441_v33 = vpop.permute.xlu1 %440  ;;  %827 = vperm.xlu0 %1078, %v824_v22  }
  0x99   : > { %v443_v34 = vsel %vm442_vm4, %v437_v30, %v439_v32  ;;  %v444_v35 = vsel %vm442_vm4, %v439_v32, %v441_v33  ;;  %v455_v36 = vsel %vm269_vm0, %v441_v33, 0  ;;  %v636_v54 = vpop.permute.xlu2 %635 }
  0x9a   : > { %v449_v37 = vsel %vm269_vm0, %v443_v34, 0  ;;  %v452_v38 = vsel %vm269_vm0, %v444_v35, 0  ;;  %490 = vmatpush.bf16.msra.mxu3 %v455_v36  ;;  %v650_v9 = vsel %vm269_vm0, %v636_v54, 0 }
  0x9b   : > { %425 = vmatpush.bf16.msra.mxu0 %v390_v31  ;;  %464 = vmatpush.bf16.msra.mxu1 %v449_v37 }
  0x9c   : > { %477 = vmatpush.bf16.msra.mxu2 %v452_v38  ;;  %839 = vrot.lane.b32.xlu1 %v836_v24, %s1102_s28 }
  0x9d   : > { %1025 = vmatmul.msk.bf16.vlgmr.msrb.gmra.mxu2 %vm265_vm1, %v1183_v15  ;;  %1031 = vmatmul.msk.bf16.vlgmr.msra.gmra.mxu3 %vm265_vm1, %v1028_v40  ;;  %v339_v26 = vpop.f32.mrf.mxu3 }
  0xa0   : > { %v504_v41 = vpop.permute.xlu1 %503  ;;  %v506_v42 = vpop.permute.xlu0 %505 }
  0xa1   : > { %v509_v43 = vsel %vm507_vm5, %v504_v41, %v506_v42  ;;  %v520_v44 = vsel %vm269_vm0, %v506_v42, 0  ;;  %v508_v45 = vsel %vm507_vm5, %v502_v39, %v504_v41  ;;  %v697_v7 = vpop.permute.xlu2 %696 }
  0xa2   : > { %555 = vmatpush.bf16.msrb.mxu2 %v520_v44  ;;  %v517_v46 = vsel %vm269_vm0, %v509_v43, 0  ;;  %v514_v47 = vsel %vm269_vm0, %v508_v45, 0 }
  0xa5   : > { %v341_v28 = vpop.f32.mrf.mxu3 }
  0xa6   : > { %1022 = vmatmul.msk.bf16.vlgmr.msrb.gmra.mxu0 %vm265_vm1, %v1174_v10  ;;  %1023 = vmatmul.msk.bf16.vlgmr.msrb.gmra.mxu1 %vm265_vm1, %v1174_v10 }
  0xa7   : > { %542 = vmatpush.bf16.msrb.mxu1 %v517_v46  ;;  %529 = vmatpush.bf16.msrb.mxu0 %v514_v47 }
  0xa8   : > { %v569_v49 = vpop.permute.xlu1 %568  ;;  %v567_v50 = vpop.permute.xlu0 %566 }
  0xa9   : > { %v573_v51 = vsel %vm572_vm6, %v567_v50, %v569_v49 }
  0xaa   : > { %v579_v52 = vsel %vm269_vm0, %v573_v51, 0 }
  0xab   : > { %594 = vmatpush.bf16.msrb.mxu3 %v579_v52 }
  0xad   : > { %1030 = vmatmul.msk.bf16.vlgmr.msra.gmra.mxu2 %vm265_vm1, %v1028_v40 }
  0xae   : > { %1037 = vmatmul.msk.bf16.vlgmr.msrb.gmra.mxu3 %vm265_vm1, %v1036_v53 }
  0xb0   : > { %v571_v55 = vpop.permute.xlu1 %570  ;;  %v634_v56 = vpop.permute.xlu0 %633 }
  0xb1   : > { %v574_v57 = vsel %vm572_vm6, %v569_v49, %v571_v55  ;;  %v638_v58 = vsel %vm637_vm7, %v632_v48, %v634_v56  ;;  %v639_v59 = vsel %vm637_vm7, %v634_v56, %v636_v54  ;;  %v585_v63 = vsel %vm269_vm0, %v571_v55, 0 }
  0xb2   : > { %v644_v60 = vsel %vm269_vm0, %v638_v58, 0  ;;  %v647_v61 = vsel %vm269_vm0, %v639_v59, 0  ;;  %v582_v62 = vsel %vm269_vm0, %v574_v57, 0  ;;  %vm932_vm7 = vcmask 1040384  }
  0xb3   : > { %659 = vmatpush.bf16.msra.mxu2 %v644_v60  ;;  %672 = vmatpush.bf16.msra.mxu3 %v647_v61 }
  0xb6   : > { %1027 = vmatmul.msk.bf16.vlgmr.msra.gmra.mxu0 %vm265_vm1, %v1183_v15  ;;  %1029 = vmatmul.msk.bf16.vlgmr.msra.gmra.mxu1 %vm265_vm1, %v1028_v40  ;;  %v762_v15 = vpop.permute.xlu2 %761 }
  0xb7   : > { %607 = vmatpush.bf16.msra.mxu0 %v582_v62  ;;  %620 = vmatpush.bf16.msra.mxu1 %v585_v63 }
  0xb8   : > { %v699_v0 = vpop.permute.xlu0 %698  ;;  %v701_v1 = vpop.permute.xlu1 %700 }
  0xb9   : > { %v704_v2 = vsel %vm702_vm8, %v699_v0, %v701_v1  ;;  %v715_v3 = vsel %vm269_vm0, %v701_v1, 0  ;;  %v703_v8 = vsel %vm702_vm8, %v697_v7, %v699_v0  ;;  %vm934_vm8 = vcmask 1041408  }
  0xba   : > { %750 = vmatpush.bf16.msrb.mxu3 %v715_v3  ;;  %v712_v5 = vsel %vm269_vm0, %v704_v2, 0  ;;  %v709_v10 = vsel %vm269_vm0, %v703_v8, 0 }
  0xbd   : > { %1035 = vmatmul.msk.bf16.vlgmr.msrb.gmra.mxu2 %vm265_vm1, %v1032_v4 }
  0xbe   : > { %1042 = vmatmul.msk.bf16.vlgmr.msra.gmra.mxu3 %vm265_vm1, %v1040_v6  ;;  %737 = vmatpush.bf16.msrb.mxu2 %v712_v5 }
  0xc0   : > { %v766_v11 = vpop.permute.xlu0 %765  ;;  %v764_v14 = vpop.permute.xlu1 %763 }
  0xc1   : > { %v780_v12 = vsel %vm269_vm0, %v766_v11, 0  ;;  %v769_v16 = vsel %vm767_vm9, %v764_v14, %v766_v11  ;;  %v768_v17 = vsel %vm767_vm9, %v762_v15, %v764_v14 }
  0xc2   : > { %v777_v19 = vsel %vm269_vm0, %v769_v16, 0  ;;  %v774_v20 = vsel %vm269_vm0, %v768_v17, 0 }
  0xc6   : > { %1033 = vmatmul.msk.bf16.vlgmr.msrb.gmra.mxu0 %vm265_vm1, %v1032_v4  ;;  %1034 = vmatmul.msk.bf16.vlgmr.msrb.gmra.mxu1 %vm265_vm1, %v1032_v4 }
  0xc7   : > { %685 = vmatpush.bf16.msrb.mxu0 %v650_v9  ;;  %724 = vmatpush.bf16.msrb.mxu1 %v709_v10 }
  0xcd   : > { %1041 = vmatmul.msk.bf16.vlgmr.msra.gmra.mxu2 %vm265_vm1, %v1040_v6 }
  0xce   : > { %1047 = vmatmul.msk.bf16.vlgmr.msrb.gmra.mxu3 %vm265_vm1, %v1044_v13  ;;  %815 = vmatpush.bf16.msra.mxu2 %v780_v12 }
  0xd6   : > { %1038 = vmatmul.msk.bf16.vlgmr.msra.gmra.mxu0 %vm265_vm1, %v1036_v53  ;;  %1039 = vmatmul.msk.bf16.vlgmr.msra.gmra.mxu1 %vm265_vm1, %v1036_v53 }
  0xd7   : > { %802 = vmatpush.bf16.msra.mxu1 %v777_v19  ;;  %789 = vmatpush.bf16.msra.mxu0 %v774_v20 }
  0xdd   : > { %1046 = vmatmul.msk.bf16.vlgmr.msrb.gmra.mxu2 %vm265_vm1, %v1044_v13 }
  0xe6   : > { %1043 = vmatmul.msk.bf16.vlgmr.msrb.gmra.mxu0 %vm265_vm1, %v1040_v6  ;;  %1045 = vmatmul.msk.bf16.vlgmr.msrb.gmra.mxu1 %vm265_vm1, %v1044_v13 }
  0xed   : > { %1051 = vmatmul.msk.bf16.vlgmr.msra.gmra.mxu2 %vm265_vm1, %v1048_v25 }
  0xf6   : > { %1049 = vmatmul.msk.bf16.vlgmr.msra.gmra.mxu0 %vm265_vm1, %v1048_v25  ;;  %1050 = vmatmul.msk.bf16.vlgmr.msra.gmra.mxu1 %vm265_vm1, %v1048_v25 }
 0x102   : > { %v414_v29 = vpop.f32.mrf.mxu3 }
 0x106   : > { %v842_v22 = vpop.permute.xlu1 %841 }
 0x10a   : > { %v416_v30 = vpop.f32.mrf.mxu3  ;;  %v828_v27 = vpop.permute.xlu0 %827 }
 0x10b   : > { %v830_v30 = vperm.slane %v828_v27, 0 }
 0x110   : > { %v314_v31 = vpop.f32.mrf.mxu2 }
 0x113   : > { %v288_v32 = vpop.f32.mrf.mxu0  ;;  %v301_v33 = vpop.f32.mrf.mxu1 }
 0x114   : > { %v340_v34 = vadd.f32 %v339_v26, %v288_v32 }
 0x118   : > { %v316_v35 = vpop.f32.mrf.mxu2 }
 0x11b   : > { %v290_v36 = vpop.f32.mrf.mxu0  ;;  %v303_v37 = vpop.f32.mrf.mxu1 }
 0x120   : > { %v401_v38 = vpop.f32.mrf.mxu2  ;;  %v492_v39 = vpop.f32.mrf.mxu3 }
 0x121   : > { %v431_v40 = vadd.f32 %v401_v38, %v340_v34 }
 0x123   : > { %v352_v41 = vpop.f32.mrf.mxu0  ;;  %v365_v42 = vpop.f32.mrf.mxu1 }
 0x124   : > { %v353_v43 = vadd.f32 %v352_v41, %v301_v33  ;;  %v366_v44 = vadd.f32 %v365_v42, %v314_v31  ;;  %v840_v41 = vpop.permute.xlu1 %839 }
 0x126   : > { %v432_v45 = vadd.f32 %v414_v29, %v353_v43 }
 0x128   : > { %v403_v46 = vpop.f32.mrf.mxu2  ;;  %v494_v47 = vpop.f32.mrf.mxu3 }
 0x12b   : > { %v354_v48 = vpop.f32.mrf.mxu0  ;;  %v367_v49 = vpop.f32.mrf.mxu1 }
 0x12c   : > { %v846_v49 = vsel %vm507_vm5, %v840_v41, %v842_v22 }
 0x130   : > { %v479_v50 = vpop.f32.mrf.mxu2 }
 0x131   : > { %v596_v51 = vpop.f32.mrf.mxu3  ;;  %v497_v16 = vadd.f32 %v479_v50, %v432_v45 }
 0x133   : > { %v427_v52 = vpop.f32.mrf.mxu0  ;;  %v466_v53 = vpop.f32.mrf.mxu1 }
 0x134   : > { %v433_v54 = vadd.f32 %v427_v52, %v366_v44  ;;  %v496_v17 = vadd.f32 %v466_v53, %v431_v40  ;;  %v844_v40 = vpop.permute.xlu2 %843 }
 0x135   : > { %v847_v47 = vsel %vm507_vm5, %v842_v22, %v844_v40 }
 0x136   : > { %v498_v55 = vadd.f32 %v492_v39, %v433_v54 }
 0x138   : > { %v481_v56 = vpop.f32.mrf.mxu2 }
 0x139   : > { %v598_v57 = vpop.f32.mrf.mxu3 }
 0x13a   : > { %v922_v57 = vlaneseq }
 0x13b   : > { %v429_v58 = vpop.f32.mrf.mxu0  ;;  %v468_v59 = vpop.f32.mrf.mxu1 }
 0x13c   : > { %vm924_vm10 = vcmp.lt.s32.totalorder %v922_v57, 384  ;;  %vm942_vm9 = vcmp.ge.s32.totalorder %v922_v57, 19 }
 0x140   : > { %v557_v60 = vpop.f32.mrf.mxu2 }
 0x141   : > { %v674_v61 = vpop.f32.mrf.mxu3  ;;  %v563_v15 = vadd.f32 %v557_v60, %v498_v55  ;;  %v1108_v60 = vmov 0.0  }
 0x142   : > { %926 = vst.msk [vmem:[%s1282_s8] sm:$0x7] %vm924_vm10, %v1108_v60  ;;  %vm943_vm10 = vcmp.lt.s32.totalorder %v922_v57, 305 }
 0x143   : > { %v531_v62 = vpop.f32.mrf.mxu0  ;;  %v544_v63 = vpop.f32.mrf.mxu1 }
 0x144   : > { %v561_v20 = vadd.f32 %v531_v62, %v496_v17  ;;  %v562_v21 = vadd.f32 %v544_v63, %v497_v16  ;;  %v911_v16 = vld [vmem:[%s1299_s4] sm:$0x7] }
 0x145   : > { %v914_v27 = vperm.slane %v911_v16, 1 }
 0x146   : > { %v626_v28 = vadd.f32 %v596_v51, %v561_v20 }
 0x148   : > { %v559_v0 = vpop.f32.mrf.mxu2 }
 0x149   : > { %v676_v1 = vpop.f32.mrf.mxu3 }
 0x14b   : > { %v533_v2 = vpop.f32.mrf.mxu0  ;;  %v546_v3 = vpop.f32.mrf.mxu1 }
 0x150   : > { %v661_v4 = vpop.f32.mrf.mxu2 }
 0x151   : > { %v752_v5 = vpop.f32.mrf.mxu3  ;;  %v691_v31 = vadd.f32 %v661_v4, %v626_v28 }
 0x153   : > { %v609_v6 = vpop.f32.mrf.mxu0  ;;  %v622_v7 = vpop.f32.mrf.mxu1 }
 0x154   : > { %v628_v19 = vadd.f32 %v622_v7, %v563_v15  ;;  %v627_v26 = vadd.f32 %v609_v6, %v562_v21 }
 0x156   : > { %v692_v32 = vadd.f32 %v674_v61, %v627_v26 }
 0x158   : > { %v663_v8 = vpop.f32.mrf.mxu2 }
 0x159   : > { %v754_v9 = vpop.f32.mrf.mxu3 }
 0x15b   : > { %v611_v10 = vpop.f32.mrf.mxu0  ;;  %v624_v11 = vpop.f32.mrf.mxu1 }
 0x160   : > { %v739_v12 = vpop.f32.mrf.mxu2 }
 0x161   : > { %v757_v35 = vadd.f32 %v739_v12, %v692_v32  ;;  %v913_v32 = vperm.slane %v911_v16, 0 }
 0x163   : > { %v687_v13 = vpop.f32.mrf.mxu0  ;;  %v726_v14 = vpop.f32.mrf.mxu1 }
 0x164   : > { %v693_v23 = vadd.f32 %v687_v13, %v628_v19  ;;  %v756_v36 = vadd.f32 %v726_v14, %v691_v31 }
 0x166   : > { %v758_v29 = vadd.f32 %v752_v5, %v693_v23 }
 0x168   : > { %v741_v18 = vpop.f32.mrf.mxu2 }
 0x16b   : > { %v689_v24 = vpop.f32.mrf.mxu0  ;;  %v728_v25 = vpop.f32.mrf.mxu1 }
 0x16c   : > { %v915_v24 = vperm.slane %v911_v16, 2 }
 0x170   : > { %v817_v33 = vpop.f32.mrf.mxu2 }
 0x171   : > { %v823_v34 = vadd.f32 %v817_v33, %v758_v29 }
 0x173   : > { %v833_v37 = vadd.f32 %v830_v30, %v823_v34  ;;  %v791_v38 = vpop.f32.mrf.mxu0  ;;  %v804_v39 = vpop.f32.mrf.mxu1 }
 0x174   : > { %v821_v42 = vadd.f32 %v791_v38, %v756_v36  ;;  %v822_v43 = vadd.f32 %v804_v39, %v757_v35 }
 0x175   : > { %v853_v44 = vadd.f32 %v844_v40, %v833_v37 }
 0x176   : > { %v831_v45 = vadd.f32 %v830_v30, %v821_v42  ;;  %v832_v46 = vadd.f32 %v830_v30, %v822_v43 }
 0x177   : > { %v1054_v48 = vmul.f32 -1.442695, %v853_v44 }
 0x178   : > { %v851_v50 = vadd.f32 %v846_v49, %v831_v45  ;;  %v852_v51 = vadd.f32 %v847_v47, %v832_v46  ;;  %v819_v52 = vpop.f32.mrf.mxu2 }
 0x179   : > { %1079 = vpow2.f32 %v1054_v48 }
 0x17a   : > { %v1052_v53 = vmul.f32 -1.442695, %v851_v50  ;;  %v1053_v54 = vmul.f32 -1.442695, %v852_v51 }
 0x17b   : > { %v793_v55 = vpop.f32.mrf.mxu0  ;;  %v806_v56 = vpop.f32.mrf.mxu1 }
 0x17c   : > { %1081 = vpow2.f32 %v1052_v53 }
 0x17d   : > { %1083 = vpow2.f32 %v1053_v54 }
 0x17f   : > { %v1080_v58 = vpop.eup %1079 }
 0x180   : > { %v865_v59 = vadd.f32 1.0, %v1080_v58 }
 0x182   : > { %v1082_v61 = vpop.eup %1081  ;;  %1085 = vrcp.f32 %v865_v59  ;;  %v907_v5 = vand.u32 2147483648, %v865_v59  ;;  %vm901_vm12 = vweird.f32 %v865_v59  ;;  %v905_v11 = vand.u32 2147483647, %v865_v59 }
 0x183   : > { %v1084_v62 = vpop.eup %1083  ;;  %v863_v63 = vadd.f32 1.0, %v1082_v61 }
 0x184   : > { %v864_v0 = vadd.f32 1.0, %v1084_v62  ;;  %v908_v15 = vor.u32 1.1754944e-38, %v907_v5  ;;  %vm906_vm1 = vcmp.eq.f32.partialorder %v905_v11, 8.507059e+37 }
 0x185   : > { %1087 = vrcp.f32 %v863_v63  ;;  %v875_v13 = vand.u32 2147483647, %v863_v63  ;;  %v877_v18 = vand.u32 2147483648, %v863_v63  ;;  %vm871_vm0 = vweird.f32 %v863_v63 }
 0x186   : > { %1089 = vrcp.f32 %v864_v0  ;;  %v892_v19 = vand.u32 2147483648, %v864_v0  ;;  %v890_v21 = vand.u32 2147483647, %v864_v0  ;;  %vm886_vm3 = vweird.f32 %v864_v0 }
 0x187   : > { %v878_v29 = vor.u32 1.1754944e-38, %v877_v18  ;;  %vm876_vm5 = vcmp.eq.f32.partialorder %v875_v13, 8.507059e+37 }
 0x188   : > { %v1086_v1 = vpop.eup %1085  ;;  %v893_v30 = vor.u32 1.1754944e-38, %v892_v19  ;;  %vm891_vm6 = vcmp.eq.f32.partialorder %v890_v21, 8.507059e+37 }
 0x189   : > { %v897_v2 = vmul.f32 %v1086_v1, %v865_v59  ;;  %vm902_vm11 = vweird.f32 %v1086_v1 }
 0x18a   : > { %vm903_vm14 = vmor %vm901_vm12, %vm902_vm11  ;;  %vm939_vm11 = vcmask 154624  }
 0x18b   : > { %v1088_v3 = vpop.eup %1087  ;;  %v898_v4 = vsub.f32 1.0, %v897_v2  ;;  %vm944_vm12 = vmand %vm942_vm9, %vm943_vm10 }
 0x18c   : > { %v1090_v6 = vpop.eup %1089  ;;  %v867_v7 = vmul.f32 %v1088_v3, %v863_v63  ;;  %vm872_vm13 = vweird.f32 %v1088_v3 }
 0x18d   : > { %v882_v8 = vmul.f32 %v1090_v6, %v864_v0  ;;  %v899_v9 = vmul.f32 %v1086_v1, %v898_v4  ;;  %vm887_vm15 = vweird.f32 %v1090_v6  ;;  %vm873_vm2 = vmor %vm871_vm0, %vm872_vm13 }
 0x18e   : > { %v868_v10 = vsub.f32 1.0, %v867_v7  ;;  %vm888_vm4 = vmor %vm886_vm3, %vm887_vm15 }
 0x18f   : > { %v883_v12 = vsub.f32 1.0, %v882_v8  ;;  %v900_v14 = vadd.f32 %v1086_v1, %v899_v9 }
 0x190   : > { %v869_v17 = vmul.f32 %v1088_v3, %v868_v10 }
 0x191   : > { %v884_v20 = vmul.f32 %v1090_v6, %v883_v12  ;;  %v904_v22 = vsel %vm903_vm14, %v1086_v1, %v900_v14 }
 0x192   : > { %v870_v23 = vadd.f32 %v1088_v3, %v869_v17  ;;  %v909_v26 = vsel %vm906_vm1, %v908_v15, %v904_v22 }
 0x193   : > { %v885_v25 = vadd.f32 %v1090_v6, %v884_v20  ;;  %v921_v35 = vmul.f32 %v915_v24, %v909_v26 }
 0x194   : > { %v874_v28 = vsel %vm873_vm2, %v1088_v3, %v870_v23 }
 0x195   : > { %v889_v31 = vsel %vm888_vm4, %v1090_v6, %v885_v25  ;;  %v879_v33 = vsel %vm876_vm5, %v878_v29, %v874_v28  ;;  %v931_v39 = vrot.slane %v921_v35, 6 }
 0x196   : > { %v894_v34 = vsel %vm891_vm6, %v893_v30, %v889_v31  ;;  %v919_v37 = vmul.f32 %v913_v32, %v879_v33 }
 0x197   : > { %v920_v36 = vmul.f32 %v914_v27, %v894_v34 }
 0x199   : > { %v930_v38 = vrot.slane %v920_v36, 7 }
 0x19b   : > { %v933_v40 = vsel %vm932_vm7, %v919_v37, %v930_v38 }
 0x19c   : > { %v935_v41 = vsel %vm934_vm8, %v933_v40, %v931_v39 }
 0x19d   : > { %936 = vrot.lane.b32.xlu2 %v935_v41, %s1109_s10 }
 0x1f7   : > { %v937_v42 = vpop.permute.xlu2 %936 }
 0x1f8   : > { %v938_v43 = vrot.slane %v937_v42, 7 }
 0x1fa   : > { %v940_v44 = vsel %vm939_vm11, %v938_v43, %v937_v42 }
 0x1fb   : > { %945 = vst.msk [vmem:[%s1282_s8] sm:$0x7] %vm944_vm12, %v940_v44 }
 0x1fc PF: > { %s17_s20 = sadd.s32 1, %s1097_s20  }
 0x1fd   : > { %p14_p4 = scmp.ge.s32.totalorder %s17_s20, 4  }
 0x1ff   :  { %16 = sbr.rel (!%p14_p4) target bundleno = 3 (0x3), region = 81 }

// kernel: _lambda_.14
= control target key start
LH: loop header
LB: loop body
LE: loop exit
PB: predicated region body
PF: predicated region fallthrough
CT: control target
= control target key end

     0   :  { %s2482_s13 = smov 0   ;;  %s3005_s0 = inlined_call_operand.vmem [shape: bf16[2,8,384], index: 0, kind: input, shape index: {}]   ;;  %s3006_s1 = inlined_call_operand.vmem [shape: bf16[2,8,384], index: 1, kind: input, shape index: {}]   ;;  %s3007_s2 = inlined_call_operand.vmem [shape: bf16[9,8,8], index: 2, kind: input, shape index: {}]   ;;  %s3008_s3 = inlined_call_operand.vmem [shape: bf16[9,8,8], index: 3, kind: input, shape index: {}]   ;;  %s3009_s4 = inlined_call_operand.vmem [shape: f32[8,1], index: 4, kind: input, shape index: {}]   ;;  %s3010_s5 = inlined_call_operand.vmem [shape: f32[8,1], index: 5, kind: input, shape index: {}]   ;;  %s3011_s6 = inlined_call_operand.vmem [shape: bf16[9,8,8], index: 6, kind: input, shape index: {}]   ;;  %s3012_s7 = inlined_call_operand.vmem [shape: f32[8,1], index: 7, kind: input, shape index: {}]   ;;  %s3013_s8 = inlined_call_operand.vmem [shape: f32[8,1], index: 8, kind: input, shape index: {}]   ;;  %s3014_s9 = inlined_call_operand.vmem [shape: f32[1,286], index: 9, kind: input, shape index: {}]   ;;  %s3015_s10 = inlined_call_operand.vmem [shape: bf16[2,8,384], index: 10, kind: output, shape index: {}]  }
   0x1 LB: > { %s2272_s14 = sadd.s32 4294967295, %s2415_s13   ;;  %p2276_p0 = scmp.ge.s32.totalorder %s2415_s13, 1  ;;  %s2415_s13 = sphi %s2482_s13, %s20_s13  }
   0x2   : > { %p322_p1 = scmp.lt.s32.totalorder %s2415_s13, 3 }
   0x4   : > { %p323_p2 = pnand %p2276_p0, %p322_p1 }
   0x5   : > { %p365_p3 = scmp.lt.s32.totalorder (!%p323_p2), %s2272_s14, 1  ;;  %s2417_s22 = smov (!%p323_p2), 127  }
   0x6   : > { %326 = sbr.rel (%p323_p2) target bundleno = 1078 (0x436), region = 60  ;;  %s2418_s23 = smov (!%p323_p2), 126  }
   0x7   : > { %s2419_s26 = smov (!%p323_p2), 110   ;;  %s2420_s29 = smov (!%p323_p2), 109  }
   0x8   : > { %s2421_s30 = smov (!%p323_p2), 108   ;;  %s2422_s11 = smov (!%p323_p2), 92  }
   0x9   : > { %s2423_s12 = smov (!%p323_p2), 91   ;;  %s2426_s27 = smov (!%p323_p2), 19  }
   0xb   : > { %s3019_s14 = smov (!%p365_p3, %s2272_s14), 1  ;;  %vm400_vm0 = vcmask 1043456   ;;  %v385_v18 = vld [vmem:[%s3008_s3] sm:$0xf]  ;;  %vm396_vm1 = vcmask 64512   ;;  %vm516_vm2 = vcmask 1039360  }
   0xc   : > { %s2490_s15 = smul.u32 12, %s3019_s14  ;;  %v382_v23 = vld [vmem:[%s3007_s2] sm:$0xf]  ;;  %s2424_s14 = smov 90   ;;  %v2286_v29 = vld [vmem:[%s3007_s2 + $0x4] sm:$0xf] }
   0xd   : > { %v2290_v42 = vld [vmem:[%s3008_s3 + $0x4] sm:$0xf]  ;;  %vm645_vm3 = vcmask 1031168   ;;  %v2294_v52 = vld [vmem:[%s3007_s2 + $0x8] sm:$0xf]  ;;  %vm774_vm4 = vcmask 900096  }
   0xe   : > { %s369_s18 = scalar_lea.vmem %s3005_s0, %s2490_s15  ;;  %s374_s21 = scalar_lea.vmem %s3006_s1, %s2490_s15  ;;  %vm903_vm5 = vcmask 891904   ;;  %vm1032_vm6 = vcmask 883712   ;;  %vm1161_vm7 = vcmask 752640   ;;  %vm1290_vm8 = vcmask 744448  }
   0xf   : > { %v384_v0 = vld [vmem:[%s369_s18 + $0x8] sm:$0xf]  ;;  %v383_v1 = vld [vmem:[%s369_s18] sm:$0xff]  ;;  %vm1419_vm9 = vcmask 736256   ;;  %vm1587_vm10 = vcmask 1043608   ;;  %vm1588_vm11 = vcmask 1047556  }
  0x10   : > { %v453_v2 = vunpack.c.l.b16 %v384_v0  ;;  %v451_v3 = vunpack.c.l.b16 %v383_v1  ;;  %v386_v4 = vld [vmem:[%s374_s21] sm:$0xff]  ;;  %v387_v8 = vld [vmem:[%s374_s21 + $0x8] sm:$0xf]  ;;  %v452_v11 = vunpack.c.h.b16 %v383_v1  ;;  %vm1582_vm12 = vcmask 154624   ;;  %vm2841_vm13 = vmor %vm1588_vm11, %vm1587_vm10 }
  0x11   : > { %v391_v5 = vunpack.c.h.b16 %v386_v4  ;;  %v390_v10 = vunpack.c.l.b16 %v386_v4  ;;  %v392_v12 = vunpack.c.l.b16 %v387_v8  ;;  %vm1591_vm14 = vcmask 396288  }
  0x12   : > { %v2500_v6 = vpack.c.b16 %v453_v2, %v453_v2  ;;  %v2502_v7 = vpack.c.b16 %v451_v3, %v451_v3  ;;  %v2514_v14 = vpack.c.b16 %v452_v11, %v452_v11  ;;  %v2298_v3 = vld [vmem:[%s3008_s3 + $0x8] sm:$0xf] }
  0x13   : > { %v2504_v9 = vpack.c.b16 %v391_v5, %v391_v5  ;;  %v2512_v13 = vpack.c.b16 %v390_v10, %v390_v10  ;;  %v2516_v15 = vpack.c.b16 %v392_v12, %v392_v12 }
  0x14   : > { %514 = vrot.lane.b32.xlu1 %v2500_v6, %s2417_s22  ;;  %510 = vrot.lane.b32.xlu0 %v2502_v7, %s2417_s22  ;;  %v464_v20 = vsel %vm400_vm0, %v2514_v14, 0  ;;  %v461_v21 = vsel %vm400_vm0, %v2502_v7, 0  ;;  %v467_v22 = vsel %vm400_vm0, %v2500_v6, 0 }
  0x15   : > { %577 = vrot.lane.b32.xlu2 %v2504_v9, %s2417_s22  ;;  %v402_v16 = vsel %vm400_vm0, %v2512_v13, 0  ;;  %v405_v17 = vsel %vm400_vm0, %v2504_v9, 0  ;;  %v408_v19 = vsel %vm400_vm0, %v2516_v15, 0  ;;  %476 = vmatpush.bf16.msra.mxu3 %v461_v21 }
  0x16   : > { %417 = vmatpush.bf16.msra.mxu0 %v402_v16  ;;  %430 = vmatpush.bf16.msra.mxu1 %v405_v17 }
  0x17   : > { %443 = vmatpush.bf16.msra.mxu2 %v408_v19  ;;  %v2302_v19 = vld [vmem:[%s3007_s2 + $0xc] sm:$0xf] }
  0x18   : > { %2283 = vmatmul.msk.bf16.vlgmr.msra.gmra.mxu3 %vm396_vm1, %v382_v23 }
  0x19   : > { %2280 = vmatmul.msk.bf16.vlgmr.msra.gmra.mxu0 %vm396_vm1, %v385_v18  ;;  %2281 = vmatmul.msk.bf16.vlgmr.msra.gmra.mxu1 %vm396_vm1, %v385_v18 }
  0x1a   : > { %489 = vmatpush.bf16.msrb.mxu0 %v464_v20  ;;  %2282 = vmatmul.msk.bf16.vlgmr.msra.gmra.mxu2 %vm396_vm1, %v385_v18 }
  0x1b   : > { %502 = vmatpush.bf16.msrb.mxu1 %v467_v22 }
  0x1c   : > { %575 = vrot.lane.b32.xlu1 %v2512_v13, %s2417_s22  ;;  %512 = vrot.lane.b32.xlu0 %v2514_v14, %s2417_s22 }
  0x1d   : > { %579 = vrot.lane.b32.xlu2 %v2516_v15, %s2417_s22 }
  0x24   : > { %641 = vrot.lane.b32.xlu1 %v2514_v14, %s2418_s23  ;;  %639 = vrot.lane.b32.xlu0 %v2502_v7, %s2418_s23 }
  0x25   : > { %643 = vrot.lane.b32.xlu2 %v2500_v6, %s2418_s23 }
  0x29   : > { %2284 = vmatmul.msk.bf16.vlgmr.msrb.gmra.mxu0 %vm396_vm1, %v382_v23  ;;  %2285 = vmatmul.msk.bf16.vlgmr.msrb.gmra.mxu1 %vm396_vm1, %v382_v23 }
  0x2c   : > { %706 = vrot.lane.b32.xlu1 %v2504_v9, %s2418_s23  ;;  %704 = vrot.lane.b32.xlu0 %v2512_v13, %s2418_s23 }
  0x2d   : > { %708 = vrot.lane.b32.xlu2 %v2516_v15, %s2418_s23 }
  0x34   : > { %770 = vrot.lane.b32.xlu1 %v2514_v14, %s2419_s26  ;;  %768 = vrot.lane.b32.xlu0 %v2502_v7, %s2419_s26 }
  0x35   : > { %772 = vrot.lane.b32.xlu2 %v2500_v6, %s2419_s26 }
  0x3c   : > { %835 = vrot.lane.b32.xlu1 %v2504_v9, %s2419_s26  ;;  %833 = vrot.lane.b32.xlu0 %v2512_v13, %s2419_s26 }
  0x3d   : > { %837 = vrot.lane.b32.xlu2 %v2516_v15, %s2419_s26 }
  0x44   : > { %899 = vrot.lane.b32.xlu1 %v2514_v14, %s2420_s29  ;;  %897 = vrot.lane.b32.xlu0 %v2502_v7, %s2420_s29 }
  0x45   : > { %901 = vrot.lane.b32.xlu2 %v2500_v6, %s2420_s29 }
  0x4c   : > { %964 = vrot.lane.b32.xlu1 %v2504_v9, %s2420_s29  ;;  %962 = vrot.lane.b32.xlu0 %v2512_v13, %s2420_s29 }
  0x4d   : > { %966 = vrot.lane.b32.xlu2 %v2516_v15, %s2420_s29 }
  0x54   : > { %1028 = vrot.lane.b32.xlu1 %v2514_v14, %s2421_s30  ;;  %1026 = vrot.lane.b32.xlu0 %v2502_v7, %s2421_s30 }
  0x55   : > { %1030 = vrot.lane.b32.xlu2 %v2500_v6, %s2421_s30 }
  0x5c   : > { %1093 = vrot.lane.b32.xlu1 %v2504_v9, %s2421_s30  ;;  %1091 = vrot.lane.b32.xlu0 %v2512_v13, %s2421_s30 }
  0x5d   : > { %1095 = vrot.lane.b32.xlu2 %v2516_v15, %s2421_s30 }
  0x64   : > { %1157 = vrot.lane.b32.xlu1 %v2514_v14, %s2422_s11  ;;  %1155 = vrot.lane.b32.xlu0 %v2502_v7, %s2422_s11 }
  0x65   : > { %1159 = vrot.lane.b32.xlu2 %v2500_v6, %s2422_s11 }
  0x6c   : > { %1222 = vrot.lane.b32.xlu1 %v2504_v9, %s2422_s11  ;;  %1220 = vrot.lane.b32.xlu0 %v2512_v13, %s2422_s11 }
  0x6d   : > { %1224 = vrot.lane.b32.xlu2 %v2516_v15, %s2422_s11 }
  0x6f   : > { %v578_v24 = vpop.permute.xlu2 %577 }
  0x74   : > { %1286 = vrot.lane.b32.xlu1 %v2514_v14, %s2423_s12  ;;  %1284 = vrot.lane.b32.xlu0 %v2502_v7, %s2423_s12 }
  0x75   : > { %1288 = vrot.lane.b32.xlu2 %v2500_v6, %s2423_s12 }
  0x77   : > { %v580_v25 = vpop.permute.xlu2 %579 }
  0x78   : > { %v582_v30 = vsel %vm516_vm2, %v578_v24, %v580_v25  ;;  %v593_v41 = vsel %vm400_vm0, %v580_v25, 0 }
  0x79   : > { %v590_v37 = vsel %vm400_vm0, %v582_v30, 0 }
  0x7c   : > { %1351 = vrot.lane.b32.xlu1 %v2504_v9, %s2423_s12  ;;  %1349 = vrot.lane.b32.xlu0 %v2512_v13, %s2423_s12 }
  0x7d   : > { %1353 = vrot.lane.b32.xlu2 %v2516_v15, %s2423_s12 }
  0x7f   : > { %v644_v31 = vpop.permute.xlu2 %643 }
  0x80   : > { %v658_v43 = vsel %vm400_vm0, %v644_v31, 0 }
  0x84   : > { %1415 = vrot.lane.b32.xlu1 %v2514_v14, %s2424_s14  ;;  %1413 = vrot.lane.b32.xlu0 %v2502_v7, %s2424_s14 }
  0x85   : > { %1417 = vrot.lane.b32.xlu2 %v2500_v6, %s2424_s14 }
  0x86   : > { %v515_v26 = vpop.permute.xlu1 %514  ;;  %v511_v27 = vpop.permute.xlu0 %510 }
  0x87   : > { %v529_v28 = vsel %vm400_vm0, %v515_v26, 0  ;;  %v709_v44 = vpop.permute.xlu2 %708 }
  0x88   : > { %564 = vmatpush.bf16.msra.mxu0 %v529_v28  ;;  %v722_v49 = vsel %vm400_vm0, %v709_v44, 0 }
  0x8b   : > { %2289 = vmatmul.msk.bf16.vlgmr.msra.gmra.mxu0 %vm396_vm1, %v2286_v29 }
  0x8c   : > { %1480 = vrot.lane.b32.xlu1 %v2504_v9, %s2424_s14  ;;  %1478 = vrot.lane.b32.xlu0 %v2512_v13, %s2424_s14 }
  0x8d   : > { %1482 = vrot.lane.b32.xlu2 %v2516_v15, %s2424_s14 }
  0x8e   : > { %v576_v32 = vpop.permute.xlu1 %575  ;;  %v513_v33 = vpop.permute.xlu0 %512 }
  0x8f   : > { %v581_v34 = vsel %vm516_vm2, %v576_v32, %v578_v24  ;;  %v517_v35 = vsel %vm516_vm2, %v511_v27, %v513_v33  ;;  %v518_v36 = vsel %vm516_vm2, %v513_v33, %v515_v26  ;;  %v773_v53 = vpop.permute.xlu2 %772  ;;  %v2306_v26 = vld [vmem:[%s3008_s3 + $0xc] sm:$0xf] }
  0x90   : > { %v587_v38 = vsel %vm400_vm0, %v581_v34, 0  ;;  %v523_v39 = vsel %vm400_vm0, %v517_v35, 0  ;;  %v526_v40 = vsel %vm400_vm0, %v518_v36, 0  ;;  %v787_v58 = vsel %vm400_vm0, %v773_v53, 0  ;;  %v2310_v34 = vld [vmem:[%s3007_s2 + $0x10] sm:$0xf] }
  0x91   : > { %538 = vmatpush.bf16.msrb.mxu2 %v523_v39  ;;  %551 = vmatpush.bf16.msrb.mxu3 %v526_v40 }
  0x92   : > { %602 = vmatpush.bf16.msra.mxu1 %v587_v38 }
  0x94   : > { %2287 = vmatmul.msk.bf16.vlgmr.msrb.gmra.mxu2 %vm396_vm1, %v2286_v29  ;;  %2288 = vmatmul.msk.bf16.vlgmr.msrb.gmra.mxu3 %vm396_vm1, %v2286_v29 }
  0x95   : > { %615 = vmatpush.bf16.msra.mxu2 %v590_v37  ;;  %628 = vmatpush.bf16.msra.mxu3 %v593_v41 }
  0x96   : > { %2291 = vmatmul.msk.bf16.vlgmr.msra.gmra.mxu1 %vm396_vm1, %v2290_v42  ;;  %v642_v45 = vpop.permute.xlu1 %641  ;;  %v640_v46 = vpop.permute.xlu0 %639 }
  0x97   : > { %v646_v47 = vsel %vm645_vm3, %v640_v46, %v642_v45  ;;  %v647_v48 = vsel %vm645_vm3, %v642_v45, %v644_v31  ;;  %v838_v4 = vpop.permute.xlu2 %837  ;;  %v419_v30 = vpop.f32.mrf.mxu0 }
  0x98   : > { %v652_v50 = vsel %vm400_vm0, %v646_v47, 0  ;;  %v655_v51 = vsel %vm400_vm0, %v647_v48, 0  ;;  %v851_v11 = vsel %vm400_vm0, %v838_v4, 0  ;;  %v432_v36 = vpop.f32.mrf.mxu1 }
  0x99   : > { %693 = vmatpush.bf16.msrb.mxu2 %v658_v43  ;;  %667 = vmatpush.bf16.msrb.mxu0 %v652_v50 }
  0x9a   : > { %680 = vmatpush.bf16.msrb.mxu1 %v655_v51 }
  0x9c   : > { %2295 = vmatmul.msk.bf16.vlgmr.msrb.gmra.mxu0 %vm396_vm1, %v2294_v52 }
  0x9e   : > { %757 = vmatpush.bf16.msra.mxu1 %v722_v49  ;;  %v707_v54 = vpop.permute.xlu1 %706  ;;  %v705_v55 = vpop.permute.xlu0 %704 }
  0x9f   : > { %v711_v56 = vsel %vm645_vm3, %v707_v54, %v709_v44  ;;  %v710_v57 = vsel %vm645_vm3, %v705_v55, %v707_v54  ;;  %v902_v12 = vpop.permute.xlu2 %901  ;;  %v421_v37 = vpop.f32.mrf.mxu0 }
  0xa0   : > { %v719_v59 = vsel %vm400_vm0, %v711_v56, 0  ;;  %v716_v60 = vsel %vm400_vm0, %v710_v57, 0  ;;  %v916_v27 = vsel %vm400_vm0, %v902_v12, 0  ;;  %v434_v46 = vpop.f32.mrf.mxu1  ;;  %v445_v55 = vpop.f32.mrf.mxu2 }
  0xa1   : > { %744 = vmatpush.bf16.msra.mxu0 %v719_v59  ;;  %731 = vmatpush.bf16.msrb.mxu3 %v716_v60 }
  0xa4   : > { %2292 = vmatmul.msk.bf16.vlgmr.msra.gmra.mxu2 %vm396_vm1, %v2290_v42  ;;  %2293 = vmatmul.msk.bf16.vlgmr.msra.gmra.mxu3 %vm396_vm1, %v2290_v42 }
  0xa5   : > { %822 = vmatpush.bf16.msrb.mxu0 %v787_v58 }
  0xa6   : > { %2296 = vmatmul.msk.bf16.vlgmr.msrb.gmra.mxu1 %vm396_vm1, %v2294_v52  ;;  %v771_v61 = vpop.permute.xlu1 %770  ;;  %v769_v62 = vpop.permute.xlu0 %768 }
  0xa7   : > { %v775_v63 = vsel %vm774_vm4, %v769_v62, %v771_v61  ;;  %v776_v0 = vsel %vm774_vm4, %v771_v61, %v773_v53  ;;  %v967_v20 = vpop.permute.xlu2 %966  ;;  %v491_v48 = vpop.f32.mrf.mxu0  ;;  %v2314_v53 = vld [vmem:[%s3008_s3 + $0x10] sm:$0xf] }
  0xa8   : > { %v781_v1 = vsel %vm400_vm0, %v775_v63, 0  ;;  %v784_v2 = vsel %vm400_vm0, %v776_v0, 0  ;;  %v980_v28 = vsel %vm400_vm0, %v967_v20, 0  ;;  %v2720_v51 = vadd.f32 %v491_v48, %v432_v36  ;;  %v504_v56 = vpop.f32.mrf.mxu1 }
  0xa9   : > { %796 = vmatpush.bf16.msra.mxu2 %v781_v1  ;;  %809 = vmatpush.bf16.msra.mxu3 %v784_v2  ;;  %v505_v59 = vadd.f32 %v504_v56, %v445_v55  ;;  %v447_v1 = vpop.f32.mrf.mxu2 }
  0xaa   : > { %v2338_v1 = vld [vmem:[%s3008_s3 + $0x1c] sm:$0xf] }
  0xac   : > { %2300 = vmatmul.msk.bf16.vlgmr.msra.gmra.mxu0 %vm396_vm1, %v2298_v3 }
  0xae   : > { %v836_v5 = vpop.permute.xlu1 %835  ;;  %v834_v6 = vpop.permute.xlu0 %833 }
  0xaf   : > { %v839_v7 = vsel %vm774_vm4, %v834_v6, %v836_v5  ;;  %v840_v8 = vsel %vm774_vm4, %v836_v5, %v838_v4  ;;  %v1031_v33 = vpop.permute.xlu2 %1030  ;;  %v493_v58 = vpop.f32.mrf.mxu0 }
  0xb0   : > { %v845_v9 = vsel %vm400_vm0, %v839_v7, 0  ;;  %v848_v10 = vsel %vm400_vm0, %v840_v8, 0  ;;  %v1045_v35 = vsel %vm400_vm0, %v1031_v33, 0  ;;  %v506_v2 = vpop.f32.mrf.mxu1  ;;  %v2318_v8 = vld [vmem:[%s3007_s2 + $0x14] sm:$0xf] }
  0xb1   : > { %860 = vmatpush.bf16.msrb.mxu1 %v845_v9 }
  0xb4   : > { %2297 = vmatmul.msk.bf16.vlgmr.msrb.gmra.mxu2 %vm396_vm1, %v2294_v52  ;;  %2299 = vmatmul.msk.bf16.vlgmr.msrb.gmra.mxu3 %vm396_vm1, %v2298_v3 }
  0xb5   : > { %873 = vmatpush.bf16.msrb.mxu2 %v848_v10  ;;  %886 = vmatpush.bf16.msrb.mxu3 %v851_v11 }
  0xb6   : > { %2301 = vmatmul.msk.bf16.vlgmr.msra.gmra.mxu1 %vm396_vm1, %v2298_v3  ;;  %v900_v13 = vpop.permute.xlu1 %899  ;;  %v898_v14 = vpop.permute.xlu0 %897 }
  0xb7   : > { %v904_v15 = vsel %vm903_vm5, %v898_v14, %v900_v13  ;;  %v905_v16 = vsel %vm903_vm5, %v900_v13, %v902_v12  ;;  %v1096_v47 = vpop.permute.xlu2 %1095  ;;  %v478_v3 = vpop.f32.mrf.mxu3  ;;  %v2322_v13 = vld [vmem:[%s3008_s3 + $0x14] sm:$0xf] }
  0xb8   : > { %v910_v17 = vsel %vm400_vm0, %v904_v15, 0  ;;  %v913_v18 = vsel %vm400_vm0, %v905_v16, 0  ;;  %v1109_v63 = vsel %vm400_vm0, %v1096_v47, 0  ;;  %v2736_v5 = vadd.f32 %v478_v3, %v419_v30 }
  0xb9   : > { %925 = vmatpush.bf16.msra.mxu0 %v910_v17  ;;  %938 = vmatpush.bf16.msra.mxu1 %v913_v18 }
  0xbc   : > { %2305 = vmatmul.msk.bf16.vlgmr.msrb.gmra.mxu0 %vm396_vm1, %v2302_v19 }
  0xbe   : > { %v965_v21 = vpop.permute.xlu1 %964  ;;  %v963_v22 = vpop.permute.xlu0 %962 }
  0xbf   : > { %v969_v23 = vsel %vm903_vm5, %v965_v21, %v967_v20  ;;  %v968_v25 = vsel %vm903_vm5, %v963_v22, %v965_v21  ;;  %v1160_v57 = vpop.permute.xlu2 %1159  ;;  %v480_v11 = vpop.f32.mrf.mxu3  ;;  %v2326_v20 = vld [vmem:[%s3007_s2 + $0x18] sm:$0xf] }
  0xc0   : > { %v977_v24 = vsel %vm400_vm0, %v969_v23, 0  ;;  %v974_v29 = vsel %vm400_vm0, %v968_v25, 0  ;;  %v1174_v14 = vsel %vm400_vm0, %v1160_v57, 0 }
  0xc1   : > { %1002 = vmatpush.bf16.msrb.mxu0 %v977_v24 }
  0xc4   : > { %2303 = vmatmul.msk.bf16.vlgmr.msra.gmra.mxu2 %vm396_vm1, %v2302_v19  ;;  %2304 = vmatmul.msk.bf16.vlgmr.msra.gmra.mxu3 %vm396_vm1, %v2302_v19 }
  0xc5   : > { %951 = vmatpush.bf16.msra.mxu2 %v916_v27  ;;  %989 = vmatpush.bf16.msra.mxu3 %v974_v29 }
  0xc6   : > { %2307 = vmatmul.msk.bf16.vlgmr.msrb.gmra.mxu1 %vm396_vm1, %v2306_v26  ;;  %v1029_v31 = vpop.permute.xlu1 %1028  ;;  %v1027_v32 = vpop.permute.xlu0 %1026 }
  0xc7   : > { %1015 = vmatpush.bf16.msrb.mxu1 %v980_v28  ;;  %v1033_v40 = vsel %vm1032_vm6, %v1027_v32, %v1029_v31  ;;  %v1034_v41 = vsel %vm1032_vm6, %v1029_v31, %v1031_v33  ;;  %v1225_v4 = vpop.permute.xlu2 %1224 }
  0xc8   : > { %v1039_v43 = vsel %vm400_vm0, %v1033_v40, 0  ;;  %v1042_v44 = vsel %vm400_vm0, %v1034_v41, 0  ;;  %v1238_v15 = vsel %vm400_vm0, %v1225_v4, 0 }
  0xcc   : > { %2311 = vmatmul.msk.bf16.vlgmr.msra.gmra.mxu0 %vm396_vm1, %v2310_v34 }
  0xcd   : > { %1080 = vmatpush.bf16.msra.mxu0 %v1045_v35 }
  0xce   : > { %v1094_v38 = vpop.permute.xlu1 %1093  ;;  %v1092_v39 = vpop.permute.xlu0 %1091 }
  0xcf   : > { %v1097_v42 = vsel %vm1032_vm6, %v1092_v39, %v1094_v38  ;;  %v1098_v60 = vsel %vm1032_vm6, %v1094_v38, %v1096_v47  ;;  %v1289_v19 = vpop.permute.xlu2 %1288 }
  0xd0   : > { %v1103_v45 = vsel %vm400_vm0, %v1097_v42, 0  ;;  %v1106_v62 = vsel %vm400_vm0, %v1098_v60, 0  ;;  %v1303_v21 = vsel %vm400_vm0, %v1289_v19, 0 }
  0xd4   : > { %2308 = vmatmul.msk.bf16.vlgmr.msrb.gmra.mxu2 %vm396_vm1, %v2306_v26  ;;  %2309 = vmatmul.msk.bf16.vlgmr.msrb.gmra.mxu3 %vm396_vm1, %v2306_v26 }
  0xd5   : > { %1054 = vmatpush.bf16.msrb.mxu2 %v1039_v43  ;;  %1067 = vmatpush.bf16.msrb.mxu3 %v1042_v44 }
  0xd6   : > { %2312 = vmatmul.msk.bf16.vlgmr.msra.gmra.mxu1 %vm396_vm1, %v2310_v34  ;;  %v1158_v49 = vpop.permute.xlu1 %1157  ;;  %v1156_v50 = vpop.permute.xlu0 %1155 }
  0xd7   : > { %1118 = vmatpush.bf16.msra.mxu1 %v1103_v45  ;;  %v1162_v52 = vsel %vm1161_vm7, %v1156_v50, %v1158_v49  ;;  %v1163_v61 = vsel %vm1161_vm7, %v1158_v49, %v1160_v57  ;;  %v1354_v30 = vpop.permute.xlu2 %1353 }
  0xd8   : > { %v1168_v54 = vsel %vm400_vm0, %v1162_v52, 0  ;;  %v1171_v0 = vsel %vm400_vm0, %v1163_v61, 0  ;;  %v1367_v44 = vsel %vm400_vm0, %v1354_v30, 0 }
  0xdc   : > { %2316 = vmatmul.msk.bf16.vlgmr.msrb.gmra.mxu0 %vm396_vm1, %v2314_v53 }
  0xdd   : > { %1183 = vmatpush.bf16.msrb.mxu0 %v1168_v54  ;;  %v2334_v54 = vld [vmem:[%s3007_s2 + $0x1c] sm:$0xf] }
  0xde   : > { %v1223_v6 = vpop.permute.xlu1 %1222  ;;  %v1221_v10 = vpop.permute.xlu0 %1220 }
  0xdf   : > { %v1227_v7 = vsel %vm1161_vm7, %v1223_v6, %v1225_v4  ;;  %v1226_v12 = vsel %vm1161_vm7, %v1221_v10, %v1223_v6  ;;  %v1418_v38 = vpop.permute.xlu2 %1417  ;;  %v2342_v10 = vld [vmem:[%s3007_s2 + $0x20] sm:$0xf] }
  0xe0   : > { %v1235_v9 = vsel %vm400_vm0, %v1227_v7, 0  ;;  %v1232_v16 = vsel %vm400_vm0, %v1226_v12, 0  ;;  %v1432_v2 = vsel %vm400_vm0, %v1418_v38, 0 }
  0xe4   : > { %2313 = vmatmul.msk.bf16.vlgmr.msra.gmra.mxu2 %vm396_vm1, %v2310_v34  ;;  %2315 = vmatmul.msk.bf16.vlgmr.msra.gmra.mxu3 %vm396_vm1, %v2314_v53  ;;  %v2330_v34 = vld [vmem:[%s3008_s3 + $0x18] sm:$0xf] }
  0xe5   : > { %1131 = vmatpush.bf16.msra.mxu2 %v1106_v62  ;;  %1144 = vmatpush.bf16.msra.mxu3 %v1109_v63 }
  0xe6   : > { %2317 = vmatmul.msk.bf16.vlgmr.msrb.gmra.mxu1 %vm396_vm1, %v2314_v53  ;;  %v1287_v17 = vpop.permute.xlu1 %1286  ;;  %v1285_v18 = vpop.permute.xlu0 %1284 }
  0xe7   : > { %1196 = vmatpush.bf16.msrb.mxu1 %v1171_v0  ;;  %v1291_v24 = vsel %vm1290_vm8, %v1285_v18, %v1287_v17  ;;  %v1292_v25 = vsel %vm1290_vm8, %v1287_v17, %v1289_v19  ;;  %v1483_v50 = vpop.permute.xlu2 %1482 }
  0xe8   : > { %v1297_v27 = vsel %vm400_vm0, %v1291_v24, 0  ;;  %v1300_v28 = vsel %vm400_vm0, %v1292_v25, 0  ;;  %v1496_v3 = vsel %vm400_vm0, %v1483_v50, 0 }
  0xec   : > { %2321 = vmatmul.msk.bf16.vlgmr.msra.gmra.mxu0 %vm396_vm1, %v2318_v8 }
  0xed   : > { %1260 = vmatpush.bf16.msra.mxu0 %v1235_v9 }
  0xee   : > { %v1352_v22 = vpop.permute.xlu1 %1351  ;;  %v1350_v23 = vpop.permute.xlu0 %1349 }
  0xef   : > { %v1355_v26 = vsel %vm1290_vm8, %v1350_v23, %v1352_v22  ;;  %v1356_v39 = vsel %vm1290_vm8, %v1352_v22, %v1354_v30 }
  0xf0   : > { %v1361_v29 = vsel %vm400_vm0, %v1355_v26, 0  ;;  %v1364_v43 = vsel %vm400_vm0, %v1356_v39, 0  ;;  %v2346_v26 = vld [vmem:[%s3008_s3 + $0x20] sm:$0xf] }
  0xf4   : > { %2319 = vmatmul.msk.bf16.vlgmr.msrb.gmra.mxu2 %vm396_vm1, %v2318_v8  ;;  %2320 = vmatmul.msk.bf16.vlgmr.msrb.gmra.mxu3 %vm396_vm1, %v2318_v8 }
  0xf5   : > { %1209 = vmatpush.bf16.msrb.mxu2 %v1174_v14  ;;  %1247 = vmatpush.bf16.msrb.mxu3 %v1232_v16  ;;  %v2425_v14 = vmov 0   ;;  %v1549_v16 = vld [vmem:[%s3010_s5] sm:$0xff] }
  0xf6   : > { %2323 = vmatmul.msk.bf16.vlgmr.msra.gmra.mxu1 %vm396_vm1, %v2322_v13  ;;  %v1416_v32 = vpop.permute.xlu1 %1415  ;;  %v1414_v35 = vpop.permute.xlu0 %1413  ;;  %2406 = vset.pattern.permute.xlu0 %v2425_v14  ;;  %1571 = vst [vmem:[#allocation2] sm:$0xff] %v2425_v14 }
  0xf7   : > { %1273 = vmatpush.bf16.msra.mxu1 %v1238_v15  ;;  %v1420_v36 = vsel %vm1419_vm9, %v1414_v35, %v1416_v32  ;;  %v1421_v41 = vsel %vm1419_vm9, %v1416_v32, %v1418_v38  ;;  %2407 = vset.pattern.permute.xlu1 %v2425_v14  ;;  %1572 = vst [vmem:[#allocation2 + $0x8] sm:$0xf] %v2425_v14 }
  0xf8   : > { %v1426_v37 = vsel %vm400_vm0, %v1420_v36, 0  ;;  %v1429_v45 = vsel %vm400_vm0, %v1421_v41, 0  ;;  %1552 = vperm.xlu1 %2407, %v1549_v16   ;;  %2408 = vset.pattern.permute.xlu2 %v2425_v14 }
  0xfc   : > { %2327 = vmatmul.msk.bf16.vlgmr.msrb.gmra.mxu0 %vm396_vm1, %v2326_v20 }
  0xfd   : > { %1338 = vmatpush.bf16.msrb.mxu0 %v1303_v21 }
  0xfe   : > { %v1481_v52 = vpop.permute.xlu1 %1480  ;;  %v1479_v60 = vpop.permute.xlu0 %1478 }
  0xff   : > { %v1485_v55 = vsel %vm1419_vm9, %v1481_v52, %v1483_v50  ;;  %v1484_v62 = vsel %vm1419_vm9, %v1479_v60, %v1481_v52 }
 0x100   : > { %v1493_v58 = vsel %vm400_vm0, %v1485_v55, 0  ;;  %v1490_v4 = vsel %vm400_vm0, %v1484_v62, 0 }
 0x104   : > { %2324 = vmatmul.msk.bf16.vlgmr.msra.gmra.mxu2 %vm396_vm1, %v2322_v13  ;;  %2325 = vmatmul.msk.bf16.vlgmr.msra.gmra.mxu3 %vm396_vm1, %v2322_v13  ;;  %v1540_v13 = vld [vmem:[%s3009_s4] sm:$0xff] }
 0x105   : > { %1312 = vmatpush.bf16.msra.mxu2 %v1297_v27  ;;  %1325 = vmatpush.bf16.msra.mxu3 %v1300_v28 }
 0x106   : > { %2328 = vmatmul.msk.bf16.vlgmr.msrb.gmra.mxu1 %vm396_vm1, %v2326_v20  ;;  %1543 = vperm.xlu0 %2406, %v1540_v13  }
 0x107   : > { %1376 = vmatpush.bf16.msrb.mxu1 %v1361_v29 }
 0x108   : > { %v566_v31 = vpop.f32.mrf.mxu0 }
 0x109   : > { %v572_v33 = vadd.f32 %v566_v31, %v505_v59 }
 0x10c   : > { %2332 = vmatmul.msk.bf16.vlgmr.msra.gmra.mxu0 %vm396_vm1, %v2330_v34 }
 0x10d   : > { %1441 = vmatpush.bf16.msra.mxu0 %v1426_v37 }
 0x110   : > { %v568_v40 = vpop.f32.mrf.mxu0 }
 0x113   : > { %v604_v42 = vpop.f32.mrf.mxu1 }
 0x114   : > { %2329 = vmatmul.msk.bf16.vlgmr.msrb.gmra.mxu2 %vm396_vm1, %v2326_v20  ;;  %2331 = vmatmul.msk.bf16.vlgmr.msrb.gmra.mxu3 %vm396_vm1, %v2330_v34 }
 0x115   : > { %1389 = vmatpush.bf16.msrb.mxu2 %v1364_v43  ;;  %1402 = vmatpush.bf16.msrb.mxu3 %v1367_v44 }
 0x116   : > { %2333 = vmatmul.msk.bf16.vlgmr.msra.gmra.mxu1 %vm396_vm1, %v2330_v34 }
 0x117   : > { %1454 = vmatpush.bf16.msra.mxu1 %v1429_v45  ;;  %v540_v46 = vpop.f32.mrf.mxu2  ;;  %v553_v47 = vpop.f32.mrf.mxu3 }
 0x118   : > { %v570_v48 = vadd.f32 %v540_v46, %v2736_v5  ;;  %v571_v49 = vadd.f32 %v553_v47, %v2720_v51 }
 0x119   : > { %v669_v53 = vpop.f32.mrf.mxu0 }
 0x11a   : > { %v634_v57 = vadd.f32 %v604_v42, %v570_v48 }
 0x11b   : > { %v606_v56 = vpop.f32.mrf.mxu1 }
 0x11c   : > { %v699_v59 = vadd.f32 %v669_v53, %v634_v57  ;;  %2337 = vmatmul.msk.bf16.vlgmr.msrb.gmra.mxu0 %vm396_vm1, %v2334_v54 }
 0x11d   : > { %1518 = vmatpush.bf16.msrb.mxu0 %v1493_v58 }
 0x11f   : > { %v542_v61 = vpop.f32.mrf.mxu2  ;;  %v555_v51 = vpop.f32.mrf.mxu3 }
 0x121   : > { %v671_v63 = vpop.f32.mrf.mxu0 }
 0x123   : > { %v682_v0 = vpop.f32.mrf.mxu1 }
 0x124   : > { %2335 = vmatmul.msk.bf16.vlgmr.msra.gmra.mxu2 %vm396_vm1, %v2334_v54  ;;  %2336 = vmatmul.msk.bf16.vlgmr.msra.gmra.mxu3 %vm396_vm1, %v2334_v54 }
 0x125   : > { %1467 = vmatpush.bf16.msra.mxu2 %v1432_v2  ;;  %1505 = vmatpush.bf16.msra.mxu3 %v1490_v4 }
 0x126   : > { %2339 = vmatmul.msk.bf16.vlgmr.msrb.gmra.mxu1 %vm396_vm1, %v2338_v1 }
 0x127   : > { %1531 = vmatpush.bf16.msrb.mxu1 %v1496_v3  ;;  %v617_v5 = vpop.f32.mrf.mxu2  ;;  %v630_v6 = vpop.f32.mrf.mxu3 }
 0x128   : > { %v635_v7 = vadd.f32 %v617_v5, %v571_v49  ;;  %v636_v8 = vadd.f32 %v630_v6, %v572_v33 }
 0x129   : > { %v746_v9 = vpop.f32.mrf.mxu0 }
 0x12a   : > { %v700_v12 = vadd.f32 %v682_v0, %v635_v7 }
 0x12b   : > { %v684_v11 = vpop.f32.mrf.mxu1 }
 0x12c   : > { %v764_v15 = vadd.f32 %v746_v9, %v700_v12  ;;  %2343 = vmatmul.msk.bf16.vlgmr.msra.gmra.mxu0 %vm396_vm1, %v2342_v10 }
 0x12f   : > { %v619_v17 = vpop.f32.mrf.mxu2  ;;  %v632_v18 = vpop.f32.mrf.mxu3 }
 0x131   : > { %v748_v19 = vpop.f32.mrf.mxu0 }
 0x133   : > { %v759_v20 = vpop.f32.mrf.mxu1 }
 0x134   : > { %2340 = vmatmul.msk.bf16.vlgmr.msrb.gmra.mxu2 %vm396_vm1, %v2338_v1  ;;  %2341 = vmatmul.msk.bf16.vlgmr.msrb.gmra.mxu3 %vm396_vm1, %v2338_v1 }
 0x136   : > { %2344 = vmatmul.msk.bf16.vlgmr.msra.gmra.mxu1 %vm396_vm1, %v2342_v10 }
 0x137   : > { %v695_v21 = vpop.f32.mrf.mxu2  ;;  %v733_v22 = vpop.f32.mrf.mxu3 }
 0x138   : > { %v701_v23 = vadd.f32 %v695_v21, %v636_v8  ;;  %v763_v24 = vadd.f32 %v733_v22, %v699_v59 }
 0x139   : > { %v824_v25 = vpop.f32.mrf.mxu0 }
 0x13a   : > { %v765_v28 = vadd.f32 %v759_v20, %v701_v23 }
 0x13b   : > { %v761_v27 = vpop.f32.mrf.mxu1 }
 0x13c   : > { %v830_v29 = vadd.f32 %v824_v25, %v765_v28  ;;  %2348 = vmatmul.msk.bf16.vlgmr.msrb.gmra.mxu0 %vm396_vm1, %v2346_v26 }
 0x13f   : > { %v697_v30 = vpop.f32.mrf.mxu2  ;;  %v735_v31 = vpop.f32.mrf.mxu3 }
 0x141   : > { %v826_v32 = vpop.f32.mrf.mxu0 }
 0x143   : > { %v862_v33 = vpop.f32.mrf.mxu1 }
 0x144   : > { %2345 = vmatmul.msk.bf16.vlgmr.msra.gmra.mxu2 %vm396_vm1, %v2342_v10  ;;  %2347 = vmatmul.msk.bf16.vlgmr.msra.gmra.mxu3 %vm396_vm1, %v2346_v26 }
 0x146   : > { %2349 = vmatmul.msk.bf16.vlgmr.msrb.gmra.mxu1 %vm396_vm1, %v2346_v26 }
 0x147   : > { %v798_v34 = vpop.f32.mrf.mxu2  ;;  %v811_v35 = vpop.f32.mrf.mxu3 }
 0x148   : > { %v828_v36 = vadd.f32 %v798_v34, %v763_v24  ;;  %v829_v37 = vadd.f32 %v811_v35, %v764_v15 }
 0x149   : > { %v927_v38 = vpop.f32.mrf.mxu0 }
 0x14a   : > { %v892_v40 = vadd.f32 %v862_v33, %v828_v36 }
 0x14b   : > { %v864_v39 = vpop.f32.mrf.mxu1 }
 0x14c   : > { %v957_v41 = vadd.f32 %v927_v38, %v892_v40 }
 0x14f   : > { %v800_v42 = vpop.f32.mrf.mxu2  ;;  %v813_v43 = vpop.f32.mrf.mxu3 }
 0x151   : > { %v929_v44 = vpop.f32.mrf.mxu0 }
 0x153   : > { %v940_v45 = vpop.f32.mrf.mxu1 }
 0x157   : > { %v875_v46 = vpop.f32.mrf.mxu2  ;;  %v888_v47 = vpop.f32.mrf.mxu3 }
 0x158   : > { %v893_v48 = vadd.f32 %v875_v46, %v829_v37  ;;  %v894_v49 = vadd.f32 %v888_v47, %v830_v29 }
 0x159   : > { %v1004_v50 = vpop.f32.mrf.mxu0 }
 0x15a   : > { %v958_v53 = vadd.f32 %v940_v45, %v893_v48 }
 0x15b   : > { %v942_v52 = vpop.f32.mrf.mxu1 }
 0x15c   : > { %v1022_v54 = vadd.f32 %v1004_v50, %v958_v53 }
 0x15f   : > { %v877_v55 = vpop.f32.mrf.mxu2  ;;  %v890_v56 = vpop.f32.mrf.mxu3 }
 0x161   : > { %v1006_v57 = vpop.f32.mrf.mxu0 }
 0x163   : > { %v1017_v58 = vpop.f32.mrf.mxu1 }
 0x167   : > { %v953_v59 = vpop.f32.mrf.mxu2  ;;  %v991_v60 = vpop.f32.mrf.mxu3 }
 0x168   : > { %v959_v61 = vadd.f32 %v953_v59, %v894_v49  ;;  %v1021_v51 = vadd.f32 %v991_v60, %v957_v41 }
 0x169   : > { %v1082_v62 = vpop.f32.mrf.mxu0 }
 0x16a   : > { %v1023_v0 = vadd.f32 %v1017_v58, %v959_v61 }
 0x16b   : > { %v1019_v63 = vpop.f32.mrf.mxu1 }
 0x16c   : > { %v1088_v1 = vadd.f32 %v1082_v62, %v1023_v0 }
 0x16f   : > { %v955_v2 = vpop.f32.mrf.mxu2  ;;  %v993_v3 = vpop.f32.mrf.mxu3 }
 0x171   : > { %v1084_v4 = vpop.f32.mrf.mxu0 }
 0x172   : > { %v1553_v4 = vpop.permute.xlu1 %1552 }
 0x173   : > { %v1120_v5 = vpop.f32.mrf.mxu1 }
 0x177   : > { %v1056_v6 = vpop.f32.mrf.mxu2  ;;  %v1069_v7 = vpop.f32.mrf.mxu3 }
 0x178   : > { %v1086_v8 = vadd.f32 %v1056_v6, %v1021_v51  ;;  %v1087_v9 = vadd.f32 %v1069_v7, %v1022_v54  ;;  %v1544_v51 = vpop.permute.xlu0 %1543 }
 0x179   : > { %v1185_v10 = vpop.f32.mrf.mxu0 }
 0x17a   : > { %v1150_v12 = vadd.f32 %v1120_v5, %v1086_v8 }
 0x17b   : > { %v1122_v11 = vpop.f32.mrf.mxu1 }
 0x17c   : > { %v1215_v13 = vadd.f32 %v1185_v10, %v1150_v12  ;;  %v2828_v11 = vld [vmem:[%s3014_s9] sm:$0x7] }
 0x17f   : > { %v1058_v15 = vpop.f32.mrf.mxu2  ;;  %v1071_v16 = vpop.f32.mrf.mxu3 }
 0x180   : > { %v1563_v16 = vperm.slane %v2828_v11, 1 }
 0x181   : > { %v1187_v17 = vpop.f32.mrf.mxu0 }
 0x183   : > { %v1198_v18 = vpop.f32.mrf.mxu1 }
 0x187   : > { %v1133_v19 = vpop.f32.mrf.mxu2  ;;  %v1146_v20 = vpop.f32.mrf.mxu3 }
 0x188   : > { %v1151_v39 = vadd.f32 %v1133_v19, %v1087_v9  ;;  %v1152_v52 = vadd.f32 %v1146_v20, %v1088_v1  ;;  %v1562_v20 = vperm.slane %v2828_v11, 0 }
 0x189   : > { %v1262_v21 = vpop.f32.mrf.mxu0 }
 0x18a   : > { %v1216_v42 = vadd.f32 %v1198_v18, %v1151_v39 }
 0x18b   : > { %v1200_v22 = vpop.f32.mrf.mxu1 }
 0x18c   : > { %v1280_v45 = vadd.f32 %v1262_v21, %v1216_v42 }
 0x18f   : > { %v1135_v23 = vpop.f32.mrf.mxu2  ;;  %v1148_v24 = vpop.f32.mrf.mxu3 }
 0x190   : > { %v1564_v23 = vperm.slane %v2828_v11, 2 }
 0x191   : > { %v1264_v25 = vpop.f32.mrf.mxu0 }
 0x193   : > { %v1275_v26 = vpop.f32.mrf.mxu1 }
 0x197   : > { %v1211_v27 = vpop.f32.mrf.mxu2  ;;  %v1249_v28 = vpop.f32.mrf.mxu3 }
 0x198   : > { %v1217_v54 = vadd.f32 %v1211_v27, %v1152_v52  ;;  %v1279_v55 = vadd.f32 %v1249_v28, %v1215_v13 }
 0x199   : > { %v1340_v29 = vpop.f32.mrf.mxu0 }
 0x19a   : > { %v1281_v60 = vadd.f32 %v1275_v26, %v1217_v54 }
 0x19b   : > { %v1277_v30 = vpop.f32.mrf.mxu1 }
 0x19c   : > { %v1346_v2 = vadd.f32 %v1340_v29, %v1281_v60 }
 0x19f   : > { %v1213_v31 = vpop.f32.mrf.mxu2  ;;  %v1251_v32 = vpop.f32.mrf.mxu3 }
 0x1a1   : > { %v1342_v33 = vpop.f32.mrf.mxu0 }
 0x1a3   : > { %v1378_v34 = vpop.f32.mrf.mxu1 }
 0x1a7   : > { %v1314_v35 = vpop.f32.mrf.mxu2  ;;  %v1327_v36 = vpop.f32.mrf.mxu3 }
 0x1a8   : > { %v1345_v46 = vadd.f32 %v1327_v36, %v1280_v45  ;;  %v1344_v57 = vadd.f32 %v1314_v35, %v1279_v55  ;;  %v2350_v55 = vld [vmem:[%s3011_s6 + $0x4] sm:$0xf] }
 0x1a9   : > { %v1443_v37 = vpop.f32.mrf.mxu0 }
 0x1aa   : > { %v1408_v63 = vadd.f32 %v1378_v34, %v1344_v57 }
 0x1ab   : > { %v1380_v38 = vpop.f32.mrf.mxu1 }
 0x1ac   : > { %v1473_v5 = vadd.f32 %v1443_v37, %v1408_v63 }
 0x1af   : > { %v1316_v40 = vpop.f32.mrf.mxu2  ;;  %v1329_v41 = vpop.f32.mrf.mxu3 }
 0x1b1   : > { %v1445_v43 = vpop.f32.mrf.mxu0 }
 0x1b3   : > { %v1456_v44 = vpop.f32.mrf.mxu1 }
 0x1b7   : > { %v1391_v47 = vpop.f32.mrf.mxu2  ;;  %v1404_v48 = vpop.f32.mrf.mxu3 }
 0x1b8   : > { %v1409_v49 = vadd.f32 %v1391_v47, %v1345_v46  ;;  %v1410_v6 = vadd.f32 %v1404_v48, %v1346_v2  ;;  %v2173_v47 = vld [vmem:[%s3013_s8] sm:$0xff] }
 0x1b9   : > { %v1520_v50 = vpop.f32.mrf.mxu0  ;;  %v1593_v48 = vld [vmem:[%s3011_s6] sm:$0xf] }
 0x1ba   : > { %v1474_v56 = vadd.f32 %v1456_v44, %v1409_v49 }
 0x1bb   : > { %v1458_v53 = vpop.f32.mrf.mxu1 }
 0x1bc   : > { %v1538_v61 = vadd.f32 %v1520_v50, %v1474_v56 }
 0x1be   : > { %v1547_v3 = vmul.f32 %v1544_v51, %v1538_v61 }
 0x1bf   : > { %v1393_v58 = vpop.f32.mrf.mxu2  ;;  %v1406_v59 = vpop.f32.mrf.mxu3 }
 0x1c0   : > { %v1556_v8 = vadd.f32 %v1553_v4, %v1547_v3 }
 0x1c1   : > { %v1522_v62 = vpop.f32.mrf.mxu0 }
 0x1c2   : > { %v1559_v17 = vmax.f32 %v1556_v8, 0.0 }
 0x1c3   : > { %v1533_v0 = vpop.f32.mrf.mxu1 }
 0x1c4   : > { %v1569_v27 = vmul.f32 %v1563_v16, %v1559_v17 }
 0x1c7   : > { %v1469_v7 = vpop.f32.mrf.mxu2  ;;  %v1507_v1 = vpop.f32.mrf.mxu3 }
 0x1c8   : > { %v1475_v9 = vadd.f32 %v1469_v7, %v1410_v6  ;;  %v1537_v10 = vadd.f32 %v1507_v1, %v1473_v5  ;;  %v2357_v7 = vld [vmem:[%s3011_s6 + $0x8] sm:$0xf] }
 0x1ca   : > { %v1539_v12 = vadd.f32 %v1533_v0, %v1475_v9  ;;  %v1546_v13 = vmul.f32 %v1544_v51, %v1537_v10 }
 0x1cb   : > { %v1535_v15 = vpop.f32.mrf.mxu1 }
 0x1cc   : > { %v1548_v18 = vmul.f32 %v1544_v51, %v1539_v12  ;;  %v1555_v19 = vadd.f32 %v1553_v4, %v1546_v13 }
 0x1ce   : > { %v1557_v21 = vadd.f32 %v1553_v4, %v1548_v18  ;;  %v1558_v22 = vmax.f32 %v1555_v19, 0.0 }
 0x1cf   : > { %v1471_v24 = vpop.f32.mrf.mxu2  ;;  %v1509_v25 = vpop.f32.mrf.mxu3 }
 0x1d0   : > { %v1568_v26 = vmul.f32 %v1562_v20, %v1558_v22  ;;  %v1560_v28 = vmax.f32 %v1557_v21, 0.0 }
 0x1d2   : > { %v1573_v29 = vpack.c.bf16 %v1569_v27, %v1568_v26  ;;  %v1570_v30 = vmul.f32 %v1564_v23, %v1560_v28  ;;  %v2361_v26 = vld [vmem:[%s3011_s6 + $0xc] sm:$0xf] }
 0x1d4   : > { %1577 = vrot.lane.b32.xlu2 %v1573_v29, %s2426_s27  ;;  %v1574_v31 = vpack.c.bf16 %v1570_v30, %v1570_v30 }
 0x1d6   : > { %1579 = vrot.lane.b32.xlu1 %v1574_v31, %s2426_s27 }
 0x22e   : > { %v1578_v32 = vpop.permute.xlu2 %1577 }
 0x22f   : > { %v1581_v34 = vrot.slane %v1578_v32, 4 }
 0x231   : > { %v1583_v35 = vsel %vm1582_vm12, %v1581_v34, %v1578_v32 }
 0x232   : > { %1590 = vst.msk [vmem:[#allocation2] sm:$0xff] %vm2841_vm13, %v1583_v35 }
 0x239   : > { %v1594_v36 = vld [vmem:[#allocation2] sm:$0xff] }
 0x23a   : > { %v1600_v37 = vunpack.c.l.b16 %v1594_v36  ;;  %v1601_v38 = vunpack.c.h.b16 %v1594_v36 }
 0x23c   : > { %v1603_v39 = vpack.c.b16 %v1600_v37, %v1600_v37  ;;  %v1604_v40 = vpack.c.b16 %v1601_v38, %v1601_v38 }
 0x23e   : > { %1608 = vrot.lane.b32.xlu0 %v1604_v40, %s2417_s22  ;;  %1606 = vrot.lane.b32.xlu2 %v1603_v39, %s2417_s22  ;;  %v1669_v41 = vsel %vm400_vm0, %v1603_v39, 0  ;;  %v1672_v54 = vsel %vm400_vm0, %v1604_v40, 0 }
 0x23f   : > { %1684 = vmatpush.bf16.msra.mxu1 %v1669_v41 }
 0x242   : > { %2354 = vmatmul.msk.bf16.vlgmr.msra.gmra.mxu1 %vm396_vm1, %v1593_v48 }
 0x246   : > { %1720 = vrot.lane.b32.xlu0 %v1604_v40, %s2418_s23  ;;  %1718 = vrot.lane.b32.xlu2 %v1603_v39, %s2418_s23 }
 0x248   : > { %v1580_v42 = vpop.permute.xlu1 %1579 }
 0x249   : > { %v1584_v43 = vsel %vm1582_vm12, %v1581_v34, %v1580_v42  ;;  %v2365_v34 = vld [vmem:[%s3011_s6 + $0x10] sm:$0xf] }
 0x24a   : > { %1592 = vst.msk [vmem:[#allocation2 + $0x8] sm:$0xf] %vm1591_vm14, %v1584_v43 }
 0x24e   : > { %1784 = vrot.lane.b32.xlu2 %v1604_v40, %s2419_s26 }
 0x251   : > { %v1595_v44 = vld [vmem:[#allocation2 + $0x8] sm:$0xf] }
 0x252   : > { %v1602_v45 = vunpack.c.l.b16 %v1595_v44 }
 0x254   : > { %v1605_v46 = vpack.c.b16 %v1602_v45, %v1602_v45 }
 0x256   : > { %1610 = vrot.lane.b32.xlu1 %v1605_v46, %s2417_s22  ;;  %1722 = vrot.lane.b32.xlu0 %v1605_v46, %s2418_s23  ;;  %v1675_v6 = vsel %vm400_vm0, %v1605_v46, 0 }
 0x257   : > { %1846 = vrot.lane.b32.xlu2 %v1603_v39, %s2420_s29 }
 0x25e   : > { %1848 = vrot.lane.b32.xlu0 %v1604_v40, %s2420_s29  ;;  %1782 = vrot.lane.b32.xlu1 %v1603_v39, %s2419_s26 }
 0x25f   : > { %1912 = vrot.lane.b32.xlu2 %v1604_v40, %s2421_s30 }
 0x266   : > { %1914 = vrot.lane.b32.xlu0 %v1605_v46, %s2421_s30  ;;  %1786 = vrot.lane.b32.xlu1 %v1605_v46, %s2419_s26 }
 0x267   : > { %1974 = vrot.lane.b32.xlu2 %v1603_v39, %s2422_s11 }
 0x26e   : > { %1976 = vrot.lane.b32.xlu0 %v1604_v40, %s2422_s11  ;;  %1850 = vrot.lane.b32.xlu1 %v1605_v46, %s2420_s29 }
 0x26f   : > { %2040 = vrot.lane.b32.xlu2 %v1604_v40, %s2423_s12 }
 0x276   : > { %1978 = vrot.lane.b32.xlu0 %v1605_v46, %s2422_s11  ;;  %1910 = vrot.lane.b32.xlu1 %v1603_v39, %s2421_s30 }
 0x277   : > { %2102 = vrot.lane.b32.xlu2 %v1603_v39, %s2424_s14 }
 0x27e   : > { %2104 = vrot.lane.b32.xlu0 %v1604_v40, %s2424_s14  ;;  %2038 = vrot.lane.b32.xlu1 %v1603_v39, %s2423_s12 }
 0x286   : > { %2176 = vperm.xlu0 %2406, %v2173_v47   ;;  %2042 = vrot.lane.b32.xlu1 %v1605_v46, %s2423_s12 }
 0x28e   : > { %2106 = vrot.lane.b32.xlu1 %v1605_v46, %s2424_s14  ;;  %v2369_v46 = vld [vmem:[%s3011_s6 + $0x14] sm:$0xf]  ;;  %s2981_s14 = scalar_lea.vmem %s3015_s10, %s2490_s15 }
 0x28f   : > { %2188 = vst [vmem:[%s2981_s14] sm:$0xff] %v2425_v14 }
 0x290   : > { %2189 = vst [vmem:[%s2981_s14 + $0x8] sm:$0xf] %v2425_v14 }
 0x298   : > { %v1607_v49 = vpop.permute.xlu2 %1606 }
 0x2a0   : > { %v1719_v56 = vpop.permute.xlu2 %1718 }
 0x2a8   : > { %v1785_v57 = vpop.permute.xlu2 %1784 }
 0x2b0   : > { %v1609_v50 = vpop.permute.xlu0 %1608 }
 0x2b1   : > { %v1612_v52 = vsel %vm516_vm2, %v1607_v49, %v1609_v50  ;;  %v1847_v51 = vpop.permute.xlu2 %1846 }
 0x2b2   : > { %v1618_v53 = vsel %vm400_vm0, %v1612_v52, 0 }
 0x2b3   : > { %1633 = vmatpush.bf16.msrb.mxu2 %v1618_v53 }
 0x2b6   : > { %2351 = vmatmul.msk.bf16.vlgmr.msrb.gmra.mxu2 %vm396_vm1, %v2350_v55 }
 0x2b7   : > { %1697 = vmatpush.bf16.msra.mxu2 %v1672_v54 }
 0x2b8   : > { %v1721_v58 = vpop.permute.xlu0 %1720 }
 0x2b9   : > { %v1724_v59 = vsel %vm645_vm3, %v1719_v56, %v1721_v58  ;;  %v1913_v15 = vpop.permute.xlu2 %1912 }
 0x2ba   : > { %v1730_v3 = vsel %vm400_vm0, %v1724_v59, 0 }
 0x2c1   : > { %v1975_v27 = vpop.permute.xlu2 %1974 }
 0x2c6   : > { %2355 = vmatmul.msk.bf16.vlgmr.msra.gmra.mxu2 %vm396_vm1, %v1593_v48 }
 0x2c8   : > { %v1611_v60 = vpop.permute.xlu1 %1610  ;;  %v1723_v61 = vpop.permute.xlu0 %1722 }
 0x2c9   : > { %v1613_v62 = vsel %vm516_vm2, %v1609_v50, %v1611_v60  ;;  %v1624_v63 = vsel %vm400_vm0, %v1611_v60, 0  ;;  %v1725_v0 = vsel %vm645_vm3, %v1721_v58, %v1723_v61  ;;  %v1736_v2 = vsel %vm400_vm0, %v1723_v61, 0  ;;  %v2041_v35 = vpop.permute.xlu2 %2040 }
 0x2ca   : > { %v1621_v4 = vsel %vm400_vm0, %v1613_v62, 0  ;;  %v1733_v5 = vsel %vm400_vm0, %v1725_v0, 0  ;;  %1659 = vmatpush.bf16.msra.mxu0 %v1624_v63  ;;  %1771 = vmatpush.bf16.msrb.mxu2 %v1736_v2  ;;  %v2381_v0 = vld [vmem:[%s3011_s6 + $0x20] sm:$0xf]  ;;  %v1686_v2 = vpop.f32.mrf.mxu1 }
 0x2cb   : > { %1646 = vmatpush.bf16.msrb.mxu3 %v1621_v4  ;;  %1758 = vmatpush.bf16.msrb.mxu1 %v1733_v5  ;;  %v2164_v4 = vld [vmem:[%s3012_s7] sm:$0xff] }
 0x2cc   : > { %2167 = vperm.xlu2 %2408, %v2164_v4  }
 0x2cd   : > { %2353 = vmatmul.msk.bf16.vlgmr.msra.gmra.mxu0 %vm396_vm1, %v2350_v55 }
 0x2ce   : > { %1745 = vmatpush.bf16.msrb.mxu0 %v1730_v3  ;;  %2352 = vmatmul.msk.bf16.vlgmr.msrb.gmra.mxu3 %vm396_vm1, %v2350_v55 }
 0x2cf   : > { %1710 = vmatpush.bf16.msra.mxu3 %v1675_v6  ;;  %2359 = vmatmul.msk.bf16.vlgmr.msrb.gmra.mxu1 %vm396_vm1, %v2357_v7 }
 0x2d0   : > { %v1849_v1 = vpop.permute.xlu0 %1848  ;;  %v1783_v8 = vpop.permute.xlu1 %1782 }
 0x2d1   : > { %v1852_v9 = vsel %vm903_vm5, %v1847_v51, %v1849_v1  ;;  %v1788_v10 = vsel %vm774_vm4, %v1783_v8, %v1785_v57  ;;  %v2103_v49 = vpop.permute.xlu2 %2102  ;;  %v2377_v51 = vld [vmem:[%s3011_s6 + $0x1c] sm:$0xf] }
 0x2d2   : > { %v1858_v12 = vsel %vm400_vm0, %v1852_v9, 0  ;;  %v1794_v13 = vsel %vm400_vm0, %v1788_v10, 0  ;;  %v1688_v3 = vpop.f32.mrf.mxu1 }
 0x2d3   : > { %1809 = vmatpush.bf16.msrb.mxu3 %v1794_v13  ;;  %1873 = vmatpush.bf16.msra.mxu2 %v1858_v12 }
 0x2d6   : > { %2360 = vmatmul.msk.bf16.vlgmr.msrb.gmra.mxu2 %vm396_vm1, %v2357_v7 }
 0x2d8   : > { %v1915_v17 = vpop.permute.xlu0 %1914  ;;  %v1787_v18 = vpop.permute.xlu1 %1786 }
 0x2d9   : > { %v1917_v19 = vsel %vm1032_vm6, %v1913_v15, %v1915_v17  ;;  %v1789_v21 = vsel %vm774_vm4, %v1785_v57, %v1787_v18  ;;  %v1800_v22 = vsel %vm400_vm0, %v1787_v18, 0  ;;  %v1928_v45 = vsel %vm400_vm0, %v1915_v17, 0  ;;  %v2373_v57 = vld [vmem:[%s3011_s6 + $0x18] sm:$0xf] }
 0x2da   : > { %v1925_v24 = vsel %vm400_vm0, %v1917_v19, 0  ;;  %v1797_v25 = vsel %vm400_vm0, %v1789_v21, 0  ;;  %1835 = vmatpush.bf16.msra.mxu1 %v1800_v22 }
 0x2db   : > { %1822 = vmatpush.bf16.msra.mxu0 %v1797_v25  ;;  %1950 = vmatpush.bf16.msrb.mxu2 %v1925_v24 }
 0x2dd   : > { %2358 = vmatmul.msk.bf16.vlgmr.msrb.gmra.mxu0 %vm396_vm1, %v2357_v7 }
 0x2de   : > { %2356 = vmatmul.msk.bf16.vlgmr.msra.gmra.mxu3 %vm396_vm1, %v1593_v48 }
 0x2df   : > { %2364 = vmatmul.msk.bf16.vlgmr.msra.gmra.mxu1 %vm396_vm1, %v2361_v26 }
 0x2e0   : > { %v1977_v28 = vpop.permute.xlu0 %1976  ;;  %v1851_v29 = vpop.permute.xlu1 %1850 }
 0x2e1   : > { %v1853_v30 = vsel %vm903_vm5, %v1849_v1, %v1851_v29  ;;  %v1864_v31 = vsel %vm400_vm0, %v1851_v29, 0  ;;  %v1980_v41 = vsel %vm1161_vm7, %v1975_v27, %v1977_v28 }
 0x2e2   : > { %v1861_v32 = vsel %vm400_vm0, %v1853_v30, 0  ;;  %1899 = vmatpush.bf16.msrb.mxu0 %v1864_v31  ;;  %v1986_v44 = vsel %vm400_vm0, %v1980_v41, 0 }
 0x2e3   : > { %1886 = vmatpush.bf16.msra.mxu3 %v1861_v32 }
 0x2e6   : > { %2366 = vmatmul.msk.bf16.vlgmr.msra.gmra.mxu2 %vm396_vm1, %v2365_v34 }
 0x2e8   : > { %v1979_v36 = vpop.permute.xlu0 %1978  ;;  %v1911_v37 = vpop.permute.xlu1 %1910 }
 0x2e9   : > { %v1981_v38 = vsel %vm1161_vm7, %v1977_v28, %v1979_v36  ;;  %v1992_v39 = vsel %vm400_vm0, %v1979_v36, 0  ;;  %v1916_v40 = vsel %vm1032_vm6, %v1911_v37, %v1913_v15 }
 0x2ea   : > { %v1989_v42 = vsel %vm400_vm0, %v1981_v38, 0  ;;  %v1922_v43 = vsel %vm400_vm0, %v1916_v40, 0  ;;  %2027 = vmatpush.bf16.msra.mxu2 %v1992_v39 }
 0x2eb   : > { %1937 = vmatpush.bf16.msrb.mxu1 %v1922_v43 }
 0x2ed   : > { %2363 = vmatmul.msk.bf16.vlgmr.msra.gmra.mxu0 %vm396_vm1, %v2361_v26 }
 0x2ee   : > { %2001 = vmatpush.bf16.msra.mxu0 %v1986_v44  ;;  %2362 = vmatmul.msk.bf16.vlgmr.msrb.gmra.mxu3 %vm396_vm1, %v2361_v26 }
 0x2ef   : > { %2014 = vmatpush.bf16.msra.mxu1 %v1989_v42  ;;  %1963 = vmatpush.bf16.msrb.mxu3 %v1928_v45 }
 0x2f0   : > { %2370 = vmatmul.msk.bf16.vlgmr.msrb.gmra.mxu1 %vm396_vm1, %v2369_v46  ;;  %v2105_v47 = vpop.permute.xlu0 %2104  ;;  %v2039_v48 = vpop.permute.xlu1 %2038 }
 0x2f1   : > { %v2108_v50 = vsel %vm1419_vm9, %v2103_v49, %v2105_v47  ;;  %v2044_v56 = vsel %vm1290_vm8, %v2039_v48, %v2041_v35 }
 0x2f2   : > { %v2114_v52 = vsel %vm400_vm0, %v2108_v50, 0  ;;  %v2050_v59 = vsel %vm400_vm0, %v2044_v56, 0 }
 0x2f6   : > { %2371 = vmatmul.msk.bf16.vlgmr.msrb.gmra.mxu2 %vm396_vm1, %v2369_v46 }
 0x2f7   : > { %2129 = vmatpush.bf16.msrb.mxu2 %v2114_v52 }
 0x2f8   : > { %v2043_v53 = vpop.permute.xlu1 %2042 }
 0x2f9   : > { %v2056_v54 = vsel %vm400_vm0, %v2043_v53, 0  ;;  %v2045_v55 = vsel %vm1290_vm8, %v2041_v35, %v2043_v53 }
 0x2fa   : > { %2091 = vmatpush.bf16.msrb.mxu1 %v2056_v54  ;;  %v2053_v58 = vsel %vm400_vm0, %v2045_v55, 0 }
 0x2fd   : > { %2368 = vmatmul.msk.bf16.vlgmr.msrb.gmra.mxu0 %vm396_vm1, %v2365_v34 }
 0x2fe   : > { %2078 = vmatpush.bf16.msrb.mxu0 %v2053_v58  ;;  %2367 = vmatmul.msk.bf16.vlgmr.msra.gmra.mxu3 %vm396_vm1, %v2365_v34 }
 0x2ff   : > { %2065 = vmatpush.bf16.msra.mxu3 %v2050_v59 }
 0x300   : > { %2375 = vmatmul.msk.bf16.vlgmr.msra.gmra.mxu1 %vm396_vm1, %v2373_v57  ;;  %v2107_v60 = vpop.permute.xlu1 %2106 }
 0x301   : > { %v2109_v61 = vsel %vm1419_vm9, %v2105_v47, %v2107_v60  ;;  %v2120_v62 = vsel %vm400_vm0, %v2107_v60, 0 }
 0x302   : > { %v2117_v63 = vsel %vm400_vm0, %v2109_v61, 0 }
 0x306   : > { %2376 = vmatmul.msk.bf16.vlgmr.msra.gmra.mxu2 %vm396_vm1, %v2373_v57 }
 0x30d   : > { %2374 = vmatmul.msk.bf16.vlgmr.msra.gmra.mxu0 %vm396_vm1, %v2373_v57 }
 0x30e   : > { %2155 = vmatpush.bf16.msra.mxu0 %v2120_v62  ;;  %2372 = vmatmul.msk.bf16.vlgmr.msrb.gmra.mxu3 %vm396_vm1, %v2369_v46 }
 0x30f   : > { %2142 = vmatpush.bf16.msrb.mxu3 %v2117_v63 }
 0x310   : > { %2380 = vmatmul.msk.bf16.vlgmr.msrb.gmra.mxu1 %vm396_vm1, %v2377_v51 }
 0x316   : > { %2382 = vmatmul.msk.bf16.vlgmr.msrb.gmra.mxu2 %vm396_vm1, %v2381_v0 }
 0x31d   : > { %2379 = vmatmul.msk.bf16.vlgmr.msrb.gmra.mxu0 %vm396_vm1, %v2377_v51 }
 0x31e   : > { %2378 = vmatmul.msk.bf16.vlgmr.msra.gmra.mxu3 %vm396_vm1, %v2377_v51 }
 0x32d   : > { %2384 = vmatmul.msk.bf16.vlgmr.msra.gmra.mxu0 %vm396_vm1, %v2381_v0 }
 0x32e   : > { %2383 = vmatmul.msk.bf16.vlgmr.msrb.gmra.mxu3 %vm396_vm1, %v2381_v0 }
 0x339   : > { %v1635_v5 = vpop.f32.mrf.mxu2 }
 0x33a   : > { %v1687_v6 = vadd.f32 %v1686_v2, %v1635_v5 }
 0x341   : > { %v1637_v7 = vpop.f32.mrf.mxu2 }
 0x349   : > { %v1699_v1 = vpop.f32.mrf.mxu2 }
 0x34a   : > { %v1661_v8 = vpop.f32.mrf.mxu0 }
 0x34c   : > { %v1760_v9 = vpop.f32.mrf.mxu1 }
 0x351   : > { %v1648_v10 = vpop.f32.mrf.mxu3  ;;  %v1701_v12 = vpop.f32.mrf.mxu2 }
 0x352   : > { %v1663_v13 = vpop.f32.mrf.mxu0  ;;  %v1700_v15 = vadd.f32 %v1699_v1, %v1648_v10 }
 0x354   : > { %v1778_v17 = vadd.f32 %v1760_v9, %v1700_v15  ;;  %v1762_v18 = vpop.f32.mrf.mxu1 }
 0x355   : > { %v2168_v18 = vpop.permute.xlu2 %2167 }
 0x359   : > { %v1650_v19 = vpop.f32.mrf.mxu3  ;;  %v1773_v21 = vpop.f32.mrf.mxu2 }
 0x35a   : > { %v1747_v22 = vpop.f32.mrf.mxu0 }
 0x35b   : > { %v1777_v24 = vadd.f32 %v1747_v22, %v1687_v6  ;;  %v2177_v22 = vpop.permute.xlu0 %2176 }
 0x35c   : > { %v1837_v25 = vpop.f32.mrf.mxu1 }
 0x361   : > { %v1712_v26 = vpop.f32.mrf.mxu3  ;;  %v1775_v27 = vpop.f32.mrf.mxu2 }
 0x362   : > { %v1713_v28 = vadd.f32 %v1712_v26, %v1661_v8  ;;  %v1749_v29 = vpop.f32.mrf.mxu0 }
 0x364   : > { %v1779_v30 = vadd.f32 %v1773_v21, %v1713_v28  ;;  %v1839_v31 = vpop.f32.mrf.mxu1 }
 0x366   : > { %v1843_v32 = vadd.f32 %v1837_v25, %v1779_v30 }
 0x369   : > { %v1714_v34 = vpop.f32.mrf.mxu3  ;;  %v1875_v35 = vpop.f32.mrf.mxu2 }
 0x36a   : > { %v1824_v36 = vpop.f32.mrf.mxu0 }
 0x36b   : > { %v1842_v6 = vadd.f32 %v1824_v36, %v1778_v17 }
 0x36d   : > { %v1939_v37 = vpop.f32.mrf.mxu1 }
 0x371   : > { %v1811_v38 = vpop.f32.mrf.mxu3  ;;  %v1877_v39 = vpop.f32.mrf.mxu2 }
 0x372   : > { %v1841_v40 = vadd.f32 %v1811_v38, %v1777_v24  ;;  %v1826_v41 = vpop.f32.mrf.mxu0 }
 0x374   : > { %v1905_v42 = vadd.f32 %v1875_v35, %v1841_v40 }
 0x375   : > { %v1941_v43 = vpop.f32.mrf.mxu1 }
 0x376   : > { %v1969_v4 = vadd.f32 %v1939_v37, %v1905_v42 }
 0x379   : > { %v1813_v44 = vpop.f32.mrf.mxu3  ;;  %v1952_v45 = vpop.f32.mrf.mxu2 }
 0x37a   : > { %v1901_v46 = vpop.f32.mrf.mxu0 }
 0x37b   : > { %v1907_v63 = vadd.f32 %v1901_v46, %v1843_v32 }
 0x37d   : > { %v2016_v47 = vpop.f32.mrf.mxu1 }
 0x381   : > { %v1888_v48 = vpop.f32.mrf.mxu3  ;;  %v1954_v49 = vpop.f32.mrf.mxu2 }
 0x382   : > { %v1903_v50 = vpop.f32.mrf.mxu0  ;;  %v1906_v8 = vadd.f32 %v1888_v48, %v1842_v6 }
 0x384   : > { %v1970_v13 = vadd.f32 %v1952_v45, %v1906_v8 }
 0x385   : > { %v2018_v52 = vpop.f32.mrf.mxu1 }
 0x386   : > { %v2034_v24 = vadd.f32 %v2016_v47, %v1970_v13 }
 0x389   : > { %v1890_v53 = vpop.f32.mrf.mxu3  ;;  %v2029_v54 = vpop.f32.mrf.mxu2 }
 0x38a   : > { %v2003_v55 = vpop.f32.mrf.mxu0 }
 0x38b   : > { %v2033_v7 = vadd.f32 %v2003_v55, %v1969_v4 }
 0x38d   : > { %v2093_v56 = vpop.f32.mrf.mxu1 }
 0x391   : > { %v1965_v57 = vpop.f32.mrf.mxu3  ;;  %v2031_v58 = vpop.f32.mrf.mxu2 }
 0x392   : > { %v2005_v59 = vpop.f32.mrf.mxu0  ;;  %v1971_v0 = vadd.f32 %v1965_v57, %v1907_v63 }
 0x394   : > { %v2035_v1 = vadd.f32 %v2029_v54, %v1971_v0 }
 0x395   : > { %v2095_v60 = vpop.f32.mrf.mxu1 }
 0x396   : > { %v2099_v10 = vadd.f32 %v2093_v56, %v2035_v1 }
 0x399   : > { %v1967_v61 = vpop.f32.mrf.mxu3  ;;  %v2131_v51 = vpop.f32.mrf.mxu2 }
 0x39a   : > { %v2080_v62 = vpop.f32.mrf.mxu0 }
 0x39b   : > { %v2098_v27 = vadd.f32 %v2080_v62, %v2034_v24 }
 0x3a1   : > { %v2067_v2 = vpop.f32.mrf.mxu3  ;;  %v2133_v3 = vpop.f32.mrf.mxu2 }
 0x3a2   : > { %v2082_v5 = vpop.f32.mrf.mxu0  ;;  %v2097_v9 = vadd.f32 %v2067_v2, %v2033_v7 }
 0x3a4   : > { %v2161_v15 = vadd.f32 %v2131_v51, %v2097_v9 }
 0x3a6   : > { %v2170_v25 = vmul.f32 %v2168_v18, %v2161_v15 }
 0x3a8   : > { %v2179_v17 = vadd.f32 %v2177_v22, %v2170_v25 }
 0x3a9   : > { %v2069_v12 = vpop.f32.mrf.mxu3 }
 0x3aa   : > { %v2157_v14 = vpop.f32.mrf.mxu0  ;;  %v2182_v36 = vmax.f32 %v2179_v17, 0.0 }
 0x3ab   : > { %v2163_v19 = vadd.f32 %v2157_v14, %v2099_v10 }
 0x3ac   : > { %v2185_v40 = vmul.f32 %v2182_v36, %v1562_v20 }
 0x3ad   : > { %v2172_v21 = vmul.f32 %v2168_v18, %v2163_v19 }
 0x3af   : > { %v2181_v26 = vadd.f32 %v2177_v22, %v2172_v21 }
 0x3b1   : > { %v2184_v28 = vmax.f32 %v2181_v26, 0.0  ;;  %v2144_v29 = vpop.f32.mrf.mxu3 }
 0x3b2   : > { %v2162_v30 = vadd.f32 %v2144_v29, %v2098_v27  ;;  %v2159_v31 = vpop.f32.mrf.mxu0 }
 0x3b3   : > { %v2187_v32 = vmul.f32 %v2184_v28, %v1564_v23 }
 0x3b4   : > { %v2171_v34 = vmul.f32 %v2168_v18, %v2162_v30 }
 0x3b5   : > { %v2191_v35 = vpack.c.bf16 %v2187_v32, %v2187_v32 }
 0x3b6   : > { %v2180_v37 = vadd.f32 %v2177_v22, %v2171_v34 }
 0x3b7   : > { %2196 = vrot.lane.b32.xlu2 %v2191_v35, %s2426_s27 }
 0x3b8   : > { %v2183_v38 = vmax.f32 %v2180_v37, 0.0 }
 0x3b9   : > { %v2146_v39 = vpop.f32.mrf.mxu3 }
 0x3ba   : > { %v2186_v41 = vmul.f32 %v2183_v38, %v1563_v16 }
 0x3bc   : > { %v2190_v42 = vpack.c.bf16 %v2186_v41, %v2185_v40 }
 0x3be   : > { %2194 = vrot.lane.b32.xlu1 %v2190_v42, %s2426_s27 }
 0x411   : > { %v2197_v44 = vpop.permute.xlu2 %2196 }
 0x430   : > { %v2195_v23 = vpop.permute.xlu1 %2194 }
 0x431   : > { %v2198_v43 = vrot.slane %v2195_v23, 4 }
 0x433   : > { %v2199_v45 = vsel %vm1582_vm12, %v2198_v43, %v2195_v23  ;;  %v2200_v46 = vsel %vm1582_vm12, %v2198_v43, %v2197_v44 }
 0x434   : > { %2203 = vst.msk [vmem:[%s2981_s14] sm:$0xff] %vm2841_vm13, %v2199_v45 }
 0x435   : > { %2204 = vst.msk [vmem:[%s2981_s14 + $0x8] sm:$0xf] %vm1591_vm14, %v2200_v46 }
 0x436 PF: > { %s20_s13 = sadd.s32 1, %s2415_s13  }
 0x437   : > { %p17_p4 = scmp.ge.s32.totalorder %s20_s13, 4  }
 0x439   :  { %19 = sbr.rel (!%p17_p4) target bundleno = 1 (0x1), region = 117 }

</bundles_post_ra>
